<compile_context>
chip_gen: v7x
topology: tpu7x:2x2x1
jax: 0.10.0
libtpu: 0.0.40
codegen_flags: <defaults>
</compile_context>

<pallas_src>
import functools
import math

import jax
import jax.numpy as jnp
from jax.experimental import pallas as pl
from jax.experimental.pallas import tpu as pltpu

NEG_INF = -1e9     # finite stand-in for float('-inf')
LN_EPS = 1e-5      # PyTorch LayerNorm default
LANE = 128         # pad model / hidden / vocab dims to full lane width


def _round_up(n, m):
    return ((n + m - 1) // m) * m


# ----------------------------- in-kernel helpers -----------------------------

def _layernorm(y, gamma, beta, lane_mask, inv_d):
    """LayerNorm over the zero-padded last dim; only `lane_mask` lanes are real."""
    mean = jnp.sum(y, axis=-1, keepdims=True) * inv_d
    cent = jnp.where(lane_mask, y - mean, 0.0)
    var = jnp.sum(cent * cent, axis=-1, keepdims=True) * inv_d
    return cent * jax.lax.rsqrt(var + LN_EPS) * gamma + beta


def _softmax(s):
    s = s - jnp.max(s, axis=-1, keepdims=True)
    p = jnp.exp(s)
    return p / jnp.sum(p, axis=-1, keepdims=True)      # exact: rows sum to 1


def _mha(xq, xkv, add_mask, wqkv, wo):
    """Multi-head attention with all heads batched into single contractions.

    xq:   (Sq, Dp) f32 query source   (padded lanes are exactly zero)
    xkv:  (Sk, Dp) f32 key/value source
    add_mask: (Sq, Sk) f32 additive mask, or None
    wqkv: (3, H, dh, Dp) bf16 per-head Q/K/V projections (stored transposed)
    wo:   (H, dh, Dp) bf16 per-head slice of the output projection
    Returns the (Sq, Dp) f32 attention output (out-proj bias is zero at init).
    """
    H, dh, Dp = wo.shape
    Sq, Sk = xq.shape[0], xkv.shape[0]
    scale = 1.0 / math.sqrt(dh)

    xq_h = jnp.broadcast_to(xq.astype(jnp.bfloat16)[None], (H, Sq, Dp))
    xkv_h = jnp.broadcast_to(xkv.astype(jnp.bfloat16)[None], (H, Sk, Dp))

    q = jnp.einsum('hsd,hed->hse', xq_h, wqkv[0],
                   preferred_element_type=jnp.float32) * scale       # (H,Sq,dh)
    k = jnp.einsum('hsd,hed->hse', xkv_h, wqkv[1],
                   preferred_element_type=jnp.float32)               # (H,Sk,dh)
    v = jnp.einsum('hsd,hed->hse', xkv_h, wqkv[2],
                   preferred_element_type=jnp.float32)               # (H,Sk,dh)

    s = jnp.einsum('hqe,hke->hqk',
                   q.astype(jnp.bfloat16), k.astype(jnp.bfloat16),
                   preferred_element_type=jnp.float32)               # (H,Sq,Sk)
    if add_mask is not None:
        s = s + add_mask[None]
    p = _softmax(s)

    ctx = jnp.einsum('hqk,hke->hqe',
                     p.astype(jnp.bfloat16), v.astype(jnp.bfloat16),
                     preferred_element_type=jnp.float32)             # (H,Sq,dh)
    out_h = jnp.einsum('hqe,heo->hqo', ctx.astype(jnp.bfloat16), wo,
                       preferred_element_type=jnp.float32)           # (H,Sq,Dp)
    return jnp.sum(out_h, axis=0)                                    # (Sq,Dp)


def _ffn(x, w1, b1, w2, b2):
    h = jnp.dot(x.astype(jnp.bfloat16), w1, preferred_element_type=jnp.float32) + b1
    h = jnp.maximum(h, 0.0)
    return jnp.dot(h.astype(jnp.bfloat16), w2, preferred_element_type=jnp.float32) + b2


# ------------------------------ the fused kernel ------------------------------

def _tf_forward_kernel(
        src_ref, tgt_ref, src_kp_ref, tgt_kp_ref, src_mask_ref, tgt_mask_ref,
        e_wqkv_ref, e_wo_ref, e_w1_ref, e_b1_ref, e_w2_ref, e_b2_ref, e_ln_ref,
        e_norm_ref,
        d_swqkv_ref, d_swo_ref, d_cwqkv_ref, d_cwo_ref,
        d_w1_ref, d_b1_ref, d_w2_ref, d_b2_ref, d_ln_ref,
        d_norm_ref, lin_w_ref, lin_b_ref,
        out_ref, *, nlayers, d_model):
    Dp = src_ref.shape[-1]
    lane_mask = jax.lax.broadcasted_iota(jnp.int32, (1, Dp), 1) < d_model
    inv_d = 1.0 / d_model
    ln = lambda y, g, b: _layernorm(y, g, b, lane_mask, inv_d)

    # ------------------------------- encoder -------------------------------
    x = src_ref[0]                                        # (Ss, Dp) f32
    src_mask = src_mask_ref[...] + src_kp_ref[0]          # hoisted: (Ss,Ss)+(1,Ss)
    for l in range(nlayers):
        lnp = e_ln_ref[l]                                 # (4, 1, Dp)
        a = _mha(x, x, src_mask, e_wqkv_ref[l], e_wo_ref[l])
        x = ln(x + a, lnp[0], lnp[1])
        f = _ffn(x, e_w1_ref[l], e_b1_ref[l], e_w2_ref[l], e_b2_ref[l])
        x = ln(x + f, lnp[2], lnp[3])
    mem = ln(x, e_norm_ref[0], e_norm_ref[1])             # final encoder norm

    # ------------------------------- decoder -------------------------------
    y = tgt_ref[0]                                        # (St, Dp) f32
    tgt_mask = tgt_mask_ref[...] + tgt_kp_ref[0]          # causal + key padding
    for l in range(nlayers):
        lnp = d_ln_ref[l]                                 # (6, 1, Dp)
        a = _mha(y, y, tgt_mask, d_swqkv_ref[l], d_swo_ref[l])
        y = ln(y + a, lnp[0], lnp[1])
        c = _mha(y, mem, None, d_cwqkv_ref[l], d_cwo_ref[l])   # no cross masks
        y = ln(y + c, lnp[2], lnp[3])
        f = _ffn(y, d_w1_ref[l], d_b1_ref[l], d_w2_ref[l], d_b2_ref[l])
        y = ln(y + f, lnp[4], lnp[5])
    y = ln(y, d_norm_ref[0], d_norm_ref[1])               # final decoder norm

    # vocabulary projection (lane-dense padded vocab)
    out_ref[0] = (jnp.dot(y.astype(jnp.bfloat16), lin_w_ref[...],
                          preferred_element_type=jnp.float32) + lin_b_ref[...])


# ------------------------------- spec helpers ----------------------------------

def _rep_spec(shape):
    """Whole-array block, replicated across the batch grid (weights / masks)."""
    nd = len(shape)
    return pl.BlockSpec(tuple(shape), lambda b: (0,) * nd)


def _batch_spec(shape):
    """(1, ...) block selected by the batch grid index along dim 0."""
    nd = len(shape)
    return pl.BlockSpec((1,) + tuple(shape[1:]), lambda b: (b,) + (0,) * (nd - 1))


# ---------------------------------- forward ------------------------------------

def tf_model_forward(params, src, tgt, srcmask, tgtmask, srcpadmask, tgtpadmask):
    nlayers, _, nhead, dh, _ = params["enc_wqkv"].shape
    d_model = nhead * dh
    ntoken = params["emb_enc"].shape[0]
    Vp = params["lin_w"].shape[1]
    B, St = tgt.shape

    # Embedding * sqrt(ninp) + positional encoding (tiny XLA gather).  Faithful
    # to the original script: PositionalEncoding receives the (batch, seq, d)
    # tensor, so pe is indexed along the *batch* axis, exactly like
    # `x + self.pe[:x.size(0)]` does there.
    emb_scale = math.sqrt(d_model)
    src_x = jnp.take(params["emb_enc"], src, axis=0) * emb_scale + params["pe"][:B]
    tgt_x = jnp.take(params["emb_dec"], tgt, axis=0) * emb_scale + params["pe"][:B]

    # Boolean key-padding masks -> tiny additive rows (combined with the attn
    # mask inside the kernel; no (B*H, Sq, Sk) mask is ever materialized).
    src_kp = jnp.where(srcpadmask, NEG_INF, 0.0).astype(jnp.float32)[:, None, :]
    tgt_kp = jnp.where(tgtpadmask, NEG_INF, 0.0).astype(jnp.float32)[:, None, :]

    inputs = (src_x, tgt_x, src_kp, tgt_kp,
              srcmask.astype(jnp.float32), tgtmask.astype(jnp.float32),
              params["enc_wqkv"], params["enc_wo"],
              params["enc_w1"], params["enc_b1"],
              params["enc_w2"], params["enc_b2"],
              params["enc_ln"], params["enc_norm"],
              params["dec_swqkv"], params["dec_swo"],
              params["dec_cwqkv"], params["dec_cwo"],
              params["dec_w1"], params["dec_b1"],
              params["dec_w2"], params["dec_b2"],
              params["dec_ln"], params["dec_norm"],
              params["lin_w"], params["lin_b"])
    in_specs = ([_batch_spec(a.shape) for a in inputs[:4]]
                + [_rep_spec(a.shape) for a in inputs[4:]])

    kernel = functools.partial(_tf_forward_kernel, nlayers=int(nlayers),
                               d_model=int(d_model))

    logits = pl.pallas_call(
        kernel,
        out_shape=jax.ShapeDtypeStruct((B, St, Vp), jnp.float32),
        grid=(B,),
        in_specs=in_specs,
        out_specs=_batch_spec((B, St, Vp)),
        compiler_params=pltpu.CompilerParams(
            dimension_semantics=("parallel",),
            vmem_limit_bytes=32 * 1024 * 1024),
    )(*inputs)

    # PyTorch-shaped (tgt_seq, batch, ntoken).  The tiny transpose + un-pad
    # slice stay in XLA: emitting (St, B, V) directly would need an output
    # block whose second-minor (batch) dim is 1 (< 8 sublanes).
    return jnp.transpose(logits, (1, 0, 2))[:, :, :ntoken]


# --------------------------------- parameters ----------------------------------

class KeyGen:
    def __init__(self, key):
        self.key = key

    def __call__(self):
        self.key, sub = jax.random.split(self.key)
        return sub


def _pad_last(x, n):
    return jnp.pad(x, [(0, 0)] * (x.ndim - 1) + [(0, n - x.shape[-1])])


def _pad2(x, rows, cols):
    return jnp.pad(x, [(0, rows - x.shape[0]), (0, cols - x.shape[1])])


def make_positional_encoding(max_len, d_model, d_pad):
    position = jnp.arange(max_len, dtype=jnp.float32)[:, None]
    div_term = jnp.exp(jnp.arange(0, d_model, 2, dtype=jnp.float32)
                       * (-math.log(10000.0) / d_model))
    pe = jnp.zeros((max_len, d_model), jnp.float32)
    pe = pe.at[:, 0::2].set(jnp.sin(position * div_term))
    pe = pe.at[:, 1::2].set(jnp.cos(position * div_term))
    return _pad_last(pe, d_pad)[:, None, :]            # (max_len, 1, Dp)


def generate_square_subsequent_mask(sz):
    tril = jnp.tril(jnp.ones((sz, sz), jnp.float32))
    return jnp.where(tril == 0.0, NEG_INF, 0.0).astype(jnp.float32)


def init_params(key, ntoken, d_model, nhead, nhid, nlayers, max_len=100):
    keys = KeyGen(key)
    dh = d_model // nhead
    Dp = _round_up(d_model, LANE)
    Hp = _round_up(nhid, LANE)
    Vp = _round_up(ntoken, LANE)

    def xavier(out_dim, in_dim):
        a = math.sqrt(6.0 / (in_dim + out_dim))
        return jax.random.uniform(keys(), (out_dim, in_dim), jnp.float32, -a, a)

    def linear_bias(fan_in, n):
        bound = 1.0 / math.sqrt(fan_in)
        return jax.random.uniform(keys(), (1, n), jnp.float32, -bound, bound)

    def mha_weights():
        # nn.MultiheadAttention: in_proj_weight (3D, D) xavier_uniform_; the
        # in_proj / out_proj biases are zero at init and are omitted.
        in_proj = xavier(3 * d_model, d_model)                       # (3D, D)
        wqkv = _pad_last(in_proj.reshape(3, nhead, dh, d_model), Dp)  # (3,H,dh,Dp)
        out_proj = xavier(d_model, d_model)                          # (Dout, Din)
        wo = _pad_last(out_proj.T.reshape(nhead, dh, d_model), Dp)   # (H,dh,Dp)
        return wqkv.astype(jnp.bfloat16), wo.astype(jnp.bfloat16)

    def ffn_weights():
        w1 = _pad2(xavier(nhid, d_model).T, Dp, Hp).astype(jnp.bfloat16)
        b1 = _pad_last(linear_bias(d_model, nhid), Hp)
        w2 = _pad2(xavier(d_model, nhid).T, Hp, Dp).astype(jnp.bfloat16)
        b2 = _pad_last(linear_bias(nhid, d_model), Dp)
        return w1, b1, w2, b2

    def ln_stack(n_pairs):
        rows = []
        for _ in range(n_pairs):
            rows.append(_pad_last(jnp.ones((1, d_model), jnp.float32), Dp))   # gamma
            rows.append(jnp.zeros((1, Dp), jnp.float32))                      # beta
        return jnp.stack(rows)                            # (2*n_pairs, 1, Dp)

    enc = {k: [] for k in ("wqkv", "wo", "w1", "b1", "w2", "b2", "ln")}
    for _ in range(nlayers):
        wqkv, wo = mha_weights()
        w1, b1, w2, b2 = ffn_weights()
        enc["wqkv"].append(wqkv); enc["wo"].append(wo)
        enc["w1"].append(w1);     enc["b1"].append(b1)
        enc["w2"].append(w2);     enc["b2"].append(b2)
        enc["ln"].append(ln_stack(2))

    dec = {k: [] for k in ("swqkv", "swo", "cwqkv", "cwo",
                           "w1", "b1", "w2", "b2", "ln")}
    for _ in range(nlayers):
        swqkv, swo = mha_weights()
        cwqkv, cwo = mha_weights()
        w1, b1, w2, b2 = ffn_weights()
        dec["swqkv"].append(swqkv); dec["swo"].append(swo)
        dec["cwqkv"].append(cwqkv); dec["cwo"].append(cwo)
        dec["w1"].append(w1);       dec["b1"].append(b1)
        dec["w2"].append(w2);       dec["b2"].append(b2)
        dec["ln"].append(ln_stack(3))

    return dict(
        # nn.Embedding(ntoken, ninp): encoder.weight uniform(-0.1, 0.1) per
        # init_weights; decoder embedding keeps nn.Embedding's default N(0,1).
        emb_enc=_pad_last(jax.random.uniform(keys(), (ntoken, d_model),
                                             jnp.float32, -0.1, 0.1), Dp),
        emb_dec=_pad_last(jax.random.normal(keys(), (ntoken, d_model),
                                            jnp.float32), Dp),
        pe=make_positional_encoding(max_len, d_model, Dp),
        enc_wqkv=jnp.stack(enc["wqkv"]), enc_wo=jnp.stack(enc["wo"]),
        enc_w1=jnp.stack(enc["w1"]), enc_b1=jnp.stack(enc["b1"]),
        enc_w2=jnp.stack(enc["w2"]), enc_b2=jnp.stack(enc["b2"]),
        enc_ln=jnp.stack(enc["ln"]), enc_norm=ln_stack(1),
        dec_swqkv=jnp.stack(dec["swqkv"]), dec_swo=jnp.stack(dec["swo"]),
        dec_cwqkv=jnp.stack(dec["cwqkv"]), dec_cwo=jnp.stack(dec["cwo"]),
        dec_w1=jnp.stack(dec["w1"]), dec_b1=jnp.stack(dec["b1"]),
        dec_w2=jnp.stack(dec["w2"]), dec_b2=jnp.stack(dec["b2"]),
        dec_ln=jnp.stack(dec["ln"]), dec_norm=ln_stack(1),
        lin_w=_pad2(xavier(ntoken, d_model).T, Dp, Vp).astype(jnp.bfloat16),
        lin_b=_pad_last(linear_bias(d_model, ntoken), Vp),
    )


# ------------------------------------ main --------------------------------------

if __name__ == "__main__":
    ntoken, ninp, nhead, nhid, nlayers = 50, 32, 4, 64, 2
    B, Ssrc, Stgt = 2, 8, 6

    root = jax.random.PRNGKey(0)
    pkey, skey, tkey = jax.random.split(root, 3)

    params = init_params(pkey, ntoken, ninp, nhead, nhid, nlayers)

    src = jax.random.randint(skey, (B, Ssrc), 0, ntoken, dtype=jnp.int32)
    tgt = jax.random.randint(tkey, (B, Stgt), 0, ntoken, dtype=jnp.int32)

    srcmask = jnp.zeros((Ssrc, Ssrc), jnp.float32)
    tgtmask = generate_square_subsequent_mask(Stgt)
    srcpadmask = jnp.zeros((B, Ssrc), dtype=jnp.bool_).at[1, Ssrc - 1].set(True)
    tgtpadmask = jnp.zeros((B, Stgt), dtype=jnp.bool_).at[1, Stgt - 1].set(True)

    fwd = jax.jit(tf_model_forward)
    out = fwd(params, src, tgt, srcmask, tgtmask, srcpadmask, tgtpadmask)
    out = jax.block_until_ready(out)

    assert out.shape == (Stgt, B, ntoken), out.shape
    assert bool(jnp.all(jnp.isfinite(out)))
    print("KERNEL_OK")
</pallas_src>

<mosaic_0001>
module attributes {stable_mosaic.version = 11 : i64} {
  func.func @_tf_forward_kernel(%arg0: i32, %arg1: memref<1x8x128xf32, #tpu.memory_space<vmem>>, %arg2: memref<1x6x128xf32, #tpu.memory_space<vmem>>, %arg3: memref<1x1x8xf32, #tpu.memory_space<vmem>>, %arg4: memref<1x1x6xf32, #tpu.memory_space<vmem>>, %arg5: memref<8x8xf32, #tpu.memory_space<vmem>>, %arg6: memref<6x6xf32, #tpu.memory_space<vmem>>, %arg7: memref<2x3x4x8x128xbf16, #tpu.memory_space<vmem>>, %arg8: memref<2x4x8x128xbf16, #tpu.memory_space<vmem>>, %arg9: memref<2x128x128xbf16, #tpu.memory_space<vmem>>, %arg10: memref<2x1x128xf32, #tpu.memory_space<vmem>>, %arg11: memref<2x128x128xbf16, #tpu.memory_space<vmem>>, %arg12: memref<2x1x128xf32, #tpu.memory_space<vmem>>, %arg13: memref<2x4x1x128xf32, #tpu.memory_space<vmem>>, %arg14: memref<2x1x128xf32, #tpu.memory_space<vmem>>, %arg15: memref<2x3x4x8x128xbf16, #tpu.memory_space<vmem>>, %arg16: memref<2x4x8x128xbf16, #tpu.memory_space<vmem>>, %arg17: memref<2x3x4x8x128xbf16, #tpu.memory_space<vmem>>, %arg18: memref<2x4x8x128xbf16, #tpu.memory_space<vmem>>, %arg19: memref<2x128x128xbf16, #tpu.memory_space<vmem>>, %arg20: memref<2x1x128xf32, #tpu.memory_space<vmem>>, %arg21: memref<2x128x128xbf16, #tpu.memory_space<vmem>>, %arg22: memref<2x1x128xf32, #tpu.memory_space<vmem>>, %arg23: memref<2x6x1x128xf32, #tpu.memory_space<vmem>>, %arg24: memref<2x1x128xf32, #tpu.memory_space<vmem>>, %arg25: memref<128x128xbf16, #tpu.memory_space<vmem>>, %arg26: memref<1x128xf32, #tpu.memory_space<vmem>>, %arg27: memref<1x6x128xf32, #tpu.memory_space<vmem>>) attributes {dimension_semantics = [#tpu.dimension_semantics<parallel>], iteration_bounds = array<i64: 2>, scalar_prefetch = 0 : i64, scratch_operands = 0 : i64, tpu.core_type = #tpu.core_type<tc>, window_params = [{transform_indices = @transform_0, window_bounds = array<i64: 1, 8, 128>}, {transform_indices = @transform_1, window_bounds = array<i64: 1, 6, 128>}, {transform_indices = @transform_2, window_bounds = array<i64: 1, 1, 8>}, {transform_indices = @transform_3, window_bounds = array<i64: 1, 1, 6>}, {pipeline_mode = #tpu.pipeline_mode<synchronous>, transform_indices = @transform_4, window_bounds = array<i64: 8, 8>}, {pipeline_mode = #tpu.pipeline_mode<synchronous>, transform_indices = @transform_5, window_bounds = array<i64: 6, 6>}, {pipeline_mode = #tpu.pipeline_mode<synchronous>, transform_indices = @transform_6, window_bounds = array<i64: 2, 3, 4, 8, 128>}, {pipeline_mode = #tpu.pipeline_mode<synchronous>, transform_indices = @transform_7, window_bounds = array<i64: 2, 4, 8, 128>}, {pipeline_mode = #tpu.pipeline_mode<synchronous>, transform_indices = @transform_8, window_bounds = array<i64: 2, 128, 128>}, {pipeline_mode = #tpu.pipeline_mode<synchronous>, transform_indices = @transform_9, window_bounds = array<i64: 2, 1, 128>}, {pipeline_mode = #tpu.pipeline_mode<synchronous>, transform_indices = @transform_10, window_bounds = array<i64: 2, 128, 128>}, {pipeline_mode = #tpu.pipeline_mode<synchronous>, transform_indices = @transform_11, window_bounds = array<i64: 2, 1, 128>}, {pipeline_mode = #tpu.pipeline_mode<synchronous>, transform_indices = @transform_12, window_bounds = array<i64: 2, 4, 1, 128>}, {pipeline_mode = #tpu.pipeline_mode<synchronous>, transform_indices = @transform_13, window_bounds = array<i64: 2, 1, 128>}, {pipeline_mode = #tpu.pipeline_mode<synchronous>, transform_indices = @transform_14, window_bounds = array<i64: 2, 3, 4, 8, 128>}, {pipeline_mode = #tpu.pipeline_mode<synchronous>, transform_indices = @transform_15, window_bounds = array<i64: 2, 4, 8, 128>}, {pipeline_mode = #tpu.pipeline_mode<synchronous>, transform_indices = @transform_16, window_bounds = array<i64: 2, 3, 4, 8, 128>}, {pipeline_mode = #tpu.pipeline_mode<synchronous>, transform_indices = @transform_17, window_bounds = array<i64: 2, 4, 8, 128>}, {pipeline_mode = #tpu.pipeline_mode<synchronous>, transform_indices = @transform_18, window_bounds = array<i64: 2, 128, 128>}, {pipeline_mode = #tpu.pipeline_mode<synchronous>, transform_indices = @transform_19, window_bounds = array<i64: 2, 1, 128>}, {pipeline_mode = #tpu.pipeline_mode<synchronous>, transform_indices = @transform_20, window_bounds = array<i64: 2, 128, 128>}, {pipeline_mode = #tpu.pipeline_mode<synchronous>, transform_indices = @transform_21, window_bounds = array<i64: 2, 1, 128>}, {pipeline_mode = #tpu.pipeline_mode<synchronous>, transform_indices = @transform_22, window_bounds = array<i64: 2, 6, 1, 128>}, {pipeline_mode = #tpu.pipeline_mode<synchronous>, transform_indices = @transform_23, window_bounds = array<i64: 2, 1, 128>}, {pipeline_mode = #tpu.pipeline_mode<synchronous>, transform_indices = @transform_24, window_bounds = array<i64: 128, 128>}, {pipeline_mode = #tpu.pipeline_mode<synchronous>, transform_indices = @transform_25, window_bounds = array<i64: 1, 128>}, {transform_indices = @transform_26, window_bounds = array<i64: 1, 6, 128>}]} {
    %0 = tpu.iota {dimensions = array<i32: 1>} : vector<1x128xi32>
    %c32_i32 = arith.constant 32 : i32
    %1 = vector.broadcast %c32_i32 : i32 to vector<1x128xi32>
    %2 = arith.cmpi slt, %0, %1 : vector<1x128xi32>
    %c0 = arith.constant 0 : index
    %c0_0 = arith.constant 0 : index
    %c0_1 = arith.constant 0 : index
    %3 = vector.load %arg1[%c0, %c0_0, %c0_1] : memref<1x8x128xf32, #tpu.memory_space<vmem>>, vector<1x8x128xf32>
    %4 = vector.shape_cast %3 : vector<1x8x128xf32> to vector<8x128xf32>
    %c0_2 = arith.constant 0 : index
    %c0_3 = arith.constant 0 : index
    %5 = vector.load %arg5[%c0_2, %c0_3] : memref<8x8xf32, #tpu.memory_space<vmem>>, vector<8x8xf32>
    %c0_4 = arith.constant 0 : index
    %c0_5 = arith.constant 0 : index
    %c0_6 = arith.constant 0 : index
    %6 = vector.load %arg3[%c0_4, %c0_5, %c0_6] : memref<1x1x8xf32, #tpu.memory_space<vmem>>, vector<1x1x8xf32>
    %7 = vector.shape_cast %6 : vector<1x1x8xf32> to vector<1x8xf32>
    %8 = vector.broadcast %7 : vector<1x8xf32> to vector<8x8xf32>
    %9 = arith.addf %5, %8 : vector<8x8xf32>
    %c0_7 = arith.constant 0 : index
    %c0_8 = arith.constant 0 : index
    %c0_9 = arith.constant 0 : index
    %c0_10 = arith.constant 0 : index
    %10 = vector.load %arg13[%c0_7, %c0_8, %c0_9, %c0_10] : memref<2x4x1x128xf32, #tpu.memory_space<vmem>>, vector<1x4x1x128xf32>
    %11 = vector.shape_cast %10 : vector<1x4x1x128xf32> to vector<4x1x128xf32>
    %c0_11 = arith.constant 0 : index
    %c0_12 = arith.constant 0 : index
    %c0_13 = arith.constant 0 : index
    %c0_14 = arith.constant 0 : index
    %c0_15 = arith.constant 0 : index
    %12 = vector.load %arg7[%c0_11, %c0_12, %c0_13, %c0_14, %c0_15] : memref<2x3x4x8x128xbf16, #tpu.memory_space<vmem>>, vector<1x3x4x8x128xbf16>
    %13 = vector.shape_cast %12 : vector<1x3x4x8x128xbf16> to vector<3x4x8x128xbf16>
    %c0_16 = arith.constant 0 : index
    %c0_17 = arith.constant 0 : index
    %c0_18 = arith.constant 0 : index
    %c0_19 = arith.constant 0 : index
    %14 = vector.load %arg8[%c0_16, %c0_17, %c0_18, %c0_19] : memref<2x4x8x128xbf16, #tpu.memory_space<vmem>>, vector<1x4x8x128xbf16>
    %15 = vector.shape_cast %14 : vector<1x4x8x128xbf16> to vector<4x8x128xbf16>
    %16 = arith.truncf %4 : vector<8x128xf32> to vector<8x128xbf16>
    %17 = vector.shape_cast %16 : vector<8x128xbf16> to vector<1x8x128xbf16>
    %18 = vector.shape_cast %17 : vector<1x8x128xbf16> to vector<1x8x128xbf16>
    %19 = vector.broadcast %18 : vector<1x8x128xbf16> to vector<4x8x128xbf16>
    %20 = arith.truncf %4 : vector<8x128xf32> to vector<8x128xbf16>
    %21 = vector.shape_cast %20 : vector<8x128xbf16> to vector<1x8x128xbf16>
    %22 = vector.shape_cast %21 : vector<1x8x128xbf16> to vector<1x8x128xbf16>
    %23 = vector.broadcast %22 : vector<1x8x128xbf16> to vector<4x8x128xbf16>
    %24 = vector.extract_strided_slice %13 {offsets = [0, 0, 0, 0], sizes = [1, 4, 8, 128], strides = [1, 1, 1, 1]} : vector<3x4x8x128xbf16> to vector<1x4x8x128xbf16>
    %25 = vector.shape_cast %24 : vector<1x4x8x128xbf16> to vector<4x8x128xbf16>
    "tpu.trace_start"() <{level = 10 : i32, message = "hsd,hed->hse"}> : () -> ()
    %cst = arith.constant dense<0.000000e+00> : vector<4x8x8xf32>
    %26 = tpu.matmul %19, %25, %cst {dimension_numbers = #tpu.dot_dimension_numbers<[2], [2], [1], [1], [0, 0, 0, 1, 1, 1], [0], [0]>} : vector<4x8x128xbf16>, vector<4x8x128xbf16>, vector<4x8x8xf32> -> vector<4x8x8xf32>
    "tpu.trace_stop"() : () -> ()
    %cst_20 = arith.constant 0.353553385 : f32
    %27 = vector.broadcast %cst_20 : f32 to vector<4x8x8xf32>
    %28 = arith.mulf %26, %27 : vector<4x8x8xf32>
    %29 = vector.extract_strided_slice %13 {offsets = [1, 0, 0, 0], sizes = [1, 4, 8, 128], strides = [1, 1, 1, 1]} : vector<3x4x8x128xbf16> to vector<1x4x8x128xbf16>
    %30 = vector.shape_cast %29 : vector<1x4x8x128xbf16> to vector<4x8x128xbf16>
    "tpu.trace_start"() <{level = 10 : i32, message = "hsd,hed->hse"}> : () -> ()
    %cst_21 = arith.constant dense<0.000000e+00> : vector<4x8x8xf32>
    %31 = tpu.matmul %23, %30, %cst_21 {dimension_numbers = #tpu.dot_dimension_numbers<[2], [2], [1], [1], [0, 0, 0, 1, 1, 1], [0], [0]>} : vector<4x8x128xbf16>, vector<4x8x128xbf16>, vector<4x8x8xf32> -> vector<4x8x8xf32>
    "tpu.trace_stop"() : () -> ()
    %32 = vector.extract_strided_slice %13 {offsets = [2, 0, 0, 0], sizes = [1, 4, 8, 128], strides = [1, 1, 1, 1]} : vector<3x4x8x128xbf16> to vector<1x4x8x128xbf16>
    %33 = vector.shape_cast %32 : vector<1x4x8x128xbf16> to vector<4x8x128xbf16>
    "tpu.trace_start"() <{level = 10 : i32, message = "hsd,hed->hse"}> : () -> ()
    %cst_22 = arith.constant dense<0.000000e+00> : vector<4x8x8xf32>
    %34 = tpu.matmul %23, %33, %cst_22 {dimension_numbers = #tpu.dot_dimension_numbers<[2], [2], [1], [1], [0, 0, 0, 1, 1, 1], [0], [0]>} : vector<4x8x128xbf16>, vector<4x8x128xbf16>, vector<4x8x8xf32> -> vector<4x8x8xf32>
    "tpu.trace_stop"() : () -> ()
    %35 = arith.truncf %28 : vector<4x8x8xf32> to vector<4x8x8xbf16>
    %36 = arith.truncf %31 : vector<4x8x8xf32> to vector<4x8x8xbf16>
    "tpu.trace_start"() <{level = 10 : i32, message = "hqe,hke->hqk"}> : () -> ()
    %cst_23 = arith.constant dense<0.000000e+00> : vector<4x8x8xf32>
    %37 = tpu.matmul %35, %36, %cst_23 {dimension_numbers = #tpu.dot_dimension_numbers<[2], [2], [1], [1], [0, 0, 0, 1, 1, 1], [0], [0]>} : vector<4x8x8xbf16>, vector<4x8x8xbf16>, vector<4x8x8xf32> -> vector<4x8x8xf32>
    "tpu.trace_stop"() : () -> ()
    %38 = vector.shape_cast %9 : vector<8x8xf32> to vector<1x8x8xf32>
    %39 = vector.broadcast %38 : vector<1x8x8xf32> to vector<4x8x8xf32>
    %40 = arith.addf %37, %39 : vector<4x8x8xf32>
    %cst_24 = arith.constant dense<0xFF800000> : vector<4x8xf32>
    %41 = vector.multi_reduction <maximumf>, %40, %cst_24 [2] : vector<4x8x8xf32> to vector<4x8xf32>
    %42 = vector.shape_cast %41 : vector<4x8xf32> to vector<4x8x1xf32>
    %43 = vector.broadcast %42 : vector<4x8x1xf32> to vector<4x8x8xf32>
    %44 = arith.subf %40, %43 : vector<4x8x8xf32>
    %45 = math.exp %44 : vector<4x8x8xf32>
    %cst_25 = arith.constant dense<0.000000e+00> : vector<4x8xf32>
    %46 = vector.multi_reduction <add>, %45, %cst_25 [2] : vector<4x8x8xf32> to vector<4x8xf32>
    %47 = vector.shape_cast %46 : vector<4x8xf32> to vector<4x8x1xf32>
    %48 = vector.broadcast %47 : vector<4x8x1xf32> to vector<4x8x8xf32>
    %49 = arith.divf %45, %48 : vector<4x8x8xf32>
    %50 = arith.truncf %49 : vector<4x8x8xf32> to vector<4x8x8xbf16>
    %51 = arith.truncf %34 : vector<4x8x8xf32> to vector<4x8x8xbf16>
    "tpu.trace_start"() <{level = 10 : i32, message = "hqk,hke->hqe"}> : () -> ()
    %cst_26 = arith.constant dense<0.000000e+00> : vector<4x8x8xf32>
    %52 = tpu.matmul %50, %51, %cst_26 {dimension_numbers = #tpu.dot_dimension_numbers<[2], [1], [1], [2], [0, 0, 0, 1, 1, 2], [0], [0]>} : vector<4x8x8xbf16>, vector<4x8x8xbf16>, vector<4x8x8xf32> -> vector<4x8x8xf32>
    "tpu.trace_stop"() : () -> ()
    %53 = arith.truncf %52 : vector<4x8x8xf32> to vector<4x8x8xbf16>
    "tpu.trace_start"() <{level = 10 : i32, message = "hqe,heo->hqo"}> : () -> ()
    %cst_27 = arith.constant dense<0.000000e+00> : vector<4x8x128xf32>
    %54 = tpu.matmul %53, %15, %cst_27 {dimension_numbers = #tpu.dot_dimension_numbers<[2], [1], [1], [2], [0, 0, 0, 1, 1, 2], [0], [0]>} : vector<4x8x8xbf16>, vector<4x8x128xbf16>, vector<4x8x128xf32> -> vector<4x8x128xf32>
    "tpu.trace_stop"() : () -> ()
    %cst_28 = arith.constant dense<0.000000e+00> : vector<8x128xf32>
    %55 = vector.multi_reduction <add>, %54, %cst_28 [0] : vector<4x8x128xf32> to vector<8x128xf32>
    %56 = arith.addf %4, %55 : vector<8x128xf32>
    %57 = vector.extract_strided_slice %11 {offsets = [0, 0, 0], sizes = [1, 1, 128], strides = [1, 1, 1]} : vector<4x1x128xf32> to vector<1x1x128xf32>
    %58 = vector.shape_cast %57 : vector<1x1x128xf32> to vector<1x128xf32>
    %59 = vector.extract_strided_slice %11 {offsets = [1, 0, 0], sizes = [1, 1, 128], strides = [1, 1, 1]} : vector<4x1x128xf32> to vector<1x1x128xf32>
    %60 = vector.shape_cast %59 : vector<1x1x128xf32> to vector<1x128xf32>
    %cst_29 = arith.constant dense<0.000000e+00> : vector<8xf32>
    %61 = vector.multi_reduction <add>, %56, %cst_29 [1] : vector<8x128xf32> to vector<8xf32>
    %62 = vector.shape_cast %61 : vector<8xf32> to vector<8x1xf32>
    %cst_30 = arith.constant 3.125000e-02 : f32
    %63 = vector.broadcast %cst_30 : f32 to vector<8x1xf32>
    %64 = arith.mulf %62, %63 : vector<8x1xf32>
    %65 = vector.broadcast %64 : vector<8x1xf32> to vector<8x128xf32>
    %66 = arith.subf %56, %65 : vector<8x128xf32>
    %cst_31 = arith.constant 0.000000e+00 : f32
    %67 = vector.shape_cast %2 : vector<1x128xi1> to vector<1x128xi1>
    %68 = vector.broadcast %67 : vector<1x128xi1> to vector<8x128xi1>
    %69 = vector.broadcast %cst_31 : f32 to vector<8x128xf32>
    %70 = arith.select %68, %66, %69 : vector<8x128xi1>, vector<8x128xf32>
    %71 = arith.mulf %70, %70 : vector<8x128xf32>
    %cst_32 = arith.constant dense<0.000000e+00> : vector<8xf32>
    %72 = vector.multi_reduction <add>, %71, %cst_32 [1] : vector<8x128xf32> to vector<8xf32>
    %73 = vector.shape_cast %72 : vector<8xf32> to vector<8x1xf32>
    %cst_33 = arith.constant 3.125000e-02 : f32
    %74 = vector.broadcast %cst_33 : f32 to vector<8x1xf32>
    %75 = arith.mulf %73, %74 : vector<8x1xf32>
    %cst_34 = arith.constant 9.99999974E-6 : f32
    %76 = vector.broadcast %cst_34 : f32 to vector<8x1xf32>
    %77 = arith.addf %75, %76 : vector<8x1xf32>
    %78 = math.rsqrt %77 : vector<8x1xf32>
    %79 = vector.broadcast %78 : vector<8x1xf32> to vector<8x128xf32>
    %80 = arith.mulf %70, %79 : vector<8x128xf32>
    %81 = vector.broadcast %58 : vector<1x128xf32> to vector<8x128xf32>
    %82 = arith.mulf %80, %81 : vector<8x128xf32>
    %83 = vector.broadcast %60 : vector<1x128xf32> to vector<8x128xf32>
    %84 = arith.addf %82, %83 : vector<8x128xf32>
    %c0_35 = arith.constant 0 : index
    %c0_36 = arith.constant 0 : index
    %c0_37 = arith.constant 0 : index
    %85 = vector.load %arg9[%c0_35, %c0_36, %c0_37] : memref<2x128x128xbf16, #tpu.memory_space<vmem>>, vector<1x128x128xbf16>
    %86 = vector.shape_cast %85 : vector<1x128x128xbf16> to vector<128x128xbf16>
    %c0_38 = arith.constant 0 : index
    %c0_39 = arith.constant 0 : index
    %c0_40 = arith.constant 0 : index
    %87 = vector.load %arg10[%c0_38, %c0_39, %c0_40] : memref<2x1x128xf32, #tpu.memory_space<vmem>>, vector<1x1x128xf32>
    %88 = vector.shape_cast %87 : vector<1x1x128xf32> to vector<1x128xf32>
    %c0_41 = arith.constant 0 : index
    %c0_42 = arith.constant 0 : index
    %c0_43 = arith.constant 0 : index
    %89 = vector.load %arg11[%c0_41, %c0_42, %c0_43] : memref<2x128x128xbf16, #tpu.memory_space<vmem>>, vector<1x128x128xbf16>
    %90 = vector.shape_cast %89 : vector<1x128x128xbf16> to vector<128x128xbf16>
    %c0_44 = arith.constant 0 : index
    %c0_45 = arith.constant 0 : index
    %c0_46 = arith.constant 0 : index
    %91 = vector.load %arg12[%c0_44, %c0_45, %c0_46] : memref<2x1x128xf32, #tpu.memory_space<vmem>>, vector<1x1x128xf32>
    %92 = vector.shape_cast %91 : vector<1x1x128xf32> to vector<1x128xf32>
    %93 = arith.truncf %84 : vector<8x128xf32> to vector<8x128xbf16>
    %cst_47 = arith.constant dense<0.000000e+00> : vector<8x128xf32>
    %94 = tpu.matmul %93, %86, %cst_47 {dimension_numbers = #tpu.dot_dimension_numbers<[1], [0], [0], [1], [0, 0, 1, 1], [], []>} : vector<8x128xbf16>, vector<128x128xbf16>, vector<8x128xf32> -> vector<8x128xf32>
    %95 = vector.broadcast %88 : vector<1x128xf32> to vector<8x128xf32>
    %96 = arith.addf %94, %95 : vector<8x128xf32>
    %cst_48 = arith.constant 0.000000e+00 : f32
    %97 = vector.broadcast %cst_48 : f32 to vector<8x128xf32>
    %98 = arith.maximumf %96, %97 : vector<8x128xf32>
    %99 = arith.truncf %98 : vector<8x128xf32> to vector<8x128xbf16>
    %cst_49 = arith.constant dense<0.000000e+00> : vector<8x128xf32>
    %100 = tpu.matmul %99, %90, %cst_49 {dimension_numbers = #tpu.dot_dimension_numbers<[1], [0], [0], [1], [0, 0, 1, 1], [], []>} : vector<8x128xbf16>, vector<128x128xbf16>, vector<8x128xf32> -> vector<8x128xf32>
    %101 = vector.broadcast %92 : vector<1x128xf32> to vector<8x128xf32>
    %102 = arith.addf %100, %101 : vector<8x128xf32>
    %103 = arith.addf %84, %102 : vector<8x128xf32>
    %104 = vector.extract_strided_slice %11 {offsets = [2, 0, 0], sizes = [1, 1, 128], strides = [1, 1, 1]} : vector<4x1x128xf32> to vector<1x1x128xf32>
    %105 = vector.shape_cast %104 : vector<1x1x128xf32> to vector<1x128xf32>
    %106 = vector.extract_strided_slice %11 {offsets = [3, 0, 0], sizes = [1, 1, 128], strides = [1, 1, 1]} : vector<4x1x128xf32> to vector<1x1x128xf32>
    %107 = vector.shape_cast %106 : vector<1x1x128xf32> to vector<1x128xf32>
    %cst_50 = arith.constant dense<0.000000e+00> : vector<8xf32>
    %108 = vector.multi_reduction <add>, %103, %cst_50 [1] : vector<8x128xf32> to vector<8xf32>
    %109 = vector.shape_cast %108 : vector<8xf32> to vector<8x1xf32>
    %cst_51 = arith.constant 3.125000e-02 : f32
    %110 = vector.broadcast %cst_51 : f32 to vector<8x1xf32>
    %111 = arith.mulf %109, %110 : vector<8x1xf32>
    %112 = vector.broadcast %111 : vector<8x1xf32> to vector<8x128xf32>
    %113 = arith.subf %103, %112 : vector<8x128xf32>
    %cst_52 = arith.constant 0.000000e+00 : f32
    %114 = vector.shape_cast %2 : vector<1x128xi1> to vector<1x128xi1>
    %115 = vector.broadcast %114 : vector<1x128xi1> to vector<8x128xi1>
    %116 = vector.broadcast %cst_52 : f32 to vector<8x128xf32>
    %117 = arith.select %115, %113, %116 : vector<8x128xi1>, vector<8x128xf32>
    %118 = arith.mulf %117, %117 : vector<8x128xf32>
    %cst_53 = arith.constant dense<0.000000e+00> : vector<8xf32>
    %119 = vector.multi_reduction <add>, %118, %cst_53 [1] : vector<8x128xf32> to vector<8xf32>
    %120 = vector.shape_cast %119 : vector<8xf32> to vector<8x1xf32>
    %cst_54 = arith.constant 3.125000e-02 : f32
    %121 = vector.broadcast %cst_54 : f32 to vector<8x1xf32>
    %122 = arith.mulf %120, %121 : vector<8x1xf32>
    %cst_55 = arith.constant 9.99999974E-6 : f32
    %123 = vector.broadcast %cst_55 : f32 to vector<8x1xf32>
    %124 = arith.addf %122, %123 : vector<8x1xf32>
    %125 = math.rsqrt %124 : vector<8x1xf32>
    %126 = vector.broadcast %125 : vector<8x1xf32> to vector<8x128xf32>
    %127 = arith.mulf %117, %126 : vector<8x128xf32>
    %128 = vector.broadcast %105 : vector<1x128xf32> to vector<8x128xf32>
    %129 = arith.mulf %127, %128 : vector<8x128xf32>
    %130 = vector.broadcast %107 : vector<1x128xf32> to vector<8x128xf32>
    %131 = arith.addf %129, %130 : vector<8x128xf32>
    %c1 = arith.constant 1 : index
    %c0_56 = arith.constant 0 : index
    %c0_57 = arith.constant 0 : index
    %c0_58 = arith.constant 0 : index
    %132 = vector.load %arg13[%c1, %c0_56, %c0_57, %c0_58] : memref<2x4x1x128xf32, #tpu.memory_space<vmem>>, vector<1x4x1x128xf32>
    %133 = vector.shape_cast %132 : vector<1x4x1x128xf32> to vector<4x1x128xf32>
    %c1_59 = arith.constant 1 : index
    %c0_60 = arith.constant 0 : index
    %c0_61 = arith.constant 0 : index
    %c0_62 = arith.constant 0 : index
    %c0_63 = arith.constant 0 : index
    %134 = vector.load %arg7[%c1_59, %c0_60, %c0_61, %c0_62, %c0_63] : memref<2x3x4x8x128xbf16, #tpu.memory_space<vmem>>, vector<1x3x4x8x128xbf16>
    %135 = vector.shape_cast %134 : vector<1x3x4x8x128xbf16> to vector<3x4x8x128xbf16>
    %c1_64 = arith.constant 1 : index
    %c0_65 = arith.constant 0 : index
    %c0_66 = arith.constant 0 : index
    %c0_67 = arith.constant 0 : index
    %136 = vector.load %arg8[%c1_64, %c0_65, %c0_66, %c0_67] : memref<2x4x8x128xbf16, #tpu.memory_space<vmem>>, vector<1x4x8x128xbf16>
    %137 = vector.shape_cast %136 : vector<1x4x8x128xbf16> to vector<4x8x128xbf16>
    %138 = arith.truncf %131 : vector<8x128xf32> to vector<8x128xbf16>
    %139 = vector.shape_cast %138 : vector<8x128xbf16> to vector<1x8x128xbf16>
    %140 = vector.shape_cast %139 : vector<1x8x128xbf16> to vector<1x8x128xbf16>
    %141 = vector.broadcast %140 : vector<1x8x128xbf16> to vector<4x8x128xbf16>
    %142 = arith.truncf %131 : vector<8x128xf32> to vector<8x128xbf16>
    %143 = vector.shape_cast %142 : vector<8x128xbf16> to vector<1x8x128xbf16>
    %144 = vector.shape_cast %143 : vector<1x8x128xbf16> to vector<1x8x128xbf16>
    %145 = vector.broadcast %144 : vector<1x8x128xbf16> to vector<4x8x128xbf16>
    %146 = vector.extract_strided_slice %135 {offsets = [0, 0, 0, 0], sizes = [1, 4, 8, 128], strides = [1, 1, 1, 1]} : vector<3x4x8x128xbf16> to vector<1x4x8x128xbf16>
    %147 = vector.shape_cast %146 : vector<1x4x8x128xbf16> to vector<4x8x128xbf16>
    "tpu.trace_start"() <{level = 10 : i32, message = "hsd,hed->hse"}> : () -> ()
    %cst_68 = arith.constant dense<0.000000e+00> : vector<4x8x8xf32>
    %148 = tpu.matmul %141, %147, %cst_68 {dimension_numbers = #tpu.dot_dimension_numbers<[2], [2], [1], [1], [0, 0, 0, 1, 1, 1], [0], [0]>} : vector<4x8x128xbf16>, vector<4x8x128xbf16>, vector<4x8x8xf32> -> vector<4x8x8xf32>
    "tpu.trace_stop"() : () -> ()
    %cst_69 = arith.constant 0.353553385 : f32
    %149 = vector.broadcast %cst_69 : f32 to vector<4x8x8xf32>
    %150 = arith.mulf %148, %149 : vector<4x8x8xf32>
    %151 = vector.extract_strided_slice %135 {offsets = [1, 0, 0, 0], sizes = [1, 4, 8, 128], strides = [1, 1, 1, 1]} : vector<3x4x8x128xbf16> to vector<1x4x8x128xbf16>
    %152 = vector.shape_cast %151 : vector<1x4x8x128xbf16> to vector<4x8x128xbf16>
    "tpu.trace_start"() <{level = 10 : i32, message = "hsd,hed->hse"}> : () -> ()
    %cst_70 = arith.constant dense<0.000000e+00> : vector<4x8x8xf32>
    %153 = tpu.matmul %145, %152, %cst_70 {dimension_numbers = #tpu.dot_dimension_numbers<[2], [2], [1], [1], [0, 0, 0, 1, 1, 1], [0], [0]>} : vector<4x8x128xbf16>, vector<4x8x128xbf16>, vector<4x8x8xf32> -> vector<4x8x8xf32>
    "tpu.trace_stop"() : () -> ()
    %154 = vector.extract_strided_slice %135 {offsets = [2, 0, 0, 0], sizes = [1, 4, 8, 128], strides = [1, 1, 1, 1]} : vector<3x4x8x128xbf16> to vector<1x4x8x128xbf16>
    %155 = vector.shape_cast %154 : vector<1x4x8x128xbf16> to vector<4x8x128xbf16>
    "tpu.trace_start"() <{level = 10 : i32, message = "hsd,hed->hse"}> : () -> ()
    %cst_71 = arith.constant dense<0.000000e+00> : vector<4x8x8xf32>
    %156 = tpu.matmul %145, %155, %cst_71 {dimension_numbers = #tpu.dot_dimension_numbers<[2], [2], [1], [1], [0, 0, 0, 1, 1, 1], [0], [0]>} : vector<4x8x128xbf16>, vector<4x8x128xbf16>, vector<4x8x8xf32> -> vector<4x8x8xf32>
    "tpu.trace_stop"() : () -> ()
    %157 = arith.truncf %150 : vector<4x8x8xf32> to vector<4x8x8xbf16>
    %158 = arith.truncf %153 : vector<4x8x8xf32> to vector<4x8x8xbf16>
    "tpu.trace_start"() <{level = 10 : i32, message = "hqe,hke->hqk"}> : () -> ()
    %cst_72 = arith.constant dense<0.000000e+00> : vector<4x8x8xf32>
    %159 = tpu.matmul %157, %158, %cst_72 {dimension_numbers = #tpu.dot_dimension_numbers<[2], [2], [1], [1], [0, 0, 0, 1, 1, 1], [0], [0]>} : vector<4x8x8xbf16>, vector<4x8x8xbf16>, vector<4x8x8xf32> -> vector<4x8x8xf32>
    "tpu.trace_stop"() : () -> ()
    %160 = vector.shape_cast %9 : vector<8x8xf32> to vector<1x8x8xf32>
    %161 = vector.broadcast %160 : vector<1x8x8xf32> to vector<4x8x8xf32>
    %162 = arith.addf %159, %161 : vector<4x8x8xf32>
    %cst_73 = arith.constant dense<0xFF800000> : vector<4x8xf32>
    %163 = vector.multi_reduction <maximumf>, %162, %cst_73 [2] : vector<4x8x8xf32> to vector<4x8xf32>
    %164 = vector.shape_cast %163 : vector<4x8xf32> to vector<4x8x1xf32>
    %165 = vector.broadcast %164 : vector<4x8x1xf32> to vector<4x8x8xf32>
    %166 = arith.subf %162, %165 : vector<4x8x8xf32>
    %167 = math.exp %166 : vector<4x8x8xf32>
    %cst_74 = arith.constant dense<0.000000e+00> : vector<4x8xf32>
    %168 = vector.multi_reduction <add>, %167, %cst_74 [2] : vector<4x8x8xf32> to vector<4x8xf32>
    %169 = vector.shape_cast %168 : vector<4x8xf32> to vector<4x8x1xf32>
    %170 = vector.broadcast %169 : vector<4x8x1xf32> to vector<4x8x8xf32>
    %171 = arith.divf %167, %170 : vector<4x8x8xf32>
    %172 = arith.truncf %171 : vector<4x8x8xf32> to vector<4x8x8xbf16>
    %173 = arith.truncf %156 : vector<4x8x8xf32> to vector<4x8x8xbf16>
    "tpu.trace_start"() <{level = 10 : i32, message = "hqk,hke->hqe"}> : () -> ()
    %cst_75 = arith.constant dense<0.000000e+00> : vector<4x8x8xf32>
    %174 = tpu.matmul %172, %173, %cst_75 {dimension_numbers = #tpu.dot_dimension_numbers<[2], [1], [1], [2], [0, 0, 0, 1, 1, 2], [0], [0]>} : vector<4x8x8xbf16>, vector<4x8x8xbf16>, vector<4x8x8xf32> -> vector<4x8x8xf32>
    "tpu.trace_stop"() : () -> ()
    %175 = arith.truncf %174 : vector<4x8x8xf32> to vector<4x8x8xbf16>
    "tpu.trace_start"() <{level = 10 : i32, message = "hqe,heo->hqo"}> : () -> ()
    %cst_76 = arith.constant dense<0.000000e+00> : vector<4x8x128xf32>
    %176 = tpu.matmul %175, %137, %cst_76 {dimension_numbers = #tpu.dot_dimension_numbers<[2], [1], [1], [2], [0, 0, 0, 1, 1, 2], [0], [0]>} : vector<4x8x8xbf16>, vector<4x8x128xbf16>, vector<4x8x128xf32> -> vector<4x8x128xf32>
    "tpu.trace_stop"() : () -> ()
    %cst_77 = arith.constant dense<0.000000e+00> : vector<8x128xf32>
    %177 = vector.multi_reduction <add>, %176, %cst_77 [0] : vector<4x8x128xf32> to vector<8x128xf32>
    %178 = arith.addf %131, %177 : vector<8x128xf32>
    %179 = vector.extract_strided_slice %133 {offsets = [0, 0, 0], sizes = [1, 1, 128], strides = [1, 1, 1]} : vector<4x1x128xf32> to vector<1x1x128xf32>
    %180 = vector.shape_cast %179 : vector<1x1x128xf32> to vector<1x128xf32>
    %181 = vector.extract_strided_slice %133 {offsets = [1, 0, 0], sizes = [1, 1, 128], strides = [1, 1, 1]} : vector<4x1x128xf32> to vector<1x1x128xf32>
    %182 = vector.shape_cast %181 : vector<1x1x128xf32> to vector<1x128xf32>
    %cst_78 = arith.constant dense<0.000000e+00> : vector<8xf32>
    %183 = vector.multi_reduction <add>, %178, %cst_78 [1] : vector<8x128xf32> to vector<8xf32>
    %184 = vector.shape_cast %183 : vector<8xf32> to vector<8x1xf32>
    %cst_79 = arith.constant 3.125000e-02 : f32
    %185 = vector.broadcast %cst_79 : f32 to vector<8x1xf32>
    %186 = arith.mulf %184, %185 : vector<8x1xf32>
    %187 = vector.broadcast %186 : vector<8x1xf32> to vector<8x128xf32>
    %188 = arith.subf %178, %187 : vector<8x128xf32>
    %cst_80 = arith.constant 0.000000e+00 : f32
    %189 = vector.shape_cast %2 : vector<1x128xi1> to vector<1x128xi1>
    %190 = vector.broadcast %189 : vector<1x128xi1> to vector<8x128xi1>
    %191 = vector.broadcast %cst_80 : f32 to vector<8x128xf32>
    %192 = arith.select %190, %188, %191 : vector<8x128xi1>, vector<8x128xf32>
    %193 = arith.mulf %192, %192 : vector<8x128xf32>
    %cst_81 = arith.constant dense<0.000000e+00> : vector<8xf32>
    %194 = vector.multi_reduction <add>, %193, %cst_81 [1] : vector<8x128xf32> to vector<8xf32>
    %195 = vector.shape_cast %194 : vector<8xf32> to vector<8x1xf32>
    %cst_82 = arith.constant 3.125000e-02 : f32
    %196 = vector.broadcast %cst_82 : f32 to vector<8x1xf32>
    %197 = arith.mulf %195, %196 : vector<8x1xf32>
    %cst_83 = arith.constant 9.99999974E-6 : f32
    %198 = vector.broadcast %cst_83 : f32 to vector<8x1xf32>
    %199 = arith.addf %197, %198 : vector<8x1xf32>
    %200 = math.rsqrt %199 : vector<8x1xf32>
    %201 = vector.broadcast %200 : vector<8x1xf32> to vector<8x128xf32>
    %202 = arith.mulf %192, %201 : vector<8x128xf32>
    %203 = vector.broadcast %180 : vector<1x128xf32> to vector<8x128xf32>
    %204 = arith.mulf %202, %203 : vector<8x128xf32>
    %205 = vector.broadcast %182 : vector<1x128xf32> to vector<8x128xf32>
    %206 = arith.addf %204, %205 : vector<8x128xf32>
    %c1_84 = arith.constant 1 : index
    %c0_85 = arith.constant 0 : index
    %c0_86 = arith.constant 0 : index
    %207 = vector.load %arg9[%c1_84, %c0_85, %c0_86] : memref<2x128x128xbf16, #tpu.memory_space<vmem>>, vector<1x128x128xbf16>
    %208 = vector.shape_cast %207 : vector<1x128x128xbf16> to vector<128x128xbf16>
    %c1_87 = arith.constant 1 : index
    %c0_88 = arith.constant 0 : index
    %c0_89 = arith.constant 0 : index
    %209 = vector.load %arg10[%c1_87, %c0_88, %c0_89] : memref<2x1x128xf32, #tpu.memory_space<vmem>>, vector<1x1x128xf32>
    %210 = vector.shape_cast %209 : vector<1x1x128xf32> to vector<1x128xf32>
    %c1_90 = arith.constant 1 : index
    %c0_91 = arith.constant 0 : index
    %c0_92 = arith.constant 0 : index
    %211 = vector.load %arg11[%c1_90, %c0_91, %c0_92] : memref<2x128x128xbf16, #tpu.memory_space<vmem>>, vector<1x128x128xbf16>
    %212 = vector.shape_cast %211 : vector<1x128x128xbf16> to vector<128x128xbf16>
    %c1_93 = arith.constant 1 : index
    %c0_94 = arith.constant 0 : index
    %c0_95 = arith.constant 0 : index
    %213 = vector.load %arg12[%c1_93, %c0_94, %c0_95] : memref<2x1x128xf32, #tpu.memory_space<vmem>>, vector<1x1x128xf32>
    %214 = vector.shape_cast %213 : vector<1x1x128xf32> to vector<1x128xf32>
    %215 = arith.truncf %206 : vector<8x128xf32> to vector<8x128xbf16>
    %cst_96 = arith.constant dense<0.000000e+00> : vector<8x128xf32>
    %216 = tpu.matmul %215, %208, %cst_96 {dimension_numbers = #tpu.dot_dimension_numbers<[1], [0], [0], [1], [0, 0, 1, 1], [], []>} : vector<8x128xbf16>, vector<128x128xbf16>, vector<8x128xf32> -> vector<8x128xf32>
    %217 = vector.broadcast %210 : vector<1x128xf32> to vector<8x128xf32>
    %218 = arith.addf %216, %217 : vector<8x128xf32>
    %cst_97 = arith.constant 0.000000e+00 : f32
    %219 = vector.broadcast %cst_97 : f32 to vector<8x128xf32>
    %220 = arith.maximumf %218, %219 : vector<8x128xf32>
    %221 = arith.truncf %220 : vector<8x128xf32> to vector<8x128xbf16>
    %cst_98 = arith.constant dense<0.000000e+00> : vector<8x128xf32>
    %222 = tpu.matmul %221, %212, %cst_98 {dimension_numbers = #tpu.dot_dimension_numbers<[1], [0], [0], [1], [0, 0, 1, 1], [], []>} : vector<8x128xbf16>, vector<128x128xbf16>, vector<8x128xf32> -> vector<8x128xf32>
    %223 = vector.broadcast %214 : vector<1x128xf32> to vector<8x128xf32>
    %224 = arith.addf %222, %223 : vector<8x128xf32>
    %225 = arith.addf %206, %224 : vector<8x128xf32>
    %226 = vector.extract_strided_slice %133 {offsets = [2, 0, 0], sizes = [1, 1, 128], strides = [1, 1, 1]} : vector<4x1x128xf32> to vector<1x1x128xf32>
    %227 = vector.shape_cast %226 : vector<1x1x128xf32> to vector<1x128xf32>
    %228 = vector.extract_strided_slice %133 {offsets = [3, 0, 0], sizes = [1, 1, 128], strides = [1, 1, 1]} : vector<4x1x128xf32> to vector<1x1x128xf32>
    %229 = vector.shape_cast %228 : vector<1x1x128xf32> to vector<1x128xf32>
    %cst_99 = arith.constant dense<0.000000e+00> : vector<8xf32>
    %230 = vector.multi_reduction <add>, %225, %cst_99 [1] : vector<8x128xf32> to vector<8xf32>
    %231 = vector.shape_cast %230 : vector<8xf32> to vector<8x1xf32>
    %cst_100 = arith.constant 3.125000e-02 : f32
    %232 = vector.broadcast %cst_100 : f32 to vector<8x1xf32>
    %233 = arith.mulf %231, %232 : vector<8x1xf32>
    %234 = vector.broadcast %233 : vector<8x1xf32> to vector<8x128xf32>
    %235 = arith.subf %225, %234 : vector<8x128xf32>
    %cst_101 = arith.constant 0.000000e+00 : f32
    %236 = vector.shape_cast %2 : vector<1x128xi1> to vector<1x128xi1>
    %237 = vector.broadcast %236 : vector<1x128xi1> to vector<8x128xi1>
    %238 = vector.broadcast %cst_101 : f32 to vector<8x128xf32>
    %239 = arith.select %237, %235, %238 : vector<8x128xi1>, vector<8x128xf32>
    %240 = arith.mulf %239, %239 : vector<8x128xf32>
    %cst_102 = arith.constant dense<0.000000e+00> : vector<8xf32>
    %241 = vector.multi_reduction <add>, %240, %cst_102 [1] : vector<8x128xf32> to vector<8xf32>
    %242 = vector.shape_cast %241 : vector<8xf32> to vector<8x1xf32>
    %cst_103 = arith.constant 3.125000e-02 : f32
    %243 = vector.broadcast %cst_103 : f32 to vector<8x1xf32>
    %244 = arith.mulf %242, %243 : vector<8x1xf32>
    %cst_104 = arith.constant 9.99999974E-6 : f32
    %245 = vector.broadcast %cst_104 : f32 to vector<8x1xf32>
    %246 = arith.addf %244, %245 : vector<8x1xf32>
    %247 = math.rsqrt %246 : vector<8x1xf32>
    %248 = vector.broadcast %247 : vector<8x1xf32> to vector<8x128xf32>
    %249 = arith.mulf %239, %248 : vector<8x128xf32>
    %250 = vector.broadcast %227 : vector<1x128xf32> to vector<8x128xf32>
    %251 = arith.mulf %249, %250 : vector<8x128xf32>
    %252 = vector.broadcast %229 : vector<1x128xf32> to vector<8x128xf32>
    %253 = arith.addf %251, %252 : vector<8x128xf32>
    %c0_105 = arith.constant 0 : index
    %c0_106 = arith.constant 0 : index
    %c0_107 = arith.constant 0 : index
    %254 = vector.load %arg14[%c0_105, %c0_106, %c0_107] : memref<2x1x128xf32, #tpu.memory_space<vmem>>, vector<1x1x128xf32>
    %255 = vector.shape_cast %254 : vector<1x1x128xf32> to vector<1x128xf32>
    %c1_108 = arith.constant 1 : index
    %c0_109 = arith.constant 0 : index
    %c0_110 = arith.constant 0 : index
    %256 = vector.load %arg14[%c1_108, %c0_109, %c0_110] : memref<2x1x128xf32, #tpu.memory_space<vmem>>, vector<1x1x128xf32>
    %257 = vector.shape_cast %256 : vector<1x1x128xf32> to vector<1x128xf32>
    %cst_111 = arith.constant dense<0.000000e+00> : vector<8xf32>
    %258 = vector.multi_reduction <add>, %253, %cst_111 [1] : vector<8x128xf32> to vector<8xf32>
    %259 = vector.shape_cast %258 : vector<8xf32> to vector<8x1xf32>
    %cst_112 = arith.constant 3.125000e-02 : f32
    %260 = vector.broadcast %cst_112 : f32 to vector<8x1xf32>
    %261 = arith.mulf %259, %260 : vector<8x1xf32>
    %262 = vector.broadcast %261 : vector<8x1xf32> to vector<8x128xf32>
    %263 = arith.subf %253, %262 : vector<8x128xf32>
    %cst_113 = arith.constant 0.000000e+00 : f32
    %264 = vector.shape_cast %2 : vector<1x128xi1> to vector<1x128xi1>
    %265 = vector.broadcast %264 : vector<1x128xi1> to vector<8x128xi1>
    %266 = vector.broadcast %cst_113 : f32 to vector<8x128xf32>
    %267 = arith.select %265, %263, %266 : vector<8x128xi1>, vector<8x128xf32>
    %268 = arith.mulf %267, %267 : vector<8x128xf32>
    %cst_114 = arith.constant dense<0.000000e+00> : vector<8xf32>
    %269 = vector.multi_reduction <add>, %268, %cst_114 [1] : vector<8x128xf32> to vector<8xf32>
    %270 = vector.shape_cast %269 : vector<8xf32> to vector<8x1xf32>
    %cst_115 = arith.constant 3.125000e-02 : f32
    %271 = vector.broadcast %cst_115 : f32 to vector<8x1xf32>
    %272 = arith.mulf %270, %271 : vector<8x1xf32>
    %cst_116 = arith.constant 9.99999974E-6 : f32
    %273 = vector.broadcast %cst_116 : f32 to vector<8x1xf32>
    %274 = arith.addf %272, %273 : vector<8x1xf32>
    %275 = math.rsqrt %274 : vector<8x1xf32>
    %276 = vector.broadcast %275 : vector<8x1xf32> to vector<8x128xf32>
    %277 = arith.mulf %267, %276 : vector<8x128xf32>
    %278 = vector.broadcast %255 : vector<1x128xf32> to vector<8x128xf32>
    %279 = arith.mulf %277, %278 : vector<8x128xf32>
    %280 = vector.broadcast %257 : vector<1x128xf32> to vector<8x128xf32>
    %281 = arith.addf %279, %280 : vector<8x128xf32>
    %c0_117 = arith.constant 0 : index
    %c0_118 = arith.constant 0 : index
    %c0_119 = arith.constant 0 : index
    %282 = vector.load %arg2[%c0_117, %c0_118, %c0_119] : memref<1x6x128xf32, #tpu.memory_space<vmem>>, vector<1x6x128xf32>
    %283 = vector.shape_cast %282 : vector<1x6x128xf32> to vector<6x128xf32>
    %c0_120 = arith.constant 0 : index
    %c0_121 = arith.constant 0 : index
    %284 = vector.load %arg6[%c0_120, %c0_121] : memref<6x6xf32, #tpu.memory_space<vmem>>, vector<6x6xf32>
    %c0_122 = arith.constant 0 : index
    %c0_123 = arith.constant 0 : index
    %c0_124 = arith.constant 0 : index
    %285 = vector.load %arg4[%c0_122, %c0_123, %c0_124] : memref<1x1x6xf32, #tpu.memory_space<vmem>>, vector<1x1x6xf32>
    %286 = vector.shape_cast %285 : vector<1x1x6xf32> to vector<1x6xf32>
    %287 = vector.broadcast %286 : vector<1x6xf32> to vector<6x6xf32>
    %288 = arith.addf %284, %287 : vector<6x6xf32>
    %c0_125 = arith.constant 0 : index
    %c0_126 = arith.constant 0 : index
    %c0_127 = arith.constant 0 : index
    %c0_128 = arith.constant 0 : index
    %289 = vector.load %arg23[%c0_125, %c0_126, %c0_127, %c0_128] : memref<2x6x1x128xf32, #tpu.memory_space<vmem>>, vector<1x6x1x128xf32>
    %290 = vector.shape_cast %289 : vector<1x6x1x128xf32> to vector<6x1x128xf32>
    %c0_129 = arith.constant 0 : index
    %c0_130 = arith.constant 0 : index
    %c0_131 = arith.constant 0 : index
    %c0_132 = arith.constant 0 : index
    %c0_133 = arith.constant 0 : index
    %291 = vector.load %arg15[%c0_129, %c0_130, %c0_131, %c0_132, %c0_133] : memref<2x3x4x8x128xbf16, #tpu.memory_space<vmem>>, vector<1x3x4x8x128xbf16>
    %292 = vector.shape_cast %291 : vector<1x3x4x8x128xbf16> to vector<3x4x8x128xbf16>
    %c0_134 = arith.constant 0 : index
    %c0_135 = arith.constant 0 : index
    %c0_136 = arith.constant 0 : index
    %c0_137 = arith.constant 0 : index
    %293 = vector.load %arg16[%c0_134, %c0_135, %c0_136, %c0_137] : memref<2x4x8x128xbf16, #tpu.memory_space<vmem>>, vector<1x4x8x128xbf16>
    %294 = vector.shape_cast %293 : vector<1x4x8x128xbf16> to vector<4x8x128xbf16>
    %295 = arith.truncf %283 : vector<6x128xf32> to vector<6x128xbf16>
    %296 = vector.shape_cast %295 : vector<6x128xbf16> to vector<1x6x128xbf16>
    %297 = vector.shape_cast %296 : vector<1x6x128xbf16> to vector<1x6x128xbf16>
    %298 = vector.broadcast %297 : vector<1x6x128xbf16> to vector<4x6x128xbf16>
    %299 = arith.truncf %283 : vector<6x128xf32> to vector<6x128xbf16>
    %300 = vector.shape_cast %299 : vector<6x128xbf16> to vector<1x6x128xbf16>
    %301 = vector.shape_cast %300 : vector<1x6x128xbf16> to vector<1x6x128xbf16>
    %302 = vector.broadcast %301 : vector<1x6x128xbf16> to vector<4x6x128xbf16>
    %303 = vector.extract_strided_slice %292 {offsets = [0, 0, 0, 0], sizes = [1, 4, 8, 128], strides = [1, 1, 1, 1]} : vector<3x4x8x128xbf16> to vector<1x4x8x128xbf16>
    %304 = vector.shape_cast %303 : vector<1x4x8x128xbf16> to vector<4x8x128xbf16>
    "tpu.trace_start"() <{level = 10 : i32, message = "hsd,hed->hse"}> : () -> ()
    %cst_138 = arith.constant dense<0.000000e+00> : vector<4x6x8xf32>
    %305 = tpu.matmul %298, %304, %cst_138 {dimension_numbers = #tpu.dot_dimension_numbers<[2], [2], [1], [1], [0, 0, 0, 1, 1, 1], [0], [0]>} : vector<4x6x128xbf16>, vector<4x8x128xbf16>, vector<4x6x8xf32> -> vector<4x6x8xf32>
    "tpu.trace_stop"() : () -> ()
    %cst_139 = arith.constant 0.353553385 : f32
    %306 = vector.broadcast %cst_139 : f32 to vector<4x6x8xf32>
    %307 = arith.mulf %305, %306 : vector<4x6x8xf32>
    %308 = vector.extract_strided_slice %292 {offsets = [1, 0, 0, 0], sizes = [1, 4, 8, 128], strides = [1, 1, 1, 1]} : vector<3x4x8x128xbf16> to vector<1x4x8x128xbf16>
    %309 = vector.shape_cast %308 : vector<1x4x8x128xbf16> to vector<4x8x128xbf16>
    "tpu.trace_start"() <{level = 10 : i32, message = "hsd,hed->hse"}> : () -> ()
    %cst_140 = arith.constant dense<0.000000e+00> : vector<4x6x8xf32>
    %310 = tpu.matmul %302, %309, %cst_140 {dimension_numbers = #tpu.dot_dimension_numbers<[2], [2], [1], [1], [0, 0, 0, 1, 1, 1], [0], [0]>} : vector<4x6x128xbf16>, vector<4x8x128xbf16>, vector<4x6x8xf32> -> vector<4x6x8xf32>
    "tpu.trace_stop"() : () -> ()
    %311 = vector.extract_strided_slice %292 {offsets = [2, 0, 0, 0], sizes = [1, 4, 8, 128], strides = [1, 1, 1, 1]} : vector<3x4x8x128xbf16> to vector<1x4x8x128xbf16>
    %312 = vector.shape_cast %311 : vector<1x4x8x128xbf16> to vector<4x8x128xbf16>
    "tpu.trace_start"() <{level = 10 : i32, message = "hsd,hed->hse"}> : () -> ()
    %cst_141 = arith.constant dense<0.000000e+00> : vector<4x6x8xf32>
    %313 = tpu.matmul %302, %312, %cst_141 {dimension_numbers = #tpu.dot_dimension_numbers<[2], [2], [1], [1], [0, 0, 0, 1, 1, 1], [0], [0]>} : vector<4x6x128xbf16>, vector<4x8x128xbf16>, vector<4x6x8xf32> -> vector<4x6x8xf32>
    "tpu.trace_stop"() : () -> ()
    %314 = arith.truncf %307 : vector<4x6x8xf32> to vector<4x6x8xbf16>
    %315 = arith.truncf %310 : vector<4x6x8xf32> to vector<4x6x8xbf16>
    "tpu.trace_start"() <{level = 10 : i32, message = "hqe,hke->hqk"}> : () -> ()
    %cst_142 = arith.constant dense<0.000000e+00> : vector<4x6x6xf32>
    %316 = tpu.matmul %314, %315, %cst_142 {dimension_numbers = #tpu.dot_dimension_numbers<[2], [2], [1], [1], [0, 0, 0, 1, 1, 1], [0], [0]>} : vector<4x6x8xbf16>, vector<4x6x8xbf16>, vector<4x6x6xf32> -> vector<4x6x6xf32>
    "tpu.trace_stop"() : () -> ()
    %317 = vector.shape_cast %288 : vector<6x6xf32> to vector<1x6x6xf32>
    %318 = vector.broadcast %317 : vector<1x6x6xf32> to vector<4x6x6xf32>
    %319 = arith.addf %316, %318 : vector<4x6x6xf32>
    %cst_143 = arith.constant dense<0xFF800000> : vector<4x6xf32>
    %320 = vector.multi_reduction <maximumf>, %319, %cst_143 [2] : vector<4x6x6xf32> to vector<4x6xf32>
    %321 = vector.shape_cast %320 : vector<4x6xf32> to vector<4x6x1xf32>
    %322 = vector.broadcast %321 : vector<4x6x1xf32> to vector<4x6x6xf32>
    %323 = arith.subf %319, %322 : vector<4x6x6xf32>
    %324 = math.exp %323 : vector<4x6x6xf32>
    %cst_144 = arith.constant dense<0.000000e+00> : vector<4x6xf32>
    %325 = vector.multi_reduction <add>, %324, %cst_144 [2] : vector<4x6x6xf32> to vector<4x6xf32>
    %326 = vector.shape_cast %325 : vector<4x6xf32> to vector<4x6x1xf32>
    %327 = vector.broadcast %326 : vector<4x6x1xf32> to vector<4x6x6xf32>
    %328 = arith.divf %324, %327 : vector<4x6x6xf32>
    %329 = arith.truncf %328 : vector<4x6x6xf32> to vector<4x6x6xbf16>
    %330 = arith.truncf %313 : vector<4x6x8xf32> to vector<4x6x8xbf16>
    "tpu.trace_start"() <{level = 10 : i32, message = "hqk,hke->hqe"}> : () -> ()
    %cst_145 = arith.constant dense<0.000000e+00> : vector<4x6x8xf32>
    %331 = tpu.matmul %329, %330, %cst_145 {dimension_numbers = #tpu.dot_dimension_numbers<[2], [1], [1], [2], [0, 0, 0, 1, 1, 2], [0], [0]>} : vector<4x6x6xbf16>, vector<4x6x8xbf16>, vector<4x6x8xf32> -> vector<4x6x8xf32>
    "tpu.trace_stop"() : () -> ()
    %332 = arith.truncf %331 : vector<4x6x8xf32> to vector<4x6x8xbf16>
    "tpu.trace_start"() <{level = 10 : i32, message = "hqe,heo->hqo"}> : () -> ()
    %cst_146 = arith.constant dense<0.000000e+00> : vector<4x6x128xf32>
    %333 = tpu.matmul %332, %294, %cst_146 {dimension_numbers = #tpu.dot_dimension_numbers<[2], [1], [1], [2], [0, 0, 0, 1, 1, 2], [0], [0]>} : vector<4x6x8xbf16>, vector<4x8x128xbf16>, vector<4x6x128xf32> -> vector<4x6x128xf32>
    "tpu.trace_stop"() : () -> ()
    %cst_147 = arith.constant dense<0.000000e+00> : vector<6x128xf32>
    %334 = vector.multi_reduction <add>, %333, %cst_147 [0] : vector<4x6x128xf32> to vector<6x128xf32>
    %335 = arith.addf %283, %334 : vector<6x128xf32>
    %336 = vector.extract_strided_slice %290 {offsets = [0, 0, 0], sizes = [1, 1, 128], strides = [1, 1, 1]} : vector<6x1x128xf32> to vector<1x1x128xf32>
    %337 = vector.shape_cast %336 : vector<1x1x128xf32> to vector<1x128xf32>
    %338 = vector.extract_strided_slice %290 {offsets = [1, 0, 0], sizes = [1, 1, 128], strides = [1, 1, 1]} : vector<6x1x128xf32> to vector<1x1x128xf32>
    %339 = vector.shape_cast %338 : vector<1x1x128xf32> to vector<1x128xf32>
    %cst_148 = arith.constant dense<0.000000e+00> : vector<6xf32>
    %340 = vector.multi_reduction <add>, %335, %cst_148 [1] : vector<6x128xf32> to vector<6xf32>
    %341 = vector.shape_cast %340 : vector<6xf32> to vector<6x1xf32>
    %cst_149 = arith.constant 3.125000e-02 : f32
    %342 = vector.broadcast %cst_149 : f32 to vector<6x1xf32>
    %343 = arith.mulf %341, %342 : vector<6x1xf32>
    %344 = vector.broadcast %343 : vector<6x1xf32> to vector<6x128xf32>
    %345 = arith.subf %335, %344 : vector<6x128xf32>
    %cst_150 = arith.constant 0.000000e+00 : f32
    %346 = vector.shape_cast %2 : vector<1x128xi1> to vector<1x128xi1>
    %347 = vector.broadcast %346 : vector<1x128xi1> to vector<6x128xi1>
    %348 = vector.broadcast %cst_150 : f32 to vector<6x128xf32>
    %349 = arith.select %347, %345, %348 : vector<6x128xi1>, vector<6x128xf32>
    %350 = arith.mulf %349, %349 : vector<6x128xf32>
    %cst_151 = arith.constant dense<0.000000e+00> : vector<6xf32>
    %351 = vector.multi_reduction <add>, %350, %cst_151 [1] : vector<6x128xf32> to vector<6xf32>
    %352 = vector.shape_cast %351 : vector<6xf32> to vector<6x1xf32>
    %cst_152 = arith.constant 3.125000e-02 : f32
    %353 = vector.broadcast %cst_152 : f32 to vector<6x1xf32>
    %354 = arith.mulf %352, %353 : vector<6x1xf32>
    %cst_153 = arith.constant 9.99999974E-6 : f32
    %355 = vector.broadcast %cst_153 : f32 to vector<6x1xf32>
    %356 = arith.addf %354, %355 : vector<6x1xf32>
    %357 = math.rsqrt %356 : vector<6x1xf32>
    %358 = vector.broadcast %357 : vector<6x1xf32> to vector<6x128xf32>
    %359 = arith.mulf %349, %358 : vector<6x128xf32>
    %360 = vector.broadcast %337 : vector<1x128xf32> to vector<6x128xf32>
    %361 = arith.mulf %359, %360 : vector<6x128xf32>
    %362 = vector.broadcast %339 : vector<1x128xf32> to vector<6x128xf32>
    %363 = arith.addf %361, %362 : vector<6x128xf32>
    %c0_154 = arith.constant 0 : index
    %c0_155 = arith.constant 0 : index
    %c0_156 = arith.constant 0 : index
    %c0_157 = arith.constant 0 : index
    %c0_158 = arith.constant 0 : index
    %364 = vector.load %arg17[%c0_154, %c0_155, %c0_156, %c0_157, %c0_158] : memref<2x3x4x8x128xbf16, #tpu.memory_space<vmem>>, vector<1x3x4x8x128xbf16>
    %365 = vector.shape_cast %364 : vector<1x3x4x8x128xbf16> to vector<3x4x8x128xbf16>
    %c0_159 = arith.constant 0 : index
    %c0_160 = arith.constant 0 : index
    %c0_161 = arith.constant 0 : index
    %c0_162 = arith.constant 0 : index
    %366 = vector.load %arg18[%c0_159, %c0_160, %c0_161, %c0_162] : memref<2x4x8x128xbf16, #tpu.memory_space<vmem>>, vector<1x4x8x128xbf16>
    %367 = vector.shape_cast %366 : vector<1x4x8x128xbf16> to vector<4x8x128xbf16>
    %368 = arith.truncf %363 : vector<6x128xf32> to vector<6x128xbf16>
    %369 = vector.shape_cast %368 : vector<6x128xbf16> to vector<1x6x128xbf16>
    %370 = vector.shape_cast %369 : vector<1x6x128xbf16> to vector<1x6x128xbf16>
    %371 = vector.broadcast %370 : vector<1x6x128xbf16> to vector<4x6x128xbf16>
    %372 = arith.truncf %281 : vector<8x128xf32> to vector<8x128xbf16>
    %373 = vector.shape_cast %372 : vector<8x128xbf16> to vector<1x8x128xbf16>
    %374 = vector.shape_cast %373 : vector<1x8x128xbf16> to vector<1x8x128xbf16>
    %375 = vector.broadcast %374 : vector<1x8x128xbf16> to vector<4x8x128xbf16>
    %376 = vector.extract_strided_slice %365 {offsets = [0, 0, 0, 0], sizes = [1, 4, 8, 128], strides = [1, 1, 1, 1]} : vector<3x4x8x128xbf16> to vector<1x4x8x128xbf16>
    %377 = vector.shape_cast %376 : vector<1x4x8x128xbf16> to vector<4x8x128xbf16>
    "tpu.trace_start"() <{level = 10 : i32, message = "hsd,hed->hse"}> : () -> ()
    %cst_163 = arith.constant dense<0.000000e+00> : vector<4x6x8xf32>
    %378 = tpu.matmul %371, %377, %cst_163 {dimension_numbers = #tpu.dot_dimension_numbers<[2], [2], [1], [1], [0, 0, 0, 1, 1, 1], [0], [0]>} : vector<4x6x128xbf16>, vector<4x8x128xbf16>, vector<4x6x8xf32> -> vector<4x6x8xf32>
    "tpu.trace_stop"() : () -> ()
    %cst_164 = arith.constant 0.353553385 : f32
    %379 = vector.broadcast %cst_164 : f32 to vector<4x6x8xf32>
    %380 = arith.mulf %378, %379 : vector<4x6x8xf32>
    %381 = vector.extract_strided_slice %365 {offsets = [1, 0, 0, 0], sizes = [1, 4, 8, 128], strides = [1, 1, 1, 1]} : vector<3x4x8x128xbf16> to vector<1x4x8x128xbf16>
    %382 = vector.shape_cast %381 : vector<1x4x8x128xbf16> to vector<4x8x128xbf16>
    "tpu.trace_start"() <{level = 10 : i32, message = "hsd,hed->hse"}> : () -> ()
    %cst_165 = arith.constant dense<0.000000e+00> : vector<4x8x8xf32>
    %383 = tpu.matmul %375, %382, %cst_165 {dimension_numbers = #tpu.dot_dimension_numbers<[2], [2], [1], [1], [0, 0, 0, 1, 1, 1], [0], [0]>} : vector<4x8x128xbf16>, vector<4x8x128xbf16>, vector<4x8x8xf32> -> vector<4x8x8xf32>
    "tpu.trace_stop"() : () -> ()
    %384 = vector.extract_strided_slice %365 {offsets = [2, 0, 0, 0], sizes = [1, 4, 8, 128], strides = [1, 1, 1, 1]} : vector<3x4x8x128xbf16> to vector<1x4x8x128xbf16>
    %385 = vector.shape_cast %384 : vector<1x4x8x128xbf16> to vector<4x8x128xbf16>
    "tpu.trace_start"() <{level = 10 : i32, message = "hsd,hed->hse"}> : () -> ()
    %cst_166 = arith.constant dense<0.000000e+00> : vector<4x8x8xf32>
    %386 = tpu.matmul %375, %385, %cst_166 {dimension_numbers = #tpu.dot_dimension_numbers<[2], [2], [1], [1], [0, 0, 0, 1, 1, 1], [0], [0]>} : vector<4x8x128xbf16>, vector<4x8x128xbf16>, vector<4x8x8xf32> -> vector<4x8x8xf32>
    "tpu.trace_stop"() : () -> ()
    %387 = arith.truncf %380 : vector<4x6x8xf32> to vector<4x6x8xbf16>
    %388 = arith.truncf %383 : vector<4x8x8xf32> to vector<4x8x8xbf16>
    "tpu.trace_start"() <{level = 10 : i32, message = "hqe,hke->hqk"}> : () -> ()
    %cst_167 = arith.constant dense<0.000000e+00> : vector<4x6x8xf32>
    %389 = tpu.matmul %387, %388, %cst_167 {dimension_numbers = #tpu.dot_dimension_numbers<[2], [2], [1], [1], [0, 0, 0, 1, 1, 1], [0], [0]>} : vector<4x6x8xbf16>, vector<4x8x8xbf16>, vector<4x6x8xf32> -> vector<4x6x8xf32>
    "tpu.trace_stop"() : () -> ()
    %cst_168 = arith.constant dense<0xFF800000> : vector<4x6xf32>
    %390 = vector.multi_reduction <maximumf>, %389, %cst_168 [2] : vector<4x6x8xf32> to vector<4x6xf32>
    %391 = vector.shape_cast %390 : vector<4x6xf32> to vector<4x6x1xf32>
    %392 = vector.broadcast %391 : vector<4x6x1xf32> to vector<4x6x8xf32>
    %393 = arith.subf %389, %392 : vector<4x6x8xf32>
    %394 = math.exp %393 : vector<4x6x8xf32>
    %cst_169 = arith.constant dense<0.000000e+00> : vector<4x6xf32>
    %395 = vector.multi_reduction <add>, %394, %cst_169 [2] : vector<4x6x8xf32> to vector<4x6xf32>
    %396 = vector.shape_cast %395 : vector<4x6xf32> to vector<4x6x1xf32>
    %397 = vector.broadcast %396 : vector<4x6x1xf32> to vector<4x6x8xf32>
    %398 = arith.divf %394, %397 : vector<4x6x8xf32>
    %399 = arith.truncf %398 : vector<4x6x8xf32> to vector<4x6x8xbf16>
    %400 = arith.truncf %386 : vector<4x8x8xf32> to vector<4x8x8xbf16>
    "tpu.trace_start"() <{level = 10 : i32, message = "hqk,hke->hqe"}> : () -> ()
    %cst_170 = arith.constant dense<0.000000e+00> : vector<4x6x8xf32>
    %401 = tpu.matmul %399, %400, %cst_170 {dimension_numbers = #tpu.dot_dimension_numbers<[2], [1], [1], [2], [0, 0, 0, 1, 1, 2], [0], [0]>} : vector<4x6x8xbf16>, vector<4x8x8xbf16>, vector<4x6x8xf32> -> vector<4x6x8xf32>
    "tpu.trace_stop"() : () -> ()
    %402 = arith.truncf %401 : vector<4x6x8xf32> to vector<4x6x8xbf16>
    "tpu.trace_start"() <{level = 10 : i32, message = "hqe,heo->hqo"}> : () -> ()
    %cst_171 = arith.constant dense<0.000000e+00> : vector<4x6x128xf32>
    %403 = tpu.matmul %402, %367, %cst_171 {dimension_numbers = #tpu.dot_dimension_numbers<[2], [1], [1], [2], [0, 0, 0, 1, 1, 2], [0], [0]>} : vector<4x6x8xbf16>, vector<4x8x128xbf16>, vector<4x6x128xf32> -> vector<4x6x128xf32>
    "tpu.trace_stop"() : () -> ()
    %cst_172 = arith.constant dense<0.000000e+00> : vector<6x128xf32>
    %404 = vector.multi_reduction <add>, %403, %cst_172 [0] : vector<4x6x128xf32> to vector<6x128xf32>
    %405 = arith.addf %363, %404 : vector<6x128xf32>
    %406 = vector.extract_strided_slice %290 {offsets = [2, 0, 0], sizes = [1, 1, 128], strides = [1, 1, 1]} : vector<6x1x128xf32> to vector<1x1x128xf32>
    %407 = vector.shape_cast %406 : vector<1x1x128xf32> to vector<1x128xf32>
    %408 = vector.extract_strided_slice %290 {offsets = [3, 0, 0], sizes = [1, 1, 128], strides = [1, 1, 1]} : vector<6x1x128xf32> to vector<1x1x128xf32>
    %409 = vector.shape_cast %408 : vector<1x1x128xf32> to vector<1x128xf32>
    %cst_173 = arith.constant dense<0.000000e+00> : vector<6xf32>
    %410 = vector.multi_reduction <add>, %405, %cst_173 [1] : vector<6x128xf32> to vector<6xf32>
    %411 = vector.shape_cast %410 : vector<6xf32> to vector<6x1xf32>
    %cst_174 = arith.constant 3.125000e-02 : f32
    %412 = vector.broadcast %cst_174 : f32 to vector<6x1xf32>
    %413 = arith.mulf %411, %412 : vector<6x1xf32>
    %414 = vector.broadcast %413 : vector<6x1xf32> to vector<6x128xf32>
    %415 = arith.subf %405, %414 : vector<6x128xf32>
    %cst_175 = arith.constant 0.000000e+00 : f32
    %416 = vector.shape_cast %2 : vector<1x128xi1> to vector<1x128xi1>
    %417 = vector.broadcast %416 : vector<1x128xi1> to vector<6x128xi1>
    %418 = vector.broadcast %cst_175 : f32 to vector<6x128xf32>
    %419 = arith.select %417, %415, %418 : vector<6x128xi1>, vector<6x128xf32>
    %420 = arith.mulf %419, %419 : vector<6x128xf32>
    %cst_176 = arith.constant dense<0.000000e+00> : vector<6xf32>
    %421 = vector.multi_reduction <add>, %420, %cst_176 [1] : vector<6x128xf32> to vector<6xf32>
    %422 = vector.shape_cast %421 : vector<6xf32> to vector<6x1xf32>
    %cst_177 = arith.constant 3.125000e-02 : f32
    %423 = vector.broadcast %cst_177 : f32 to vector<6x1xf32>
    %424 = arith.mulf %422, %423 : vector<6x1xf32>
    %cst_178 = arith.constant 9.99999974E-6 : f32
    %425 = vector.broadcast %cst_178 : f32 to vector<6x1xf32>
    %426 = arith.addf %424, %425 : vector<6x1xf32>
    %427 = math.rsqrt %426 : vector<6x1xf32>
    %428 = vector.broadcast %427 : vector<6x1xf32> to vector<6x128xf32>
    %429 = arith.mulf %419, %428 : vector<6x128xf32>
    %430 = vector.broadcast %407 : vector<1x128xf32> to vector<6x128xf32>
    %431 = arith.mulf %429, %430 : vector<6x128xf32>
    %432 = vector.broadcast %409 : vector<1x128xf32> to vector<6x128xf32>
    %433 = arith.addf %431, %432 : vector<6x128xf32>
    %c0_179 = arith.constant 0 : index
    %c0_180 = arith.constant 0 : index
    %c0_181 = arith.constant 0 : index
    %434 = vector.load %arg19[%c0_179, %c0_180, %c0_181] : memref<2x128x128xbf16, #tpu.memory_space<vmem>>, vector<1x128x128xbf16>
    %435 = vector.shape_cast %434 : vector<1x128x128xbf16> to vector<128x128xbf16>
    %c0_182 = arith.constant 0 : index
    %c0_183 = arith.constant 0 : index
    %c0_184 = arith.constant 0 : index
    %436 = vector.load %arg20[%c0_182, %c0_183, %c0_184] : memref<2x1x128xf32, #tpu.memory_space<vmem>>, vector<1x1x128xf32>
    %437 = vector.shape_cast %436 : vector<1x1x128xf32> to vector<1x128xf32>
    %c0_185 = arith.constant 0 : index
    %c0_186 = arith.constant 0 : index
    %c0_187 = arith.constant 0 : index
    %438 = vector.load %arg21[%c0_185, %c0_186, %c0_187] : memref<2x128x128xbf16, #tpu.memory_space<vmem>>, vector<1x128x128xbf16>
    %439 = vector.shape_cast %438 : vector<1x128x128xbf16> to vector<128x128xbf16>
    %c0_188 = arith.constant 0 : index
    %c0_189 = arith.constant 0 : index
    %c0_190 = arith.constant 0 : index
    %440 = vector.load %arg22[%c0_188, %c0_189, %c0_190] : memref<2x1x128xf32, #tpu.memory_space<vmem>>, vector<1x1x128xf32>
    %441 = vector.shape_cast %440 : vector<1x1x128xf32> to vector<1x128xf32>
    %442 = arith.truncf %433 : vector<6x128xf32> to vector<6x128xbf16>
    %cst_191 = arith.constant dense<0.000000e+00> : vector<6x128xf32>
    %443 = tpu.matmul %442, %435, %cst_191 {dimension_numbers = #tpu.dot_dimension_numbers<[1], [0], [0], [1], [0, 0, 1, 1], [], []>} : vector<6x128xbf16>, vector<128x128xbf16>, vector<6x128xf32> -> vector<6x128xf32>
    %444 = vector.broadcast %437 : vector<1x128xf32> to vector<6x128xf32>
    %445 = arith.addf %443, %444 : vector<6x128xf32>
    %cst_192 = arith.constant 0.000000e+00 : f32
    %446 = vector.broadcast %cst_192 : f32 to vector<6x128xf32>
    %447 = arith.maximumf %445, %446 : vector<6x128xf32>
    %448 = arith.truncf %447 : vector<6x128xf32> to vector<6x128xbf16>
    %cst_193 = arith.constant dense<0.000000e+00> : vector<6x128xf32>
    %449 = tpu.matmul %448, %439, %cst_193 {dimension_numbers = #tpu.dot_dimension_numbers<[1], [0], [0], [1], [0, 0, 1, 1], [], []>} : vector<6x128xbf16>, vector<128x128xbf16>, vector<6x128xf32> -> vector<6x128xf32>
    %450 = vector.broadcast %441 : vector<1x128xf32> to vector<6x128xf32>
    %451 = arith.addf %449, %450 : vector<6x128xf32>
    %452 = arith.addf %433, %451 : vector<6x128xf32>
    %453 = vector.extract_strided_slice %290 {offsets = [4, 0, 0], sizes = [1, 1, 128], strides = [1, 1, 1]} : vector<6x1x128xf32> to vector<1x1x128xf32>
    %454 = vector.shape_cast %453 : vector<1x1x128xf32> to vector<1x128xf32>
    %455 = vector.extract_strided_slice %290 {offsets = [5, 0, 0], sizes = [1, 1, 128], strides = [1, 1, 1]} : vector<6x1x128xf32> to vector<1x1x128xf32>
    %456 = vector.shape_cast %455 : vector<1x1x128xf32> to vector<1x128xf32>
    %cst_194 = arith.constant dense<0.000000e+00> : vector<6xf32>
    %457 = vector.multi_reduction <add>, %452, %cst_194 [1] : vector<6x128xf32> to vector<6xf32>
    %458 = vector.shape_cast %457 : vector<6xf32> to vector<6x1xf32>
    %cst_195 = arith.constant 3.125000e-02 : f32
    %459 = vector.broadcast %cst_195 : f32 to vector<6x1xf32>
    %460 = arith.mulf %458, %459 : vector<6x1xf32>
    %461 = vector.broadcast %460 : vector<6x1xf32> to vector<6x128xf32>
    %462 = arith.subf %452, %461 : vector<6x128xf32>
    %cst_196 = arith.constant 0.000000e+00 : f32
    %463 = vector.shape_cast %2 : vector<1x128xi1> to vector<1x128xi1>
    %464 = vector.broadcast %463 : vector<1x128xi1> to vector<6x128xi1>
    %465 = vector.broadcast %cst_196 : f32 to vector<6x128xf32>
    %466 = arith.select %464, %462, %465 : vector<6x128xi1>, vector<6x128xf32>
    %467 = arith.mulf %466, %466 : vector<6x128xf32>
    %cst_197 = arith.constant dense<0.000000e+00> : vector<6xf32>
    %468 = vector.multi_reduction <add>, %467, %cst_197 [1] : vector<6x128xf32> to vector<6xf32>
    %469 = vector.shape_cast %468 : vector<6xf32> to vector<6x1xf32>
    %cst_198 = arith.constant 3.125000e-02 : f32
    %470 = vector.broadcast %cst_198 : f32 to vector<6x1xf32>
    %471 = arith.mulf %469, %470 : vector<6x1xf32>
    %cst_199 = arith.constant 9.99999974E-6 : f32
    %472 = vector.broadcast %cst_199 : f32 to vector<6x1xf32>
    %473 = arith.addf %471, %472 : vector<6x1xf32>
    %474 = math.rsqrt %473 : vector<6x1xf32>
    %475 = vector.broadcast %474 : vector<6x1xf32> to vector<6x128xf32>
    %476 = arith.mulf %466, %475 : vector<6x128xf32>
    %477 = vector.broadcast %454 : vector<1x128xf32> to vector<6x128xf32>
    %478 = arith.mulf %476, %477 : vector<6x128xf32>
    %479 = vector.broadcast %456 : vector<1x128xf32> to vector<6x128xf32>
    %480 = arith.addf %478, %479 : vector<6x128xf32>
    %c1_200 = arith.constant 1 : index
    %c0_201 = arith.constant 0 : index
    %c0_202 = arith.constant 0 : index
    %c0_203 = arith.constant 0 : index
    %481 = vector.load %arg23[%c1_200, %c0_201, %c0_202, %c0_203] : memref<2x6x1x128xf32, #tpu.memory_space<vmem>>, vector<1x6x1x128xf32>
    %482 = vector.shape_cast %481 : vector<1x6x1x128xf32> to vector<6x1x128xf32>
    %c1_204 = arith.constant 1 : index
    %c0_205 = arith.constant 0 : index
    %c0_206 = arith.constant 0 : index
    %c0_207 = arith.constant 0 : index
    %c0_208 = arith.constant 0 : index
    %483 = vector.load %arg15[%c1_204, %c0_205, %c0_206, %c0_207, %c0_208] : memref<2x3x4x8x128xbf16, #tpu.memory_space<vmem>>, vector<1x3x4x8x128xbf16>
    %484 = vector.shape_cast %483 : vector<1x3x4x8x128xbf16> to vector<3x4x8x128xbf16>
    %c1_209 = arith.constant 1 : index
    %c0_210 = arith.constant 0 : index
    %c0_211 = arith.constant 0 : index
    %c0_212 = arith.constant 0 : index
    %485 = vector.load %arg16[%c1_209, %c0_210, %c0_211, %c0_212] : memref<2x4x8x128xbf16, #tpu.memory_space<vmem>>, vector<1x4x8x128xbf16>
    %486 = vector.shape_cast %485 : vector<1x4x8x128xbf16> to vector<4x8x128xbf16>
    %487 = arith.truncf %480 : vector<6x128xf32> to vector<6x128xbf16>
    %488 = vector.shape_cast %487 : vector<6x128xbf16> to vector<1x6x128xbf16>
    %489 = vector.shape_cast %488 : vector<1x6x128xbf16> to vector<1x6x128xbf16>
    %490 = vector.broadcast %489 : vector<1x6x128xbf16> to vector<4x6x128xbf16>
    %491 = arith.truncf %480 : vector<6x128xf32> to vector<6x128xbf16>
    %492 = vector.shape_cast %491 : vector<6x128xbf16> to vector<1x6x128xbf16>
    %493 = vector.shape_cast %492 : vector<1x6x128xbf16> to vector<1x6x128xbf16>
    %494 = vector.broadcast %493 : vector<1x6x128xbf16> to vector<4x6x128xbf16>
    %495 = vector.extract_strided_slice %484 {offsets = [0, 0, 0, 0], sizes = [1, 4, 8, 128], strides = [1, 1, 1, 1]} : vector<3x4x8x128xbf16> to vector<1x4x8x128xbf16>
    %496 = vector.shape_cast %495 : vector<1x4x8x128xbf16> to vector<4x8x128xbf16>
    "tpu.trace_start"() <{level = 10 : i32, message = "hsd,hed->hse"}> : () -> ()
    %cst_213 = arith.constant dense<0.000000e+00> : vector<4x6x8xf32>
    %497 = tpu.matmul %490, %496, %cst_213 {dimension_numbers = #tpu.dot_dimension_numbers<[2], [2], [1], [1], [0, 0, 0, 1, 1, 1], [0], [0]>} : vector<4x6x128xbf16>, vector<4x8x128xbf16>, vector<4x6x8xf32> -> vector<4x6x8xf32>
    "tpu.trace_stop"() : () -> ()
    %cst_214 = arith.constant 0.353553385 : f32
    %498 = vector.broadcast %cst_214 : f32 to vector<4x6x8xf32>
    %499 = arith.mulf %497, %498 : vector<4x6x8xf32>
    %500 = vector.extract_strided_slice %484 {offsets = [1, 0, 0, 0], sizes = [1, 4, 8, 128], strides = [1, 1, 1, 1]} : vector<3x4x8x128xbf16> to vector<1x4x8x128xbf16>
    %501 = vector.shape_cast %500 : vector<1x4x8x128xbf16> to vector<4x8x128xbf16>
    "tpu.trace_start"() <{level = 10 : i32, message = "hsd,hed->hse"}> : () -> ()
    %cst_215 = arith.constant dense<0.000000e+00> : vector<4x6x8xf32>
    %502 = tpu.matmul %494, %501, %cst_215 {dimension_numbers = #tpu.dot_dimension_numbers<[2], [2], [1], [1], [0, 0, 0, 1, 1, 1], [0], [0]>} : vector<4x6x128xbf16>, vector<4x8x128xbf16>, vector<4x6x8xf32> -> vector<4x6x8xf32>
    "tpu.trace_stop"() : () -> ()
    %503 = vector.extract_strided_slice %484 {offsets = [2, 0, 0, 0], sizes = [1, 4, 8, 128], strides = [1, 1, 1, 1]} : vector<3x4x8x128xbf16> to vector<1x4x8x128xbf16>
    %504 = vector.shape_cast %503 : vector<1x4x8x128xbf16> to vector<4x8x128xbf16>
    "tpu.trace_start"() <{level = 10 : i32, message = "hsd,hed->hse"}> : () -> ()
    %cst_216 = arith.constant dense<0.000000e+00> : vector<4x6x8xf32>
    %505 = tpu.matmul %494, %504, %cst_216 {dimension_numbers = #tpu.dot_dimension_numbers<[2], [2], [1], [1], [0, 0, 0, 1, 1, 1], [0], [0]>} : vector<4x6x128xbf16>, vector<4x8x128xbf16>, vector<4x6x8xf32> -> vector<4x6x8xf32>
    "tpu.trace_stop"() : () -> ()
    %506 = arith.truncf %499 : vector<4x6x8xf32> to vector<4x6x8xbf16>
    %507 = arith.truncf %502 : vector<4x6x8xf32> to vector<4x6x8xbf16>
    "tpu.trace_start"() <{level = 10 : i32, message = "hqe,hke->hqk"}> : () -> ()
    %cst_217 = arith.constant dense<0.000000e+00> : vector<4x6x6xf32>
    %508 = tpu.matmul %506, %507, %cst_217 {dimension_numbers = #tpu.dot_dimension_numbers<[2], [2], [1], [1], [0, 0, 0, 1, 1, 1], [0], [0]>} : vector<4x6x8xbf16>, vector<4x6x8xbf16>, vector<4x6x6xf32> -> vector<4x6x6xf32>
    "tpu.trace_stop"() : () -> ()
    %509 = vector.shape_cast %288 : vector<6x6xf32> to vector<1x6x6xf32>
    %510 = vector.broadcast %509 : vector<1x6x6xf32> to vector<4x6x6xf32>
    %511 = arith.addf %508, %510 : vector<4x6x6xf32>
    %cst_218 = arith.constant dense<0xFF800000> : vector<4x6xf32>
    %512 = vector.multi_reduction <maximumf>, %511, %cst_218 [2] : vector<4x6x6xf32> to vector<4x6xf32>
    %513 = vector.shape_cast %512 : vector<4x6xf32> to vector<4x6x1xf32>
    %514 = vector.broadcast %513 : vector<4x6x1xf32> to vector<4x6x6xf32>
    %515 = arith.subf %511, %514 : vector<4x6x6xf32>
    %516 = math.exp %515 : vector<4x6x6xf32>
    %cst_219 = arith.constant dense<0.000000e+00> : vector<4x6xf32>
    %517 = vector.multi_reduction <add>, %516, %cst_219 [2] : vector<4x6x6xf32> to vector<4x6xf32>
    %518 = vector.shape_cast %517 : vector<4x6xf32> to vector<4x6x1xf32>
    %519 = vector.broadcast %518 : vector<4x6x1xf32> to vector<4x6x6xf32>
    %520 = arith.divf %516, %519 : vector<4x6x6xf32>
    %521 = arith.truncf %520 : vector<4x6x6xf32> to vector<4x6x6xbf16>
    %522 = arith.truncf %505 : vector<4x6x8xf32> to vector<4x6x8xbf16>
    "tpu.trace_start"() <{level = 10 : i32, message = "hqk,hke->hqe"}> : () -> ()
    %cst_220 = arith.constant dense<0.000000e+00> : vector<4x6x8xf32>
    %523 = tpu.matmul %521, %522, %cst_220 {dimension_numbers = #tpu.dot_dimension_numbers<[2], [1], [1], [2], [0, 0, 0, 1, 1, 2], [0], [0]>} : vector<4x6x6xbf16>, vector<4x6x8xbf16>, vector<4x6x8xf32> -> vector<4x6x8xf32>
    "tpu.trace_stop"() : () -> ()
    %524 = arith.truncf %523 : vector<4x6x8xf32> to vector<4x6x8xbf16>
    "tpu.trace_start"() <{level = 10 : i32, message = "hqe,heo->hqo"}> : () -> ()
    %cst_221 = arith.constant dense<0.000000e+00> : vector<4x6x128xf32>
    %525 = tpu.matmul %524, %486, %cst_221 {dimension_numbers = #tpu.dot_dimension_numbers<[2], [1], [1], [2], [0, 0, 0, 1, 1, 2], [0], [0]>} : vector<4x6x8xbf16>, vector<4x8x128xbf16>, vector<4x6x128xf32> -> vector<4x6x128xf32>
    "tpu.trace_stop"() : () -> ()
    %cst_222 = arith.constant dense<0.000000e+00> : vector<6x128xf32>
    %526 = vector.multi_reduction <add>, %525, %cst_222 [0] : vector<4x6x128xf32> to vector<6x128xf32>
    %527 = arith.addf %480, %526 : vector<6x128xf32>
    %528 = vector.extract_strided_slice %482 {offsets = [0, 0, 0], sizes = [1, 1, 128], strides = [1, 1, 1]} : vector<6x1x128xf32> to vector<1x1x128xf32>
    %529 = vector.shape_cast %528 : vector<1x1x128xf32> to vector<1x128xf32>
    %530 = vector.extract_strided_slice %482 {offsets = [1, 0, 0], sizes = [1, 1, 128], strides = [1, 1, 1]} : vector<6x1x128xf32> to vector<1x1x128xf32>
    %531 = vector.shape_cast %530 : vector<1x1x128xf32> to vector<1x128xf32>
    %cst_223 = arith.constant dense<0.000000e+00> : vector<6xf32>
    %532 = vector.multi_reduction <add>, %527, %cst_223 [1] : vector<6x128xf32> to vector<6xf32>
    %533 = vector.shape_cast %532 : vector<6xf32> to vector<6x1xf32>
    %cst_224 = arith.constant 3.125000e-02 : f32
    %534 = vector.broadcast %cst_224 : f32 to vector<6x1xf32>
    %535 = arith.mulf %533, %534 : vector<6x1xf32>
    %536 = vector.broadcast %535 : vector<6x1xf32> to vector<6x128xf32>
    %537 = arith.subf %527, %536 : vector<6x128xf32>
    %cst_225 = arith.constant 0.000000e+00 : f32
    %538 = vector.shape_cast %2 : vector<1x128xi1> to vector<1x128xi1>
    %539 = vector.broadcast %538 : vector<1x128xi1> to vector<6x128xi1>
    %540 = vector.broadcast %cst_225 : f32 to vector<6x128xf32>
    %541 = arith.select %539, %537, %540 : vector<6x128xi1>, vector<6x128xf32>
    %542 = arith.mulf %541, %541 : vector<6x128xf32>
    %cst_226 = arith.constant dense<0.000000e+00> : vector<6xf32>
    %543 = vector.multi_reduction <add>, %542, %cst_226 [1] : vector<6x128xf32> to vector<6xf32>
    %544 = vector.shape_cast %543 : vector<6xf32> to vector<6x1xf32>
    %cst_227 = arith.constant 3.125000e-02 : f32
    %545 = vector.broadcast %cst_227 : f32 to vector<6x1xf32>
    %546 = arith.mulf %544, %545 : vector<6x1xf32>
    %cst_228 = arith.constant 9.99999974E-6 : f32
    %547 = vector.broadcast %cst_228 : f32 to vector<6x1xf32>
    %548 = arith.addf %546, %547 : vector<6x1xf32>
    %549 = math.rsqrt %548 : vector<6x1xf32>
    %550 = vector.broadcast %549 : vector<6x1xf32> to vector<6x128xf32>
    %551 = arith.mulf %541, %550 : vector<6x128xf32>
    %552 = vector.broadcast %529 : vector<1x128xf32> to vector<6x128xf32>
    %553 = arith.mulf %551, %552 : vector<6x128xf32>
    %554 = vector.broadcast %531 : vector<1x128xf32> to vector<6x128xf32>
    %555 = arith.addf %553, %554 : vector<6x128xf32>
    %c1_229 = arith.constant 1 : index
    %c0_230 = arith.constant 0 : index
    %c0_231 = arith.constant 0 : index
    %c0_232 = arith.constant 0 : index
    %c0_233 = arith.constant 0 : index
    %556 = vector.load %arg17[%c1_229, %c0_230, %c0_231, %c0_232, %c0_233] : memref<2x3x4x8x128xbf16, #tpu.memory_space<vmem>>, vector<1x3x4x8x128xbf16>
    %557 = vector.shape_cast %556 : vector<1x3x4x8x128xbf16> to vector<3x4x8x128xbf16>
    %c1_234 = arith.constant 1 : index
    %c0_235 = arith.constant 0 : index
    %c0_236 = arith.constant 0 : index
    %c0_237 = arith.constant 0 : index
    %558 = vector.load %arg18[%c1_234, %c0_235, %c0_236, %c0_237] : memref<2x4x8x128xbf16, #tpu.memory_space<vmem>>, vector<1x4x8x128xbf16>
    %559 = vector.shape_cast %558 : vector<1x4x8x128xbf16> to vector<4x8x128xbf16>
    %560 = arith.truncf %555 : vector<6x128xf32> to vector<6x128xbf16>
    %561 = vector.shape_cast %560 : vector<6x128xbf16> to vector<1x6x128xbf16>
    %562 = vector.shape_cast %561 : vector<1x6x128xbf16> to vector<1x6x128xbf16>
    %563 = vector.broadcast %562 : vector<1x6x128xbf16> to vector<4x6x128xbf16>
    %564 = arith.truncf %281 : vector<8x128xf32> to vector<8x128xbf16>
    %565 = vector.shape_cast %564 : vector<8x128xbf16> to vector<1x8x128xbf16>
    %566 = vector.shape_cast %565 : vector<1x8x128xbf16> to vector<1x8x128xbf16>
    %567 = vector.broadcast %566 : vector<1x8x128xbf16> to vector<4x8x128xbf16>
    %568 = vector.extract_strided_slice %557 {offsets = [0, 0, 0, 0], sizes = [1, 4, 8, 128], strides = [1, 1, 1, 1]} : vector<3x4x8x128xbf16> to vector<1x4x8x128xbf16>
    %569 = vector.shape_cast %568 : vector<1x4x8x128xbf16> to vector<4x8x128xbf16>
    "tpu.trace_start"() <{level = 10 : i32, message = "hsd,hed->hse"}> : () -> ()
    %cst_238 = arith.constant dense<0.000000e+00> : vector<4x6x8xf32>
    %570 = tpu.matmul %563, %569, %cst_238 {dimension_numbers = #tpu.dot_dimension_numbers<[2], [2], [1], [1], [0, 0, 0, 1, 1, 1], [0], [0]>} : vector<4x6x128xbf16>, vector<4x8x128xbf16>, vector<4x6x8xf32> -> vector<4x6x8xf32>
    "tpu.trace_stop"() : () -> ()
    %cst_239 = arith.constant 0.353553385 : f32
    %571 = vector.broadcast %cst_239 : f32 to vector<4x6x8xf32>
    %572 = arith.mulf %570, %571 : vector<4x6x8xf32>
    %573 = vector.extract_strided_slice %557 {offsets = [1, 0, 0, 0], sizes = [1, 4, 8, 128], strides = [1, 1, 1, 1]} : vector<3x4x8x128xbf16> to vector<1x4x8x128xbf16>
    %574 = vector.shape_cast %573 : vector<1x4x8x128xbf16> to vector<4x8x128xbf16>
    "tpu.trace_start"() <{level = 10 : i32, message = "hsd,hed->hse"}> : () -> ()
    %cst_240 = arith.constant dense<0.000000e+00> : vector<4x8x8xf32>
    %575 = tpu.matmul %567, %574, %cst_240 {dimension_numbers = #tpu.dot_dimension_numbers<[2], [2], [1], [1], [0, 0, 0, 1, 1, 1], [0], [0]>} : vector<4x8x128xbf16>, vector<4x8x128xbf16>, vector<4x8x8xf32> -> vector<4x8x8xf32>
    "tpu.trace_stop"() : () -> ()
    %576 = vector.extract_strided_slice %557 {offsets = [2, 0, 0, 0], sizes = [1, 4, 8, 128], strides = [1, 1, 1, 1]} : vector<3x4x8x128xbf16> to vector<1x4x8x128xbf16>
    %577 = vector.shape_cast %576 : vector<1x4x8x128xbf16> to vector<4x8x128xbf16>
    "tpu.trace_start"() <{level = 10 : i32, message = "hsd,hed->hse"}> : () -> ()
    %cst_241 = arith.constant dense<0.000000e+00> : vector<4x8x8xf32>
    %578 = tpu.matmul %567, %577, %cst_241 {dimension_numbers = #tpu.dot_dimension_numbers<[2], [2], [1], [1], [0, 0, 0, 1, 1, 1], [0], [0]>} : vector<4x8x128xbf16>, vector<4x8x128xbf16>, vector<4x8x8xf32> -> vector<4x8x8xf32>
    "tpu.trace_stop"() : () -> ()
    %579 = arith.truncf %572 : vector<4x6x8xf32> to vector<4x6x8xbf16>
    %580 = arith.truncf %575 : vector<4x8x8xf32> to vector<4x8x8xbf16>
    "tpu.trace_start"() <{level = 10 : i32, message = "hqe,hke->hqk"}> : () -> ()
    %cst_242 = arith.constant dense<0.000000e+00> : vector<4x6x8xf32>
    %581 = tpu.matmul %579, %580, %cst_242 {dimension_numbers = #tpu.dot_dimension_numbers<[2], [2], [1], [1], [0, 0, 0, 1, 1, 1], [0], [0]>} : vector<4x6x8xbf16>, vector<4x8x8xbf16>, vector<4x6x8xf32> -> vector<4x6x8xf32>
    "tpu.trace_stop"() : () -> ()
    %cst_243 = arith.constant dense<0xFF800000> : vector<4x6xf32>
    %582 = vector.multi_reduction <maximumf>, %581, %cst_243 [2] : vector<4x6x8xf32> to vector<4x6xf32>
    %583 = vector.shape_cast %582 : vector<4x6xf32> to vector<4x6x1xf32>
    %584 = vector.broadcast %583 : vector<4x6x1xf32> to vector<4x6x8xf32>
    %585 = arith.subf %581, %584 : vector<4x6x8xf32>
    %586 = math.exp %585 : vector<4x6x8xf32>
    %cst_244 = arith.constant dense<0.000000e+00> : vector<4x6xf32>
    %587 = vector.multi_reduction <add>, %586, %cst_244 [2] : vector<4x6x8xf32> to vector<4x6xf32>
    %588 = vector.shape_cast %587 : vector<4x6xf32> to vector<4x6x1xf32>
    %589 = vector.broadcast %588 : vector<4x6x1xf32> to vector<4x6x8xf32>
    %590 = arith.divf %586, %589 : vector<4x6x8xf32>
    %591 = arith.truncf %590 : vector<4x6x8xf32> to vector<4x6x8xbf16>
    %592 = arith.truncf %578 : vector<4x8x8xf32> to vector<4x8x8xbf16>
    "tpu.trace_start"() <{level = 10 : i32, message = "hqk,hke->hqe"}> : () -> ()
    %cst_245 = arith.constant dense<0.000000e+00> : vector<4x6x8xf32>
    %593 = tpu.matmul %591, %592, %cst_245 {dimension_numbers = #tpu.dot_dimension_numbers<[2], [1], [1], [2], [0, 0, 0, 1, 1, 2], [0], [0]>} : vector<4x6x8xbf16>, vector<4x8x8xbf16>, vector<4x6x8xf32> -> vector<4x6x8xf32>
    "tpu.trace_stop"() : () -> ()
    %594 = arith.truncf %593 : vector<4x6x8xf32> to vector<4x6x8xbf16>
    "tpu.trace_start"() <{level = 10 : i32, message = "hqe,heo->hqo"}> : () -> ()
    %cst_246 = arith.constant dense<0.000000e+00> : vector<4x6x128xf32>
    %595 = tpu.matmul %594, %559, %cst_246 {dimension_numbers = #tpu.dot_dimension_numbers<[2], [1], [1], [2], [0, 0, 0, 1, 1, 2], [0], [0]>} : vector<4x6x8xbf16>, vector<4x8x128xbf16>, vector<4x6x128xf32> -> vector<4x6x128xf32>
    "tpu.trace_stop"() : () -> ()
    %cst_247 = arith.constant dense<0.000000e+00> : vector<6x128xf32>
    %596 = vector.multi_reduction <add>, %595, %cst_247 [0] : vector<4x6x128xf32> to vector<6x128xf32>
    %597 = arith.addf %555, %596 : vector<6x128xf32>
    %598 = vector.extract_strided_slice %482 {offsets = [2, 0, 0], sizes = [1, 1, 128], strides = [1, 1, 1]} : vector<6x1x128xf32> to vector<1x1x128xf32>
    %599 = vector.shape_cast %598 : vector<1x1x128xf32> to vector<1x128xf32>
    %600 = vector.extract_strided_slice %482 {offsets = [3, 0, 0], sizes = [1, 1, 128], strides = [1, 1, 1]} : vector<6x1x128xf32> to vector<1x1x128xf32>
    %601 = vector.shape_cast %600 : vector<1x1x128xf32> to vector<1x128xf32>
    %cst_248 = arith.constant dense<0.000000e+00> : vector<6xf32>
    %602 = vector.multi_reduction <add>, %597, %cst_248 [1] : vector<6x128xf32> to vector<6xf32>
    %603 = vector.shape_cast %602 : vector<6xf32> to vector<6x1xf32>
    %cst_249 = arith.constant 3.125000e-02 : f32
    %604 = vector.broadcast %cst_249 : f32 to vector<6x1xf32>
    %605 = arith.mulf %603, %604 : vector<6x1xf32>
    %606 = vector.broadcast %605 : vector<6x1xf32> to vector<6x128xf32>
    %607 = arith.subf %597, %606 : vector<6x128xf32>
    %cst_250 = arith.constant 0.000000e+00 : f32
    %608 = vector.shape_cast %2 : vector<1x128xi1> to vector<1x128xi1>
    %609 = vector.broadcast %608 : vector<1x128xi1> to vector<6x128xi1>
    %610 = vector.broadcast %cst_250 : f32 to vector<6x128xf32>
    %611 = arith.select %609, %607, %610 : vector<6x128xi1>, vector<6x128xf32>
    %612 = arith.mulf %611, %611 : vector<6x128xf32>
    %cst_251 = arith.constant dense<0.000000e+00> : vector<6xf32>
    %613 = vector.multi_reduction <add>, %612, %cst_251 [1] : vector<6x128xf32> to vector<6xf32>
    %614 = vector.shape_cast %613 : vector<6xf32> to vector<6x1xf32>
    %cst_252 = arith.constant 3.125000e-02 : f32
    %615 = vector.broadcast %cst_252 : f32 to vector<6x1xf32>
    %616 = arith.mulf %614, %615 : vector<6x1xf32>
    %cst_253 = arith.constant 9.99999974E-6 : f32
    %617 = vector.broadcast %cst_253 : f32 to vector<6x1xf32>
    %618 = arith.addf %616, %617 : vector<6x1xf32>
    %619 = math.rsqrt %618 : vector<6x1xf32>
    %620 = vector.broadcast %619 : vector<6x1xf32> to vector<6x128xf32>
    %621 = arith.mulf %611, %620 : vector<6x128xf32>
    %622 = vector.broadcast %599 : vector<1x128xf32> to vector<6x128xf32>
    %623 = arith.mulf %621, %622 : vector<6x128xf32>
    %624 = vector.broadcast %601 : vector<1x128xf32> to vector<6x128xf32>
    %625 = arith.addf %623, %624 : vector<6x128xf32>
    %c1_254 = arith.constant 1 : index
    %c0_255 = arith.constant 0 : index
    %c0_256 = arith.constant 0 : index
    %626 = vector.load %arg19[%c1_254, %c0_255, %c0_256] : memref<2x128x128xbf16, #tpu.memory_space<vmem>>, vector<1x128x128xbf16>
    %627 = vector.shape_cast %626 : vector<1x128x128xbf16> to vector<128x128xbf16>
    %c1_257 = arith.constant 1 : index
    %c0_258 = arith.constant 0 : index
    %c0_259 = arith.constant 0 : index
    %628 = vector.load %arg20[%c1_257, %c0_258, %c0_259] : memref<2x1x128xf32, #tpu.memory_space<vmem>>, vector<1x1x128xf32>
    %629 = vector.shape_cast %628 : vector<1x1x128xf32> to vector<1x128xf32>
    %c1_260 = arith.constant 1 : index
    %c0_261 = arith.constant 0 : index
    %c0_262 = arith.constant 0 : index
    %630 = vector.load %arg21[%c1_260, %c0_261, %c0_262] : memref<2x128x128xbf16, #tpu.memory_space<vmem>>, vector<1x128x128xbf16>
    %631 = vector.shape_cast %630 : vector<1x128x128xbf16> to vector<128x128xbf16>
    %c1_263 = arith.constant 1 : index
    %c0_264 = arith.constant 0 : index
    %c0_265 = arith.constant 0 : index
    %632 = vector.load %arg22[%c1_263, %c0_264, %c0_265] : memref<2x1x128xf32, #tpu.memory_space<vmem>>, vector<1x1x128xf32>
    %633 = vector.shape_cast %632 : vector<1x1x128xf32> to vector<1x128xf32>
    %634 = arith.truncf %625 : vector<6x128xf32> to vector<6x128xbf16>
    %cst_266 = arith.constant dense<0.000000e+00> : vector<6x128xf32>
    %635 = tpu.matmul %634, %627, %cst_266 {dimension_numbers = #tpu.dot_dimension_numbers<[1], [0], [0], [1], [0, 0, 1, 1], [], []>} : vector<6x128xbf16>, vector<128x128xbf16>, vector<6x128xf32> -> vector<6x128xf32>
    %636 = vector.broadcast %629 : vector<1x128xf32> to vector<6x128xf32>
    %637 = arith.addf %635, %636 : vector<6x128xf32>
    %cst_267 = arith.constant 0.000000e+00 : f32
    %638 = vector.broadcast %cst_267 : f32 to vector<6x128xf32>
    %639 = arith.maximumf %637, %638 : vector<6x128xf32>
    %640 = arith.truncf %639 : vector<6x128xf32> to vector<6x128xbf16>
    %cst_268 = arith.constant dense<0.000000e+00> : vector<6x128xf32>
    %641 = tpu.matmul %640, %631, %cst_268 {dimension_numbers = #tpu.dot_dimension_numbers<[1], [0], [0], [1], [0, 0, 1, 1], [], []>} : vector<6x128xbf16>, vector<128x128xbf16>, vector<6x128xf32> -> vector<6x128xf32>
    %642 = vector.broadcast %633 : vector<1x128xf32> to vector<6x128xf32>
    %643 = arith.addf %641, %642 : vector<6x128xf32>
    %644 = arith.addf %625, %643 : vector<6x128xf32>
    %645 = vector.extract_strided_slice %482 {offsets = [4, 0, 0], sizes = [1, 1, 128], strides = [1, 1, 1]} : vector<6x1x128xf32> to vector<1x1x128xf32>
    %646 = vector.shape_cast %645 : vector<1x1x128xf32> to vector<1x128xf32>
    %647 = vector.extract_strided_slice %482 {offsets = [5, 0, 0], sizes = [1, 1, 128], strides = [1, 1, 1]} : vector<6x1x128xf32> to vector<1x1x128xf32>
    %648 = vector.shape_cast %647 : vector<1x1x128xf32> to vector<1x128xf32>
    %cst_269 = arith.constant dense<0.000000e+00> : vector<6xf32>
    %649 = vector.multi_reduction <add>, %644, %cst_269 [1] : vector<6x128xf32> to vector<6xf32>
    %650 = vector.shape_cast %649 : vector<6xf32> to vector<6x1xf32>
    %cst_270 = arith.constant 3.125000e-02 : f32
    %651 = vector.broadcast %cst_270 : f32 to vector<6x1xf32>
    %652 = arith.mulf %650, %651 : vector<6x1xf32>
    %653 = vector.broadcast %652 : vector<6x1xf32> to vector<6x128xf32>
    %654 = arith.subf %644, %653 : vector<6x128xf32>
    %cst_271 = arith.constant 0.000000e+00 : f32
    %655 = vector.shape_cast %2 : vector<1x128xi1> to vector<1x128xi1>
    %656 = vector.broadcast %655 : vector<1x128xi1> to vector<6x128xi1>
    %657 = vector.broadcast %cst_271 : f32 to vector<6x128xf32>
    %658 = arith.select %656, %654, %657 : vector<6x128xi1>, vector<6x128xf32>
    %659 = arith.mulf %658, %658 : vector<6x128xf32>
    %cst_272 = arith.constant dense<0.000000e+00> : vector<6xf32>
    %660 = vector.multi_reduction <add>, %659, %cst_272 [1] : vector<6x128xf32> to vector<6xf32>
    %661 = vector.shape_cast %660 : vector<6xf32> to vector<6x1xf32>
    %cst_273 = arith.constant 3.125000e-02 : f32
    %662 = vector.broadcast %cst_273 : f32 to vector<6x1xf32>
    %663 = arith.mulf %661, %662 : vector<6x1xf32>
    %cst_274 = arith.constant 9.99999974E-6 : f32
    %664 = vector.broadcast %cst_274 : f32 to vector<6x1xf32>
    %665 = arith.addf %663, %664 : vector<6x1xf32>
    %666 = math.rsqrt %665 : vector<6x1xf32>
    %667 = vector.broadcast %666 : vector<6x1xf32> to vector<6x128xf32>
    %668 = arith.mulf %658, %667 : vector<6x128xf32>
    %669 = vector.broadcast %646 : vector<1x128xf32> to vector<6x128xf32>
    %670 = arith.mulf %668, %669 : vector<6x128xf32>
    %671 = vector.broadcast %648 : vector<1x128xf32> to vector<6x128xf32>
    %672 = arith.addf %670, %671 : vector<6x128xf32>
    %c0_275 = arith.constant 0 : index
    %c0_276 = arith.constant 0 : index
    %c0_277 = arith.constant 0 : index
    %673 = vector.load %arg24[%c0_275, %c0_276, %c0_277] : memref<2x1x128xf32, #tpu.memory_space<vmem>>, vector<1x1x128xf32>
    %674 = vector.shape_cast %673 : vector<1x1x128xf32> to vector<1x128xf32>
    %c1_278 = arith.constant 1 : index
    %c0_279 = arith.constant 0 : index
    %c0_280 = arith.constant 0 : index
    %675 = vector.load %arg24[%c1_278, %c0_279, %c0_280] : memref<2x1x128xf32, #tpu.memory_space<vmem>>, vector<1x1x128xf32>
    %676 = vector.shape_cast %675 : vector<1x1x128xf32> to vector<1x128xf32>
    %cst_281 = arith.constant dense<0.000000e+00> : vector<6xf32>
    %677 = vector.multi_reduction <add>, %672, %cst_281 [1] : vector<6x128xf32> to vector<6xf32>
    %678 = vector.shape_cast %677 : vector<6xf32> to vector<6x1xf32>
    %cst_282 = arith.constant 3.125000e-02 : f32
    %679 = vector.broadcast %cst_282 : f32 to vector<6x1xf32>
    %680 = arith.mulf %678, %679 : vector<6x1xf32>
    %681 = vector.broadcast %680 : vector<6x1xf32> to vector<6x128xf32>
    %682 = arith.subf %672, %681 : vector<6x128xf32>
    %cst_283 = arith.constant 0.000000e+00 : f32
    %683 = vector.shape_cast %2 : vector<1x128xi1> to vector<1x128xi1>
    %684 = vector.broadcast %683 : vector<1x128xi1> to vector<6x128xi1>
    %685 = vector.broadcast %cst_283 : f32 to vector<6x128xf32>
    %686 = arith.select %684, %682, %685 : vector<6x128xi1>, vector<6x128xf32>
    %687 = arith.mulf %686, %686 : vector<6x128xf32>
    %cst_284 = arith.constant dense<0.000000e+00> : vector<6xf32>
    %688 = vector.multi_reduction <add>, %687, %cst_284 [1] : vector<6x128xf32> to vector<6xf32>
    %689 = vector.shape_cast %688 : vector<6xf32> to vector<6x1xf32>
    %cst_285 = arith.constant 3.125000e-02 : f32
    %690 = vector.broadcast %cst_285 : f32 to vector<6x1xf32>
    %691 = arith.mulf %689, %690 : vector<6x1xf32>
    %cst_286 = arith.constant 9.99999974E-6 : f32
    %692 = vector.broadcast %cst_286 : f32 to vector<6x1xf32>
    %693 = arith.addf %691, %692 : vector<6x1xf32>
    %694 = math.rsqrt %693 : vector<6x1xf32>
    %695 = vector.broadcast %694 : vector<6x1xf32> to vector<6x128xf32>
    %696 = arith.mulf %686, %695 : vector<6x128xf32>
    %697 = vector.broadcast %674 : vector<1x128xf32> to vector<6x128xf32>
    %698 = arith.mulf %696, %697 : vector<6x128xf32>
    %699 = vector.broadcast %676 : vector<1x128xf32> to vector<6x128xf32>
    %700 = arith.addf %698, %699 : vector<6x128xf32>
    %701 = arith.truncf %700 : vector<6x128xf32> to vector<6x128xbf16>
    %c0_287 = arith.constant 0 : index
    %c0_288 = arith.constant 0 : index
    %702 = vector.load %arg25[%c0_287, %c0_288] : memref<128x128xbf16, #tpu.memory_space<vmem>>, vector<128x128xbf16>
    %cst_289 = arith.constant dense<0.000000e+00> : vector<6x128xf32>
    %703 = tpu.matmul %701, %702, %cst_289 {dimension_numbers = #tpu.dot_dimension_numbers<[1], [0], [0], [1], [0, 0, 1, 1], [], []>} : vector<6x128xbf16>, vector<128x128xbf16>, vector<6x128xf32> -> vector<6x128xf32>
    %c0_290 = arith.constant 0 : index
    %c0_291 = arith.constant 0 : index
    %704 = vector.load %arg26[%c0_290, %c0_291] : memref<1x128xf32, #tpu.memory_space<vmem>>, vector<1x128xf32>
    %705 = vector.broadcast %704 : vector<1x128xf32> to vector<6x128xf32>
    %706 = arith.addf %703, %705 : vector<6x128xf32>
    %c0_292 = arith.constant 0 : index
    %c0_293 = arith.constant 0 : index
    %c0_294 = arith.constant 0 : index
    %707 = vector.load %arg27[%c0_292, %c0_293, %c0_294] : memref<1x6x128xf32, #tpu.memory_space<vmem>>, vector<1x6x128xf32>
    %708 = vector.shape_cast %707 : vector<1x6x128xf32> to vector<6x128xf32>
    %709 = vector.shape_cast %706 : vector<6x128xf32> to vector<1x6x128xf32>
    tpu.vector_store %arg27[%c0_292, %c0_293, %c0_294], %709 {strides = array<i32>} : memref<1x6x128xf32, #tpu.memory_space<vmem>>, vector<1x6x128xf32>,
    return
  }
  func.func @transform_0(%arg0: i32) -> (i32, i32, i32) {
    %c0_i32 = arith.constant 0 : i32
    %c0_i32_0 = arith.constant 0 : i32
    %c0_i32_1 = arith.constant 0 : i32
    return %arg0, %c0_i32, %c0_i32_0 : i32, i32, i32
  }
  func.func @transform_1(%arg0: i32) -> (i32, i32, i32) {
    %c0_i32 = arith.constant 0 : i32
    %c0_i32_0 = arith.constant 0 : i32
    %c0_i32_1 = arith.constant 0 : i32
    return %arg0, %c0_i32, %c0_i32_0 : i32, i32, i32
  }
  func.func @transform_2(%arg0: i32) -> (i32, i32, i32) {
    %c0_i32 = arith.constant 0 : i32
    %c0_i32_0 = arith.constant 0 : i32
    %c0_i32_1 = arith.constant 0 : i32
    return %arg0, %c0_i32, %c0_i32_0 : i32, i32, i32
  }
  func.func @transform_3(%arg0: i32) -> (i32, i32, i32) {
    %c0_i32 = arith.constant 0 : i32
    %c0_i32_0 = arith.constant 0 : i32
    %c0_i32_1 = arith.constant 0 : i32
    return %arg0, %c0_i32, %c0_i32_0 : i32, i32, i32
  }
  func.func @transform_4(%arg0: i32) -> (i32, i32) {
    %c0_i32 = arith.constant 0 : i32
    %c0_i32_0 = arith.constant 0 : i32
    %c0_i32_1 = arith.constant 0 : i32
    return %c0_i32, %c0_i32_0 : i32, i32
  }
  func.func @transform_5(%arg0: i32) -> (i32, i32) {
    %c0_i32 = arith.constant 0 : i32
    %c0_i32_0 = arith.constant 0 : i32
    %c0_i32_1 = arith.constant 0 : i32
    return %c0_i32, %c0_i32_0 : i32, i32
  }
  func.func @transform_6(%arg0: i32) -> (i32, i32, i32, i32, i32) {
    %c0_i32 = arith.constant 0 : i32
    %c0_i32_0 = arith.constant 0 : i32
    %c0_i32_1 = arith.constant 0 : i32
    %c0_i32_2 = arith.constant 0 : i32
    %c0_i32_3 = arith.constant 0 : i32
    %c0_i32_4 = arith.constant 0 : i32
    return %c0_i32, %c0_i32_0, %c0_i32_1, %c0_i32_2, %c0_i32_3 : i32, i32, i32, i32, i32
  }
  func.func @transform_7(%arg0: i32) -> (i32, i32, i32, i32) {
    %c0_i32 = arith.constant 0 : i32
    %c0_i32_0 = arith.constant 0 : i32
    %c0_i32_1 = arith.constant 0 : i32
    %c0_i32_2 = arith.constant 0 : i32
    %c0_i32_3 = arith.constant 0 : i32
    return %c0_i32, %c0_i32_0, %c0_i32_1, %c0_i32_2 : i32, i32, i32, i32
  }
  func.func @transform_8(%arg0: i32) -> (i32, i32, i32) {
    %c0_i32 = arith.constant 0 : i32
    %c0_i32_0 = arith.constant 0 : i32
    %c0_i32_1 = arith.constant 0 : i32
    %c0_i32_2 = arith.constant 0 : i32
    return %c0_i32, %c0_i32_0, %c0_i32_1 : i32, i32, i32
  }
  func.func @transform_9(%arg0: i32) -> (i32, i32, i32) {
    %c0_i32 = arith.constant 0 : i32
    %c0_i32_0 = arith.constant 0 : i32
    %c0_i32_1 = arith.constant 0 : i32
    %c0_i32_2 = arith.constant 0 : i32
    return %c0_i32, %c0_i32_0, %c0_i32_1 : i32, i32, i32
  }
  func.func @transform_10(%arg0: i32) -> (i32, i32, i32) {
    %c0_i32 = arith.constant 0 : i32
    %c0_i32_0 = arith.constant 0 : i32
    %c0_i32_1 = arith.constant 0 : i32
    %c0_i32_2 = arith.constant 0 : i32
    return %c0_i32, %c0_i32_0, %c0_i32_1 : i32, i32, i32
  }
  func.func @transform_11(%arg0: i32) -> (i32, i32, i32) {
    %c0_i32 = arith.constant 0 : i32
    %c0_i32_0 = arith.constant 0 : i32
    %c0_i32_1 = arith.constant 0 : i32
    %c0_i32_2 = arith.constant 0 : i32
    return %c0_i32, %c0_i32_0, %c0_i32_1 : i32, i32, i32
  }
  func.func @transform_12(%arg0: i32) -> (i32, i32, i32, i32) {
    %c0_i32 = arith.constant 0 : i32
    %c0_i32_0 = arith.constant 0 : i32
    %c0_i32_1 = arith.constant 0 : i32
    %c0_i32_2 = arith.constant 0 : i32
    %c0_i32_3 = arith.constant 0 : i32
    return %c0_i32, %c0_i32_0, %c0_i32_1, %c0_i32_2 : i32, i32, i32, i32
  }
  func.func @transform_13(%arg0: i32) -> (i32, i32, i32) {
    %c0_i32 = arith.constant 0 : i32
    %c0_i32_0 = arith.constant 0 : i32
    %c0_i32_1 = arith.constant 0 : i32
    %c0_i32_2 = arith.constant 0 : i32
    return %c0_i32, %c0_i32_0, %c0_i32_1 : i32, i32, i32
  }
  func.func @transform_14(%arg0: i32) -> (i32, i32, i32, i32, i32) {
    %c0_i32 = arith.constant 0 : i32
    %c0_i32_0 = arith.constant 0 : i32
    %c0_i32_1 = arith.constant 0 : i32
    %c0_i32_2 = arith.constant 0 : i32
    %c0_i32_3 = arith.constant 0 : i32
    %c0_i32_4 = arith.constant 0 : i32
    return %c0_i32, %c0_i32_0, %c0_i32_1, %c0_i32_2, %c0_i32_3 : i32, i32, i32, i32, i32
  }
  func.func @transform_15(%arg0: i32) -> (i32, i32, i32, i32) {
    %c0_i32 = arith.constant 0 : i32
    %c0_i32_0 = arith.constant 0 : i32
    %c0_i32_1 = arith.constant 0 : i32
    %c0_i32_2 = arith.constant 0 : i32
    %c0_i32_3 = arith.constant 0 : i32
    return %c0_i32, %c0_i32_0, %c0_i32_1, %c0_i32_2 : i32, i32, i32, i32
  }
  func.func @transform_16(%arg0: i32) -> (i32, i32, i32, i32, i32) {
    %c0_i32 = arith.constant 0 : i32
    %c0_i32_0 = arith.constant 0 : i32
    %c0_i32_1 = arith.constant 0 : i32
    %c0_i32_2 = arith.constant 0 : i32
    %c0_i32_3 = arith.constant 0 : i32
    %c0_i32_4 = arith.constant 0 : i32
    return %c0_i32, %c0_i32_0, %c0_i32_1, %c0_i32_2, %c0_i32_3 : i32, i32, i32, i32, i32
  }
  func.func @transform_17(%arg0: i32) -> (i32, i32, i32, i32) {
    %c0_i32 = arith.constant 0 : i32
    %c0_i32_0 = arith.constant 0 : i32
    %c0_i32_1 = arith.constant 0 : i32
    %c0_i32_2 = arith.constant 0 : i32
    %c0_i32_3 = arith.constant 0 : i32
    return %c0_i32, %c0_i32_0, %c0_i32_1, %c0_i32_2 : i32, i32, i32, i32
  }
  func.func @transform_18(%arg0: i32) -> (i32, i32, i32) {
    %c0_i32 = arith.constant 0 : i32
    %c0_i32_0 = arith.constant 0 : i32
    %c0_i32_1 = arith.constant 0 : i32
    %c0_i32_2 = arith.constant 0 : i32
    return %c0_i32, %c0_i32_0, %c0_i32_1 : i32, i32, i32
  }
  func.func @transform_19(%arg0: i32) -> (i32, i32, i32) {
    %c0_i32 = arith.constant 0 : i32
    %c0_i32_0 = arith.constant 0 : i32
    %c0_i32_1 = arith.constant 0 : i32
    %c0_i32_2 = arith.constant 0 : i32
    return %c0_i32, %c0_i32_0, %c0_i32_1 : i32, i32, i32
  }
  func.func @transform_20(%arg0: i32) -> (i32, i32, i32) {
    %c0_i32 = arith.constant 0 : i32
    %c0_i32_0 = arith.constant 0 : i32
    %c0_i32_1 = arith.constant 0 : i32
    %c0_i32_2 = arith.constant 0 : i32
    return %c0_i32, %c0_i32_0, %c0_i32_1 : i32, i32, i32
  }
  func.func @transform_21(%arg0: i32) -> (i32, i32, i32) {
    %c0_i32 = arith.constant 0 : i32
    %c0_i32_0 = arith.constant 0 : i32
    %c0_i32_1 = arith.constant 0 : i32
    %c0_i32_2 = arith.constant 0 : i32
    return %c0_i32, %c0_i32_0, %c0_i32_1 : i32, i32, i32
  }
  func.func @transform_22(%arg0: i32) -> (i32, i32, i32, i32) {
    %c0_i32 = arith.constant 0 : i32
    %c0_i32_0 = arith.constant 0 : i32
    %c0_i32_1 = arith.constant 0 : i32
    %c0_i32_2 = arith.constant 0 : i32
    %c0_i32_3 = arith.constant 0 : i32
    return %c0_i32, %c0_i32_0, %c0_i32_1, %c0_i32_2 : i32, i32, i32, i32
  }
  func.func @transform_23(%arg0: i32) -> (i32, i32, i32) {
    %c0_i32 = arith.constant 0 : i32
    %c0_i32_0 = arith.constant 0 : i32
    %c0_i32_1 = arith.constant 0 : i32
    %c0_i32_2 = arith.constant 0 : i32
    return %c0_i32, %c0_i32_0, %c0_i32_1 : i32, i32, i32
  }
  func.func @transform_24(%arg0: i32) -> (i32, i32) {
    %c0_i32 = arith.constant 0 : i32
    %c0_i32_0 = arith.constant 0 : i32
    %c0_i32_1 = arith.constant 0 : i32
    return %c0_i32, %c0_i32_0 : i32, i32
  }
  func.func @transform_25(%arg0: i32) -> (i32, i32) {
    %c0_i32 = arith.constant 0 : i32
    %c0_i32_0 = arith.constant 0 : i32
    %c0_i32_1 = arith.constant 0 : i32
    return %c0_i32, %c0_i32_0 : i32, i32
  }
  func.func @transform_26(%arg0: i32) -> (i32, i32, i32) {
    %c0_i32 = arith.constant 0 : i32
    %c0_i32_0 = arith.constant 0 : i32
    %c0_i32_1 = arith.constant 0 : i32
    return %arg0, %c0_i32, %c0_i32_0 : i32, i32, i32
  }
}

</mosaic_0001>

<bundles_post_ra>
// kernel: tf_model_forward.1
= control target key start
LH: loop header
LB: loop body
LE: loop exit
PB: predicated region body
PF: predicated region fallthrough
CT: control target
= control target key end

     0   :  { %s13845_s0 = inlined_call_operand.vmem [shape: f32[2,8,128], index: 0, kind: input, shape index: {}]   ;;  %s13846_s1 = inlined_call_operand.vmem [shape: f32[2,6,128], index: 1, kind: input, shape index: {}]   ;;  %s13847_s2 = inlined_call_operand.vmem [shape: f32[2,1,8], index: 2, kind: input, shape index: {}]   ;;  %s13848_s3 = inlined_call_operand.vmem [shape: f32[2,1,6], index: 3, kind: input, shape index: {}]   ;;  %s13849_s4 = inlined_call_operand.hbm [shape: f32[8,8], index: 4, kind: input, shape index: {}]   ;;  %s13850_s5 = inlined_call_operand.hbm [shape: f32[6,6], index: 5, kind: input, shape index: {}]   ;;  %s13851_s6 = inlined_call_operand.hbm [shape: bf16[2,3,4,8,128], index: 6, kind: input, shape index: {}]   ;;  %s13852_s7 = inlined_call_operand.hbm [shape: bf16[2,4,8,128], index: 7, kind: input, shape index: {}]   ;;  %s13853_s8 = inlined_call_operand.vmem [shape: bf16[2,128,128], index: 8, kind: input, shape index: {}]   ;;  %s13854_s9 = inlined_call_operand.hbm [shape: f32[2,1,128], index: 9, kind: input, shape index: {}]   ;;  %s13855_s10 = inlined_call_operand.vmem [shape: bf16[2,128,128], index: 10, kind: input, shape index: {}]   ;;  %s13856_s11 = inlined_call_operand.hbm [shape: f32[2,1,128], index: 11, kind: input, shape index: {}]   ;;  %s13857_s12 = inlined_call_operand.vmem [shape: f32[2,4,1,128], index: 12, kind: input, shape index: {}]   ;;  %s13858_s13 = inlined_call_operand.hbm [shape: f32[2,1,128], index: 13, kind: input, shape index: {}]   ;;  %s13859_s14 = inlined_call_operand.vmem [shape: bf16[2,3,4,8,128], index: 14, kind: input, shape index: {}]   ;;  %s13860_s15 = inlined_call_operand.hbm [shape: bf16[2,4,8,128], index: 15, kind: input, shape index: {}]   ;;  %s13861_s16 = inlined_call_operand.hbm [shape: bf16[2,3,4,8,128], index: 16, kind: input, shape index: {}]   ;;  %s13862_s17 = inlined_call_operand.hbm [shape: bf16[2,4,8,128], index: 17, kind: input, shape index: {}]   ;;  %s13863_s18 = inlined_call_operand.vmem [shape: bf16[2,128,128], index: 18, kind: input, shape index: {}]   ;;  %s13864_s19 = inlined_call_operand.hbm [shape: f32[2,1,128], index: 19, kind: input, shape index: {}]   ;;  %s13865_s20 = inlined_call_operand.hbm [shape: bf16[2,128,128], index: 20, kind: input, shape index: {}]   ;;  %s13866_s21 = inlined_call_operand.hbm [shape: f32[2,1,128], index: 21, kind: input, shape index: {}]   ;;  %s13867_s22 = inlined_call_operand.hbm [shape: f32[2,6,1,128], index: 22, kind: input, shape index: {}]   ;;  %s13868_s23 = inlined_call_operand.hbm [shape: f32[2,1,128], index: 23, kind: input, shape index: {}]   ;;  %s13869_s24 = inlined_call_operand.hbm [shape: bf16[128,128], index: 24, kind: input, shape index: {}]   ;;  %s13870_s25 = inlined_call_operand.hbm [shape: f32[1,128], index: 25, kind: input, shape index: {}]   ;;  %s13871_s26 = inlined_call_operand.vmem [shape: f32[2,6,128], index: 26, kind: output, shape index: {}]  }
   0x1   :  { %13894 = sst [smem:[#allocation39_spill]] %s13845_s0 }
   0x2   :  { %13895 = sst [smem:[#allocation40_spill]] %s13846_s1 }
   0x3   :  { %13896 = sst [smem:[#allocation41_spill]] %s13847_s2 }
   0x4   :  { %13897 = sst [smem:[#allocation42_spill]] %s13848_s3 }
   0x5   :  { %13898 = sst [smem:[#allocation43_spill]] %s13849_s4 }
   0x6   :  { %13899 = sst [smem:[#allocation44_spill]] %s13850_s5 }
   0x7   :  { %13900 = sst [smem:[#allocation45_spill]] %s13851_s6 }
   0x8   :  { %13901 = sst [smem:[#allocation46_spill]] %s13852_s7 }
   0x9   :  { %13902 = sst [smem:[#allocation47_spill]] %s13853_s8 }
   0xa   :  { %13903 = sst [smem:[#allocation48_spill]] %s13854_s9 }
   0xb   :  { %13904 = sst [smem:[#allocation49_spill]] %s13855_s10 }
   0xc   :  { %13905 = sst [smem:[#allocation50_spill]] %s13856_s11 }
   0xd   :  { %13906 = sst [smem:[#allocation51_spill]] %s13857_s12 }
   0xe   :  { %13907 = sst [smem:[#allocation52_spill]] %s13859_s14 }
   0xf   :  { %13908 = sst [smem:[#allocation53_spill]] %s13860_s15 }
  0x10   :  { %13909 = sst [smem:[#allocation54_spill]] %s13862_s17 }
  0x11   :  { %13910 = sst [smem:[#allocation55_spill]] %s13863_s18 }
  0x12   :  { %13911 = sst [smem:[#allocation56_spill]] %s13871_s26 }
  0x13   :  { %31 = vsyncpa [#allocation3], 0 }
  0x14   :  { %32 = vsyncpa [#allocation5], 0 }
  0x15   :  { %33 = vsyncpa [#allocation8], 0 }
  0x16   :  { %34 = vsyncpa [#allocation11], 0 }
  0x17   :  { %35 = vsyncpa [#allocation14], 0 }
  0x18   :  { %36 = vsyncpa [#allocation17], 0 }
  0x19   :  { %37 = vsyncpa [#allocation20], 0 }
  0x1a   :  { %38 = vsyncpa [#allocation23], 0 }
  0x1b   :  { %39 = vsyncpa [#allocation26], 0  ;;  %s12236_s27 = smov 0  }
  0x1c LB: > { %13912 = sst [smem:[#allocation37_spill]] %s12076_s27  ;;  %s12078_s3 = smov [#allocation4]   ;;  %s12076_s27 = sphi %s12236_s27, %s45_s27  }
  0x1d   : > { %s666_s7 = sshll.u32 %s12078_s3, 4  ;;  %s12242_s28 = sadd.s32 4294967295, %s12076_s27   ;;  %s667_s7 = int_to_ptr.vmem [resolvable:$true] %s666_s7 }
  0x1e   : > { %13913 = sst [smem:[#allocation38_spill]] %s12242_s28  ;;  %p9483_p0 = scmp.ge.s32.totalorder %s12076_s27, 1 }
  0x1f   : > { %p642_p1 = scmp.lt.s32.totalorder %s12076_s27, 3  ;;  %p13880_p2 = scmp.eq.s32.totalorder %s12242_s28, 0 }
  0x20   : > { %s12079_s4 = smov [#allocation7]   ;;  %s12080_s9 = smov [#allocation10]  }
  0x21   : > { %p12247_p3 = pnand %p9483_p0, %p642_p1  ;;  %s689_s29 = sshll.u32 %s12079_s4, 4  ;;  %s12253_s29 = int_to_ptr.vmem [resolvable:$true] %s689_s29 }
  0x22   : > { %s12261_s30 = sshll.u32 %s12080_s9, 4  ;;  %s13916_s10 = sld [smem:[#allocation44_spill]]  ;;  %s722_s30 = int_to_ptr.vmem [resolvable:$true] %s12261_s30 }
  0x23   : > { %s13914_s8 = scalar_select %p12247_p3, 1, 0 }
  0x24   : > { %p11249_p4 = pneg %p12247_p3 }
  0x26   : > { %p12257_p5 = pnand %p13880_p2, %p11249_p4 }
  0x28   : > { %s11558_s6 = scalar_lea.hbm %s13916_s10, 128  ;;  %p12271_p7 = pneg %p12257_p5 }
  0x29   : > { %p11559_p6 = scmp.ne.s32.totalorder %s13916_s10, %s11558_s6  ;;  %p11565_p10 = scmp.lt.u32.totalorder %s11558_s6, %s13916_s10 }
  0x2b   : > { %p11561_p8 = pnand %p12271_p7, %p11559_p6 }
  0x2d   : > { %p11562_p9 = pneg %p11561_p8 }
  0x2f   : > { %p11567_p11 = pnand %p11565_p10, %p11562_p9 }
  0x31   : > { %11570 = shalt.err (!%p11567_p11)
}
  0x32   : > { %s11571_s2 = scalar_lea.vmem %s667_s7, 128  ;;  %p11579_p1 = scmp.lt.s32.totalorder %s667_s7, %s667_s7 }
  0x33   : > { %p11572_p12 = scmp.ne.s32.totalorder %s667_s7, %s11571_s2  ;;  %p11580_p4 = scmp.lt.s32.totalorder %s11571_s2, %s11571_s2 }
  0x35   : > { %p11574_p13 = pnand %p11572_p12, %p12271_p7  ;;  %p11581_p2 = por %p11580_p4, %p11579_p1 }
  0x37   : > { %p11575_p0 = pneg %p11574_p13 }
  0x39   : > { %p11582_p3 = pnand %p11581_p2, %p11575_p0 }
  0x3b   : > { %11585 = shalt.err (!%p11582_p3)
}
  0x3c   : > { %11255 = dma.hbm_to_vmem [thread:$0]  (!%p12257_p5), %s13916_s10, 128, %s667_s7, [#allocation5]  }
  0x3d   : > { %s13918_s3 = sld [smem:[#allocation46_spill]] }
  0x43   : > { %s11586_s9 = scalar_lea.hbm %s13918_s3, 512 }
  0x44   : > { %p11587_p6 = scmp.ne.s32.totalorder %s13918_s3, %s11586_s9  ;;  %p11593_p2 = scmp.lt.u32.totalorder %s11586_s9, %s13918_s3 }
  0x46   : > { %p11589_p8 = pnand %p11587_p6, %p12271_p7 }
  0x48   : > { %p11590_p9 = pneg %p11589_p8 }
  0x4a   : > { %p11595_p3 = pnand %p11593_p2, %p11590_p9 }
  0x4c   : > { %11598 = shalt.err (!%p11595_p3)
}
  0x4d   : > { %s11599_s7 = scalar_lea.vmem %s12253_s29, 512  ;;  %p11607_p13 = scmp.lt.s32.totalorder %s12253_s29, %s12253_s29 }
  0x4e   : > { %p11600_p10 = scmp.ne.s32.totalorder %s12253_s29, %s11599_s7  ;;  %p11608_p0 = scmp.lt.s32.totalorder %s11599_s7, %s11599_s7 }
  0x50   : > { %p11602_p11 = pnand %p11600_p10, %p12271_p7  ;;  %p11609_p1 = por %p11608_p0, %p11607_p13 }
  0x52   : > { %p11603_p12 = pneg %p11602_p11 }
  0x54   : > { %p11610_p4 = pnand %p11609_p1, %p11603_p12 }
  0x56   : > { %11613 = shalt.err (!%p11610_p4)
}
  0x57   : > { %s12081_s18 = smov 64   ;;  %s12082_s14 = smov 4  }
  0x58   : > { %11261 = dma.hbm_to_vmem [thread:$0]  (!%p12257_p5), %s13918_s3, 512, %s12253_s29, [#allocation8], %s12081_s18, %s12081_s18, %s12082_s14  }
  0x59   : > { %s12083_s1 = smov [#allocation13]   ;;  %s13919_s11 = sld [smem:[#allocation50_spill]] }
  0x5a   : > { %s753_s27 = sshll.u32 %s12083_s1, 4  ;;  %s754_s27 = int_to_ptr.vmem [resolvable:$true] %s753_s27 }
  0x5f   : > { %s11614_s2 = scalar_lea.hbm %s13919_s11, 32 }
  0x60   : > { %p11615_p6 = scmp.ne.s32.totalorder %s13919_s11, %s11614_s2  ;;  %p11621_p2 = scmp.lt.u32.totalorder %s11614_s2, %s13919_s11 }
  0x62   : > { %p11617_p8 = pnand %p11615_p6, %p12271_p7 }
  0x64   : > { %p11618_p9 = pneg %p11617_p8 }
  0x66   : > { %p11623_p3 = pnand %p11621_p2, %p11618_p9 }
  0x68   : > { %11626 = shalt.err (!%p11623_p3)
}
  0x69   : > { %s11627_s29 = scalar_lea.vmem %s722_s30, 32  ;;  %p11635_p13 = scmp.lt.s32.totalorder %s722_s30, %s722_s30 }
  0x6a   : > { %p11628_p10 = scmp.ne.s32.totalorder %s722_s30, %s11627_s29  ;;  %p11636_p0 = scmp.lt.s32.totalorder %s11627_s29, %s11627_s29 }
  0x6c   : > { %p11630_p11 = pnand %p11628_p10, %p12271_p7  ;;  %p11637_p1 = por %p11636_p0, %p11635_p13 }
  0x6e   : > { %p11631_p12 = pneg %p11630_p11 }
  0x70   : > { %p11638_p4 = pnand %p11637_p1, %p11631_p12 }
  0x72   : > { %11641 = shalt.err (!%p11638_p4)
}
  0x73   : > { %s13888_s10 = smov 16   ;;  %s13890_s26 = smov 1  }
  0x74   : > { %11267 = dma.hbm_to_vmem [thread:$0]  (!%p12257_p5), %s13919_s11, 32, %s722_s30, [#allocation11], %s13888_s10, %s13888_s10, %s13890_s26  }
  0x75   : > { %s13920_s15 = sld [smem:[#allocation53_spill]] }
  0x7b   : > { %s11642_s6 = scalar_lea.hbm %s13920_s15, 512 }
  0x7c   : > { %p11643_p6 = scmp.ne.s32.totalorder %s13920_s15, %s11642_s6  ;;  %p11649_p2 = scmp.lt.u32.totalorder %s11642_s6, %s13920_s15 }
  0x7e   : > { %p11645_p8 = pnand %p11643_p6, %p12271_p7 }
  0x80   : > { %p11646_p9 = pneg %p11645_p8 }
  0x82   : > { %p11651_p3 = pnand %p11649_p2, %p11646_p9 }
  0x84   : > { %11654 = shalt.err (!%p11651_p3)
}
  0x85   : > { %s11655_s12 = scalar_lea.vmem %s754_s27, 512  ;;  %p11663_p13 = scmp.lt.s32.totalorder %s754_s27, %s754_s27 }
  0x86   : > { %p11656_p10 = scmp.ne.s32.totalorder %s754_s27, %s11655_s12  ;;  %p11664_p0 = scmp.lt.s32.totalorder %s11655_s12, %s11655_s12 }
  0x88   : > { %p11658_p11 = pnand %p11656_p10, %p12271_p7  ;;  %p11665_p1 = por %p11664_p0, %p11663_p13 }
  0x8a   : > { %p11659_p12 = pneg %p11658_p11 }
  0x8c   : > { %p11666_p4 = pnand %p11665_p1, %p11659_p12 }
  0x8e   : > { %11669 = shalt.err (!%p11666_p4)
}
  0x8f   : > { %11273 = dma.hbm_to_vmem [thread:$0]  (!%p12257_p5), %s13920_s15, 512, %s754_s27, [#allocation14], %s12081_s18, %s12081_s18, %s12082_s14  }
  0x90   : > { %s12086_s5 = smov [#allocation16]   ;;  %s12087_s6 = smov [#allocation19]  }
  0x91   : > { %s779_s1 = sshll.u32 %s12086_s5, 4  ;;  %s808_s9 = sshll.u32 %s12087_s6, 4  ;;  %s780_s1 = int_to_ptr.vmem [resolvable:$true] %s779_s1  ;;  %s809_s9 = int_to_ptr.vmem [resolvable:$true] %s808_s9 }
  0x92   : > { %s13921_s17 = sld [smem:[#allocation54_spill]] }
  0x98   : > { %s11670_s29 = scalar_lea.hbm %s13921_s17, 512 }
  0x99   : > { %p11671_p6 = scmp.ne.s32.totalorder %s13921_s17, %s11670_s29  ;;  %p11677_p2 = scmp.lt.u32.totalorder %s11670_s29, %s13921_s17 }
  0x9b   : > { %p11673_p8 = pnand %p11671_p6, %p12271_p7 }
  0x9d   : > { %p11674_p9 = pneg %p11673_p8 }
  0x9f   : > { %p11679_p3 = pnand %p11677_p2, %p11674_p9 }
  0xa1   : > { %11682 = shalt.err (!%p11679_p3)
}
  0xa2   : > { %s11683_s27 = scalar_lea.vmem %s780_s1, 512  ;;  %p11691_p13 = scmp.lt.s32.totalorder %s780_s1, %s780_s1 }
  0xa3   : > { %p11684_p10 = scmp.ne.s32.totalorder %s780_s1, %s11683_s27  ;;  %p11692_p0 = scmp.lt.s32.totalorder %s11683_s27, %s11683_s27 }
  0xa5   : > { %p11686_p11 = pnand %p11684_p10, %p12271_p7  ;;  %p11693_p1 = por %p11692_p0, %p11691_p13 }
  0xa7   : > { %p11687_p12 = pneg %p11686_p11 }
  0xa9   : > { %p11694_p4 = pnand %p11693_p1, %p11687_p12 }
  0xab   : > { %11697 = shalt.err (!%p11694_p4)
}
  0xac   : > { %11279 = dma.hbm_to_vmem [thread:$0]  (!%p12257_p5), %s13921_s17, 512, %s780_s1, [#allocation17], %s12081_s18, %s12081_s18, %s12082_s14  }
  0xad   : > { %s11698_s6 = scalar_lea.hbm %s13865_s20, 2048 }
  0xae   : > { %p11699_p6 = scmp.ne.s32.totalorder %s13865_s20, %s11698_s6  ;;  %p11705_p2 = scmp.lt.u32.totalorder %s11698_s6, %s13865_s20 }
  0xb0   : > { %p11701_p8 = pnand %p11699_p6, %p12271_p7 }
  0xb2   : > { %p11702_p9 = pneg %p11701_p8 }
  0xb4   : > { %p11707_p3 = pnand %p11705_p2, %p11702_p9 }
  0xb6   : > { %11710 = shalt.err (!%p11707_p3)
}
  0xb7   : > { %s11711_s30 = scalar_lea.vmem %s809_s9, 2048  ;;  %p11719_p13 = scmp.lt.s32.totalorder %s809_s9, %s809_s9 }
  0xb8   : > { %p11712_p10 = scmp.ne.s32.totalorder %s809_s9, %s11711_s30  ;;  %p11720_p0 = scmp.lt.s32.totalorder %s11711_s30, %s11711_s30 }
  0xba   : > { %p11714_p11 = pnand %p11712_p10, %p12271_p7  ;;  %p11721_p1 = por %p11720_p0, %p11719_p13 }
  0xbc   : > { %p11715_p12 = pneg %p11714_p11 }
  0xbe   : > { %p11722_p4 = pnand %p11721_p1, %p11715_p12 }
  0xc0   : > { %11725 = shalt.err (!%p11722_p4)
}
  0xc1   : > { %11285 = dma.hbm_to_vmem [thread:$0]  (!%p12257_p5), %s13865_s20, 2048, %s809_s9, [#allocation20], %s12081_s18, %s12081_s18, %s12082_s14  }
  0xc2   : > { %s12088_s10 = smov [#allocation22]   ;;  %s12089_s28 = smov [#allocation25]  }
  0xc3   : > { %s834_s26 = sshll.u32 %s12088_s10, 4  ;;  %s860_s5 = sshll.u32 %s12089_s28, 4  ;;  %s835_s26 = int_to_ptr.vmem [resolvable:$true] %s834_s26  ;;  %s861_s5 = int_to_ptr.vmem [resolvable:$true] %s860_s5 }
  0xc4   : > { %s11726_s7 = scalar_lea.hbm %s13867_s22, 192 }
  0xc5   : > { %p11727_p6 = scmp.ne.s32.totalorder %s13867_s22, %s11726_s7  ;;  %p11733_p2 = scmp.lt.u32.totalorder %s11726_s7, %s13867_s22 }
  0xc7   : > { %p11729_p8 = pnand %p11727_p6, %p12271_p7 }
  0xc9   : > { %p11730_p9 = pneg %p11729_p8 }
  0xcb   : > { %p11735_p3 = pnand %p11733_p2, %p11730_p9 }
  0xcd   : > { %11738 = shalt.err (!%p11735_p3)
}
  0xce   : > { %s11739_s9 = scalar_lea.vmem %s835_s26, 192  ;;  %p11747_p13 = scmp.lt.s32.totalorder %s835_s26, %s835_s26 }
  0xcf   : > { %p11740_p10 = scmp.ne.s32.totalorder %s835_s26, %s11739_s9  ;;  %p11748_p0 = scmp.lt.s32.totalorder %s11739_s9, %s11739_s9 }
  0xd1   : > { %p11742_p11 = pnand %p11740_p10, %p12271_p7  ;;  %p11749_p1 = por %p11748_p0, %p11747_p13 }
  0xd3   : > { %p11743_p12 = pneg %p11742_p11 }
  0xd5   : > { %p11750_p4 = pnand %p11749_p1, %p11743_p12 }
  0xd7   : > { %11753 = shalt.err (!%p11750_p4)
}
  0xd8   : > { %s13922_s27 = smov 1   ;;  %s13923_s10 = smov 16  }
  0xd9   : > { %11291 = dma.hbm_to_vmem [thread:$0]  (!%p12257_p5), %s13867_s22, 192, %s835_s26, [#allocation23], %s13923_s10, %s13923_s10, %s13922_s27  }
  0xda   : > { %s11754_s29 = scalar_lea.hbm %s13869_s24, 1024 }
  0xdb   : > { %p11755_p6 = scmp.ne.s32.totalorder %s13869_s24, %s11754_s29  ;;  %p11761_p2 = scmp.lt.u32.totalorder %s11754_s29, %s13869_s24 }
  0xdd   : > { %p11757_p8 = pnand %p11755_p6, %p12271_p7 }
  0xdf   : > { %p11758_p9 = pneg %p11757_p8 }
  0xe1   : > { %p11763_p3 = pnand %p11761_p2, %p11758_p9 }
  0xe3   : > { %11766 = shalt.err (!%p11763_p3)
}
  0xe4   : > { %s11767_s28 = scalar_lea.vmem %s861_s5, 1024  ;;  %p11775_p13 = scmp.lt.s32.totalorder %s861_s5, %s861_s5 }
  0xe5   : > { %p11768_p10 = scmp.ne.s32.totalorder %s861_s5, %s11767_s28  ;;  %p11776_p0 = scmp.lt.s32.totalorder %s11767_s28, %s11767_s28 }
  0xe7   : > { %p11770_p11 = pnand %p11768_p10, %p12271_p7  ;;  %p11777_p1 = por %p11776_p0, %p11775_p13 }
  0xe9   : > { %p11771_p12 = pneg %p11770_p11 }
  0xeb   : > { %p11778_p4 = pnand %p11777_p1, %p11771_p12 }
  0xed   : > { %11781 = shalt.err (!%p11778_p4)
}
  0xee   : > { %11297 = dma.hbm_to_vmem [thread:$0]  (!%p12257_p5), %s13869_s24, 1024, %s861_s5, [#allocation26], %s12081_s18, %s12081_s18, %s12082_s14  }
  0xef   : > { %s12090_s2 = smov [#allocation2]   ;;  %s12091_s29 = smov [#allocation6]  }
  0xf0   : > { %s655_s7 = sshll.u32 %s12090_s2, 4  ;;  %s676_s12 = sshll.u32 %s12091_s29, 4  ;;  %s656_s7 = int_to_ptr.vmem [resolvable:$true] %s655_s7  ;;  %s677_s12 = int_to_ptr.vmem [resolvable:$true] %s676_s12 }
  0xf1   : > { %s13924_s9 = sld [smem:[#allocation43_spill]] }
  0xf7   : > { %s11782_s28 = scalar_lea.hbm %s13924_s9, 128 }
  0xf8   : > { %p11783_p6 = scmp.ne.s32.totalorder %s13924_s9, %s11782_s28  ;;  %p11789_p2 = scmp.lt.u32.totalorder %s11782_s28, %s13924_s9 }
  0xfa   : > { %p11785_p8 = pnand %p11783_p6, %p12271_p7 }
  0xfc   : > { %p11786_p9 = pneg %p11785_p8 }
  0xfe   : > { %p11791_p3 = pnand %p11789_p2, %p11786_p9 }
 0x100   : > { %11794 = shalt.err (!%p11791_p3)
}
 0x101   : > { %s11795_s5 = scalar_lea.vmem %s656_s7, 128  ;;  %p11803_p13 = scmp.lt.s32.totalorder %s656_s7, %s656_s7 }
 0x102   : > { %p11796_p10 = scmp.ne.s32.totalorder %s656_s7, %s11795_s5  ;;  %p11804_p0 = scmp.lt.s32.totalorder %s11795_s5, %s11795_s5 }
 0x104   : > { %p11798_p11 = pnand %p11796_p10, %p12271_p7  ;;  %p11805_p1 = por %p11804_p0, %p11803_p13 }
 0x106   : > { %p11799_p12 = pneg %p11798_p11 }
 0x108   : > { %p11806_p4 = pnand %p11805_p1, %p11799_p12 }
 0x10a   : > { %11809 = shalt.err (!%p11806_p4)
}
 0x10b   : > { %11252 = dma.hbm_to_vmem [thread:$0]  (!%p12257_p5), %s13924_s9, 128, %s656_s7, [#allocation3]  }
 0x10c   : > { %s13925_s2 = sld [smem:[#allocation45_spill]] }
 0x112   : > { %s11810_s29 = scalar_lea.hbm %s13925_s2, 1536 }
 0x113   : > { %p11811_p6 = scmp.ne.s32.totalorder %s13925_s2, %s11810_s29  ;;  %p11817_p2 = scmp.lt.u32.totalorder %s11810_s29, %s13925_s2 }
 0x115   : > { %p11813_p8 = pnand %p11811_p6, %p12271_p7 }
 0x117   : > { %p11814_p9 = pneg %p11813_p8 }
 0x119   : > { %p11819_p3 = pnand %p11817_p2, %p11814_p9 }
 0x11b   : > { %11822 = shalt.err (!%p11819_p3)
}
 0x11c   : > { %s11823_s5 = scalar_lea.vmem %s677_s12, 1536  ;;  %p11831_p13 = scmp.lt.s32.totalorder %s677_s12, %s677_s12 }
 0x11d   : > { %p11824_p10 = scmp.ne.s32.totalorder %s677_s12, %s11823_s5  ;;  %p11832_p0 = scmp.lt.s32.totalorder %s11823_s5, %s11823_s5 }
 0x11f   : > { %p11826_p11 = pnand %p11824_p10, %p12271_p7  ;;  %p11833_p1 = por %p11832_p0, %p11831_p13 }
 0x121   : > { %p11827_p12 = pneg %p11826_p11 }
 0x123   : > { %p11834_p4 = pnand %p11833_p1, %p11827_p12 }
 0x125   : > { %11837 = shalt.err (!%p11834_p4)
}
 0x126   : > { %11258 = dma.hbm_to_vmem [thread:$0]  (!%p12257_p5), %s13925_s2, 1536, %s677_s12, [#allocation5], %s12081_s18, %s12081_s18, %s12082_s14  }
 0x127   : > { %s12092_s3 = smov [#allocation9]   ;;  %s12093_s6 = smov [#allocation12]  }
 0x128   : > { %s705_s15 = sshll.u32 %s12092_s3, 4  ;;  %s737_s29 = sshll.u32 %s12093_s6, 4  ;;  %s706_s15 = int_to_ptr.vmem [resolvable:$true] %s705_s15  ;;  %s738_s29 = int_to_ptr.vmem [resolvable:$true] %s737_s29 }
 0x129   : > { %s13926_s28 = sld [smem:[#allocation48_spill]] }
 0x12f   : > { %s11838_s26 = scalar_lea.hbm %s13926_s28, 32 }
 0x130   : > { %p11839_p6 = scmp.ne.s32.totalorder %s13926_s28, %s11838_s26  ;;  %p11845_p2 = scmp.lt.u32.totalorder %s11838_s26, %s13926_s28 }
 0x132   : > { %p11841_p8 = pnand %p11839_p6, %p12271_p7 }
 0x134   : > { %p11842_p9 = pneg %p11841_p8 }
 0x136   : > { %p11847_p3 = pnand %p11845_p2, %p11842_p9 }
 0x138   : > { %11850 = shalt.err (!%p11847_p3)
}
 0x139   : > { %s11851_s12 = scalar_lea.vmem %s706_s15, 32  ;;  %p11859_p13 = scmp.lt.s32.totalorder %s706_s15, %s706_s15 }
 0x13a   : > { %p11852_p10 = scmp.ne.s32.totalorder %s706_s15, %s11851_s12  ;;  %p11860_p0 = scmp.lt.s32.totalorder %s11851_s12, %s11851_s12 }
 0x13c   : > { %p11854_p11 = pnand %p11852_p10, %p12271_p7  ;;  %p11861_p1 = por %p11860_p0, %p11859_p13 }
 0x13e   : > { %p11855_p12 = pneg %p11854_p11 }
 0x140   : > { %p11862_p4 = pnand %p11861_p1, %p11855_p12 }
 0x142   : > { %11865 = shalt.err (!%p11862_p4)
}
 0x143   : > { %11264 = dma.hbm_to_vmem [thread:$0]  (!%p12257_p5), %s13926_s28, 32, %s706_s15, [#allocation8], %s13923_s10, %s13923_s10, %s13922_s27  }
 0x144   : > { %s11866_s6 = scalar_lea.hbm %s13858_s13, 32 }
 0x145   : > { %p11867_p6 = scmp.ne.s32.totalorder %s13858_s13, %s11866_s6  ;;  %p11873_p2 = scmp.lt.u32.totalorder %s11866_s6, %s13858_s13 }
 0x147   : > { %p11869_p8 = pnand %p11867_p6, %p12271_p7 }
 0x149   : > { %p11870_p9 = pneg %p11869_p8 }
 0x14b   : > { %p11875_p3 = pnand %p11873_p2, %p11870_p9 }
 0x14d   : > { %11878 = shalt.err (!%p11875_p3)
}
 0x14e   : > { %s11879_s7 = scalar_lea.vmem %s738_s29, 32  ;;  %p11887_p13 = scmp.lt.s32.totalorder %s738_s29, %s738_s29 }
 0x14f   : > { %p11880_p10 = scmp.ne.s32.totalorder %s738_s29, %s11879_s7  ;;  %p11888_p0 = scmp.lt.s32.totalorder %s11879_s7, %s11879_s7 }
 0x151   : > { %p11882_p11 = pnand %p11880_p10, %p12271_p7  ;;  %p11889_p1 = por %p11888_p0, %p11887_p13 }
 0x153   : > { %p11883_p12 = pneg %p11882_p11 }
 0x155   : > { %p11890_p4 = pnand %p11889_p1, %p11883_p12 }
 0x157   : > { %11893 = shalt.err (!%p11890_p4)
}
 0x158   : > { %11270 = dma.hbm_to_vmem [thread:$0]  (!%p12257_p5), %s13858_s13, 32, %s738_s29, [#allocation11], %s13923_s10, %s13923_s10, %s13922_s27  }
 0x159   : > { %s12094_s17 = smov [#allocation15]   ;;  %s12095_s11 = smov [#allocation18]  }
 0x15a   : > { %s766_s9 = sshll.u32 %s12094_s17, 4  ;;  %s795_s3 = sshll.u32 %s12095_s11, 4  ;;  %s767_s9 = int_to_ptr.vmem [resolvable:$true] %s766_s9  ;;  %s796_s3 = int_to_ptr.vmem [resolvable:$true] %s795_s3 }
 0x15b   : > { %s11894_s1 = scalar_lea.hbm %s13861_s16, 1536 }
 0x15c   : > { %p11895_p6 = scmp.ne.s32.totalorder %s13861_s16, %s11894_s1  ;;  %p11901_p2 = scmp.lt.u32.totalorder %s11894_s1, %s13861_s16 }
 0x15e   : > { %p11897_p8 = pnand %p11895_p6, %p12271_p7 }
 0x160   : > { %p11898_p9 = pneg %p11897_p8 }
 0x162   : > { %p11903_p3 = pnand %p11901_p2, %p11898_p9 }
 0x164   : > { %11906 = shalt.err (!%p11903_p3)
}
 0x165   : > { %s11907_s29 = scalar_lea.vmem %s767_s9, 1536  ;;  %p11915_p13 = scmp.lt.s32.totalorder %s767_s9, %s767_s9 }
 0x166   : > { %p11908_p10 = scmp.ne.s32.totalorder %s767_s9, %s11907_s29  ;;  %p11916_p0 = scmp.lt.s32.totalorder %s11907_s29, %s11907_s29 }
 0x168   : > { %p11910_p11 = pnand %p11908_p10, %p12271_p7  ;;  %p11917_p1 = por %p11916_p0, %p11915_p13 }
 0x16a   : > { %p11911_p12 = pneg %p11910_p11 }
 0x16c   : > { %p11918_p4 = pnand %p11917_p1, %p11911_p12 }
 0x16e   : > { %11921 = shalt.err (!%p11918_p4)
}
 0x16f   : > { %11276 = dma.hbm_to_vmem [thread:$0]  (!%p12257_p5), %s13861_s16, 1536, %s767_s9, [#allocation14], %s12081_s18, %s12081_s18, %s12082_s14  }
 0x170   : > { %s11922_s30 = scalar_lea.hbm %s13864_s19, 32 }
 0x171   : > { %p11923_p6 = scmp.ne.s32.totalorder %s13864_s19, %s11922_s30  ;;  %p11929_p2 = scmp.lt.u32.totalorder %s11922_s30, %s13864_s19 }
 0x173   : > { %p11925_p8 = pnand %p11923_p6, %p12271_p7 }
 0x175   : > { %p11926_p9 = pneg %p11925_p8 }
 0x177   : > { %p11931_p3 = pnand %p11929_p2, %p11926_p9 }
 0x179   : > { %11934 = shalt.err (!%p11931_p3)
}
 0x17a   : > { %s11935_s15 = scalar_lea.vmem %s796_s3, 32  ;;  %p11943_p13 = scmp.lt.s32.totalorder %s796_s3, %s796_s3 }
 0x17b   : > { %p11936_p10 = scmp.ne.s32.totalorder %s796_s3, %s11935_s15  ;;  %p11944_p0 = scmp.lt.s32.totalorder %s11935_s15, %s11935_s15 }
 0x17d   : > { %p11938_p11 = pnand %p11936_p10, %p12271_p7  ;;  %p11945_p1 = por %p11944_p0, %p11943_p13 }
 0x17f   : > { %p11939_p12 = pneg %p11938_p11 }
 0x181   : > { %p11946_p4 = pnand %p11945_p1, %p11939_p12 }
 0x183   : > { %11949 = shalt.err (!%p11946_p4)
}
 0x184   : > { %11282 = dma.hbm_to_vmem [thread:$0]  (!%p12257_p5), %s13864_s19, 32, %s796_s3, [#allocation17], %s13923_s10, %s13923_s10, %s13922_s27  }
 0x185   : > { %s12096_s9 = smov [#allocation21]   ;;  %s12097_s12 = smov [#allocation24]  }
 0x186   : > { %s821_s29 = sshll.u32 %s12096_s9, 4  ;;  %s847_s17 = sshll.u32 %s12097_s12, 4  ;;  %s822_s29 = int_to_ptr.vmem [resolvable:$true] %s821_s29  ;;  %s848_s17 = int_to_ptr.vmem [resolvable:$true] %s847_s17 }
 0x187   : > { %s11950_s30 = scalar_lea.hbm %s13866_s21, 32 }
 0x188   : > { %p11951_p6 = scmp.ne.s32.totalorder %s13866_s21, %s11950_s30  ;;  %p11957_p2 = scmp.lt.u32.totalorder %s11950_s30, %s13866_s21 }
 0x18a   : > { %p11953_p8 = pnand %p11951_p6, %p12271_p7 }
 0x18c   : > { %p11954_p9 = pneg %p11953_p8 }
 0x18e   : > { %p11959_p3 = pnand %p11957_p2, %p11954_p9 }
 0x190   : > { %11962 = shalt.err (!%p11959_p3)
}
 0x191   : > { %s11963_s3 = scalar_lea.vmem %s822_s29, 32  ;;  %p11971_p13 = scmp.lt.s32.totalorder %s822_s29, %s822_s29 }
 0x192   : > { %p11964_p10 = scmp.ne.s32.totalorder %s822_s29, %s11963_s3  ;;  %p11972_p0 = scmp.lt.s32.totalorder %s11963_s3, %s11963_s3 }
 0x194   : > { %p11966_p11 = pnand %p11964_p10, %p12271_p7  ;;  %p11973_p1 = por %p11972_p0, %p11971_p13 }
 0x196   : > { %p11967_p12 = pneg %p11966_p11 }
 0x198   : > { %p11974_p4 = pnand %p11973_p1, %p11967_p12 }
 0x19a   : > { %11977 = shalt.err (!%p11974_p4)
}
 0x19b   : > { %11288 = dma.hbm_to_vmem [thread:$0]  (!%p12257_p5), %s13866_s21, 32, %s822_s29, [#allocation20], %s13923_s10, %s13923_s10, %s13922_s27  }
 0x19c   : > { %s11978_s12 = scalar_lea.hbm %s13868_s23, 32 }
 0x19d   : > { %p11979_p6 = scmp.ne.s32.totalorder %s13868_s23, %s11978_s12  ;;  %p11985_p2 = scmp.lt.u32.totalorder %s11978_s12, %s13868_s23 }
 0x19f   : > { %p11981_p8 = pnand %p11979_p6, %p12271_p7 }
 0x1a1   : > { %p11982_p9 = pneg %p11981_p8 }
 0x1a3   : > { %p11987_p3 = pnand %p11985_p2, %p11982_p9 }
 0x1a5   : > { %11990 = shalt.err (!%p11987_p3)
}
 0x1a6   : > { %s11991_s26 = scalar_lea.vmem %s848_s17, 32  ;;  %p11999_p13 = scmp.lt.s32.totalorder %s848_s17, %s848_s17 }
 0x1a7   : > { %p11992_p10 = scmp.ne.s32.totalorder %s848_s17, %s11991_s26  ;;  %p12000_p0 = scmp.lt.s32.totalorder %s11991_s26, %s11991_s26 }
 0x1a9   : > { %p11994_p11 = pnand %p11992_p10, %p12271_p7  ;;  %p12001_p1 = por %p12000_p0, %p11999_p13 }
 0x1ab   : > { %p11995_p12 = pneg %p11994_p11 }
 0x1ad   : > { %p12002_p4 = pnand %p12001_p1, %p11995_p12 }
 0x1af   : > { %12005 = shalt.err (!%p12002_p4)
}
 0x1b0   : > { %11294 = dma.hbm_to_vmem [thread:$0]  (!%p12257_p5), %s13868_s23, 32, %s848_s17, [#allocation23], %s13923_s10, %s13923_s10, %s13922_s27  }
 0x1b1   : > { %s12098_s7 = smov [#allocation27]   ;;  %s12006_s14 = scalar_lea.hbm %s13870_s25, 16 }
 0x1b2   : > { %s874_s3 = sshll.u32 %s12098_s7, 4  ;;  %p12007_p6 = scmp.ne.s32.totalorder %s13870_s25, %s12006_s14  ;;  %s875_s3 = int_to_ptr.vmem [resolvable:$true] %s874_s3 }
 0x1b3   : > { %p12013_p2 = scmp.lt.u32.totalorder %s12006_s14, %s13870_s25 }
 0x1b4   : > { %p12009_p8 = pnand %p12007_p6, %p12271_p7 }
 0x1b6   : > { %p12010_p9 = pneg %p12009_p8 }
 0x1b8   : > { %p12015_p3 = pnand %p12013_p2, %p12010_p9 }
 0x1ba   : > { %12018 = shalt.err (!%p12015_p3)
}
 0x1bb   : > { %s12019_s27 = scalar_lea.vmem %s875_s3, 16  ;;  %s12026_s10 = scalar_lea.vmem %s875_s3, 32 }
 0x1bc   : > { %p12020_p10 = scmp.ne.s32.totalorder %s875_s3, %s12019_s27  ;;  %p12027_p13 = scmp.lt.s32.totalorder %s875_s3, %s875_s3 }
 0x1bd   : > { %p12028_p0 = scmp.lt.s32.totalorder %s12026_s10, %s12019_s27 }
 0x1be   : > { %p12022_p11 = pnand %p12020_p10, %p12271_p7 }
 0x1bf   : > { %p12029_p1 = por %p12028_p0, %p12027_p13 }
 0x1c0   : > { %p12023_p12 = pneg %p12022_p11 }
 0x1c2   : > { %p12030_p4 = pnand %p12029_p1, %p12023_p12 }
 0x1c4   : > { %12033 = shalt.err (!%p12030_p4)
}
 0x1c5   : > { %11300 = dma.hbm_to_vmem [thread:$0]  (!%p12257_p5), %s13870_s25, 16, %s875_s3, [#allocation26]  }
 0x1c6   : > { %p13927_p6 = scmp.ne.s32.totalorder %s13914_s8, 0 }
 0x1c7   : > { %s13928_s1 = sld [smem:[#allocation38_spill]] (!%p13927_p6) }
 0x1c8   : > { %913 = sbr.rel (%p13927_p6) target bundleno = 12654 (0x316e), region = 124 }
 0x1cd   : > { %p13929_p8 = scmp.eq.s32.totalorder (!%p13927_p6), %s13928_s1, 0 }
 0x1cf   : > { %12039 = dma.done.wait (%p13929_p8), [#allocation3], 128   ;;  %p13930_p7 = pmov %p13929_p8 }
 0x1d1   : > { %12041 = vsyncadd (%p13930_p7), [#allocation3], 4294967168  ;;  %p13931_p9 = pmov %p13930_p7 }
 0x1d2   : > { %p13932_p2 = pmov %p13930_p7 }
 0x1d3   : > { %12043 = dma.done.wait (%p13931_p9), [#allocation5], 1664  }
 0x1d4   : > { %12045 = vsyncadd (%p13932_p2), [#allocation5], 4294965632  ;;  %p13933_p3 = pmov %p13932_p2 }
 0x1d5   : > { %p13934_p5 = pmov %p13932_p2 }
 0x1d6   : > { %12047 = dma.done.wait (%p13933_p3), [#allocation8], 544  }
 0x1d7   : > { %12049 = vsyncadd (%p13934_p5), [#allocation8], 4294966752  ;;  %p13935_p10 = pmov %p13932_p2 }
 0x1d8   : > { %p13936_p11 = pmov %p13932_p2 }
 0x1d9   : > { %12051 = dma.done.wait (%p13935_p10), [#allocation11], 64  }
 0x1da   : > { %12053 = vsyncadd (%p13936_p11), [#allocation11], 4294967232  ;;  %p13937_p12 = pmov %p13932_p2 }
 0x1db   : > { %p13938_p13 = pmov %p13932_p2 }
 0x1dc   : > { %12055 = dma.done.wait (%p13937_p12), [#allocation14], 2048  }
 0x1dd   : > { %12057 = vsyncadd (%p13938_p13), [#allocation14], 4294965248  ;;  %p13939_p0 = pmov %p13932_p2 }
 0x1df   : > { %12059 = dma.done.wait (%p13939_p0), [#allocation17], 544   ;;  %p13940_p1 = pmov %p13939_p0 }
 0x1e0   : > { %p13941_p4 = pmov %p13939_p0 }
 0x1e1   : > { %12061 = vsyncadd (%p13940_p1), [#allocation17], 4294966752 }
 0x1e2   : > { %12063 = dma.done.wait (%p13941_p4), [#allocation20], 2080   ;;  %p13942_p6 = pmov %p13939_p0 }
 0x1e3   : > { %p13943_p8 = pmov %p13939_p0 }
 0x1e4   : > { %12065 = vsyncadd (%p13942_p6), [#allocation20], 4294965216 }
 0x1e5   : > { %12067 = dma.done.wait (%p13943_p8), [#allocation23], 224   ;;  %p13944_p7 = pmov %p13939_p0 }
 0x1e6   : > { %p13945_p9 = pmov %p13939_p0 }
 0x1e7   : > { %12069 = vsyncadd (%p13944_p7), [#allocation23], 4294967072 }
 0x1e8   : > { %12071 = dma.done.wait (%p13945_p9), [#allocation26], 1040   ;;  %p13946_p2 = pmov %p13939_p0 }
 0x1e9   : > { %p1055_p3 = scmp.lt.s32.totalorder %s13928_s1, 1  ;;  %v12099_v0 = vmov 0.0   ;;  %vm12100_vm0 = vmmov 0   ;;  %s13947_s26 = sld [smem:[#allocation39_spill]]  ;;  %v1091_v1 = vld [vmem:[#allocation6] sm:$0xf] }
 0x1ea   : > { %12073 = vsyncadd (%p13946_p2), [#allocation26], 4294966256  ;;  %10137 = vmatprep.subr.bf16.mxu1 %v12099_v0  ;;  %10161 = vmatprep.subr.bf16.mxu0 %v12099_v0  ;;  %v1095_v2 = vld [vmem:[#allocation6 + $0x10] sm:$0xf]  ;;  %v1092_v5 = vld [vmem:[#allocation6 + $0x4] sm:$0xf] }
 0x1eb   : > { %10139 = vmatprep.mubr.msk.bf16.mxu1 %vm12100_vm0, %v12099_v0  ;;  %10163 = vmatprep.mubr.msk.bf16.mxu0 %vm12100_vm0, %v12099_v0  ;;  %s13959_s1 = smov (!%p1055_p3, %s13928_s1), 1  ;;  %v1097_v6 = vld [vmem:[#allocation6 + $0x18] sm:$0xf]  ;;  %v1093_v7 = vld [vmem:[#allocation6 + $0x8] sm:$0xf]  ;;  %vm1600_vm1 = vcmask 64512  }
 0x1ec   : > { %s12672_s8 = sshll.u32 %s13959_s1, 3  ;;  %10138 = vmatpush3.bf16.xpose.msra.mxu1 %v1091_v1  ;;  %10162 = vmatpush3.bf16.xpose.msra.mxu0 %v1095_v2  ;;  %v1099_v8 = vld [vmem:[#allocation6 + $0x20] sm:$0xf]  ;;  %v1094_v9 = vld [vmem:[#allocation6 + $0xc] sm:$0xf]  ;;  %vm1840_vm2 = vcmask 1043456  }
 0x1ed   : > { %10143 = vmatprep.subr.bf16.mxu1 %v12099_v0  ;;  %10173 = vmatprep.subr.bf16.mxu0 %v12099_v0  ;;  %v1101_v10 = vld [vmem:[#allocation6 + $0x28] sm:$0xf]  ;;  %v1096_v11 = vld [vmem:[#allocation6 + $0x14] sm:$0xf]  ;;  %v1098_v12 = vld [vmem:[#allocation6 + $0x1c] sm:$0xf] }
 0x1ee   : > { %v1100_v13 = vld [vmem:[#allocation6 + $0x24] sm:$0xf]  ;;  %v1102_v14 = vld [vmem:[#allocation6 + $0x2c] sm:$0xf]  ;;  %s13948_s3 = sld [smem:[#allocation41_spill]]  ;;  %s13949_s9 = sld [smem:[#allocation47_spill]] }
 0x1ef   : > { %s1058_s29 = scalar_lea.vmem %s13947_s26, %s12672_s8  ;;  %s13950_s14 = sld [smem:[#allocation49_spill]]  ;;  %vm4699_vm4 = vcmask 1042432   ;;  %vm4642_vm5 = vcmask 46080   ;;  %vm4695_vm6 = vcmask 48128   ;;  %vm5069_vm7 = vcmask 1045504  }
 0x1f0   : > { %v12678_v3 = vld [vmem:[%s1058_s29] sm:$0xff]  ;;  %s13951_s7 = sld [smem:[#allocation51_spill]]  ;;  %s13952_s12 = sld [smem:[#allocation52_spill]]  ;;  %vm5800_vm8 = vcmask 62464  }
 0x1f1   : > { %v1107_v4 = vpack.c.bf16 %v12678_v3, %v12678_v3  ;;  %s13953_s27 = sld [smem:[#allocation40_spill]]  ;;  %s13954_s11 = sld [smem:[#allocation42_spill]] }
 0x1f2   : > { %s13955_s4 = sld [smem:[#allocation55_spill]]  ;;  %s13956_s26 = sld [smem:[#allocation56_spill]] }
 0x1f3   : > { %10140 = vmatmul.mubr.bf16.vlgmr.msra.gmra.mrb[0].mxu1 %v1107_v4  ;;  %10164 = vmatmul.mubr.bf16.vlgmr.msra.gmra.mrb[0].mxu0 %v1107_v4 }
 0x1f4   : > { %10144 = vmatpush3.bf16.xpose.msra.mxu1 %v1092_v5  ;;  %10174 = vmatpush3.bf16.xpose.msra.mxu0 %v1097_v6  ;;  %s1065_s15 = scalar_lea.vmem %s13948_s3, %s13959_s1 }
 0x1f5   : > { %10145 = vmatprep.mubr.msk.bf16.mxu1 %vm12100_vm0, %v12099_v0  ;;  %10149 = vmatprep.subr.bf16.mxu1 %v12099_v0 }
 0x1f6   : > { %10175 = vmatprep.mubr.msk.bf16.mxu0 %vm12100_vm0, %v12099_v0  ;;  %10185 = vmatprep.subr.bf16.mxu0 %v12099_v0 }
 0x1f7   : > { %s1062_s10 = scalar_lea.vmem %s13953_s27, %s12672_s8  ;;  %s1068_s6 = scalar_lea.vmem %s13954_s11, %s13959_s1 }
 0x1f8   : > { %s1072_s29 = scalar_lea.vmem %s13956_s26, %s12672_s8 }
 0x1fb   : > { %10146 = vmatmul.mubr.bf16.vlgmr.msra.gmra.mrb[4].mxu1 %v1107_v4  ;;  %10176 = vmatmul.mubr.bf16.vlgmr.msra.gmra.mrb[4].mxu0 %v1107_v4 }
 0x1fc   : > { %10150 = vmatpush3.bf16.xpose.msra.mxu1 %v1093_v7  ;;  %10151 = vmatprep.mubr.msk.bf16.mxu1 %vm12100_vm0, %v12099_v0 }
 0x1fd   : > { %10155 = vmatprep.subr.bf16.mxu1 %v12099_v0  ;;  %10186 = vmatpush3.bf16.xpose.msra.mxu0 %v1099_v8 }
 0x1fe   : > { %10187 = vmatprep.mubr.msk.bf16.mxu0 %vm12100_vm0, %v12099_v0  ;;  %10197 = vmatprep.subr.bf16.mxu0 %v12099_v0 }
 0x203   : > { %10152 = vmatmul.mubr.bf16.vlgmr.msra.gmra.mrb[8].mxu1 %v1107_v4 }
 0x204   : > { %10156 = vmatpush3.bf16.xpose.msra.mxu1 %v1094_v9  ;;  %10157 = vmatprep.mubr.msk.bf16.mxu1 %vm12100_vm0, %v12099_v0 }
 0x205   : > { %10167 = vmatprep.subr.bf16.mxu1 %v12099_v0  ;;  %10188 = vmatmul.mubr.bf16.vlgmr.msra.gmra.mrb[8].mxu0 %v1107_v4 }
 0x206   : > { %10198 = vmatpush3.bf16.xpose.msra.mxu0 %v1101_v10  ;;  %10199 = vmatprep.mubr.msk.bf16.mxu0 %vm12100_vm0, %v12099_v0 }
 0x207   : > { %10209 = vmatprep.subr.bf16.mxu0 %v12099_v0 }
 0x20b   : > { %10158 = vmatmul.mubr.bf16.vlgmr.msra.gmra.mrb[12].mxu1 %v1107_v4 }
 0x20c   : > { %10168 = vmatpush3.bf16.xpose.msra.mxu1 %v1096_v11  ;;  %10169 = vmatprep.mubr.msk.bf16.mxu1 %vm12100_vm0, %v12099_v0 }
 0x20d   : > { %10179 = vmatprep.subr.bf16.mxu1 %v12099_v0  ;;  %10200 = vmatmul.mubr.bf16.vlgmr.msra.gmra.mrb[12].mxu0 %v1107_v4 }
 0x20e   : > { %10211 = vmatprep.mubr.msk.bf16.mxu0 %vm12100_vm0, %v12099_v0 }
 0x213   : > { %10170 = vmatmul.mubr.bf16.vlgmr.msra.gmra.mrb[16].mxu1 %v1107_v4 }
 0x214   : > { %10180 = vmatpush3.bf16.xpose.msra.mxu1 %v1098_v12  ;;  %10181 = vmatprep.mubr.msk.bf16.mxu1 %vm12100_vm0, %v12099_v0 }
 0x215   : > { %10191 = vmatprep.subr.bf16.mxu1 %v12099_v0 }
 0x21b   : > { %10182 = vmatmul.mubr.bf16.vlgmr.msra.gmra.mrb[20].mxu1 %v1107_v4 }
 0x21c   : > { %10193 = vmatprep.mubr.msk.bf16.mxu1 %vm12100_vm0, %v12099_v0  ;;  %10192 = vmatpush3.bf16.xpose.msra.mxu1 %v1100_v13 }
 0x21d   : > { %10203 = vmatprep.subr.bf16.mxu1 %v12099_v0 }
 0x223   : > { %10194 = vmatmul.mubr.bf16.vlgmr.msra.gmra.mrb[24].mxu1 %v1107_v4 }
 0x224   : > { %10204 = vmatpush3.bf16.xpose.msra.mxu1 %v1102_v14  ;;  %10205 = vmatprep.mubr.msk.bf16.mxu1 %vm12100_vm0, %v12099_v0 }
 0x225   : > { %10215 = vmatprep.subr.bf16.mxu1 %v12099_v0 }
 0x22b   : > { %10206 = vmatmul.mubr.bf16.vlgmr.msra.gmra.mrb[28].mxu1 %v1107_v4 }
 0x22c   : > { %10217 = vmatprep.mubr.msk.bf16.mxu1 %vm12100_vm0, %v12099_v0 }
 0x2c6   : > { %v1142_v15 = vpop.f32.mrb[0].mxu1  ;;  %v1306_v16 = vpop.f32.mrb[0].mxu0 }
 0x2c7   : > { %v1596_v17 = vpack.c.bf16 %v1306_v16, %v1306_v16  ;;  %v10141_v18 = vpop.f32.mrb[1].mxu1  ;;  %v10165_v19 = vpop.f32.mrb[1].mxu0  ;;  %v1268_v25 = vmul.f32 0.35355338, %v1142_v15 }
 0x2c8   : > { %v1145_v20 = vpop.f32.mrb[2].mxu1  ;;  %v1309_v21 = vpop.f32.mrb[2].mxu0 }
 0x2c9   : > { %v10142_v22 = vpop.f32.mrb[3].mxu1  ;;  %v1605_v23 = vsel %vm1600_vm1, %v1596_v17, 0  ;;  %v10166_v24 = vpop.f32.mrb[3].mxu0  ;;  %v1592_v28 = vpack.c.bf16 %v1268_v25, %v1268_v25  ;;  %v1078_v21 = vld [vmem:[#allocation2] sm:$0xff] }
 0x2ca   : > { %10210 = vmatpush3.bf16.xpose.msra.mxu0 %v1605_v23  ;;  %v9523_v22 = vld [vmem:[%s1065_s15] ss:$0 sm:$0xff] }
 0x2cb   : > { %10221 = vmatprep.subr.bf16.mxu0 %v12099_v0  ;;  %v12750_v23 = vadd.f32 %v9523_v22, %v1078_v21 }
 0x2ce   : > { %v1182_v26 = vpop.f32.mrb[4].mxu1  ;;  %v1386_v27 = vpop.f32.mrb[4].mxu0 }
 0x2cf   : > { %v10147_v29 = vpop.f32.mrb[5].mxu1  ;;  %v1598_v30 = vpack.c.bf16 %v1386_v27, %v1386_v27  ;;  %v10177_v31 = vpop.f32.mrb[5].mxu0  ;;  %v1269_v61 = vmul.f32 0.35355338, %v1182_v26 }
 0x2d0   : > { %v1185_v32 = vpop.f32.mrb[6].mxu1  ;;  %v1389_v33 = vpop.f32.mrb[6].mxu0 }
 0x2d1   : > { %v10148_v34 = vpop.f32.mrb[7].mxu1  ;;  %10212 = vmatmul.mubr.msk.bf16.vlgmr.msra.gmra.mrb[16].mxu0 %vm1600_vm1, %v1592_v28  ;;  %v1697_v35 = vsel %vm1600_vm1, %v1598_v30, 0  ;;  %v10178_v36 = vpop.f32.mrb[7].mxu0  ;;  %v1593_v63 = vpack.c.bf16 %v1269_v61, %v1269_v61 }
 0x2d2   : > { %10222 = vmatpush3.bf16.xpose.msra.mxu0 %v1697_v35  ;;  %10223 = vmatprep.mubr.msk.bf16.mxu0 %vm12100_vm0, %v12099_v0 }
 0x2d3   : > { %10233 = vmatprep.subr.bf16.mxu0 %v12099_v0 }
 0x2d6   : > { %v1222_v37 = vpop.f32.mrb[8].mxu1 }
 0x2d7   : > { %v1270_v38 = vmul.f32 0.35355338, %v1222_v37  ;;  %v10153_v39 = vpop.f32.mrb[9].mxu1 }
 0x2d8   : > { %v1225_v40 = vpop.f32.mrb[10].mxu1  ;;  %v1466_v41 = vpop.f32.mrb[8].mxu0 }
 0x2d9   : > { %v1594_v42 = vpack.c.bf16 %v1270_v38, %v1270_v38  ;;  %v10154_v43 = vpop.f32.mrb[11].mxu1  ;;  %v10189_v44 = vpop.f32.mrb[9].mxu0  ;;  %v1833_v9 = vpack.c.bf16 %v1466_v41, %v1466_v41 }
 0x2da   : > { %v1469_v45 = vpop.f32.mrb[10].mxu0 }
 0x2db   : > { %10224 = vmatmul.mubr.msk.bf16.vlgmr.msra.gmra.mrb[20].mxu0 %vm1600_vm1, %v1594_v42  ;;  %v10190_v46 = vpop.f32.mrb[11].mxu0  ;;  %v1842_v14 = vsel %vm1840_vm2, %v1833_v9, 0 }
 0x2dc   : > { %10235 = vmatprep.mubr.msk.bf16.mxu0 %vm12100_vm0, %v12099_v0  ;;  %10234 = vmatpush3.bf16.msra.mxu0 %v1842_v14 }
 0x2dd   : > { %10245 = vmatprep.subr.bf16.mxu0 %v12099_v0 }
 0x2de   : > { %v1262_v47 = vpop.f32.mrb[12].mxu1 }
 0x2df   : > { %v10159_v48 = vpop.f32.mrb[13].mxu1  ;;  %v1271_v7 = vmul.f32 0.35355338, %v1262_v47 }
 0x2e0   : > { %v1265_v49 = vpop.f32.mrb[14].mxu1  ;;  %v12728_v50 = vpop.f32.mrb[12].mxu0 }
 0x2e1   : > { %v10160_v51 = vpop.f32.mrb[15].mxu1  ;;  %v10201_v52 = vpop.f32.mrb[13].mxu0  ;;  %v1595_v8 = vpack.c.bf16 %v1271_v7, %v1271_v7 }
 0x2e2   : > { %v1549_v53 = vpop.f32.mrb[14].mxu0 }
 0x2e3   : > { %v10202_v54 = vpop.f32.mrb[15].mxu0 }
 0x2e6   : > { %v1346_v55 = vpop.f32.mrb[16].mxu1 }
 0x2e7   : > { %v1597_v56 = vpack.c.bf16 %v1346_v55, %v1346_v55  ;;  %v10171_v57 = vpop.f32.mrb[17].mxu1 }
 0x2e8   : > { %v1349_v58 = vpop.f32.mrb[18].mxu1 }
 0x2e9   : > { %v10172_v59 = vpop.f32.mrb[19].mxu1  ;;  %v1651_v60 = vsel %vm1600_vm1, %v1597_v56, 0 }
 0x2ea   : > { %10216 = vmatpush3.bf16.xpose.msra.mxu1 %v1651_v60 }
 0x2eb   : > { %10227 = vmatprep.subr.bf16.mxu1 %v12099_v0 }
 0x2ee   : > { %v1426_v62 = vpop.f32.mrb[20].mxu1 }
 0x2ef   : > { %v1599_v1 = vpack.c.bf16 %v1426_v62, %v1426_v62  ;;  %v10183_v2 = vpop.f32.mrb[21].mxu1 }
 0x2f0   : > { %v1429_v4 = vpop.f32.mrb[22].mxu1 }
 0x2f1   : > { %v10184_v5 = vpop.f32.mrb[23].mxu1  ;;  %10218 = vmatmul.mubr.msk.bf16.vlgmr.msra.gmra.mrb[32].mxu1 %vm1600_vm1, %v1593_v63  ;;  %v1743_v6 = vsel %vm1600_vm1, %v1599_v1, 0 }
 0x2f2   : > { %10228 = vmatpush3.bf16.xpose.msra.mxu1 %v1743_v6  ;;  %10229 = vmatprep.mubr.msk.bf16.mxu1 %vm12100_vm0, %v12099_v0 }
 0x2f3   : > { %10239 = vmatprep.subr.bf16.mxu1 %v12099_v0 }
 0x2f6   : > { %v1506_v10 = vpop.f32.mrb[24].mxu1 }
 0x2f7   : > { %v1834_v11 = vpack.c.bf16 %v1506_v10, %v1506_v10  ;;  %v10195_v12 = vpop.f32.mrb[25].mxu1  ;;  %v1835_v10 = vpack.c.bf16 %v12728_v50, %v12728_v50 }
 0x2f8   : > { %v1509_v13 = vpop.f32.mrb[26].mxu1 }
 0x2f9   : > { %10230 = vmatmul.mubr.msk.bf16.vlgmr.msra.gmra.mrb[36].mxu1 %vm1600_vm1, %v1595_v8  ;;  %v10196_v15 = vpop.f32.mrb[27].mxu1  ;;  %v1888_v16 = vsel %vm1840_vm2, %v1834_v11, 0  ;;  %v1934_v13 = vsel %vm1840_vm2, %v1835_v10, 0 }
 0x2fa   : > { %10241 = vmatprep.mubr.msk.bf16.mxu1 %vm12100_vm0, %v12099_v0  ;;  %10240 = vmatpush3.bf16.msra.mxu1 %v1888_v16 }
 0x2fb   : > { %10251 = vmatprep.subr.bf16.mxu1 %v12099_v0 }
 0x2fe   : > { %v12744_v17 = vpop.f32.mrb[28].mxu1 }
 0x2ff   : > { %v10207_v18 = vpop.f32.mrb[29].mxu1 }
 0x300   : > { %v1589_v19 = vpop.f32.mrb[30].mxu1 }
 0x301   : > { %v10208_v20 = vpop.f32.mrb[31].mxu1 }
 0x302   : > { %v1836_v20 = vpack.c.bf16 %v12744_v17, %v12744_v17  ;;  %v1103_v17 = vld [vmem:[#allocation7] sm:$0xf] }
 0x3a4   : > { %v1641_v24 = vpop.f32.mrb[16].mxu0 }
 0x3a5   : > { %v10213_v25 = vpop.f32.mrb[17].mxu0  ;;  %v1642_v26 = vadd.f32 %v1641_v24, %v12750_v23  ;;  %v1980_v24 = vsel %vm1840_vm2, %v1836_v20, 0 }
 0x3a6   : > { %v1644_v27 = vpop.f32.mrb[18].mxu0 }
 0x3a7   : > { %v10214_v28 = vpop.f32.mrb[19].mxu0  ;;  %v1785_v29 = vsel %vm1600_vm1, %v1642_v26, -inf }
 0x3a8   : > { %1786 = vmax.xlane.f32.xlu0 %v1785_v29  ;;  %v2030_v28 = vsel %vm1840_vm2, %v1103_v17, 0  ;;  %v1104_v29 = vld [vmem:[#allocation7 + $0x4] sm:$0xf]  ;;  %v11373_v17 = vld [vmem:[%s13949_s9 + $0x38] sm:$0xff]  }
 0x3ae   : > { %v1733_v30 = vpop.f32.mrb[20].mxu0 }
 0x3af   : > { %v10225_v31 = vpop.f32.mrb[21].mxu0  ;;  %v1734_v32 = vadd.f32 %v1733_v30, %v12750_v23  ;;  %v2076_v30 = vsel %vm1840_vm2, %v1104_v29, 0  ;;  %v11375_v29 = vld [vmem:[%s13950_s14 + $0x8] sm:$0xff]  }
 0x3b0   : > { %v1736_v33 = vpop.f32.mrb[22].mxu0  ;;  %v1105_v31 = vld [vmem:[#allocation7 + $0x8] sm:$0xf] }
 0x3b1   : > { %v10226_v34 = vpop.f32.mrb[23].mxu0  ;;  %v1791_v35 = vsel %vm1600_vm1, %v1734_v32, -inf }
 0x3b2   : > { %1792 = vmax.xlane.f32.xlu1 %v1791_v35  ;;  %v2122_v35 = vsel %vm1840_vm2, %v1105_v31, 0  ;;  %v11377_v31 = vld [vmem:[%s13950_s14 + $0x18] sm:$0xff]  }
 0x3c4   : > { %v1687_v36 = vpop.f32.mrb[32].mxu1 }
 0x3c5   : > { %v10219_v37 = vpop.f32.mrb[33].mxu1  ;;  %v1688_v38 = vadd.f32 %v1687_v36, %v12750_v23 }
 0x3c6   : > { %v1690_v39 = vpop.f32.mrb[34].mxu1 }
 0x3c7   : > { %v10220_v40 = vpop.f32.mrb[35].mxu1  ;;  %v1788_v41 = vsel %vm1600_vm1, %v1688_v38, -inf }
 0x3c8   : > { %1789 = vmax.xlane.f32.xlu0 %v1788_v41 }
 0x3cc   : > { %v1779_v42 = vpop.f32.mrb[36].mxu1 }
 0x3cd   : > { %v10231_v43 = vpop.f32.mrb[37].mxu1  ;;  %v1780_v44 = vadd.f32 %v1779_v42, %v12750_v23 }
 0x3ce   : > { %v1782_v45 = vpop.f32.mrb[38].mxu1  ;;  %v1106_v43 = vld [vmem:[#allocation7 + $0xc] sm:$0xf] }
 0x3cf   : > { %v10232_v46 = vpop.f32.mrb[39].mxu1  ;;  %v1794_v47 = vsel %vm1600_vm1, %v1780_v44, -inf }
 0x3d0   : > { %1795 = vmax.xlane.f32.xlu1 %v1794_v47  ;;  %v2168_v47 = vsel %vm1840_vm2, %v1106_v43, 0 }
 0x435   : > { %v1787_v48 = vpop.xlane.xlu0 %1786 }
 0x436   : > { %v1797_v49 = vsub.f32 %v1642_v26, %v1787_v48 }
 0x438   : > { %v1801_v51 = vmul.f32 1.442695, %v1797_v49 }
 0x43a   : > { %11438 = vpow2.f32 %v1801_v51 }
 0x43f   : > { %v1793_v52 = vpop.xlane.xlu1 %1792 }
 0x440   : > { %v1799_v53 = vsub.f32 %v1734_v32, %v1793_v52 }
 0x442   : > { %v1805_v54 = vmul.f32 1.442695, %v1799_v53 }
 0x444   : > { %v11439_v55 = vpop.eup %11438  ;;  %11440 = vpow2.f32 %v1805_v54 }
 0x445   : > { %v1809_v56 = vsel %vm1600_vm1, %v11439_v55, 0.0 }
 0x446   : > { %1810 = vadd.xlane.f32.xlu0 %v1809_v56 }
 0x44e   : > { %v11441_v57 = vpop.eup %11440 }
 0x44f   : > { %v1815_v58 = vsel %vm1600_vm1, %v11441_v57, 0.0 }
 0x450   : > { %1816 = vadd.xlane.f32.xlu0 %v1815_v58 }
 0x455   : > { %v1790_v59 = vpop.xlane.xlu0 %1789 }
 0x456   : > { %v1798_v60 = vsub.f32 %v1688_v38, %v1790_v59 }
 0x458   : > { %v1803_v61 = vmul.f32 1.442695, %v1798_v60 }
 0x45a   : > { %11442 = vpow2.f32 %v1803_v61 }
 0x45d   : > { %v1796_v62 = vpop.xlane.xlu1 %1795 }
 0x45e   : > { %v1800_v63 = vsub.f32 %v1780_v44, %v1796_v62 }
 0x460   : > { %v1807_v1 = vmul.f32 1.442695, %v1800_v63 }
 0x462   : > { %11444 = vpow2.f32 %v1807_v1 }
 0x464   : > { %v11443_v2 = vpop.eup %11442 }
 0x465   : > { %v1812_v4 = vsel %vm1600_vm1, %v11443_v2, 0.0 }
 0x466   : > { %1813 = vadd.xlane.f32.xlu1 %v1812_v4 }
 0x46c   : > { %v11445_v5 = vpop.eup %11444 }
 0x46d   : > { %v1818_v6 = vsel %vm1600_vm1, %v11445_v5, 0.0 }
 0x46e   : > { %1819 = vadd.xlane.f32.xlu1 %v1818_v6 }
 0x4d3   : > { %v1811_v7 = vpop.xlane.xlu0 %1810 }
 0x4d4   : > { %11446 = vrcp.f32 %v1811_v7 }
 0x4dd   : > { %v1817_v8 = vpop.xlane.xlu0 %1816 }
 0x4de   : > { %v11447_v9 = vpop.eup %11446  ;;  %11448 = vrcp.f32 %v1817_v8 }
 0x4df   : > { %v1822_v11 = vmul.f32 %v11447_v9, %v11439_v55 }
 0x4e1   : > { %v1829_v12 = vpack.c.bf16 %v1822_v11, %v1822_v11 }
 0x4e3   : > { %10236 = vmatmul.mubr.msk.bf16.vlgmr.msra.gmra.mrb[24].mxu0 %vm1600_vm1, %v1829_v12 }
 0x4e4   : > { %10246 = vmatpush3.bf16.msra.mxu0 %v1934_v13  ;;  %10247 = vmatprep.mubr.msk.bf16.mxu0 %vm12100_vm0, %v12099_v0 }
 0x4e5   : > { %10257 = vmatprep.subr.bf16.mxu0 %v12099_v0 }
 0x4e8   : > { %v11449_v14 = vpop.eup %11448 }
 0x4e9   : > { %v1826_v15 = vmul.f32 %v11449_v14, %v11441_v57  ;;  %v11366_v14 = vld [vmem:[%s13949_s9] sm:$0xff]  }
 0x4eb   : > { %v1831_v16 = vpack.c.bf16 %v1826_v15, %v1826_v15  ;;  %v11367_v15 = vld [vmem:[%s13949_s9 + $0x8] sm:$0xff]  }
 0x4ed   : > { %10248 = vmatmul.mubr.msk.bf16.vlgmr.msra.gmra.mrb[28].mxu0 %vm1600_vm1, %v1831_v16  ;;  %v1074_v16 = vlaneseq }
 0x4ee   : > { %10259 = vmatprep.mubr.msk.bf16.mxu0 %vm12100_vm0, %v12099_v0  ;;  %10258 = vmatpush3.bf16.msra.mxu0 %v2030_v28  ;;  %v11374_v28 = vld [vmem:[%s13950_s14] sm:$0xff]  }
 0x4ef   : > { %10269 = vmatprep.subr.bf16.mxu0 %v12099_v0 }
 0x4f3   : > { %v1814_v50 = vpop.xlane.xlu1 %1813 }
 0x4f4   : > { %11450 = vrcp.f32 %v1814_v50  ;;  %v12813_v50 = vand.u32 127, %v1074_v16 }
 0x4f6   : > { %vm1076_vm3 = vcmp.lt.s32.totalorder %v12813_v50, 32  ;;  %v11436_v50 = vld [vmem:[#allocation25 + $0x30] sm:$0xff]  }
 0x4fb   : > { %v1820_v18 = vpop.xlane.xlu1 %1819 }
 0x4fc   : > { %11452 = vrcp.f32 %v1820_v18 }
 0x4fe   : > { %v11451_v19 = vpop.eup %11450 }
 0x4ff   : > { %v1824_v21 = vmul.f32 %v11451_v19, %v11443_v2 }
 0x501   : > { %v1830_v22 = vpack.c.bf16 %v1824_v21, %v1824_v21 }
 0x503   : > { %10242 = vmatmul.mubr.msk.bf16.vlgmr.msra.gmra.mrb[40].mxu1 %vm1600_vm1, %v1830_v22  ;;  %v11368_v22 = vld [vmem:[%s13949_s9 + $0x10] sm:$0xff]  }
 0x504   : > { %10252 = vmatpush3.bf16.msra.mxu1 %v1980_v24  ;;  %10253 = vmatprep.mubr.msk.bf16.mxu1 %vm12100_vm0, %v12099_v0  ;;  %v11369_v24 = vld [vmem:[%s13949_s9 + $0x18] sm:$0xff]  }
 0x505   : > { %10263 = vmatprep.subr.bf16.mxu1 %v12099_v0 }
 0x506   : > { %v11453_v25 = vpop.eup %11452 }
 0x507   : > { %v1828_v26 = vmul.f32 %v11453_v25, %v11445_v5  ;;  %v11370_v25 = vld [vmem:[%s13949_s9 + $0x20] sm:$0xff]  }
 0x509   : > { %v1832_v27 = vpack.c.bf16 %v1828_v26, %v1828_v26  ;;  %v11371_v26 = vld [vmem:[%s13949_s9 + $0x28] sm:$0xff]  }
 0x50b   : > { %10254 = vmatmul.mubr.msk.bf16.vlgmr.msra.gmra.mrb[44].mxu1 %vm1600_vm1, %v1832_v27  ;;  %v11372_v27 = vld [vmem:[%s13949_s9 + $0x30] sm:$0xff]  }
 0x50c   : > { %10265 = vmatprep.mubr.msk.bf16.mxu1 %vm12100_vm0, %v12099_v0  ;;  %10264 = vmatpush3.bf16.msra.mxu1 %v2076_v30  ;;  %v11376_v30 = vld [vmem:[%s13950_s14 + $0x10] sm:$0xff]  }
 0x50d   : > { %10275 = vmatprep.subr.bf16.mxu1 %v12099_v0 }
 0x5b6   : > { %v1878_v32 = vpop.f32.mrb[24].mxu0 }
 0x5b7   : > { %v2022_v33 = vpack.c.bf16 %v1878_v32, %v1878_v32  ;;  %v10237_v34 = vpop.f32.mrb[25].mxu0  ;;  %v11378_v32 = vld [vmem:[%s13950_s14 + $0x20] sm:$0xff]  }
 0x5b8   : > { %v1881_v36 = vpop.f32.mrb[26].mxu0 }
 0x5b9   : > { %v10238_v37 = vpop.f32.mrb[27].mxu0  ;;  %10260 = vmatmul.mubr.msk.bf16.vlgmr.msra.gmra.mrb[32].mxu0 %vm1600_vm1, %v2022_v33  ;;  %v11379_v33 = vld [vmem:[%s13950_s14 + $0x28] sm:$0xff]  }
 0x5ba   : > { %10270 = vmatpush3.bf16.msra.mxu0 %v2122_v35  ;;  %10271 = vmatprep.mubr.msk.bf16.mxu0 %vm12100_vm0, %v12099_v0 }
 0x5bb   : > { %10281 = vmatprep.subr.bf16.mxu0 %v12099_v0 }
 0x5c0   : > { %v1970_v38 = vpop.f32.mrb[28].mxu0 }
 0x5c1   : > { %v2024_v39 = vpack.c.bf16 %v1970_v38, %v1970_v38  ;;  %v10249_v40 = vpop.f32.mrb[29].mxu0  ;;  %v9536_v38 = vld [vmem:[%s13951_s7] ss:$0 sm:$0xff] }
 0x5c2   : > { %v1973_v41 = vpop.f32.mrb[30].mxu0  ;;  %v9537_v40 = vld [vmem:[%s13951_s7 + $0x1] ss:$0 sm:$0xff] }
 0x5c3   : > { %v10250_v42 = vpop.f32.mrb[31].mxu0  ;;  %10272 = vmatmul.mubr.msk.bf16.vlgmr.msra.gmra.mrb[36].mxu0 %vm1600_vm1, %v2024_v39 }
 0x5c4   : > { %10297 = vmatprep.mubr.msk.bf16.mxu0 %vm12100_vm0, %v12099_v0  ;;  %10282 = vmatpush3.bf16.msra.mxu0 %v11366_v14 }
 0x5c5   : > { %10283 = vmatprep.subr.bf16.mxu0 %v12099_v0 }
 0x5c8   : > { %10284 = vmatpush3.bf16.msra.mxu0 %v11367_v15 }
 0x5c9   : > { %10285 = vmatprep.subr.bf16.mxu0 %v12099_v0 }
 0x5cc   : > { %10286 = vmatpush3.bf16.msra.mxu0 %v11368_v22  ;;  %v2507_v22 = vld [vmem:[#allocation6 + $0x4c] sm:$0xf] }
 0x5cd   : > { %10287 = vmatprep.subr.bf16.mxu0 %v12099_v0 }
 0x5d0   : > { %10288 = vmatpush3.bf16.msra.mxu0 %v11369_v24  ;;  %v2508_v24 = vld [vmem:[#allocation6 + $0x50] sm:$0xf] }
 0x5d1   : > { %10289 = vmatprep.subr.bf16.mxu0 %v12099_v0 }
 0x5d4   : > { %10290 = vmatpush3.bf16.msra.mxu0 %v11370_v25  ;;  %v2509_v25 = vld [vmem:[#allocation6 + $0x54] sm:$0xf] }
 0x5d5   : > { %10291 = vmatprep.subr.bf16.mxu0 %v12099_v0 }
 0x5d6   : > { %v1924_v44 = vpop.f32.mrb[40].mxu1 }
 0x5d7   : > { %v2023_v45 = vpack.c.bf16 %v1924_v44, %v1924_v44  ;;  %v10243_v46 = vpop.f32.mrb[41].mxu1  ;;  %v11380_v44 = vld [vmem:[%s13950_s14 + $0x30] sm:$0xff]  }
 0x5d8   : > { %v1927_v48 = vpop.f32.mrb[42].mxu1  ;;  %10292 = vmatpush3.bf16.msra.mxu0 %v11371_v26  ;;  %v9538_v46 = vld [vmem:[#allocation9] ss:$0 sm:$0xff]  ;;  %v2510_v26 = vld [vmem:[#allocation6 + $0x58] sm:$0xf] }
 0x5d9   : > { %v10244_v49 = vpop.f32.mrb[43].mxu1  ;;  %10266 = vmatmul.mubr.msk.bf16.vlgmr.msra.gmra.mrb[48].mxu1 %vm1600_vm1, %v2023_v45  ;;  %10293 = vmatprep.subr.bf16.mxu0 %v12099_v0  ;;  %v11381_v45 = vld [vmem:[%s13950_s14 + $0x38] sm:$0xff]  }
 0x5da   : > { %10276 = vmatpush3.bf16.msra.mxu1 %v2168_v47  ;;  %10277 = vmatprep.mubr.msk.bf16.mxu1 %vm12100_vm0, %v12099_v0 }
 0x5db   : > { %10301 = vmatprep.subr.bf16.mxu1 %v12099_v0 }
 0x5dc   : > { %10294 = vmatpush3.bf16.msra.mxu0 %v11372_v27  ;;  %v2511_v27 = vld [vmem:[#allocation6 + $0x5c] sm:$0xf] }
 0x5dd   : > { %10295 = vmatprep.subr.bf16.mxu0 %v12099_v0 }
 0x5de   : > { %v2016_v51 = vpop.f32.mrb[44].mxu1 }
 0x5df   : > { %v2025_v52 = vpack.c.bf16 %v2016_v51, %v2016_v51  ;;  %v10255_v53 = vpop.f32.mrb[45].mxu1 }
 0x5e0   : > { %v2019_v54 = vpop.f32.mrb[46].mxu1  ;;  %10296 = vmatpush3.bf16.msra.mxu0 %v11373_v17 }
 0x5e1   : > { %v10256_v55 = vpop.f32.mrb[47].mxu1  ;;  %10278 = vmatmul.mubr.msk.bf16.vlgmr.msra.gmra.mrb[52].mxu1 %vm1600_vm1, %v2025_v52  ;;  %10321 = vmatprep.subr.bf16.mxu0 %v12099_v0 }
 0x5e2   : > { %10317 = vmatprep.mubr.msk.bf16.mxu1 %vm12100_vm0, %v12099_v0  ;;  %10302 = vmatpush3.bf16.msra.mxu1 %v11374_v28  ;;  %v9547_v55 = vld [vmem:[#allocation10] ss:$0 sm:$0xff] }
 0x5e3   : > { %10303 = vmatprep.subr.bf16.mxu1 %v12099_v0 }
 0x5e6   : > { %10304 = vmatpush3.bf16.msra.mxu1 %v11375_v29 }
 0x5e7   : > { %10305 = vmatprep.subr.bf16.mxu1 %v12099_v0 }
 0x5ea   : > { %10306 = vmatpush3.bf16.msra.mxu1 %v11376_v30 }
 0x5eb   : > { %10307 = vmatprep.subr.bf16.mxu1 %v12099_v0 }
 0x5ee   : > { %10308 = vmatpush3.bf16.msra.mxu1 %v11377_v31 }
 0x5ef   : > { %10309 = vmatprep.subr.bf16.mxu1 %v12099_v0 }
 0x5f2   : > { %10310 = vmatpush3.bf16.msra.mxu1 %v11378_v32 }
 0x5f3   : > { %10311 = vmatprep.subr.bf16.mxu1 %v12099_v0 }
 0x5f6   : > { %10312 = vmatpush3.bf16.msra.mxu1 %v11379_v33 }
 0x5f7   : > { %10313 = vmatprep.subr.bf16.mxu1 %v12099_v0 }
 0x5fa   : > { %10314 = vmatpush3.bf16.msra.mxu1 %v11380_v44 }
 0x5fb   : > { %10315 = vmatprep.subr.bf16.mxu1 %v12099_v0 }
 0x5fe   : > { %10316 = vmatpush3.bf16.msra.mxu1 %v11381_v45 }
 0x5ff   : > { %10327 = vmatprep.subr.bf16.mxu1 %v12099_v0 }
 0x68c   : > { %v2066_v56 = vpop.f32.mrb[32].mxu0 }
 0x68d   : > { %v10261_v57 = vpop.f32.mrb[33].mxu0 }
 0x68e   : > { %v2069_v58 = vpop.f32.mrb[34].mxu0 }
 0x68f   : > { %v10262_v59 = vpop.f32.mrb[35].mxu0 }
 0x696   : > { %v2158_v60 = vpop.f32.mrb[36].mxu0 }
 0x697   : > { %v10273_v61 = vpop.f32.mrb[37].mxu0 }
 0x698   : > { %v2161_v62 = vpop.f32.mrb[38].mxu0 }
 0x699   : > { %v10274_v63 = vpop.f32.mrb[39].mxu0 }
 0x6ac   : > { %v2112_v1 = vpop.f32.mrb[48].mxu1 }
 0x6ad   : > { %v2210_v2 = vadd.f32 %v2112_v1, %v2066_v56  ;;  %v10267_v4 = vpop.f32.mrb[49].mxu1 }
 0x6ae   : > { %v2115_v5 = vpop.f32.mrb[50].mxu1 }
 0x6af   : > { %v10268_v6 = vpop.f32.mrb[51].mxu1  ;;  %v2211_v7 = vadd.f32 %v2210_v2, %v2158_v60  ;;  %v2500_v5 = vld [vmem:[#allocation6 + $0x30] sm:$0xf] }
 0x6b0   : > { %v2501_v6 = vld [vmem:[#allocation6 + $0x34] sm:$0xf] }
 0x6b4   : > { %v2204_v8 = vpop.f32.mrb[52].mxu1 }
 0x6b5   : > { %v10279_v9 = vpop.f32.mrb[53].mxu1  ;;  %v2212_v10 = vadd.f32 %v2211_v7, %v2204_v8 }
 0x6b6   : > { %v2207_v11 = vpop.f32.mrb[54].mxu1 }
 0x6b7   : > { %v10280_v12 = vpop.f32.mrb[55].mxu1  ;;  %v2213_v13 = vadd.f32 %v2212_v10, %v12678_v3  ;;  %v9556_v11 = vld [vmem:[%s13951_s7 + $0x2] ss:$0 sm:$0xff] }
 0x6b9   : > { %2214 = vadd.xlane.f32.xlu0 %v2213_v13 }
 0x746   : > { %v2215_v18 = vpop.xlane.xlu0 %2214 }
 0x747   : > { %v2216_v3 = vmul.f32 0.03125, %v2215_v18  ;;  %v2502_v18 = vld [vmem:[#allocation6 + $0x38] sm:$0xf] }
 0x749   : > { %v2217_v19 = vsub.f32 %v2213_v13, %v2216_v3  ;;  %v9557_v13 = vld [vmem:[%s13951_s7 + $0x3] ss:$0 sm:$0xff]  ;;  %v2503_v3 = vld [vmem:[#allocation6 + $0x3c] sm:$0xf] }
 0x74b   : > { %v2220_v20 = vsel %vm1076_vm3, %v2217_v19, 0.0  ;;  %v2504_v19 = vld [vmem:[#allocation6 + $0x40] sm:$0xf] }
 0x74c   : > { %v2221_v21 = vmul.f32 %v2220_v20, %v2220_v20 }
 0x74e   : > { %2222 = vadd.xlane.f32.xlu1 %v2221_v21  ;;  %v2506_v21 = vld [vmem:[#allocation6 + $0x48] sm:$0xf] }
 0x7db   : > { %v2223_v34 = vpop.xlane.xlu1 %2222 }
 0x7dc   : > { %v2224_v35 = vmul.f32 0.03125, %v2223_v34 }
 0x7de   : > { %v2225_v36 = vadd.f32 1e-05, %v2224_v35 }
 0x7e0   : > { %11454 = vrsqrt.f32 %v2225_v36 }
 0x7ea   : > { %v11455_v37 = vpop.eup %11454 }
 0x7eb   : > { %v2227_v39 = vmul.f32 %v11455_v37, %v2220_v20  ;;  %v2505_v20 = vld [vmem:[#allocation6 + $0x44] sm:$0xf] }
 0x7ed   : > { %v2234_v41 = vmul.f32 %v9536_v38, %v2227_v39 }
 0x7ef   : > { %v2241_v42 = vadd.f32 %v9537_v40, %v2234_v41 }
 0x7f1   : > { %v2276_v43 = vpack.c.bf16 %v2241_v42, %v2241_v42 }
 0x7f3   : > { %10298 = vmatmul.mubr.bf16.vlgmr.msra.gmra.mrb[40].mxu0 %v2276_v43 }
 0x7f4   : > { %10323 = vmatprep.mubr.msk.bf16.mxu0 %vm12100_vm0, %v12099_v0  ;;  %10322 = vmatpush3.bf16.xpose.msra.mxu0 %v2500_v5 }
 0x7f5   : > { %10333 = vmatprep.subr.bf16.mxu0 %v12099_v0 }
 0x8c6   : > { %v2365_v47 = vpop.f32.mrb[40].mxu0 }
 0x8c7   : > { %v2366_v48 = vadd.f32 %v9538_v46, %v2365_v47  ;;  %v10299_v49 = vpop.f32.mrb[41].mxu0 }
 0x8c8   : > { %v2368_v51 = vpop.f32.mrb[42].mxu0 }
 0x8c9   : > { %v2371_v52 = vmax.f32 %v2366_v48, 0.0  ;;  %v10300_v53 = vpop.f32.mrb[43].mxu0 }
 0x8cb   : > { %v2372_v54 = vpack.c.bf16 %v2371_v52, %v2371_v52 }
 0x8cd   : > { %10318 = vmatmul.mubr.bf16.vlgmr.msra.gmra.mrb[56].mxu1 %v2372_v54 }
 0x8ce   : > { %10329 = vmatprep.mubr.msk.bf16.mxu1 %vm12100_vm0, %v12099_v0  ;;  %10328 = vmatpush3.bf16.xpose.msra.mxu1 %v2501_v6 }
 0x8cf   : > { %10339 = vmatprep.subr.bf16.mxu1 %v12099_v0 }
 0x9a0   : > { %v2461_v56 = vpop.f32.mrb[56].mxu1 }
 0x9a1   : > { %v2462_v57 = vadd.f32 %v9547_v55, %v2461_v56  ;;  %v10319_v58 = vpop.f32.mrb[57].mxu1 }
 0x9a2   : > { %v2464_v59 = vpop.f32.mrb[58].mxu1 }
 0x9a3   : > { %v10320_v60 = vpop.f32.mrb[59].mxu1  ;;  %v2467_v61 = vadd.f32 %v2462_v57, %v2241_v42 }
 0x9a5   : > { %2468 = vadd.xlane.f32.xlu0 %v2467_v61 }
 0xa32   : > { %v2469_v62 = vpop.xlane.xlu0 %2468 }
 0xa33   : > { %v2470_v63 = vmul.f32 0.03125, %v2469_v62 }
 0xa35   : > { %v2471_v1 = vsub.f32 %v2467_v61, %v2470_v63 }
 0xa37   : > { %v2472_v2 = vsel %vm1076_vm3, %v2471_v1, 0.0 }
 0xa38   : > { %v2473_v4 = vmul.f32 %v2472_v2, %v2472_v2 }
 0xa3a   : > { %2474 = vadd.xlane.f32.xlu1 %v2473_v4 }
 0xac7   : > { %v2475_v7 = vpop.xlane.xlu1 %2474 }
 0xac8   : > { %v2476_v8 = vmul.f32 0.03125, %v2475_v7 }
 0xaca   : > { %v2477_v9 = vadd.f32 1e-05, %v2476_v8 }
 0xacc   : > { %11456 = vrsqrt.f32 %v2477_v9 }
 0xad6   : > { %v11457_v10 = vpop.eup %11456 }
 0xad7   : > { %v2479_v12 = vmul.f32 %v11457_v10, %v2472_v2 }
 0xad9   : > { %v2486_v14 = vmul.f32 %v9556_v11, %v2479_v12 }
 0xadb   : > { %v12894_v15 = vadd.f32 %v9557_v13, %v2486_v14 }
 0xadd   : > { %v2517_v16 = vpack.c.bf16 %v12894_v15, %v12894_v15 }
 0xadf   : > { %10324 = vmatmul.mubr.bf16.vlgmr.msra.gmra.mrb[44].mxu0 %v2517_v16  ;;  %10330 = vmatmul.mubr.bf16.vlgmr.msra.gmra.mrb[60].mxu1 %v2517_v16 }
 0xae0   : > { %10334 = vmatpush3.bf16.xpose.msra.mxu0 %v2502_v18  ;;  %10340 = vmatpush3.bf16.xpose.msra.mxu1 %v2503_v3 }
 0xae1   : > { %10335 = vmatprep.mubr.msk.bf16.mxu0 %vm12100_vm0, %v12099_v0  ;;  %10341 = vmatprep.mubr.msk.bf16.mxu1 %vm12100_vm0, %v12099_v0 }
 0xae2   : > { %10345 = vmatprep.subr.bf16.mxu0 %v12099_v0  ;;  %10351 = vmatprep.subr.bf16.mxu1 %v12099_v0 }
 0xae7   : > { %10336 = vmatmul.mubr.bf16.vlgmr.msra.gmra.mrb[48].mxu0 %v2517_v16  ;;  %10342 = vmatmul.mubr.bf16.vlgmr.msra.gmra.mrb[64].mxu1 %v2517_v16 }
 0xae8   : > { %10346 = vmatpush3.bf16.xpose.msra.mxu0 %v2504_v19  ;;  %10352 = vmatpush3.bf16.xpose.msra.mxu1 %v2505_v20 }
 0xae9   : > { %10347 = vmatprep.mubr.msk.bf16.mxu0 %vm12100_vm0, %v12099_v0  ;;  %10353 = vmatprep.mubr.msk.bf16.mxu1 %vm12100_vm0, %v12099_v0 }
 0xaea   : > { %10357 = vmatprep.subr.bf16.mxu0 %v12099_v0  ;;  %10363 = vmatprep.subr.bf16.mxu1 %v12099_v0 }
 0xaef   : > { %10348 = vmatmul.mubr.bf16.vlgmr.msra.gmra.mrb[52].mxu0 %v2517_v16  ;;  %10354 = vmatmul.mubr.bf16.vlgmr.msra.gmra.mrb[68].mxu1 %v2517_v16 }
 0xaf0   : > { %10358 = vmatpush3.bf16.xpose.msra.mxu0 %v2506_v21  ;;  %10364 = vmatpush3.bf16.xpose.msra.mxu1 %v2507_v22 }
 0xaf1   : > { %10359 = vmatprep.mubr.msk.bf16.mxu0 %vm12100_vm0, %v12099_v0  ;;  %10365 = vmatprep.mubr.msk.bf16.mxu1 %vm12100_vm0, %v12099_v0 }
 0xaf2   : > { %10369 = vmatprep.subr.bf16.mxu0 %v12099_v0  ;;  %10375 = vmatprep.subr.bf16.mxu1 %v12099_v0 }
 0xaf7   : > { %10360 = vmatmul.mubr.bf16.vlgmr.msra.gmra.mrb[56].mxu0 %v2517_v16  ;;  %10366 = vmatmul.mubr.bf16.vlgmr.msra.gmra.mrb[72].mxu1 %v2517_v16 }
 0xaf8   : > { %10370 = vmatpush3.bf16.xpose.msra.mxu0 %v2508_v24  ;;  %10376 = vmatpush3.bf16.xpose.msra.mxu1 %v2509_v25 }
 0xaf9   : > { %10371 = vmatprep.mubr.msk.bf16.mxu0 %vm12100_vm0, %v12099_v0  ;;  %10377 = vmatprep.mubr.msk.bf16.mxu1 %vm12100_vm0, %v12099_v0 }
 0xafa   : > { %10381 = vmatprep.subr.bf16.mxu0 %v12099_v0  ;;  %10387 = vmatprep.subr.bf16.mxu1 %v12099_v0 }
 0xaff   : > { %10372 = vmatmul.mubr.bf16.vlgmr.msra.gmra.mrb[60].mxu0 %v2517_v16  ;;  %10378 = vmatmul.mubr.bf16.vlgmr.msra.gmra.mrb[76].mxu1 %v2517_v16 }
 0xb00   : > { %10382 = vmatpush3.bf16.xpose.msra.mxu0 %v2510_v26  ;;  %10388 = vmatpush3.bf16.xpose.msra.mxu1 %v2511_v27 }
 0xb01   : > { %10383 = vmatprep.mubr.msk.bf16.mxu0 %vm12100_vm0, %v12099_v0  ;;  %10389 = vmatprep.mubr.msk.bf16.mxu1 %vm12100_vm0, %v12099_v0 }
 0xb02   : > { %10393 = vmatprep.subr.bf16.mxu0 %v12099_v0  ;;  %10399 = vmatprep.subr.bf16.mxu1 %v12099_v0 }
 0xb07   : > { %10384 = vmatmul.mubr.bf16.vlgmr.msra.gmra.mrb[64].mxu0 %v2517_v16  ;;  %10390 = vmatmul.mubr.bf16.vlgmr.msra.gmra.mrb[80].mxu1 %v2517_v16 }
 0xb08   : > { %10395 = vmatprep.mubr.msk.bf16.mxu0 %vm12100_vm0, %v12099_v0  ;;  %10401 = vmatprep.mubr.msk.bf16.mxu1 %vm12100_vm0, %v12099_v0 }
 0xbb2   : > { %v2552_v17 = vpop.f32.mrb[44].mxu0  ;;  %v2592_v28 = vpop.f32.mrb[60].mxu1 }
 0xbb3   : > { %v10325_v29 = vpop.f32.mrb[45].mxu0  ;;  %v10331_v30 = vpop.f32.mrb[61].mxu1  ;;  %v2678_v56 = vmul.f32 0.35355338, %v2552_v17  ;;  %v2679_v57 = vmul.f32 0.35355338, %v2592_v28 }
 0xbb4   : > { %v2555_v31 = vpop.f32.mrb[46].mxu0  ;;  %v2595_v32 = vpop.f32.mrb[62].mxu1 }
 0xbb5   : > { %v10326_v33 = vpop.f32.mrb[47].mxu0  ;;  %v10332_v34 = vpop.f32.mrb[63].mxu1  ;;  %v3002_v60 = vpack.c.bf16 %v2678_v56, %v2678_v56  ;;  %v3003_v61 = vpack.c.bf16 %v2679_v57, %v2679_v57 }
 0xbba   : > { %v2632_v35 = vpop.f32.mrb[48].mxu0  ;;  %v2672_v36 = vpop.f32.mrb[64].mxu1 }
 0xbbb   : > { %v10337_v37 = vpop.f32.mrb[49].mxu0  ;;  %v10343_v38 = vpop.f32.mrb[65].mxu1  ;;  %v2680_v10 = vmul.f32 0.35355338, %v2632_v35  ;;  %v2681_v11 = vmul.f32 0.35355338, %v2672_v36 }
 0xbbc   : > { %v2635_v39 = vpop.f32.mrb[50].mxu0  ;;  %v2675_v40 = vpop.f32.mrb[66].mxu1 }
 0xbbd   : > { %v10338_v41 = vpop.f32.mrb[51].mxu0  ;;  %v10344_v42 = vpop.f32.mrb[67].mxu1  ;;  %v3004_v14 = vpack.c.bf16 %v2680_v10, %v2680_v10  ;;  %v3005_v16 = vpack.c.bf16 %v2681_v11, %v2681_v11 }
 0xbc2   : > { %v2716_v43 = vpop.f32.mrb[52].mxu0  ;;  %v2756_v44 = vpop.f32.mrb[68].mxu1 }
 0xbc3   : > { %v3006_v45 = vpack.c.bf16 %v2716_v43, %v2716_v43  ;;  %v3007_v46 = vpack.c.bf16 %v2756_v44, %v2756_v44  ;;  %v10349_v47 = vpop.f32.mrb[53].mxu0  ;;  %v10355_v48 = vpop.f32.mrb[69].mxu1 }
 0xbc4   : > { %v2719_v49 = vpop.f32.mrb[54].mxu0  ;;  %v2759_v51 = vpop.f32.mrb[70].mxu1 }
 0xbc5   : > { %v3014_v52 = vsel %vm1600_vm1, %v3006_v45, 0  ;;  %v3060_v53 = vsel %vm1600_vm1, %v3007_v46, 0  ;;  %v10350_v54 = vpop.f32.mrb[55].mxu0  ;;  %v10356_v55 = vpop.f32.mrb[71].mxu1 }
 0xbc6   : > { %10394 = vmatpush3.bf16.xpose.msra.mxu0 %v3014_v52  ;;  %10400 = vmatpush3.bf16.xpose.msra.mxu1 %v3060_v53 }
 0xbc7   : > { %10405 = vmatprep.subr.bf16.mxu0 %v12099_v0  ;;  %10411 = vmatprep.subr.bf16.mxu1 %v12099_v0 }
 0xbca   : > { %v2796_v58 = vpop.f32.mrb[56].mxu0  ;;  %v2836_v59 = vpop.f32.mrb[72].mxu1 }
 0xbcb   : > { %v3008_v62 = vpack.c.bf16 %v2796_v58, %v2796_v58  ;;  %v3009_v63 = vpack.c.bf16 %v2836_v59, %v2836_v59  ;;  %v10361_v1 = vpop.f32.mrb[57].mxu0  ;;  %v10367_v2 = vpop.f32.mrb[73].mxu1 }
 0xbcc   : > { %v2799_v4 = vpop.f32.mrb[58].mxu0  ;;  %v2839_v5 = vpop.f32.mrb[74].mxu1 }
 0xbcd   : > { %v3106_v6 = vsel %vm1600_vm1, %v3008_v62, 0  ;;  %v3152_v7 = vsel %vm1600_vm1, %v3009_v63, 0  ;;  %v10362_v8 = vpop.f32.mrb[59].mxu0  ;;  %v10368_v9 = vpop.f32.mrb[75].mxu1  ;;  %10396 = vmatmul.mubr.msk.bf16.vlgmr.msra.gmra.mrb[68].mxu0 %vm1600_vm1, %v3002_v60  ;;  %10402 = vmatmul.mubr.msk.bf16.vlgmr.msra.gmra.mrb[84].mxu1 %vm1600_vm1, %v3003_v61 }
 0xbce   : > { %10406 = vmatpush3.bf16.xpose.msra.mxu0 %v3106_v6  ;;  %10412 = vmatpush3.bf16.xpose.msra.mxu1 %v3152_v7 }
 0xbcf   : > { %10407 = vmatprep.mubr.msk.bf16.mxu0 %vm12100_vm0, %v12099_v0  ;;  %10413 = vmatprep.mubr.msk.bf16.mxu1 %vm12100_vm0, %v12099_v0 }
 0xbd0   : > { %10417 = vmatprep.subr.bf16.mxu0 %v12099_v0  ;;  %10423 = vmatprep.subr.bf16.mxu1 %v12099_v0 }
 0xbd2   : > { %v2876_v12 = vpop.f32.mrb[60].mxu0  ;;  %v2916_v13 = vpop.f32.mrb[76].mxu1 }
 0xbd3   : > { %v3242_v18 = vpack.c.bf16 %v2876_v12, %v2876_v12  ;;  %v3243_v3 = vpack.c.bf16 %v2916_v13, %v2916_v13  ;;  %v10373_v19 = vpop.f32.mrb[61].mxu0  ;;  %v10379_v20 = vpop.f32.mrb[77].mxu1 }
 0xbd4   : > { %v2879_v21 = vpop.f32.mrb[62].mxu0  ;;  %v2919_v22 = vpop.f32.mrb[78].mxu1 }
 0xbd5   : > { %v3250_v24 = vsel %vm1840_vm2, %v3242_v18, 0  ;;  %v3296_v25 = vsel %vm1840_vm2, %v3243_v3, 0  ;;  %v10374_v26 = vpop.f32.mrb[63].mxu0  ;;  %v10380_v27 = vpop.f32.mrb[79].mxu1  ;;  %10408 = vmatmul.mubr.msk.bf16.vlgmr.msra.gmra.mrb[72].mxu0 %vm1600_vm1, %v3004_v14  ;;  %10414 = vmatmul.mubr.msk.bf16.vlgmr.msra.gmra.mrb[88].mxu1 %vm1600_vm1, %v3005_v16 }
 0xbd6   : > { %10418 = vmatpush3.bf16.msra.mxu0 %v3250_v24  ;;  %10424 = vmatpush3.bf16.msra.mxu1 %v3296_v25 }
 0xbd7   : > { %10419 = vmatprep.mubr.msk.bf16.mxu0 %vm12100_vm0, %v12099_v0  ;;  %10425 = vmatprep.mubr.msk.bf16.mxu1 %vm12100_vm0, %v12099_v0 }
 0xbd8   : > { %10429 = vmatprep.subr.bf16.mxu0 %v12099_v0  ;;  %10435 = vmatprep.subr.bf16.mxu1 %v12099_v0 }
 0xbda   : > { %v12956_v17 = vpop.f32.mrb[64].mxu0  ;;  %v12958_v28 = vpop.f32.mrb[80].mxu1 }
 0xbdb   : > { %v10385_v29 = vpop.f32.mrb[65].mxu0  ;;  %v10391_v30 = vpop.f32.mrb[81].mxu1  ;;  %v3244_v25 = vpack.c.bf16 %v12956_v17, %v12956_v17  ;;  %v3245_v27 = vpack.c.bf16 %v12958_v28, %v12958_v28  ;;  %v2513_v28 = vld [vmem:[#allocation7 + $0x10] sm:$0xf] }
 0xbdc   : > { %v2959_v31 = vpop.f32.mrb[66].mxu0  ;;  %v2999_v32 = vpop.f32.mrb[82].mxu1 }
 0xbdd   : > { %v10386_v33 = vpop.f32.mrb[67].mxu0  ;;  %v10392_v34 = vpop.f32.mrb[83].mxu1  ;;  %v3342_v32 = vsel %vm1840_vm2, %v3244_v25, 0 }
 0xbde   : > { %v3388_v33 = vsel %vm1840_vm2, %v3245_v27, 0  ;;  %v11383_v27 = vld [vmem:[%s13949_s9 + $0x48] sm:$0xff]  }
 0xca0   : > { %v3050_v35 = vpop.f32.mrb[68].mxu0  ;;  %v3096_v36 = vpop.f32.mrb[84].mxu1 }
 0xca1   : > { %v3051_v37 = vadd.f32 %v3050_v35, %v12750_v23  ;;  %v3097_v38 = vadd.f32 %v3096_v36, %v12750_v23  ;;  %v10397_v39 = vpop.f32.mrb[69].mxu0  ;;  %v10403_v40 = vpop.f32.mrb[85].mxu1  ;;  %v2514_v36 = vld [vmem:[#allocation7 + $0x14] sm:$0xf] }
 0xca2   : > { %v3053_v41 = vpop.f32.mrb[70].mxu0  ;;  %v3099_v42 = vpop.f32.mrb[86].mxu1  ;;  %v3438_v39 = vsel %vm1840_vm2, %v2513_v28, 0  ;;  %v11386_v28 = vld [vmem:[%s13949_s9 + $0x60] sm:$0xff]  }
 0xca3   : > { %v10398_v43 = vpop.f32.mrb[71].mxu0  ;;  %v10404_v44 = vpop.f32.mrb[87].mxu1  ;;  %v3194_v45 = vsel %vm1600_vm1, %v3051_v37, -inf  ;;  %v3197_v46 = vsel %vm1600_vm1, %v3097_v38, -inf  ;;  %v3484_v41 = vsel %vm1840_vm2, %v2514_v36, 0  ;;  %v11389_v36 = vld [vmem:[%s13949_s9 + $0x78] sm:$0xff]  }
 0xca4   : > { %3195 = vmax.xlane.f32.xlu0 %v3194_v45  ;;  %3198 = vmax.xlane.f32.xlu1 %v3197_v46  ;;  %v2515_v42 = vld [vmem:[#allocation7 + $0x18] sm:$0xf]  ;;  %v2516_v43 = vld [vmem:[#allocation7 + $0x1c] sm:$0xf] }
 0xca8   : > { %v3142_v47 = vpop.f32.mrb[72].mxu0  ;;  %v3188_v48 = vpop.f32.mrb[88].mxu1 }
 0xca9   : > { %v3143_v49 = vadd.f32 %v3142_v47, %v12750_v23  ;;  %v3189_v51 = vadd.f32 %v3188_v48, %v12750_v23  ;;  %v10409_v52 = vpop.f32.mrb[73].mxu0  ;;  %v10415_v53 = vpop.f32.mrb[89].mxu1  ;;  %v3530_v48 = vsel %vm1840_vm2, %v2515_v42, 0  ;;  %v11395_v42 = vld [vmem:[%s13950_s14 + $0x68] sm:$0xff]  }
 0xcaa   : > { %v3145_v54 = vpop.f32.mrb[74].mxu0  ;;  %v3191_v55 = vpop.f32.mrb[90].mxu1  ;;  %v3576_v53 = vsel %vm1840_vm2, %v2516_v43, 0  ;;  %v11396_v43 = vld [vmem:[%s13950_s14 + $0x70] sm:$0xff]  }
 0xcab   : > { %v10410_v56 = vpop.f32.mrb[75].mxu0  ;;  %v10416_v57 = vpop.f32.mrb[91].mxu1  ;;  %v3200_v58 = vsel %vm1600_vm1, %v3143_v49, -inf  ;;  %v3203_v59 = vsel %vm1600_vm1, %v3189_v51, -inf }
 0xcac   : > { %3201 = vmax.xlane.f32.xlu0 %v3200_v58  ;;  %3204 = vmax.xlane.f32.xlu1 %v3203_v59 }
 0xd31   : > { %v3196_v60 = vpop.xlane.xlu0 %3195  ;;  %v3199_v61 = vpop.xlane.xlu1 %3198 }
 0xd32   : > { %v3206_v62 = vsub.f32 %v3051_v37, %v3196_v60  ;;  %v3207_v63 = vsub.f32 %v3097_v38, %v3199_v61 }
 0xd34   : > { %v3210_v1 = vmul.f32 1.442695, %v3206_v62  ;;  %v3212_v2 = vmul.f32 1.442695, %v3207_v63 }
 0xd36   : > { %11458 = vpow2.f32 %v3210_v1 }
 0xd37   : > { %11460 = vpow2.f32 %v3212_v2 }
 0xd39   : > { %v3202_v23 = vpop.xlane.xlu0 %3201  ;;  %v3205_v4 = vpop.xlane.xlu1 %3204 }
 0xd3a   : > { %v3208_v5 = vsub.f32 %v3143_v49, %v3202_v23  ;;  %v3209_v6 = vsub.f32 %v3189_v51, %v3205_v4 }
 0xd3c   : > { %v3214_v7 = vmul.f32 1.442695, %v3208_v5  ;;  %v3216_v8 = vmul.f32 1.442695, %v3209_v6 }
 0xd3e   : > { %11462 = vpow2.f32 %v3214_v7 }
 0xd3f   : > { %11464 = vpow2.f32 %v3216_v8 }
 0xd40   : > { %v11459_v9 = vpop.eup %11458 }
 0xd41   : > { %v11461_v10 = vpop.eup %11460  ;;  %v3218_v11 = vsel %vm1600_vm1, %v11459_v9, 0.0 }
 0xd42   : > { %3219 = vadd.xlane.f32.xlu0 %v3218_v11  ;;  %v3221_v12 = vsel %vm1600_vm1, %v11461_v10, 0.0 }
 0xd43   : > { %3222 = vadd.xlane.f32.xlu1 %v3221_v12 }
 0xd48   : > { %v11463_v13 = vpop.eup %11462 }
 0xd49   : > { %v11465_v14 = vpop.eup %11464  ;;  %v3224_v16 = vsel %vm1600_vm1, %v11463_v13, 0.0 }
 0xd4a   : > { %3225 = vadd.xlane.f32.xlu0 %v3224_v16  ;;  %v3227_v18 = vsel %vm1600_vm1, %v11465_v14, 0.0 }
 0xd4b   : > { %3228 = vadd.xlane.f32.xlu1 %v3227_v18 }
 0xdcf   : > { %v3220_v3 = vpop.xlane.xlu0 %3219 }
 0xdd0   : > { %11466 = vrcp.f32 %v3220_v3  ;;  %v3223_v19 = vpop.xlane.xlu1 %3222 }
 0xdd1   : > { %11468 = vrcp.f32 %v3223_v19 }
 0xdd7   : > { %v3226_v20 = vpop.xlane.xlu0 %3225 }
 0xdd8   : > { %11470 = vrcp.f32 %v3226_v20  ;;  %v3229_v21 = vpop.xlane.xlu1 %3228 }
 0xdd9   : > { %11472 = vrcp.f32 %v3229_v21 }
 0xdda   : > { %v11467_v22 = vpop.eup %11466 }
 0xddb   : > { %v11469_v24 = vpop.eup %11468  ;;  %v3231_v26 = vmul.f32 %v11467_v22, %v11459_v9 }
 0xddc   : > { %v3233_v29 = vmul.f32 %v11469_v24, %v11461_v10 }
 0xddd   : > { %v3238_v30 = vpack.c.bf16 %v3231_v26, %v3231_v26  ;;  %v11382_v26 = vld [vmem:[%s13949_s9 + $0x40] sm:$0xff]  }
 0xdde   : > { %v3239_v31 = vpack.c.bf16 %v3233_v29, %v3233_v29  ;;  %v11384_v29 = vld [vmem:[%s13949_s9 + $0x50] sm:$0xff]  }
 0xddf   : > { %10420 = vmatmul.mubr.msk.bf16.vlgmr.msra.gmra.mrb[76].mxu0 %vm1600_vm1, %v3238_v30 }
 0xde0   : > { %10426 = vmatmul.mubr.msk.bf16.vlgmr.msra.gmra.mrb[92].mxu1 %vm1600_vm1, %v3239_v31  ;;  %10430 = vmatpush3.bf16.msra.mxu0 %v3342_v32 }
 0xde1   : > { %10436 = vmatpush3.bf16.msra.mxu1 %v3388_v33  ;;  %10431 = vmatprep.mubr.msk.bf16.mxu0 %vm12100_vm0, %v12099_v0 }
 0xde2   : > { %v11471_v17 = vpop.eup %11470  ;;  %10437 = vmatprep.mubr.msk.bf16.mxu1 %vm12100_vm0, %v12099_v0  ;;  %10441 = vmatprep.subr.bf16.mxu0 %v12099_v0 }
 0xde3   : > { %v11473_v34 = vpop.eup %11472  ;;  %v3235_v35 = vmul.f32 %v11471_v17, %v11463_v13  ;;  %10447 = vmatprep.subr.bf16.mxu1 %v12099_v0 }
 0xde4   : > { %v3237_v37 = vmul.f32 %v11473_v34, %v11465_v14  ;;  %v11387_v34 = vld [vmem:[%s13949_s9 + $0x68] sm:$0xff]  }
 0xde5   : > { %v3240_v38 = vpack.c.bf16 %v3235_v35, %v3235_v35  ;;  %v11388_v35 = vld [vmem:[%s13949_s9 + $0x70] sm:$0xff]  }
 0xde6   : > { %v3241_v40 = vpack.c.bf16 %v3237_v37, %v3237_v37  ;;  %v11390_v37 = vld [vmem:[%s13950_s14 + $0x40] sm:$0xff]  }
 0xde7   : > { %10432 = vmatmul.mubr.msk.bf16.vlgmr.msra.gmra.mrb[80].mxu0 %vm1600_vm1, %v3240_v38  ;;  %v11391_v38 = vld [vmem:[%s13950_s14 + $0x48] sm:$0xff]  }
 0xde8   : > { %10438 = vmatmul.mubr.msk.bf16.vlgmr.msra.gmra.mrb[96].mxu1 %vm1600_vm1, %v3241_v40  ;;  %10442 = vmatpush3.bf16.msra.mxu0 %v3438_v39  ;;  %v11392_v39 = vld [vmem:[%s13950_s14 + $0x50] sm:$0xff]   ;;  %v11393_v40 = vld [vmem:[%s13950_s14 + $0x58] sm:$0xff]  }
 0xde9   : > { %10448 = vmatpush3.bf16.msra.mxu1 %v3484_v41  ;;  %10443 = vmatprep.mubr.msk.bf16.mxu0 %vm12100_vm0, %v12099_v0  ;;  %v11394_v41 = vld [vmem:[%s13950_s14 + $0x60] sm:$0xff]  }
 0xdea   : > { %10449 = vmatprep.mubr.msk.bf16.mxu1 %vm12100_vm0, %v12099_v0  ;;  %10453 = vmatprep.subr.bf16.mxu0 %v12099_v0 }
 0xdeb   : > { %10459 = vmatprep.subr.bf16.mxu1 %v12099_v0 }
 0xeb2   : > { %v3286_v44 = vpop.f32.mrb[76].mxu0 }
 0xeb3   : > { %v3430_v45 = vpack.c.bf16 %v3286_v44, %v3286_v44  ;;  %v3332_v46 = vpop.f32.mrb[92].mxu1  ;;  %v10421_v47 = vpop.f32.mrb[77].mxu0  ;;  %v11397_v44 = vld [vmem:[%s13950_s14 + $0x78] sm:$0xff]  }
 0xeb4   : > { %v3431_v49 = vpack.c.bf16 %v3332_v46, %v3332_v46  ;;  %v10427_v51 = vpop.f32.mrb[93].mxu1  ;;  %v3289_v52 = vpop.f32.mrb[78].mxu0 }
 0xeb5   : > { %v3335_v54 = vpop.f32.mrb[94].mxu1  ;;  %v10422_v55 = vpop.f32.mrb[79].mxu0  ;;  %10444 = vmatmul.mubr.msk.bf16.vlgmr.msra.gmra.mrb[84].mxu0 %vm1600_vm1, %v3430_v45  ;;  %v9575_v52 = vld [vmem:[%s13951_s7 + $0x5] ss:$0 sm:$0xff] }
 0xeb6   : > { %v10428_v56 = vpop.f32.mrb[95].mxu1  ;;  %10450 = vmatmul.mubr.msk.bf16.vlgmr.msra.gmra.mrb[100].mxu1 %vm1600_vm1, %v3431_v49  ;;  %10454 = vmatpush3.bf16.msra.mxu0 %v3530_v48  ;;  %v9574_v49 = vld [vmem:[%s13951_s7 + $0x4] ss:$0 sm:$0xff] }
 0xeb7   : > { %10460 = vmatpush3.bf16.msra.mxu1 %v3576_v53  ;;  %10455 = vmatprep.mubr.msk.bf16.mxu0 %vm12100_vm0, %v12099_v0  ;;  %v3949_v56 = vld [vmem:[%s13952_s12] sm:$0xf] }
 0xeb8   : > { %10461 = vmatprep.mubr.msk.bf16.mxu1 %vm12100_vm0, %v12099_v0  ;;  %10465 = vmatprep.subr.bf16.mxu0 %v12099_v0 }
 0xeb9   : > { %10485 = vmatprep.subr.bf16.mxu1 %v12099_v0 }
 0xeba   : > { %v3378_v57 = vpop.f32.mrb[80].mxu0 }
 0xebb   : > { %v3432_v58 = vpack.c.bf16 %v3378_v57, %v3378_v57  ;;  %v3424_v59 = vpop.f32.mrb[96].mxu1  ;;  %v10433_v60 = vpop.f32.mrb[81].mxu0  ;;  %v13098_v57 = vld [vmem:[%s1062_s10] sm:$0x3f] }
 0xebc   : > { %v3433_v61 = vpack.c.bf16 %v3424_v59, %v3424_v59  ;;  %v10439_v62 = vpop.f32.mrb[97].mxu1  ;;  %v3381_v63 = vpop.f32.mrb[82].mxu0  ;;  %v3951_v59 = vld [vmem:[%s13952_s12 + $0x8] sm:$0xf]  ;;  %v3953_v60 = vld [vmem:[%s13952_s12 + $0x10] sm:$0xf] }
 0xebd   : > { %v3427_v1 = vpop.f32.mrb[98].mxu1  ;;  %v10434_v2 = vpop.f32.mrb[83].mxu0  ;;  %10456 = vmatmul.mubr.msk.bf16.vlgmr.msra.gmra.mrb[88].mxu0 %vm1600_vm1, %v3432_v58  ;;  %v13103_v58 = vpack.c.bf16 %v13098_v57, %v13098_v57  ;;  %v3957_v62 = vld [vmem:[%s13952_s12 + $0x20] sm:$0xf]  ;;  %v3959_v63 = vld [vmem:[%s13952_s12 + $0x28] sm:$0xf] }
 0xebe   : > { %v10440_v23 = vpop.f32.mrb[99].mxu1  ;;  %10462 = vmatmul.mubr.msk.bf16.vlgmr.msra.gmra.mrb[104].mxu1 %vm1600_vm1, %v3433_v61  ;;  %10481 = vmatprep.mubr.msk.bf16.mxu0 %vm12100_vm0, %v12099_v0  ;;  %v3955_v61 = vld [vmem:[%s13952_s12 + $0x18] sm:$0xf]  ;;  %v9608_v1 = vld [vmem:[#allocation9 + $0x1] ss:$0 sm:$0xff] }
 0xebf   : > { %10501 = vmatprep.mubr.msk.bf16.mxu1 %vm12100_vm0, %v12099_v0  ;;  %10466 = vmatpush3.bf16.msra.mxu0 %v11382_v26 }
 0xec0   : > { %10467 = vmatprep.subr.bf16.mxu0 %v12099_v0  ;;  %10486 = vmatpush3.bf16.msra.mxu1 %v11390_v37  ;;  %v3958_v37 = vld [vmem:[%s13952_s12 + $0x24] sm:$0xf] }
 0xec1   : > { %10487 = vmatprep.subr.bf16.mxu1 %v12099_v0 }
 0xec3   : > { %10468 = vmatpush3.bf16.msra.mxu0 %v11383_v27 }
 0xec4   : > { %10469 = vmatprep.subr.bf16.mxu0 %v12099_v0  ;;  %10488 = vmatpush3.bf16.msra.mxu1 %v11391_v38  ;;  %v3960_v38 = vld [vmem:[%s13952_s12 + $0x2c] sm:$0xf] }
 0xec5   : > { %10489 = vmatprep.subr.bf16.mxu1 %v12099_v0 }
 0xec7   : > { %10470 = vmatpush3.bf16.msra.mxu0 %v11384_v29 }
 0xec8   : > { %10471 = vmatprep.subr.bf16.mxu0 %v12099_v0  ;;  %10490 = vmatpush3.bf16.msra.mxu1 %v11392_v39 }
 0xec9   : > { %10491 = vmatprep.subr.bf16.mxu1 %v12099_v0 }
 0xecc   : > { %10492 = vmatpush3.bf16.msra.mxu1 %v11393_v40 }
 0xecd   : > { %10493 = vmatprep.subr.bf16.mxu1 %v12099_v0 }
 0xed0   : > { %10494 = vmatpush3.bf16.msra.mxu1 %v11394_v41 }
 0xed1   : > { %10495 = vmatprep.subr.bf16.mxu1 %v12099_v0 }
 0xed4   : > { %10496 = vmatpush3.bf16.msra.mxu1 %v11395_v42 }
 0xed5   : > { %10497 = vmatprep.subr.bf16.mxu1 %v12099_v0 }
 0xed8   : > { %10498 = vmatpush3.bf16.msra.mxu1 %v11396_v43 }
 0xed9   : > { %10499 = vmatprep.subr.bf16.mxu1 %v12099_v0 }
 0xedc   : > { %10500 = vmatpush3.bf16.msra.mxu1 %v11397_v44 }
 0xedd   : > { %10511 = vmatprep.subr.bf16.mxu1 %v12099_v0 }
 0xf88   : > { %v3474_v4 = vpop.f32.mrb[84].mxu0 }
 0xf89   : > { %v3520_v5 = vpop.f32.mrb[100].mxu1  ;;  %v10445_v6 = vpop.f32.mrb[85].mxu0 }
 0xf8a   : > { %v3618_v7 = vadd.f32 %v3520_v5, %v3474_v4  ;;  %v10451_v8 = vpop.f32.mrb[101].mxu1  ;;  %v3477_v9 = vpop.f32.mrb[86].mxu0 }
 0xf8b   : > { %v3523_v10 = vpop.f32.mrb[102].mxu1  ;;  %v10446_v11 = vpop.f32.mrb[87].mxu0  ;;  %v3950_v9 = vld [vmem:[%s13952_s12 + $0x4] sm:$0xf] }
 0xf8c   : > { %v10452_v12 = vpop.f32.mrb[103].mxu1 }
 0xf90   : > { %v3566_v13 = vpop.f32.mrb[88].mxu0 }
 0xf91   : > { %v3619_v14 = vadd.f32 %v3618_v7, %v3566_v13  ;;  %v3612_v16 = vpop.f32.mrb[104].mxu1  ;;  %v10457_v18 = vpop.f32.mrb[89].mxu0 }
 0xf92   : > { %v10463_v3 = vpop.f32.mrb[105].mxu1  ;;  %v3569_v19 = vpop.f32.mrb[90].mxu0 }
 0xf93   : > { %v3620_v20 = vadd.f32 %v3619_v14, %v3612_v16  ;;  %v3615_v21 = vpop.f32.mrb[106].mxu1  ;;  %v10458_v22 = vpop.f32.mrb[91].mxu0  ;;  %v3952_v14 = vld [vmem:[%s13952_s12 + $0xc] sm:$0xf] }
 0xf94   : > { %v10464_v24 = vpop.f32.mrb[107].mxu1 }
 0xf95   : > { %v3621_v25 = vadd.f32 %v3620_v20, %v12894_v15  ;;  %v11385_v15 = vld [vmem:[%s13949_s9 + $0x58] sm:$0xff]   ;;  %v3954_v20 = vld [vmem:[%s13952_s12 + $0x14] sm:$0xf] }
 0xf96   : > { %10472 = vmatpush3.bf16.msra.mxu0 %v11385_v15  ;;  %v3956_v15 = vld [vmem:[%s13952_s12 + $0x1c] sm:$0xf] }
 0xf97   : > { %3622 = vadd.xlane.f32.xlu0 %v3621_v25  ;;  %10473 = vmatprep.subr.bf16.mxu0 %v12099_v0 }
 0xf9a   : > { %10474 = vmatpush3.bf16.msra.mxu0 %v11386_v28 }
 0xf9b   : > { %10475 = vmatprep.subr.bf16.mxu0 %v12099_v0 }
 0xf9e   : > { %10476 = vmatpush3.bf16.msra.mxu0 %v11387_v34 }
 0xf9f   : > { %10477 = vmatprep.subr.bf16.mxu0 %v12099_v0 }
 0xfa2   : > { %10478 = vmatpush3.bf16.msra.mxu0 %v11388_v35 }
 0xfa3   : > { %10479 = vmatprep.subr.bf16.mxu0 %v12099_v0 }
 0xfa6   : > { %10480 = vmatpush3.bf16.msra.mxu0 %v11389_v36 }
 0xfa7   : > { %10505 = vmatprep.subr.bf16.mxu0 %v12099_v0 }
0x1024   : > { %v3623_v30 = vpop.xlane.xlu0 %3622 }
0x1025   : > { %v3624_v31 = vmul.f32 0.03125, %v3623_v30 }
0x1027   : > { %v3625_v32 = vsub.f32 %v3621_v25, %v3624_v31 }
0x1029   : > { %v3626_v33 = vsel %vm1076_vm3, %v3625_v32, 0.0 }
0x102a   : > { %v3627_v17 = vmul.f32 %v3626_v33, %v3626_v33 }
0x102c   : > { %3628 = vadd.xlane.f32.xlu1 %v3627_v17 }
0x10b9   : > { %v3629_v45 = vpop.xlane.xlu1 %3628 }
0x10ba   : > { %v3630_v46 = vmul.f32 0.03125, %v3629_v45 }
0x10bc   : > { %v3631_v47 = vadd.f32 1e-05, %v3630_v46 }
0x10be   : > { %11474 = vrsqrt.f32 %v3631_v47 }
0x10c8   : > { %v11475_v48 = vpop.eup %11474 }
0x10c9   : > { %v3633_v51 = vmul.f32 %v11475_v48, %v3626_v33 }
0x10cb   : > { %v3640_v53 = vmul.f32 %v9574_v49, %v3633_v51 }
0x10cd   : > { %v13085_v54 = vadd.f32 %v9575_v52, %v3640_v53 }
0x10cf   : > { %v3686_v55 = vpack.c.bf16 %v13085_v54, %v13085_v54 }
0x10d1   : > { %10482 = vmatmul.mubr.bf16.vlgmr.msra.gmra.mrb[92].mxu0 %v3686_v55 }
0x10d2   : > { %10506 = vmatpush3.bf16.xpose.msra.mxu0 %v3949_v56  ;;  %10507 = vmatprep.mubr.msk.bf16.mxu0 %vm12100_vm0, %v12099_v0 }
0x10d3   : > { %10517 = vmatprep.subr.bf16.mxu0 %v12099_v0 }
0x10d9   : > { %10508 = vmatmul.mubr.bf16.vlgmr.msra.gmra.mrb[96].mxu0 %v13103_v58 }
0x10da   : > { %10518 = vmatpush3.bf16.xpose.msra.mxu0 %v3951_v59  ;;  %10519 = vmatprep.mubr.msk.bf16.mxu0 %vm12100_vm0, %v12099_v0 }
0x10db   : > { %10529 = vmatprep.subr.bf16.mxu0 %v12099_v0 }
0x10e1   : > { %10520 = vmatmul.mubr.bf16.vlgmr.msra.gmra.mrb[100].mxu0 %v13103_v58 }
0x10e2   : > { %10530 = vmatpush3.bf16.xpose.msra.mxu0 %v3953_v60  ;;  %10531 = vmatprep.mubr.msk.bf16.mxu0 %vm12100_vm0, %v12099_v0 }
0x10e3   : > { %10541 = vmatprep.subr.bf16.mxu0 %v12099_v0 }
0x10e9   : > { %10532 = vmatmul.mubr.bf16.vlgmr.msra.gmra.mrb[104].mxu0 %v13103_v58 }
0x10ea   : > { %10542 = vmatpush3.bf16.xpose.msra.mxu0 %v3955_v61  ;;  %10543 = vmatprep.mubr.msk.bf16.mxu0 %vm12100_vm0, %v12099_v0 }
0x10eb   : > { %10553 = vmatprep.subr.bf16.mxu0 %v12099_v0 }
0x10f1   : > { %10544 = vmatmul.mubr.bf16.vlgmr.msra.gmra.mrb[108].mxu0 %v13103_v58 }
0x10f2   : > { %10555 = vmatprep.mubr.msk.bf16.mxu0 %vm12100_vm0, %v12099_v0  ;;  %10554 = vmatpush3.bf16.xpose.msra.mxu0 %v3957_v62 }
0x10f3   : > { %10565 = vmatprep.subr.bf16.mxu0 %v12099_v0 }
0x10f9   : > { %10556 = vmatmul.mubr.bf16.vlgmr.msra.gmra.mrb[112].mxu0 %v13103_v58 }
0x10fa   : > { %10567 = vmatprep.mubr.msk.bf16.mxu0 %vm12100_vm0, %v12099_v0  ;;  %10566 = vmatpush3.bf16.xpose.msra.mxu0 %v3959_v63 }
0x10fb   : > { %10577 = vmatprep.subr.bf16.mxu0 %v12099_v0 }
0x1101   : > { %10568 = vmatmul.mubr.bf16.vlgmr.msra.gmra.mrb[116].mxu0 %v13103_v58 }
0x1102   : > { %10579 = vmatprep.mubr.msk.bf16.mxu0 %vm12100_vm0, %v12099_v0 }
0x11a4   : > { %v3775_v2 = vpop.f32.mrb[92].mxu0 }
0x11a5   : > { %v3776_v23 = vadd.f32 %v9608_v1, %v3775_v2  ;;  %v10483_v4 = vpop.f32.mrb[93].mxu0  ;;  %v3934_v1 = vld [vmem:[#allocation4] sm:$0x3f]  ;;  %v9630_v2 = vld [vmem:[%s1068_s6] ss:$0 sm:$0xff] }
0x11a6   : > { %v3778_v5 = vpop.f32.mrb[94].mxu0 }
0x11a7   : > { %v3781_v6 = vmax.f32 %v3776_v23, 0.0  ;;  %v10484_v7 = vpop.f32.mrb[95].mxu0 }
0x11a9   : > { %v3782_v8 = vpack.c.bf16 %v3781_v6, %v3781_v6  ;;  %v13207_v6 = vadd.f32 %v9630_v2, %v3934_v1 }
0x11ab   : > { %10502 = vmatmul.mubr.bf16.vlgmr.msra.gmra.mrb[108].mxu1 %v3782_v8 }
0x11ac   : > { %10512 = vmatpush3.bf16.xpose.msra.mxu1 %v3950_v9  ;;  %10513 = vmatprep.mubr.msk.bf16.mxu1 %vm12100_vm0, %v12099_v0  ;;  %v4000_v10 = vpop.f32.mrb[96].mxu0 }
0x11ad   : > { %10523 = vmatprep.subr.bf16.mxu1 %v12099_v0  ;;  %v10509_v11 = vpop.f32.mrb[97].mxu0  ;;  %v4126_v26 = vmul.f32 0.35355338, %v4000_v10 }
0x11ae   : > { %v4003_v12 = vpop.f32.mrb[98].mxu0 }
0x11af   : > { %v10510_v13 = vpop.f32.mrb[99].mxu0  ;;  %v4450_v30 = vpack.c.bf16 %v4126_v26, %v4126_v26 }
0x11b3   : > { %10514 = vmatmul.mubr.bf16.vlgmr.msra.gmra.mrb[112].mxu1 %v13103_v58 }
0x11b4   : > { %10524 = vmatpush3.bf16.xpose.msra.mxu1 %v3952_v14  ;;  %v4080_v16 = vpop.f32.mrb[100].mxu0  ;;  %10525 = vmatprep.mubr.msk.bf16.mxu1 %vm12100_vm0, %v12099_v0 }
0x11b5   : > { %v10521_v18 = vpop.f32.mrb[101].mxu0  ;;  %10535 = vmatprep.subr.bf16.mxu1 %v12099_v0  ;;  %v4128_v28 = vmul.f32 0.35355338, %v4080_v16 }
0x11b6   : > { %v4083_v3 = vpop.f32.mrb[102].mxu0 }
0x11b7   : > { %v10522_v19 = vpop.f32.mrb[103].mxu0  ;;  %v4452_v36 = vpack.c.bf16 %v4128_v28, %v4128_v28 }
0x11bb   : > { %10526 = vmatmul.mubr.bf16.vlgmr.msra.gmra.mrb[116].mxu1 %v13103_v58 }
0x11bc   : > { %v4164_v21 = vpop.f32.mrb[104].mxu0  ;;  %10536 = vmatpush3.bf16.xpose.msra.mxu1 %v3954_v20  ;;  %10537 = vmatprep.mubr.msk.bf16.mxu1 %vm12100_vm0, %v12099_v0 }
0x11bd   : > { %v4454_v22 = vpack.c.bf16 %v4164_v21, %v4164_v21  ;;  %v10533_v24 = vpop.f32.mrb[105].mxu0  ;;  %10547 = vmatprep.subr.bf16.mxu1 %v12099_v0 }
0x11be   : > { %v4167_v25 = vpop.f32.mrb[106].mxu0 }
0x11bf   : > { %v4462_v27 = vsel %vm1600_vm1, %v4454_v22, 0  ;;  %v10534_v29 = vpop.f32.mrb[107].mxu0 }
0x11c0   : > { %10578 = vmatpush3.bf16.xpose.msra.mxu0 %v4462_v27 }
0x11c1   : > { %10589 = vmatprep.subr.bf16.mxu0 %v12099_v0 }
0x11c3   : > { %10538 = vmatmul.mubr.bf16.vlgmr.msra.gmra.mrb[120].mxu1 %v13103_v58 }
0x11c4   : > { %v4244_v31 = vpop.f32.mrb[108].mxu0  ;;  %10548 = vmatpush3.bf16.xpose.msra.mxu1 %v3956_v15  ;;  %10549 = vmatprep.mubr.msk.bf16.mxu1 %vm12100_vm0, %v12099_v0 }
0x11c5   : > { %v4456_v32 = vpack.c.bf16 %v4244_v31, %v4244_v31  ;;  %10559 = vmatprep.subr.bf16.mxu1 %v12099_v0  ;;  %v10545_v33 = vpop.f32.mrb[109].mxu0 }
0x11c6   : > { %v4247_v17 = vpop.f32.mrb[110].mxu0 }
0x11c7   : > { %v4554_v34 = vsel %vm1600_vm1, %v4456_v32, 0  ;;  %10580 = vmatmul.mubr.msk.bf16.vlgmr.msra.gmra.mrb[120].mxu0 %vm1600_vm1, %v4450_v30  ;;  %v10546_v35 = vpop.f32.mrb[111].mxu0 }
0x11c8   : > { %10590 = vmatpush3.bf16.xpose.msra.mxu0 %v4554_v34  ;;  %10591 = vmatprep.mubr.msk.bf16.mxu0 %vm12100_vm0, %v12099_v0 }
0x11c9   : > { %10601 = vmatprep.subr.bf16.mxu0 %v12099_v0 }
0x11cb   : > { %10550 = vmatmul.mubr.bf16.vlgmr.msra.gmra.mrb[124].mxu1 %v13103_v58 }
0x11cc   : > { %10561 = vmatprep.mubr.msk.bf16.mxu1 %vm12100_vm0, %v12099_v0  ;;  %10560 = vmatpush3.bf16.xpose.msra.mxu1 %v3958_v37  ;;  %v4324_v39 = vpop.f32.mrb[112].mxu0 }
0x11cd   : > { %10571 = vmatprep.subr.bf16.mxu1 %v12099_v0  ;;  %v4691_v40 = vpack.c.bf16 %v4324_v39, %v4324_v39  ;;  %v10557_v41 = vpop.f32.mrb[113].mxu0 }
0x11ce   : > { %v4327_v42 = vpop.f32.mrb[114].mxu0 }
0x11cf   : > { %10592 = vmatmul.mubr.msk.bf16.vlgmr.msra.gmra.mrb[124].mxu0 %vm1600_vm1, %v4452_v36  ;;  %v4701_v43 = vsel %vm4699_vm4, %v4691_v40, 0  ;;  %v10558_v44 = vpop.f32.mrb[115].mxu0 }
0x11d0   : > { %10603 = vmatprep.mubr.msk.bf16.mxu0 %vm12100_vm0, %v12099_v0  ;;  %10602 = vmatpush3.bf16.msra.mxu0 %v4701_v43 }
0x11d1   : > { %10613 = vmatprep.subr.bf16.mxu0 %v12099_v0 }
0x11d3   : > { %10562 = vmatmul.mubr.bf16.vlgmr.msra.gmra.mrb[128].mxu1 %v13103_v58 }
0x11d4   : > { %10572 = vmatpush3.bf16.xpose.msra.mxu1 %v3960_v38  ;;  %10573 = vmatprep.mubr.msk.bf16.mxu1 %vm12100_vm0, %v12099_v0  ;;  %v13196_v45 = vpop.f32.mrb[116].mxu0 }
0x11d5   : > { %10583 = vmatprep.subr.bf16.mxu1 %v12099_v0  ;;  %v10569_v46 = vpop.f32.mrb[117].mxu0 }
0x11d6   : > { %v4407_v47 = vpop.f32.mrb[118].mxu0 }
0x11d7   : > { %v10570_v48 = vpop.f32.mrb[119].mxu0 }
0x11db   : > { %10574 = vmatmul.mubr.bf16.vlgmr.msra.gmra.mrb[132].mxu1 %v13103_v58 }
0x11dc   : > { %10585 = vmatprep.mubr.msk.bf16.mxu1 %vm12100_vm0, %v12099_v0 }
0x127e   : > { %v13201_v49 = vpop.f32.mrb[108].mxu1 }
0x127f   : > { %v10503_v51 = vpop.f32.mrb[109].mxu1 }
0x1280   : > { %v3874_v52 = vpop.f32.mrb[110].mxu1 }
0x1281   : > { %v10504_v53 = vpop.f32.mrb[111].mxu1 }
0x1282   : > { %v9617_v53 = vld [vmem:[#allocation10 + $0x1] ss:$0 sm:$0xff] }
0x1286   : > { %v4040_v55 = vpop.f32.mrb[112].mxu1 }
0x1287   : > { %v10515_v56 = vpop.f32.mrb[113].mxu1  ;;  %v4127_v11 = vmul.f32 0.35355338, %v4040_v55 }
0x1288   : > { %v4043_v59 = vpop.f32.mrb[114].mxu1  ;;  %v3872_v56 = vadd.f32 %v9617_v53, %v13201_v49 }
0x1289   : > { %v10516_v60 = vpop.f32.mrb[115].mxu1  ;;  %v4451_v19 = vpack.c.bf16 %v4127_v11, %v4127_v11  ;;  %v4693_v11 = vpack.c.bf16 %v13196_v45, %v13196_v45 }
0x128a   : > { %v3877_v60 = vadd.f32 %v3872_v56, %v13085_v54 }
0x128e   : > { %v4120_v61 = vpop.f32.mrb[116].mxu1 }
0x128f   : > { %v10527_v62 = vpop.f32.mrb[117].mxu1  ;;  %v4129_v27 = vmul.f32 0.35355338, %v4120_v61 }
0x1290   : > { %v4123_v63 = vpop.f32.mrb[118].mxu1 }
0x1291   : > { %v10528_v58 = vpop.f32.mrb[119].mxu1  ;;  %v4453_v33 = vpack.c.bf16 %v4129_v27, %v4129_v27 }
0x1296   : > { %v4204_v23 = vpop.f32.mrb[120].mxu1 }
0x1297   : > { %v4455_v4 = vpack.c.bf16 %v4204_v23, %v4204_v23  ;;  %v10539_v5 = vpop.f32.mrb[121].mxu1 }
0x1298   : > { %v4207_v7 = vpop.f32.mrb[122].mxu1 }
0x1299   : > { %v4508_v8 = vsel %vm1600_vm1, %v4455_v4, 0  ;;  %v10540_v9 = vpop.f32.mrb[123].mxu1 }
0x129a   : > { %v4498_v10 = vpop.f32.mrb[120].mxu0  ;;  %10584 = vmatpush3.bf16.xpose.msra.mxu1 %v4508_v8 }
0x129b   : > { %v4499_v12 = vadd.f32 %v4498_v10, %v13207_v6  ;;  %v10581_v13 = vpop.f32.mrb[121].mxu0  ;;  %10595 = vmatprep.subr.bf16.mxu1 %v12099_v0 }
0x129c   : > { %v4501_v14 = vpop.f32.mrb[122].mxu0 }
0x129d   : > { %v4643_v16 = vsel %vm4642_vm5, %v4499_v12, -inf  ;;  %v10582_v18 = vpop.f32.mrb[123].mxu0  ;;  %v4793_v14 = vsel %vm4699_vm4, %v4693_v11, 0 }
0x129e   : > { %4644 = vmax.xlane.f32.xlu0 %v4643_v16  ;;  %v4284_v3 = vpop.f32.mrb[124].mxu1 }
0x129f   : > { %v4457_v20 = vpack.c.bf16 %v4284_v3, %v4284_v3  ;;  %v10551_v21 = vpop.f32.mrb[125].mxu1 }
0x12a0   : > { %v4287_v22 = vpop.f32.mrb[126].mxu1 }
0x12a1   : > { %v4600_v24 = vsel %vm1600_vm1, %v4457_v20, 0  ;;  %v10552_v25 = vpop.f32.mrb[127].mxu1  ;;  %10586 = vmatmul.mubr.msk.bf16.vlgmr.msra.gmra.mrb[136].mxu1 %vm1600_vm1, %v4451_v19 }
0x12a2   : > { %v4590_v26 = vpop.f32.mrb[124].mxu0  ;;  %10596 = vmatpush3.bf16.xpose.msra.mxu1 %v4600_v24  ;;  %10597 = vmatprep.mubr.msk.bf16.mxu1 %vm12100_vm0, %v12099_v0 }
0x12a3   : > { %v4591_v29 = vadd.f32 %v4590_v26, %v13207_v6  ;;  %v10593_v15 = vpop.f32.mrb[125].mxu0  ;;  %10607 = vmatprep.subr.bf16.mxu1 %v12099_v0 }
0x12a4   : > { %v4593_v30 = vpop.f32.mrb[126].mxu0 }
0x12a5   : > { %v4649_v31 = vsel %vm4642_vm5, %v4591_v29, -inf  ;;  %v10594_v32 = vpop.f32.mrb[127].mxu0 }
0x12a6   : > { %4650 = vmax.xlane.f32.xlu0 %v4649_v31  ;;  %v4364_v17 = vpop.f32.mrb[128].mxu1 }
0x12a7   : > { %v4692_v28 = vpack.c.bf16 %v4364_v17, %v4364_v17  ;;  %v10563_v34 = vpop.f32.mrb[129].mxu1  ;;  %v3961_v17 = vld [vmem:[#allocation13] sm:$0xf] }
0x12a8   : > { %v4367_v35 = vpop.f32.mrb[130].mxu1 }
0x12a9   : > { %10598 = vmatmul.mubr.msk.bf16.vlgmr.msra.gmra.mrb[140].mxu1 %vm1600_vm1, %v4453_v33  ;;  %v4747_v36 = vsel %vm4699_vm4, %v4692_v28, 0  ;;  %v10564_v37 = vpop.f32.mrb[131].mxu1  ;;  %v4889_v28 = vsel %vm1840_vm2, %v3961_v17, 0  ;;  %v3963_v35 = vld [vmem:[#allocation13 + $0x8] sm:$0xf] }
0x12aa   : > { %10609 = vmatprep.mubr.msk.bf16.mxu1 %vm12100_vm0, %v12099_v0  ;;  %10608 = vmatpush3.bf16.msra.mxu1 %v4747_v36 }
0x12ab   : > { %10619 = vmatprep.subr.bf16.mxu1 %v12099_v0 }
0x12ae   : > { %v13225_v38 = vpop.f32.mrb[132].mxu1 }
0x12af   : > { %v10575_v39 = vpop.f32.mrb[133].mxu1 }
0x12b0   : > { %v4447_v40 = vpop.f32.mrb[134].mxu1 }
0x12b1   : > { %v10576_v41 = vpop.f32.mrb[135].mxu1 }
0x12b2   : > { %v4981_v41 = vsel %vm1840_vm2, %v3963_v35, 0 }
0x132b   : > { %v4645_v42 = vpop.xlane.xlu0 %4644 }
0x132c   : > { %v4655_v43 = vsub.f32 %v4499_v12, %v4645_v42 }
0x132e   : > { %v4659_v44 = vmul.f32 1.442695, %v4655_v43 }
0x1330   : > { %11476 = vpow2.f32 %v4659_v44  ;;  %v4694_v44 = vpack.c.bf16 %v13225_v38, %v13225_v38 }
0x1333   : > { %v4651_v46 = vpop.xlane.xlu0 %4650 }
0x1334   : > { %v4657_v47 = vsub.f32 %v4591_v29, %v4651_v46 }
0x1336   : > { %v4663_v48 = vmul.f32 1.442695, %v4657_v47 }
0x1338   : > { %11478 = vpow2.f32 %v4663_v48 }
0x133a   : > { %v11477_v51 = vpop.eup %11476 }
0x133b   : > { %v4667_v52 = vsel %vm4642_vm5, %v11477_v51, 0.0 }
0x133c   : > { %4668 = vadd.xlane.f32.xlu0 %v4667_v52 }
0x1342   : > { %v11479_v55 = vpop.eup %11478 }
0x1343   : > { %v4673_v59 = vsel %vm4642_vm5, %v11479_v55, 0.0 }
0x1344   : > { %4674 = vadd.xlane.f32.xlu0 %v4673_v59 }
0x1348   : > { %3878 = vadd.xlane.f32.xlu0 %v3877_v60 }
0x1374   : > { %v4544_v61 = vpop.f32.mrb[136].mxu1 }
0x1375   : > { %v4545_v62 = vadd.f32 %v4544_v61, %v13207_v6  ;;  %v10587_v63 = vpop.f32.mrb[137].mxu1 }
0x1376   : > { %v4547_v58 = vpop.f32.mrb[138].mxu1 }
0x1377   : > { %v10588_v1 = vpop.f32.mrb[139].mxu1  ;;  %v4646_v2 = vsel %vm4642_vm5, %v4545_v62, -inf }
0x1378   : > { %4647 = vmax.xlane.f32.xlu1 %v4646_v2  ;;  %v9626_v2 = vld [vmem:[%s13951_s7 + $0x6] ss:$0 sm:$0xff] }
0x137c   : > { %v4636_v23 = vpop.f32.mrb[140].mxu1 }
0x137d   : > { %v4637_v4 = vadd.f32 %v4636_v23, %v13207_v6  ;;  %v10599_v5 = vpop.f32.mrb[141].mxu1 }
0x137e   : > { %v4639_v49 = vpop.f32.mrb[142].mxu1 }
0x137f   : > { %v10600_v7 = vpop.f32.mrb[143].mxu1  ;;  %v4652_v8 = vsel %vm4642_vm5, %v4637_v4, -inf }
0x1380   : > { %4653 = vmax.xlane.f32.xlu1 %v4652_v8  ;;  %v3962_v7 = vld [vmem:[#allocation13 + $0x4] sm:$0xf] }
0x1381   : > { %v4935_v8 = vsel %vm1840_vm2, %v3962_v7, 0  ;;  %v9644_v7 = vld [vmem:[#allocation22 + $0x1] ss:$0 sm:$0xff] }
0x13c9   : > { %v4669_v54 = vpop.xlane.xlu0 %4668 }
0x13ca   : > { %11480 = vrcp.f32 %v4669_v54 }
0x13d1   : > { %v4675_v9 = vpop.xlane.xlu0 %4674 }
0x13d2   : > { %11482 = vrcp.f32 %v4675_v9 }
0x13d4   : > { %v11481_v10 = vpop.eup %11480 }
0x13d5   : > { %v4680_v12 = vmul.f32 %v11481_v10, %v11477_v51  ;;  %v3879_v25 = vpop.xlane.xlu0 %3878 }
0x13d6   : > { %v3880_v27 = vmul.f32 0.03125, %v3879_v25 }
0x13d7   : > { %v4687_v13 = vpack.c.bf16 %v4680_v12, %v4680_v12 }
0x13d8   : > { %v3881_v15 = vsub.f32 %v3877_v60, %v3880_v27 }
0x13d9   : > { %10604 = vmatmul.mubr.msk.bf16.vlgmr.msra.gmra.mrb[128].mxu0 %vm4695_vm6, %v4687_v13 }
0x13da   : > { %10614 = vmatpush3.bf16.msra.mxu0 %v4793_v14  ;;  %10615 = vmatprep.mubr.msk.bf16.mxu0 %vm12100_vm0, %v12099_v0  ;;  %v3882_v32 = vsel %vm1076_vm3, %v3881_v15, 0.0 }
0x13db   : > { %10625 = vmatprep.subr.bf16.mxu0 %v12099_v0  ;;  %v3883_v33 = vmul.f32 %v3882_v32, %v3882_v32 }
0x13dc   : > { %v11483_v16 = vpop.eup %11482 }
0x13dd   : > { %v4684_v18 = vmul.f32 %v11483_v16, %v11479_v55  ;;  %v4839_v55 = vsel %vm4699_vm4, %v4694_v44, 0 }
0x13df   : > { %v4689_v3 = vpack.c.bf16 %v4684_v18, %v4684_v18  ;;  %v3964_v18 = vld [vmem:[#allocation13 + $0xc] sm:$0xf] }
0x13e1   : > { %10616 = vmatmul.mubr.msk.bf16.vlgmr.msra.gmra.mrb[132].mxu0 %vm4695_vm6, %v4689_v3 }
0x13e2   : > { %10627 = vmatprep.mubr.msk.bf16.mxu0 %vm12100_vm0, %v12099_v0  ;;  %10626 = vmatpush3.bf16.msra.mxu0 %v4889_v28 }
0x13e3   : > { %10637 = vmatprep.subr.bf16.mxu0 %v12099_v0 }
0x1405   : > { %v4648_v45 = vpop.xlane.xlu1 %4647 }
0x1406   : > { %v4656_v19 = vsub.f32 %v4545_v62, %v4648_v45 }
0x1408   : > { %v4661_v20 = vmul.f32 1.442695, %v4656_v19 }
0x140a   : > { %11484 = vpow2.f32 %v4661_v20 }
0x140d   : > { %v4654_v21 = vpop.xlane.xlu1 %4653 }
0x140e   : > { %v4658_v22 = vsub.f32 %v4637_v4, %v4654_v21  ;;  %v9627_v4 = vld [vmem:[%s13951_s7 + $0x7] ss:$0 sm:$0xff]  ;;  %v5027_v21 = vsel %vm1840_vm2, %v3964_v18, 0 }
0x1410   : > { %v4665_v24 = vmul.f32 1.442695, %v4658_v22 }
0x1412   : > { %11486 = vpow2.f32 %v4665_v24 }
0x1414   : > { %v11485_v26 = vpop.eup %11484 }
0x1415   : > { %v4670_v29 = vsel %vm4642_vm5, %v11485_v26, 0.0 }
0x1416   : > { %4671 = vadd.xlane.f32.xlu1 %v4670_v29 }
0x141c   : > { %v11487_v30 = vpop.eup %11486 }
0x141d   : > { %v4676_v31 = vsel %vm4642_vm5, %v11487_v30, 0.0 }
0x141e   : > { %4677 = vadd.xlane.f32.xlu1 %v4676_v31 }
0x1422   : > { %3884 = vadd.xlane.f32.xlu1 %v3883_v33 }
0x14a3   : > { %v4672_v34 = vpop.xlane.xlu1 %4671 }
0x14a4   : > { %11488 = vrcp.f32 %v4672_v34 }
0x14ab   : > { %v4678_v36 = vpop.xlane.xlu1 %4677 }
0x14ac   : > { %11490 = vrcp.f32 %v4678_v36  ;;  %v4737_v37 = vpop.f32.mrb[128].mxu0 }
0x14ad   : > { %v4881_v39 = vpack.c.bf16 %v4737_v37, %v4737_v37  ;;  %v10605_v40 = vpop.f32.mrb[129].mxu0 }
0x14ae   : > { %v11489_v42 = vpop.eup %11488  ;;  %v4740_v43 = vpop.f32.mrb[130].mxu0 }
0x14af   : > { %v4682_v46 = vmul.f32 %v11489_v42, %v11485_v26  ;;  %v10606_v47 = vpop.f32.mrb[131].mxu0  ;;  %10628 = vmatmul.mubr.msk.bf16.vlgmr.msra.gmra.mrb[136].mxu0 %vm1600_vm1, %v4881_v39  ;;  %v3885_v48 = vpop.xlane.xlu1 %3884 }
0x14b0   : > { %v3886_v51 = vmul.f32 0.03125, %v3885_v48  ;;  %10638 = vmatpush3.bf16.msra.mxu0 %v4981_v41  ;;  %10639 = vmatprep.mubr.msk.bf16.mxu0 %vm12100_vm0, %v12099_v0 }
0x14b1   : > { %v4688_v52 = vpack.c.bf16 %v4682_v46, %v4682_v46  ;;  %10649 = vmatprep.subr.bf16.mxu0 %v12099_v0 }
0x14b2   : > { %v3887_v53 = vadd.f32 1e-05, %v3886_v51 }
0x14b3   : > { %10610 = vmatmul.mubr.msk.bf16.vlgmr.msra.gmra.mrb[144].mxu1 %vm4695_vm6, %v4688_v52 }
0x14b4   : > { %11492 = vrsqrt.f32 %v3887_v53  ;;  %10620 = vmatpush3.bf16.msra.mxu1 %v4839_v55  ;;  %v4829_v38 = vpop.f32.mrb[132].mxu0  ;;  %10621 = vmatprep.mubr.msk.bf16.mxu1 %vm12100_vm0, %v12099_v0 }
0x14b5   : > { %v4883_v56 = vpack.c.bf16 %v4829_v38, %v4829_v38  ;;  %v10617_v59 = vpop.f32.mrb[133].mxu0  ;;  %10631 = vmatprep.subr.bf16.mxu1 %v12099_v0 }
0x14b6   : > { %v11491_v60 = vpop.eup %11490  ;;  %v4832_v61 = vpop.f32.mrb[134].mxu0 }
0x14b7   : > { %v4686_v62 = vmul.f32 %v11491_v60, %v11487_v30  ;;  %v10618_v63 = vpop.f32.mrb[135].mxu0  ;;  %10640 = vmatmul.mubr.msk.bf16.vlgmr.msra.gmra.mrb[140].mxu0 %vm1600_vm1, %v4883_v56  ;;  %v5106_v61 = vld [vmem:[#allocation15] sm:$0xf] }
0x14b8   : > { %10651 = vmatprep.mubr.msk.bf16.mxu0 %vm12100_vm0, %v12099_v0 }
0x14b9   : > { %v4690_v58 = vpack.c.bf16 %v4686_v62, %v4686_v62  ;;  %v5107_v62 = vld [vmem:[#allocation15 + $0x4] sm:$0xf]  ;;  %10650 = vmatpush3.bf16.xpose.msra.mxu0 %v5106_v61 }
0x14ba   : > { %10661 = vmatprep.subr.bf16.mxu0 %v12099_v0 }
0x14bb   : > { %10622 = vmatmul.mubr.msk.bf16.vlgmr.msra.gmra.mrb[148].mxu1 %vm4695_vm6, %v4690_v58 }
0x14bc   : > { %10633 = vmatprep.mubr.msk.bf16.mxu1 %vm12100_vm0, %v12099_v0  ;;  %10632 = vmatpush3.bf16.msra.mxu1 %v4935_v8 }
0x14bd   : > { %10643 = vmatprep.subr.bf16.mxu1 %v12099_v0 }
0x14be   : > { %v11493_v1 = vpop.eup %11492 }
0x14bf   : > { %v3889_v23 = vmul.f32 %v11493_v1, %v3882_v32 }
0x14c1   : > { %v3896_v5 = vmul.f32 %v9626_v2, %v3889_v23 }
0x14c3   : > { %v3903_v49 = vadd.f32 %v9627_v4, %v3896_v5  ;;  %v9643_v5 = vld [vmem:[#allocation22] ss:$0 sm:$0xff] }
0x14c5   : > { %3907 = vadd.xlane.f32.xlu1 %v3903_v49 }
0x1552   : > { %v3908_v54 = vpop.xlane.xlu1 %3907 }
0x1553   : > { %v3909_v9 = vmul.f32 0.03125, %v3908_v54 }
0x1555   : > { %v3910_v10 = vsub.f32 %v3903_v49, %v3909_v9 }
0x1557   : > { %v13279_v11 = vsel %vm1076_vm3, %v3910_v10, 0.0  ;;  %v5108_v10 = vld [vmem:[#allocation15 + $0x8] sm:$0xf] }
0x1558   : > { %v3912_v12 = vmul.f32 %v13279_v11, %v13279_v11 }
0x155a   : > { %3913 = vadd.xlane.f32.xlu1 %v3912_v12  ;;  %v5109_v12 = vld [vmem:[#allocation15 + $0xc] sm:$0xf] }
0x1582   : > { %v4925_v13 = vpop.f32.mrb[136].mxu0 }
0x1583   : > { %v10629_v14 = vpop.f32.mrb[137].mxu0  ;;  %v5070_v28 = vsel %vm5069_vm7, %v4925_v13, 0.0 }
0x1584   : > { %v4928_v16 = vpop.f32.mrb[138].mxu0 }
0x1585   : > { %v10630_v3 = vpop.f32.mrb[139].mxu0  ;;  %v9628_v16 = vld [vmem:[#allocation12] ss:$0 sm:$0xff] }
0x1586   : > { %v4783_v45 = vpop.f32.mrb[144].mxu1  ;;  %v5110_v3 = vld [vmem:[#allocation15 + $0x10] sm:$0xf] }
0x1587   : > { %v4882_v19 = vpack.c.bf16 %v4783_v45, %v4783_v45  ;;  %v10611_v20 = vpop.f32.mrb[145].mxu1  ;;  %v5111_v45 = vld [vmem:[#allocation15 + $0x14] sm:$0xf] }
0x1588   : > { %v4786_v22 = vpop.f32.mrb[146].mxu1 }
0x1589   : > { %v10612_v24 = vpop.f32.mrb[147].mxu1  ;;  %10634 = vmatmul.mubr.msk.bf16.vlgmr.msra.gmra.mrb[152].mxu1 %vm1600_vm1, %v4882_v19  ;;  %v9629_v19 = vld [vmem:[#allocation12 + $0x1] ss:$0 sm:$0xff] }
0x158a   : > { %v5017_v25 = vpop.f32.mrb[140].mxu0  ;;  %10644 = vmatpush3.bf16.msra.mxu1 %v5027_v21  ;;  %10645 = vmatprep.mubr.msk.bf16.mxu1 %vm12100_vm0, %v12099_v0  ;;  %v5112_v21 = vld [vmem:[#allocation15 + $0x18] sm:$0xf]  ;;  %v5113_v22 = vld [vmem:[#allocation15 + $0x1c] sm:$0xf] }
0x158b   : > { %v10641_v26 = vpop.f32.mrb[141].mxu0  ;;  %10655 = vmatprep.subr.bf16.mxu1 %v12099_v0  ;;  %v5073_v39 = vsel %vm5069_vm7, %v5017_v25, 0.0  ;;  %v5114_v24 = vld [vmem:[#allocation15 + $0x20] sm:$0xf]  ;;  %v5115_v25 = vld [vmem:[#allocation15 + $0x24] sm:$0xf] }
0x158c   : > { %v5020_v27 = vpop.f32.mrb[142].mxu0  ;;  %v5116_v26 = vld [vmem:[#allocation15 + $0x28] sm:$0xf] }
0x158d   : > { %v10642_v29 = vpop.f32.mrb[143].mxu0  ;;  %v5117_v27 = vld [vmem:[#allocation15 + $0x2c] sm:$0xf] }
0x158e   : > { %v4875_v15 = vpop.f32.mrb[148].mxu1 }
0x158f   : > { %v4884_v30 = vpack.c.bf16 %v4875_v15, %v4875_v15  ;;  %v10623_v31 = vpop.f32.mrb[149].mxu1 }
0x1590   : > { %v4878_v32 = vpop.f32.mrb[150].mxu1 }
0x1591   : > { %v10624_v33 = vpop.f32.mrb[151].mxu1  ;;  %10646 = vmatmul.mubr.msk.bf16.vlgmr.msra.gmra.mrb[156].mxu1 %vm1600_vm1, %v4884_v30 }
0x1592   : > { %10657 = vmatprep.mubr.msk.bf16.mxu1 %vm12100_vm0, %v12099_v0 }
0x1593   : > { %10656 = vmatpush3.bf16.xpose.msra.mxu1 %v5107_v62 }
0x1594   : > { %10667 = vmatprep.subr.bf16.mxu1 %v12099_v0 }
0x15e7   : > { %v3914_v58 = vpop.xlane.xlu1 %3913 }
0x15e8   : > { %v3915_v2 = vmul.f32 0.03125, %v3914_v58 }
0x15ea   : > { %v3916_v23 = vadd.f32 1e-05, %v3915_v2 }
0x165c   : > { %v4971_v17 = vpop.f32.mrb[152].mxu1 }
0x165d   : > { %v5071_v34 = vsel %vm5069_vm7, %v4971_v17, 0.0  ;;  %v10635_v35 = vpop.f32.mrb[153].mxu1 }
0x165e   : > { %v5072_v36 = vadd.f32 %v5071_v34, %v5070_v28  ;;  %v4974_v37 = vpop.f32.mrb[154].mxu1 }
0x165f   : > { %v10636_v40 = vpop.f32.mrb[155].mxu1 }
0x1660   : > { %v5074_v41 = vadd.f32 %v5073_v39, %v5072_v36 }
0x1664   : > { %v5063_v42 = vpop.f32.mrb[156].mxu1 }
0x1665   : > { %v5075_v43 = vsel %vm5069_vm7, %v5063_v42, 0.0  ;;  %v10647_v44 = vpop.f32.mrb[157].mxu1 }
0x1666   : > { %v5076_v46 = vadd.f32 %v5075_v43, %v5074_v41  ;;  %v5066_v47 = vpop.f32.mrb[158].mxu1 }
0x1667   : > { %v10648_v48 = vpop.f32.mrb[159].mxu1 }
0x1668   : > { %v5077_v51 = vadd.f32 %v5076_v46, %v13098_v57 }
0x166a   : > { %v5078_v52 = vsel %vm5069_vm7, %v5077_v51, 0.0 }
0x166b   : > { %5079 = vadd.xlane.f32.xlu0 %v5078_v52 }
0x16f8   : > { %v5080_v53 = vpop.xlane.xlu0 %5079 }
0x16f9   : > { %v5081_v55 = vmul.f32 0.03125, %v5080_v53 }
0x16fb   : > { %v5082_v38 = vsub.f32 %v5077_v51, %v5081_v55 }
0x16fd   : > { %v5083_v56 = vsel %vm1076_vm3, %v5082_v38, 0.0 }
0x16fe   : > { %v5084_v59 = vmul.f32 %v5083_v56, %v5083_v56 }
0x1700   : > { %v5085_v60 = vsel %vm5069_vm7, %v5084_v59, 0.0 }
0x1701   : > { %5086 = vadd.xlane.f32.xlu0 %v5085_v60 }
0x178e   : > { %v5087_v57 = vpop.xlane.xlu0 %5086 }
0x178f   : > { %v5088_v63 = vmul.f32 0.03125, %v5087_v57 }
0x1791   : > { %v5089_v1 = vadd.f32 1e-05, %v5088_v63 }
0x1793   : > { %11494 = vrsqrt.f32 %v5089_v1 }
0x1794   : > { %11496 = vrsqrt.f32 %v3916_v23 }
0x179d   : > { %v11495_v4 = vpop.eup %11494 }
0x179e   : > { %v5091_v49 = vmul.f32 %v11495_v4, %v5083_v56  ;;  %v11497_v13 = vpop.eup %11496 }
0x179f   : > { %v3918_v14 = vmul.f32 %v11497_v13, %v13279_v11 }
0x17a0   : > { %v5098_v8 = vmul.f32 %v9643_v5, %v5091_v49 }
0x17a1   : > { %v3925_v18 = vmul.f32 %v9628_v16, %v3918_v14 }
0x17a2   : > { %v13302_v54 = vadd.f32 %v9644_v7, %v5098_v8 }
0x17a3   : > { %v3932_v11 = vadd.f32 %v9629_v19, %v3925_v18 }
0x17a4   : > { %v5122_v9 = vpack.c.bf16 %v13302_v54, %v13302_v54 }
0x17a5   : > { %v13319_v20 = vpack.c.bf16 %v3932_v11, %v3932_v11 }
0x17a6   : > { %10652 = vmatmul.mubr.bf16.vlgmr.msra.gmra.mrb[144].mxu0 %v5122_v9  ;;  %10658 = vmatmul.mubr.bf16.vlgmr.msra.gmra.mrb[160].mxu1 %v5122_v9 }
0x17a7   : > { %10662 = vmatpush3.bf16.xpose.msra.mxu0 %v5108_v10  ;;  %10668 = vmatpush3.bf16.xpose.msra.mxu1 %v5109_v12 }
0x17a8   : > { %10663 = vmatprep.mubr.msk.bf16.mxu0 %vm12100_vm0, %v12099_v0  ;;  %10669 = vmatprep.mubr.msk.bf16.mxu1 %vm12100_vm0, %v12099_v0 }
0x17a9   : > { %10673 = vmatprep.subr.bf16.mxu0 %v12099_v0  ;;  %10679 = vmatprep.subr.bf16.mxu1 %v12099_v0 }
0x17ae   : > { %10664 = vmatmul.mubr.bf16.vlgmr.msra.gmra.mrb[148].mxu0 %v5122_v9  ;;  %10670 = vmatmul.mubr.bf16.vlgmr.msra.gmra.mrb[164].mxu1 %v5122_v9 }
0x17af   : > { %10674 = vmatpush3.bf16.xpose.msra.mxu0 %v5110_v3  ;;  %10680 = vmatpush3.bf16.xpose.msra.mxu1 %v5111_v45 }
0x17b0   : > { %10675 = vmatprep.mubr.msk.bf16.mxu0 %vm12100_vm0, %v12099_v0  ;;  %10681 = vmatprep.mubr.msk.bf16.mxu1 %vm12100_vm0, %v12099_v0 }
0x17b1   : > { %10685 = vmatprep.subr.bf16.mxu0 %v12099_v0  ;;  %10691 = vmatprep.subr.bf16.mxu1 %v12099_v0 }
0x17b6   : > { %10676 = vmatmul.mubr.bf16.vlgmr.msra.gmra.mrb[152].mxu0 %v13319_v20  ;;  %10682 = vmatmul.mubr.bf16.vlgmr.msra.gmra.mrb[168].mxu1 %v13319_v20 }
0x17b7   : > { %10686 = vmatpush3.bf16.xpose.msra.mxu0 %v5112_v21  ;;  %10692 = vmatpush3.bf16.xpose.msra.mxu1 %v5113_v22 }
0x17b8   : > { %10687 = vmatprep.mubr.msk.bf16.mxu0 %vm12100_vm0, %v12099_v0  ;;  %10693 = vmatprep.mubr.msk.bf16.mxu1 %vm12100_vm0, %v12099_v0 }
0x17b9   : > { %10697 = vmatprep.subr.bf16.mxu0 %v12099_v0  ;;  %10703 = vmatprep.subr.bf16.mxu1 %v12099_v0 }
0x17be   : > { %10688 = vmatmul.mubr.bf16.vlgmr.msra.gmra.mrb[156].mxu0 %v13319_v20  ;;  %10694 = vmatmul.mubr.bf16.vlgmr.msra.gmra.mrb[172].mxu1 %v13319_v20 }
0x17bf   : > { %10698 = vmatpush3.bf16.xpose.msra.mxu0 %v5114_v24  ;;  %10704 = vmatpush3.bf16.xpose.msra.mxu1 %v5115_v25 }
0x17c0   : > { %10699 = vmatprep.mubr.msk.bf16.mxu0 %vm12100_vm0, %v12099_v0  ;;  %10705 = vmatprep.mubr.msk.bf16.mxu1 %vm12100_vm0, %v12099_v0 }
0x17c1   : > { %10709 = vmatprep.subr.bf16.mxu0 %v12099_v0  ;;  %10715 = vmatprep.subr.bf16.mxu1 %v12099_v0 }
0x17c6   : > { %10700 = vmatmul.mubr.bf16.vlgmr.msra.gmra.mrb[160].mxu0 %v13319_v20  ;;  %10706 = vmatmul.mubr.bf16.vlgmr.msra.gmra.mrb[176].mxu1 %v13319_v20 }
0x17c7   : > { %10710 = vmatpush3.bf16.xpose.msra.mxu0 %v5116_v26  ;;  %10716 = vmatpush3.bf16.xpose.msra.mxu1 %v5117_v27 }
0x17c8   : > { %10711 = vmatprep.mubr.msk.bf16.mxu0 %vm12100_vm0, %v12099_v0  ;;  %10717 = vmatprep.mubr.msk.bf16.mxu1 %vm12100_vm0, %v12099_v0 }
0x17c9   : > { %10721 = vmatprep.subr.bf16.mxu0 %v12099_v0  ;;  %10727 = vmatprep.subr.bf16.mxu1 %v12099_v0 }
0x17ce   : > { %10712 = vmatmul.mubr.bf16.vlgmr.msra.gmra.mrb[164].mxu0 %v13319_v20  ;;  %10718 = vmatmul.mubr.bf16.vlgmr.msra.gmra.mrb[180].mxu1 %v13319_v20 }
0x17cf   : > { %10723 = vmatprep.mubr.msk.bf16.mxu0 %vm12100_vm0, %v12099_v0  ;;  %10729 = vmatprep.mubr.msk.bf16.mxu1 %vm12100_vm0, %v12099_v0 }
0x1879   : > { %v5158_v29 = vpop.f32.mrb[144].mxu0  ;;  %v5198_v15 = vpop.f32.mrb[160].mxu1 }
0x187a   : > { %v10653_v30 = vpop.f32.mrb[145].mxu0  ;;  %v10659_v31 = vpop.f32.mrb[161].mxu1  ;;  %v5284_v60 = vmul.f32 0.35355338, %v5158_v29  ;;  %v5285_v61 = vmul.f32 0.35355338, %v5198_v15 }
0x187b   : > { %v5161_v32 = vpop.f32.mrb[146].mxu0  ;;  %v5201_v33 = vpop.f32.mrb[162].mxu1 }
0x187c   : > { %v10654_v17 = vpop.f32.mrb[147].mxu0  ;;  %v10660_v28 = vpop.f32.mrb[163].mxu1  ;;  %v5608_v63 = vpack.c.bf16 %v5284_v60, %v5284_v60  ;;  %v5609_v58 = vpack.c.bf16 %v5285_v61, %v5285_v61 }
0x1881   : > { %v5238_v34 = vpop.f32.mrb[148].mxu0  ;;  %v5278_v35 = vpop.f32.mrb[164].mxu1 }
0x1882   : > { %v10665_v36 = vpop.f32.mrb[149].mxu0  ;;  %v10671_v37 = vpop.f32.mrb[165].mxu1  ;;  %v5286_v12 = vmul.f32 0.35355338, %v5238_v34  ;;  %v5287_v13 = vmul.f32 0.35355338, %v5278_v35 }
0x1883   : > { %v5241_v39 = vpop.f32.mrb[150].mxu0  ;;  %v5281_v40 = vpop.f32.mrb[166].mxu1 }
0x1884   : > { %v10666_v41 = vpop.f32.mrb[151].mxu0  ;;  %v10672_v42 = vpop.f32.mrb[167].mxu1  ;;  %v5610_v18 = vpack.c.bf16 %v5286_v12, %v5286_v12  ;;  %v5611_v3 = vpack.c.bf16 %v5287_v13, %v5287_v13 }
0x1889   : > { %v5322_v43 = vpop.f32.mrb[152].mxu0  ;;  %v5362_v44 = vpop.f32.mrb[168].mxu1 }
0x188a   : > { %v5612_v46 = vpack.c.bf16 %v5322_v43, %v5322_v43  ;;  %v5613_v47 = vpack.c.bf16 %v5362_v44, %v5362_v44  ;;  %v10677_v48 = vpop.f32.mrb[153].mxu0  ;;  %v10683_v51 = vpop.f32.mrb[169].mxu1 }
0x188b   : > { %v5325_v52 = vpop.f32.mrb[154].mxu0  ;;  %v5365_v53 = vpop.f32.mrb[170].mxu1 }
0x188c   : > { %v5620_v55 = vsel %vm1600_vm1, %v5612_v46, 0  ;;  %v5666_v38 = vsel %vm1600_vm1, %v5613_v47, 0  ;;  %v10678_v56 = vpop.f32.mrb[155].mxu0  ;;  %v10684_v59 = vpop.f32.mrb[171].mxu1 }
0x188d   : > { %10722 = vmatpush3.bf16.xpose.msra.mxu0 %v5620_v55  ;;  %10728 = vmatpush3.bf16.xpose.msra.mxu1 %v5666_v38 }
0x188e   : > { %10733 = vmatprep.subr.bf16.mxu0 %v12099_v0  ;;  %10739 = vmatprep.subr.bf16.mxu1 %v12099_v0 }
0x1891   : > { %v5402_v62 = vpop.f32.mrb[156].mxu0  ;;  %v5442_v57 = vpop.f32.mrb[172].mxu1 }
0x1892   : > { %v5614_v1 = vpack.c.bf16 %v5402_v62, %v5402_v62  ;;  %v5615_v2 = vpack.c.bf16 %v5442_v57, %v5442_v57  ;;  %v10689_v23 = vpop.f32.mrb[157].mxu0  ;;  %v10695_v4 = vpop.f32.mrb[173].mxu1 }
0x1893   : > { %v5405_v5 = vpop.f32.mrb[158].mxu0  ;;  %v5445_v49 = vpop.f32.mrb[174].mxu1 }
0x1894   : > { %v5712_v7 = vsel %vm1600_vm1, %v5614_v1, 0  ;;  %v5758_v8 = vsel %vm1600_vm1, %v5615_v2, 0  ;;  %v10690_v9 = vpop.f32.mrb[159].mxu0  ;;  %v10696_v10 = vpop.f32.mrb[175].mxu1  ;;  %10724 = vmatmul.mubr.msk.bf16.vlgmr.msra.gmra.mrb[168].mxu0 %vm1600_vm1, %v5608_v63  ;;  %10730 = vmatmul.mubr.msk.bf16.vlgmr.msra.gmra.mrb[184].mxu1 %vm1600_vm1, %v5609_v58 }
0x1895   : > { %10734 = vmatpush3.bf16.xpose.msra.mxu0 %v5712_v7  ;;  %10740 = vmatpush3.bf16.xpose.msra.mxu1 %v5758_v8 }
0x1896   : > { %10735 = vmatprep.mubr.msk.bf16.mxu0 %vm12100_vm0, %v12099_v0  ;;  %10741 = vmatprep.mubr.msk.bf16.mxu1 %vm12100_vm0, %v12099_v0 }
0x1897   : > { %10745 = vmatprep.subr.bf16.mxu0 %v12099_v0  ;;  %10751 = vmatprep.subr.bf16.mxu1 %v12099_v0 }
0x1899   : > { %v5482_v14 = vpop.f32.mrb[160].mxu0  ;;  %v5522_v16 = vpop.f32.mrb[176].mxu1 }
0x189a   : > { %v5849_v45 = vpack.c.bf16 %v5482_v14, %v5482_v14  ;;  %v5850_v19 = vpack.c.bf16 %v5522_v16, %v5522_v16  ;;  %v10701_v11 = vpop.f32.mrb[161].mxu0  ;;  %v10707_v21 = vpop.f32.mrb[177].mxu1 }
0x189b   : > { %v5485_v22 = vpop.f32.mrb[162].mxu0  ;;  %v5525_v24 = vpop.f32.mrb[178].mxu1 }
0x189c   : > { %v5857_v25 = vsel %vm1840_vm2, %v5849_v45, 0  ;;  %v5903_v26 = vsel %vm1840_vm2, %v5850_v19, 0  ;;  %v10702_v27 = vpop.f32.mrb[163].mxu0  ;;  %v10708_v29 = vpop.f32.mrb[179].mxu1  ;;  %10736 = vmatmul.mubr.msk.bf16.vlgmr.msra.gmra.mrb[172].mxu0 %vm1600_vm1, %v5610_v18  ;;  %10742 = vmatmul.mubr.msk.bf16.vlgmr.msra.gmra.mrb[188].mxu1 %vm1600_vm1, %v5611_v3 }
0x189d   : > { %10746 = vmatpush3.bf16.msra.mxu0 %v5857_v25  ;;  %10752 = vmatpush3.bf16.msra.mxu1 %v5903_v26 }
0x189e   : > { %10747 = vmatprep.mubr.msk.bf16.mxu0 %vm12100_vm0, %v12099_v0  ;;  %10753 = vmatprep.mubr.msk.bf16.mxu1 %vm12100_vm0, %v12099_v0 }
0x189f   : > { %10757 = vmatprep.subr.bf16.mxu0 %v12099_v0  ;;  %10763 = vmatprep.subr.bf16.mxu1 %v12099_v0 }
0x18a1   : > { %v13375_v15 = vpop.f32.mrb[164].mxu0  ;;  %v13377_v30 = vpop.f32.mrb[180].mxu1 }
0x18a2   : > { %v10713_v31 = vpop.f32.mrb[165].mxu0  ;;  %v10719_v32 = vpop.f32.mrb[181].mxu1  ;;  %v5851_v24 = vpack.c.bf16 %v13375_v15, %v13375_v15  ;;  %v5852_v26 = vpack.c.bf16 %v13377_v30, %v13377_v30  ;;  %v5118_v30 = vld [vmem:[#allocation16] sm:$0xf] }
0x18a3   : > { %v5565_v33 = vpop.f32.mrb[166].mxu0  ;;  %v5605_v17 = vpop.f32.mrb[182].mxu1 }
0x18a4   : > { %v10714_v28 = vpop.f32.mrb[167].mxu0  ;;  %v10720_v34 = vpop.f32.mrb[183].mxu1  ;;  %v5949_v32 = vsel %vm1840_vm2, %v5851_v24, 0  ;;  %v5995_v33 = vsel %vm1840_vm2, %v5852_v26, 0 }
0x18a5   : > { %v5119_v34 = vld [vmem:[#allocation16 + $0x4] sm:$0xf] }
0x1967   : > { %v5656_v35 = vpop.f32.mrb[168].mxu0  ;;  %v5702_v36 = vpop.f32.mrb[184].mxu1 }
0x1968   : > { %v10725_v37 = vpop.f32.mrb[169].mxu0  ;;  %v10731_v39 = vpop.f32.mrb[185].mxu1  ;;  %v5801_v40 = vsel %vm5800_vm8, %v5656_v35, -inf  ;;  %v5804_v41 = vsel %vm5800_vm8, %v5702_v36, -inf }
0x1969   : > { %5802 = vmax.xlane.f32.xlu0 %v5801_v40  ;;  %v5659_v42 = vpop.f32.mrb[170].mxu0  ;;  %5805 = vmax.xlane.f32.xlu1 %v5804_v41  ;;  %v5705_v43 = vpop.f32.mrb[186].mxu1  ;;  %v6045_v37 = vsel %vm1840_vm2, %v5118_v30, 0  ;;  %v6091_v40 = vsel %vm1840_vm2, %v5119_v34, 0  ;;  %v5120_v41 = vld [vmem:[#allocation16 + $0x8] sm:$0xf] }
0x196a   : > { %v10726_v44 = vpop.f32.mrb[171].mxu0  ;;  %v10732_v46 = vpop.f32.mrb[187].mxu1  ;;  %v5121_v42 = vld [vmem:[#allocation16 + $0xc] sm:$0xf]  ;;  %v11399_v30 = vld [vmem:[%s13955_s4 + $0x8] sm:$0xff]  }
0x196f   : > { %v5748_v47 = vpop.f32.mrb[172].mxu0  ;;  %v5794_v48 = vpop.f32.mrb[188].mxu1 }
0x1970   : > { %v10737_v51 = vpop.f32.mrb[173].mxu0  ;;  %v10743_v52 = vpop.f32.mrb[189].mxu1  ;;  %v5807_v53 = vsel %vm5800_vm8, %v5748_v47, -inf  ;;  %v5810_v55 = vsel %vm5800_vm8, %v5794_v48, -inf }
0x1971   : > { %5808 = vmax.xlane.f32.xlu0 %v5807_v53  ;;  %v5751_v38 = vpop.f32.mrb[174].mxu0  ;;  %5811 = vmax.xlane.f32.xlu1 %v5810_v55  ;;  %v5797_v56 = vpop.f32.mrb[190].mxu1  ;;  %v6183_v55 = vsel %vm1840_vm2, %v5121_v42, 0  ;;  %v11404_v42 = vld [vmem:[%s13955_s4 + $0x30] sm:$0xff]  }
0x1972   : > { %v10738_v59 = vpop.f32.mrb[175].mxu0  ;;  %v10744_v60 = vpop.f32.mrb[191].mxu1 }
0x19f6   : > { %v5803_v61 = vpop.xlane.xlu0 %5802  ;;  %v5806_v62 = vpop.xlane.xlu1 %5805 }
0x19f7   : > { %v5813_v57 = vsub.f32 %v5656_v35, %v5803_v61  ;;  %v5814_v63 = vsub.f32 %v5702_v36, %v5806_v62 }
0x19f9   : > { %v5817_v58 = vmul.f32 1.442695, %v5813_v57  ;;  %v5819_v1 = vmul.f32 1.442695, %v5814_v63 }
0x19fb   : > { %11498 = vpow2.f32 %v5817_v58 }
0x19fc   : > { %11500 = vpow2.f32 %v5819_v1 }
0x19fe   : > { %v5809_v2 = vpop.xlane.xlu0 %5808  ;;  %v5812_v23 = vpop.xlane.xlu1 %5811 }
0x19ff   : > { %v5815_v4 = vsub.f32 %v5748_v47, %v5809_v2  ;;  %v5816_v5 = vsub.f32 %v5794_v48, %v5812_v23  ;;  %v6137_v48 = vsel %vm1840_vm2, %v5120_v41, 0  ;;  %v11403_v41 = vld [vmem:[%s13955_s4 + $0x28] sm:$0xff]  }
0x1a01   : > { %v5821_v49 = vmul.f32 1.442695, %v5815_v4  ;;  %v5823_v7 = vmul.f32 1.442695, %v5816_v5 }
0x1a03   : > { %11502 = vpow2.f32 %v5821_v49 }
0x1a04   : > { %11504 = vpow2.f32 %v5823_v7 }
0x1a05   : > { %v11499_v8 = vpop.eup %11498 }
0x1a06   : > { %v11501_v9 = vpop.eup %11500  ;;  %v5825_v10 = vsel %vm5800_vm8, %v11499_v8, 0.0 }
0x1a07   : > { %5826 = vadd.xlane.f32.xlu0 %v5825_v10  ;;  %v5828_v12 = vsel %vm5800_vm8, %v11501_v9, 0.0 }
0x1a08   : > { %5829 = vadd.xlane.f32.xlu1 %v5828_v12 }
0x1a0d   : > { %v11503_v13 = vpop.eup %11502 }
0x1a0e   : > { %v11505_v14 = vpop.eup %11504  ;;  %v5831_v16 = vsel %vm5800_vm8, %v11503_v13, 0.0 }
0x1a0f   : > { %5832 = vadd.xlane.f32.xlu0 %v5831_v16  ;;  %v5834_v18 = vsel %vm5800_vm8, %v11505_v14, 0.0 }
0x1a10   : > { %5835 = vadd.xlane.f32.xlu1 %v5834_v18 }
0x1a94   : > { %v5827_v3 = vpop.xlane.xlu0 %5826 }
0x1a95   : > { %11506 = vrcp.f32 %v5827_v3  ;;  %v5830_v45 = vpop.xlane.xlu1 %5829 }
0x1a96   : > { %11508 = vrcp.f32 %v5830_v45 }
0x1a9c   : > { %v5833_v19 = vpop.xlane.xlu0 %5832 }
0x1a9d   : > { %11510 = vrcp.f32 %v5833_v19  ;;  %v5836_v11 = vpop.xlane.xlu1 %5835 }
0x1a9e   : > { %11512 = vrcp.f32 %v5836_v11 }
0x1a9f   : > { %v11507_v21 = vpop.eup %11506 }
0x1aa0   : > { %v11509_v22 = vpop.eup %11508  ;;  %v5838_v25 = vmul.f32 %v11507_v21, %v11499_v8 }
0x1aa1   : > { %v5840_v27 = vmul.f32 %v11509_v22, %v11501_v9 }
0x1aa2   : > { %v5845_v29 = vpack.c.bf16 %v5838_v25, %v5838_v25 }
0x1aa3   : > { %v5846_v31 = vpack.c.bf16 %v5840_v27, %v5840_v27 }
0x1aa4   : > { %10748 = vmatmul.mubr.msk.bf16.vlgmr.msra.gmra.mrb[176].mxu0 %vm1600_vm1, %v5845_v29 }
0x1aa5   : > { %10754 = vmatmul.mubr.msk.bf16.vlgmr.msra.gmra.mrb[192].mxu1 %vm1600_vm1, %v5846_v31  ;;  %10758 = vmatpush3.bf16.msra.mxu0 %v5949_v32 }
0x1aa6   : > { %10764 = vmatpush3.bf16.msra.mxu1 %v5995_v33  ;;  %10759 = vmatprep.mubr.msk.bf16.mxu0 %vm12100_vm0, %v12099_v0 }
0x1aa7   : > { %v11511_v15 = vpop.eup %11510  ;;  %10765 = vmatprep.mubr.msk.bf16.mxu1 %vm12100_vm0, %v12099_v0  ;;  %10769 = vmatprep.subr.bf16.mxu0 %v12099_v0 }
0x1aa8   : > { %v11513_v17 = vpop.eup %11512  ;;  %v5842_v28 = vmul.f32 %v11511_v15, %v11503_v13  ;;  %10775 = vmatprep.subr.bf16.mxu1 %v12099_v0  ;;  %v11398_v15 = vld [vmem:[%s13955_s4] sm:$0xff]  }
0x1aa9   : > { %v5844_v35 = vmul.f32 %v11513_v17, %v11505_v14 }
0x1aaa   : > { %v5847_v36 = vpack.c.bf16 %v5842_v28, %v5842_v28 }
0x1aab   : > { %v5848_v39 = vpack.c.bf16 %v5844_v35, %v5844_v35 }
0x1aac   : > { %10760 = vmatmul.mubr.msk.bf16.vlgmr.msra.gmra.mrb[180].mxu0 %vm1600_vm1, %v5847_v36 }
0x1aad   : > { %10766 = vmatmul.mubr.msk.bf16.vlgmr.msra.gmra.mrb[196].mxu1 %vm1600_vm1, %v5848_v39  ;;  %10770 = vmatpush3.bf16.msra.mxu0 %v6045_v37  ;;  %v11400_v37 = vld [vmem:[%s13955_s4 + $0x10] sm:$0xff]   ;;  %v11401_v39 = vld [vmem:[%s13955_s4 + $0x18] sm:$0xff]  }
0x1aae   : > { %10776 = vmatpush3.bf16.msra.mxu1 %v6091_v40  ;;  %10771 = vmatprep.mubr.msk.bf16.mxu0 %vm12100_vm0, %v12099_v0  ;;  %v11402_v40 = vld [vmem:[%s13955_s4 + $0x20] sm:$0xff]  }
0x1aaf   : > { %10777 = vmatprep.mubr.msk.bf16.mxu1 %vm12100_vm0, %v12099_v0  ;;  %10781 = vmatprep.subr.bf16.mxu0 %v12099_v0 }
0x1ab0   : > { %10787 = vmatprep.subr.bf16.mxu1 %v12099_v0 }
0x1b77   : > { %v5893_v43 = vpop.f32.mrb[176].mxu0 }
0x1b78   : > { %v6037_v44 = vpack.c.bf16 %v5893_v43, %v5893_v43  ;;  %v5939_v46 = vpop.f32.mrb[192].mxu1  ;;  %v10749_v47 = vpop.f32.mrb[177].mxu0  ;;  %v11405_v43 = vld [vmem:[%s13955_s4 + $0x38] sm:$0xff]  }
0x1b79   : > { %v6038_v51 = vpack.c.bf16 %v5939_v46, %v5939_v46  ;;  %v10755_v52 = vpop.f32.mrb[193].mxu1  ;;  %v5896_v53 = vpop.f32.mrb[178].mxu0  ;;  %v11407_v46 = vld [vmem:[#allocation19 + $0x8] sm:$0xff]   ;;  %v11408_v47 = vld [vmem:[#allocation19 + $0x10] sm:$0xff]  }
0x1b7a   : > { %v5942_v38 = vpop.f32.mrb[194].mxu1  ;;  %v10750_v56 = vpop.f32.mrb[179].mxu0  ;;  %10772 = vmatmul.mubr.msk.bf16.vlgmr.msra.gmra.mrb[184].mxu0 %vm1600_vm1, %v6037_v44  ;;  %v11406_v44 = vld [vmem:[#allocation19] sm:$0xff]   ;;  %v11411_v52 = vld [vmem:[#allocation19 + $0x28] sm:$0xff]  }
0x1b7b   : > { %v10756_v59 = vpop.f32.mrb[195].mxu1  ;;  %10778 = vmatmul.mubr.msk.bf16.vlgmr.msra.gmra.mrb[200].mxu1 %vm1600_vm1, %v6038_v51  ;;  %10782 = vmatpush3.bf16.msra.mxu0 %v6137_v48  ;;  %v11409_v48 = vld [vmem:[#allocation19 + $0x18] sm:$0xff]   ;;  %v11410_v51 = vld [vmem:[#allocation19 + $0x20] sm:$0xff]  }
0x1b7c   : > { %10788 = vmatpush3.bf16.msra.mxu1 %v6183_v55  ;;  %10783 = vmatprep.mubr.msk.bf16.mxu0 %vm12100_vm0, %v12099_v0  ;;  %v9657_v59 = vld [vmem:[#allocation22 + $0x2] ss:$0 sm:$0xff] }
0x1b7d   : > { %10789 = vmatprep.mubr.msk.bf16.mxu1 %vm12100_vm0, %v12099_v0  ;;  %10793 = vmatprep.subr.bf16.mxu0 %v12099_v0 }
0x1b7e   : > { %10813 = vmatprep.subr.bf16.mxu1 %v12099_v0 }
0x1b7f   : > { %v5985_v60 = vpop.f32.mrb[180].mxu0 }
0x1b80   : > { %v6039_v61 = vpack.c.bf16 %v5985_v60, %v5985_v60  ;;  %v6031_v62 = vpop.f32.mrb[196].mxu1  ;;  %v10761_v57 = vpop.f32.mrb[181].mxu0 }
0x1b81   : > { %v6040_v63 = vpack.c.bf16 %v6031_v62, %v6031_v62  ;;  %v10767_v58 = vpop.f32.mrb[197].mxu1  ;;  %v5988_v1 = vpop.f32.mrb[182].mxu0 }
0x1b82   : > { %v6034_v2 = vpop.f32.mrb[198].mxu1  ;;  %v10762_v23 = vpop.f32.mrb[183].mxu0  ;;  %10784 = vmatmul.mubr.msk.bf16.vlgmr.msra.gmra.mrb[188].mxu0 %vm1600_vm1, %v6039_v61  ;;  %v9658_v61 = vld [vmem:[#allocation22 + $0x3] ss:$0 sm:$0xff]  ;;  %v11412_v58 = vld [vmem:[#allocation19 + $0x30] sm:$0xff]   ;;  %v11413_v1 = vld [vmem:[#allocation19 + $0x38] sm:$0xff]  }
0x1b83   : > { %v10768_v4 = vpop.f32.mrb[199].mxu1  ;;  %10790 = vmatmul.mubr.msk.bf16.vlgmr.msra.gmra.mrb[204].mxu1 %vm1600_vm1, %v6040_v63  ;;  %10809 = vmatprep.mubr.msk.bf16.mxu0 %vm12100_vm0, %v12099_v0  ;;  %v9659_v2 = vld [vmem:[#allocation18] ss:$0 sm:$0xff] }
0x1b84   : > { %10829 = vmatprep.mubr.msk.bf16.mxu1 %vm12100_vm0, %v12099_v0  ;;  %10794 = vmatpush3.bf16.msra.mxu0 %v11398_v15  ;;  %v9677_v15 = vld [vmem:[#allocation22 + $0x4] ss:$0 sm:$0xff] }
0x1b85   : > { %10795 = vmatprep.subr.bf16.mxu0 %v12099_v0  ;;  %10814 = vmatpush3.bf16.msra.mxu1 %v11406_v44  ;;  %v9689_v44 = vld [vmem:[%s13952_s12 + $0x58] sm:$0xf] }
0x1b86   : > { %10815 = vmatprep.subr.bf16.mxu1 %v12099_v0 }
0x1b88   : > { %10796 = vmatpush3.bf16.msra.mxu0 %v11399_v30 }
0x1b89   : > { %10797 = vmatprep.subr.bf16.mxu0 %v12099_v0  ;;  %10816 = vmatpush3.bf16.msra.mxu1 %v11407_v46  ;;  %v9690_v46 = vld [vmem:[%s13952_s12 + $0x5c] sm:$0xf] }
0x1b8a   : > { %10817 = vmatprep.subr.bf16.mxu1 %v12099_v0 }
0x1b8c   : > { %10798 = vmatpush3.bf16.msra.mxu0 %v11400_v37  ;;  %v9683_v37 = vld [vmem:[%s13952_s12 + $0x40] sm:$0xf] }
0x1b8d   : > { %10799 = vmatprep.subr.bf16.mxu0 %v12099_v0  ;;  %10818 = vmatpush3.bf16.msra.mxu1 %v11408_v47 }
0x1b8e   : > { %10819 = vmatprep.subr.bf16.mxu1 %v12099_v0 }
0x1b90   : > { %10800 = vmatpush3.bf16.msra.mxu0 %v11401_v39  ;;  %v9684_v39 = vld [vmem:[%s13952_s12 + $0x44] sm:$0xf] }
0x1b91   : > { %10801 = vmatprep.subr.bf16.mxu0 %v12099_v0  ;;  %10820 = vmatpush3.bf16.msra.mxu1 %v11409_v48 }
0x1b92   : > { %10821 = vmatprep.subr.bf16.mxu1 %v12099_v0 }
0x1b94   : > { %10802 = vmatpush3.bf16.msra.mxu0 %v11402_v40  ;;  %v9685_v40 = vld [vmem:[%s13952_s12 + $0x48] sm:$0xf] }
0x1b95   : > { %10803 = vmatprep.subr.bf16.mxu0 %v12099_v0  ;;  %10822 = vmatpush3.bf16.msra.mxu1 %v11410_v51 }
0x1b96   : > { %10823 = vmatprep.subr.bf16.mxu1 %v12099_v0 }
0x1b98   : > { %10804 = vmatpush3.bf16.msra.mxu0 %v11403_v41  ;;  %v9686_v41 = vld [vmem:[%s13952_s12 + $0x4c] sm:$0xf] }
0x1b99   : > { %10805 = vmatprep.subr.bf16.mxu0 %v12099_v0  ;;  %10824 = vmatpush3.bf16.msra.mxu1 %v11411_v52 }
0x1b9a   : > { %10825 = vmatprep.subr.bf16.mxu1 %v12099_v0 }
0x1b9c   : > { %10806 = vmatpush3.bf16.msra.mxu0 %v11404_v42  ;;  %v9687_v42 = vld [vmem:[%s13952_s12 + $0x50] sm:$0xf] }
0x1b9d   : > { %10807 = vmatprep.subr.bf16.mxu0 %v12099_v0  ;;  %10826 = vmatpush3.bf16.msra.mxu1 %v11412_v58 }
0x1b9e   : > { %10827 = vmatprep.subr.bf16.mxu1 %v12099_v0 }
0x1ba0   : > { %10808 = vmatpush3.bf16.msra.mxu0 %v11405_v43  ;;  %v9688_v43 = vld [vmem:[%s13952_s12 + $0x54] sm:$0xf] }
0x1ba1   : > { %10833 = vmatprep.subr.bf16.mxu0 %v12099_v0  ;;  %10828 = vmatpush3.bf16.msra.mxu1 %v11413_v1 }
0x1ba2   : > { %10839 = vmatprep.subr.bf16.mxu1 %v12099_v0 }
0x1c4d   : > { %v6081_v5 = vpop.f32.mrb[184].mxu0 }
0x1c4e   : > { %v6225_v49 = vsel %vm5069_vm7, %v6081_v5, 0.0  ;;  %v6127_v7 = vpop.f32.mrb[200].mxu1  ;;  %v10773_v8 = vpop.f32.mrb[185].mxu0 }
0x1c4f   : > { %v6226_v9 = vsel %vm5069_vm7, %v6127_v7, 0.0  ;;  %v10779_v10 = vpop.f32.mrb[201].mxu1  ;;  %v6084_v12 = vpop.f32.mrb[186].mxu0 }
0x1c50   : > { %v6227_v13 = vadd.f32 %v6226_v9, %v6225_v49  ;;  %v6130_v14 = vpop.f32.mrb[202].mxu1  ;;  %v10774_v16 = vpop.f32.mrb[187].mxu0  ;;  %v9668_v10 = vld [vmem:[#allocation21] ss:$0 sm:$0xff] }
0x1c51   : > { %v10780_v18 = vpop.f32.mrb[203].mxu1 }
0x1c55   : > { %v6173_v3 = vpop.f32.mrb[188].mxu0 }
0x1c56   : > { %v6228_v45 = vsel %vm5069_vm7, %v6173_v3, 0.0  ;;  %v6219_v19 = vpop.f32.mrb[204].mxu1  ;;  %v10785_v11 = vpop.f32.mrb[189].mxu0 }
0x1c57   : > { %v6229_v21 = vadd.f32 %v6228_v45, %v6227_v13  ;;  %v10791_v22 = vpop.f32.mrb[205].mxu1  ;;  %v6176_v24 = vpop.f32.mrb[190].mxu0  ;;  %v6230_v25 = vsel %vm5069_vm7, %v6219_v19, 0.0 }
0x1c58   : > { %v6222_v26 = vpop.f32.mrb[206].mxu1  ;;  %v10786_v27 = vpop.f32.mrb[191].mxu0 }
0x1c59   : > { %v6231_v29 = vadd.f32 %v6230_v25, %v6229_v21  ;;  %v10792_v31 = vpop.f32.mrb[207].mxu1  ;;  %v9679_v26 = vld [vmem:[%s13952_s12 + $0x30] sm:$0xf]  ;;  %v9680_v27 = vld [vmem:[%s13952_s12 + $0x34] sm:$0xf] }
0x1c5b   : > { %v6232_v32 = vadd.f32 %v6231_v29, %v13302_v54 }
0x1c5d   : > { %v6233_v33 = vsel %vm5069_vm7, %v6232_v32, 0.0 }
0x1c5e   : > { %6234 = vadd.xlane.f32.xlu0 %v6233_v33 }
0x1ceb   : > { %v6235_v17 = vpop.xlane.xlu0 %6234 }
0x1cec   : > { %v6236_v28 = vmul.f32 0.03125, %v6235_v17  ;;  %v9678_v17 = vld [vmem:[#allocation22 + $0x5] ss:$0 sm:$0xff] }
0x1cee   : > { %v6237_v54 = vsub.f32 %v6232_v32, %v6236_v28 }
0x1cf0   : > { %v6238_v34 = vsel %vm1076_vm3, %v6237_v54, 0.0 }
0x1cf1   : > { %v6239_v35 = vmul.f32 %v6238_v34, %v6238_v34 }
0x1cf3   : > { %v6240_v36 = vsel %vm5069_vm7, %v6239_v35, 0.0  ;;  %v9681_v35 = vld [vmem:[%s13952_s12 + $0x38] sm:$0xf] }
0x1cf4   : > { %6241 = vadd.xlane.f32.xlu1 %v6240_v36  ;;  %v9682_v36 = vld [vmem:[%s13952_s12 + $0x3c] sm:$0xf] }
0x1d81   : > { %v6242_v53 = vpop.xlane.xlu1 %6241 }
0x1d82   : > { %v6243_v55 = vmul.f32 0.03125, %v6242_v53 }
0x1d84   : > { %v6244_v38 = vadd.f32 1e-05, %v6243_v55 }
0x1d86   : > { %11514 = vrsqrt.f32 %v6244_v38 }
0x1d90   : > { %v11515_v56 = vpop.eup %11514 }
0x1d91   : > { %v6246_v60 = vmul.f32 %v11515_v56, %v6238_v34 }
0x1d93   : > { %v6253_v62 = vmul.f32 %v9657_v59, %v6246_v60 }
0x1d95   : > { %v6260_v57 = vadd.f32 %v9658_v61, %v6253_v62 }
0x1d97   : > { %v6295_v63 = vpack.c.bf16 %v6260_v57, %v6260_v57 }
0x1d99   : > { %10810 = vmatmul.mubr.bf16.vlgmr.msra.gmra.mrb[192].mxu0 %v6295_v63 }
0x1d9a   : > { %10835 = vmatprep.mubr.msk.bf16.mxu0 %vm12100_vm0, %v12099_v0  ;;  %10834 = vmatpush3.bf16.xpose.msra.mxu0 %v9679_v26 }
0x1d9b   : > { %10845 = vmatprep.subr.bf16.mxu0 %v12099_v0 }
0x1e6c   : > { %v6384_v23 = vpop.f32.mrb[192].mxu0 }
0x1e6d   : > { %v6385_v4 = vadd.f32 %v9659_v2, %v6384_v23  ;;  %v10811_v5 = vpop.f32.mrb[193].mxu0 }
0x1e6e   : > { %v6387_v49 = vpop.f32.mrb[194].mxu0 }
0x1e6f   : > { %v6390_v7 = vmax.f32 %v6385_v4, 0.0  ;;  %v10812_v8 = vpop.f32.mrb[195].mxu0 }
0x1e71   : > { %v6391_v9 = vpack.c.bf16 %v6390_v7, %v6390_v7 }
0x1e73   : > { %10830 = vmatmul.mubr.bf16.vlgmr.msra.gmra.mrb[208].mxu1 %v6391_v9 }
0x1e74   : > { %10841 = vmatprep.mubr.msk.bf16.mxu1 %vm12100_vm0, %v12099_v0  ;;  %10840 = vmatpush3.bf16.xpose.msra.mxu1 %v9680_v27 }
0x1e75   : > { %10851 = vmatprep.subr.bf16.mxu1 %v12099_v0 }
0x1f46   : > { %v6480_v12 = vpop.f32.mrb[208].mxu1 }
0x1f47   : > { %v6481_v13 = vadd.f32 %v9668_v10, %v6480_v12  ;;  %v10831_v14 = vpop.f32.mrb[209].mxu1 }
0x1f48   : > { %v6483_v16 = vpop.f32.mrb[210].mxu1 }
0x1f49   : > { %v10832_v18 = vpop.f32.mrb[211].mxu1  ;;  %v6486_v3 = vadd.f32 %v6481_v13, %v6260_v57 }
0x1f4b   : > { %v6487_v45 = vsel %vm5069_vm7, %v6486_v3, 0.0 }
0x1f4c   : > { %6488 = vadd.xlane.f32.xlu0 %v6487_v45 }
0x1fd9   : > { %v6489_v19 = vpop.xlane.xlu0 %6488 }
0x1fda   : > { %v6490_v11 = vmul.f32 0.03125, %v6489_v19 }
0x1fdc   : > { %v6491_v21 = vsub.f32 %v6486_v3, %v6490_v11 }
0x1fde   : > { %v6492_v22 = vsel %vm1076_vm3, %v6491_v21, 0.0 }
0x1fdf   : > { %v6493_v24 = vmul.f32 %v6492_v22, %v6492_v22 }
0x1fe1   : > { %v6494_v25 = vsel %vm5069_vm7, %v6493_v24, 0.0 }
0x1fe2   : > { %6495 = vadd.xlane.f32.xlu1 %v6494_v25 }
0x206f   : > { %v6496_v29 = vpop.xlane.xlu1 %6495 }
0x2070   : > { %v6497_v31 = vmul.f32 0.03125, %v6496_v29 }
0x2072   : > { %v6498_v32 = vadd.f32 1e-05, %v6497_v31 }
0x2074   : > { %11516 = vrsqrt.f32 %v6498_v32 }
0x207e   : > { %v11517_v33 = vpop.eup %11516 }
0x207f   : > { %v6500_v30 = vmul.f32 %v11517_v33, %v6492_v22 }
0x2081   : > { %v6507_v28 = vmul.f32 %v9677_v15, %v6500_v30 }
0x2083   : > { %v13492_v54 = vadd.f32 %v9678_v17, %v6507_v28 }
0x2085   : > { %v6540_v34 = vpack.c.bf16 %v13492_v54, %v13492_v54 }
0x2087   : > { %10836 = vmatmul.mubr.bf16.vlgmr.msra.gmra.mrb[196].mxu0 %v6540_v34  ;;  %10842 = vmatmul.mubr.bf16.vlgmr.msra.gmra.mrb[212].mxu1 %v6540_v34 }
0x2088   : > { %10846 = vmatpush3.bf16.xpose.msra.mxu0 %v9681_v35  ;;  %10852 = vmatpush3.bf16.xpose.msra.mxu1 %v9682_v36 }
0x2089   : > { %10847 = vmatprep.mubr.msk.bf16.mxu0 %vm12100_vm0, %v12099_v0  ;;  %10853 = vmatprep.mubr.msk.bf16.mxu1 %vm12100_vm0, %v12099_v0 }
0x208a   : > { %10857 = vmatprep.subr.bf16.mxu0 %v12099_v0  ;;  %10863 = vmatprep.subr.bf16.mxu1 %v12099_v0 }
0x208f   : > { %10848 = vmatmul.mubr.bf16.vlgmr.msra.gmra.mrb[200].mxu0 %v6540_v34  ;;  %10854 = vmatmul.mubr.bf16.vlgmr.msra.gmra.mrb[216].mxu1 %v6540_v34 }
0x2090   : > { %10858 = vmatpush3.bf16.xpose.msra.mxu0 %v9683_v37  ;;  %10864 = vmatpush3.bf16.xpose.msra.mxu1 %v9684_v39 }
0x2091   : > { %10859 = vmatprep.mubr.msk.bf16.mxu0 %vm12100_vm0, %v12099_v0  ;;  %10865 = vmatprep.mubr.msk.bf16.mxu1 %vm12100_vm0, %v12099_v0 }
0x2092   : > { %10869 = vmatprep.subr.bf16.mxu0 %v12099_v0  ;;  %10875 = vmatprep.subr.bf16.mxu1 %v12099_v0 }
0x2097   : > { %10860 = vmatmul.mubr.bf16.vlgmr.msra.gmra.mrb[204].mxu0 %v6540_v34  ;;  %10866 = vmatmul.mubr.bf16.vlgmr.msra.gmra.mrb[220].mxu1 %v6540_v34 }
0x2098   : > { %10870 = vmatpush3.bf16.xpose.msra.mxu0 %v9685_v40  ;;  %10876 = vmatpush3.bf16.xpose.msra.mxu1 %v9686_v41 }
0x2099   : > { %10871 = vmatprep.mubr.msk.bf16.mxu0 %vm12100_vm0, %v12099_v0  ;;  %10877 = vmatprep.mubr.msk.bf16.mxu1 %vm12100_vm0, %v12099_v0 }
0x209a   : > { %10881 = vmatprep.subr.bf16.mxu0 %v12099_v0  ;;  %10887 = vmatprep.subr.bf16.mxu1 %v12099_v0 }
0x209f   : > { %10872 = vmatmul.mubr.bf16.vlgmr.msra.gmra.mrb[208].mxu0 %v6540_v34  ;;  %10878 = vmatmul.mubr.bf16.vlgmr.msra.gmra.mrb[224].mxu1 %v6540_v34 }
0x20a0   : > { %10882 = vmatpush3.bf16.xpose.msra.mxu0 %v9687_v42  ;;  %10888 = vmatpush3.bf16.xpose.msra.mxu1 %v9688_v43 }
0x20a1   : > { %10883 = vmatprep.mubr.msk.bf16.mxu0 %vm12100_vm0, %v12099_v0  ;;  %10889 = vmatprep.mubr.msk.bf16.mxu1 %vm12100_vm0, %v12099_v0 }
0x20a2   : > { %10893 = vmatprep.subr.bf16.mxu0 %v12099_v0  ;;  %10899 = vmatprep.subr.bf16.mxu1 %v12099_v0 }
0x20a7   : > { %10884 = vmatmul.mubr.bf16.vlgmr.msra.gmra.mrb[212].mxu0 %v6540_v34  ;;  %10890 = vmatmul.mubr.bf16.vlgmr.msra.gmra.mrb[228].mxu1 %v6540_v34 }
0x20a8   : > { %10894 = vmatpush3.bf16.xpose.msra.mxu0 %v9689_v44  ;;  %10900 = vmatpush3.bf16.xpose.msra.mxu1 %v9690_v46 }
0x20a9   : > { %10895 = vmatprep.mubr.msk.bf16.mxu0 %vm12100_vm0, %v12099_v0  ;;  %10901 = vmatprep.mubr.msk.bf16.mxu1 %vm12100_vm0, %v12099_v0 }
0x20aa   : > { %10905 = vmatprep.subr.bf16.mxu0 %v12099_v0  ;;  %10911 = vmatprep.subr.bf16.mxu1 %v12099_v0 }
0x20af   : > { %10896 = vmatmul.mubr.bf16.vlgmr.msra.gmra.mrb[216].mxu0 %v6540_v34  ;;  %10902 = vmatmul.mubr.bf16.vlgmr.msra.gmra.mrb[232].mxu1 %v6540_v34 }
0x20b0   : > { %10907 = vmatprep.mubr.msk.bf16.mxu0 %vm12100_vm0, %v12099_v0  ;;  %10913 = vmatprep.mubr.msk.bf16.mxu1 %vm12100_vm0, %v12099_v0 }
0x215a   : > { %v6575_v47 = vpop.f32.mrb[196].mxu0  ;;  %v6615_v48 = vpop.f32.mrb[212].mxu1 }
0x215b   : > { %v10837_v51 = vpop.f32.mrb[197].mxu0  ;;  %v10843_v52 = vpop.f32.mrb[213].mxu1  ;;  %v6701_v16 = vmul.f32 0.35355338, %v6575_v47  ;;  %v6702_v18 = vmul.f32 0.35355338, %v6615_v48 }
0x215c   : > { %v6578_v53 = vpop.f32.mrb[198].mxu0  ;;  %v6618_v55 = vpop.f32.mrb[214].mxu1 }
0x215d   : > { %v10838_v38 = vpop.f32.mrb[199].mxu0  ;;  %v10844_v56 = vpop.f32.mrb[215].mxu1  ;;  %v7025_v19 = vpack.c.bf16 %v6701_v16, %v6701_v16  ;;  %v7026_v11 = vpack.c.bf16 %v6702_v18, %v6702_v18 }
0x2162   : > { %v6655_v59 = vpop.f32.mrb[200].mxu0  ;;  %v6695_v60 = vpop.f32.mrb[216].mxu1 }
0x2163   : > { %v10849_v61 = vpop.f32.mrb[201].mxu0  ;;  %v10855_v62 = vpop.f32.mrb[217].mxu1  ;;  %v6703_v15 = vmul.f32 0.35355338, %v6655_v59  ;;  %v6704_v30 = vmul.f32 0.35355338, %v6695_v60 }
0x2164   : > { %v6658_v57 = vpop.f32.mrb[202].mxu0  ;;  %v6698_v63 = vpop.f32.mrb[218].mxu1 }
0x2165   : > { %v10850_v58 = vpop.f32.mrb[203].mxu0  ;;  %v10856_v1 = vpop.f32.mrb[219].mxu1  ;;  %v7027_v34 = vpack.c.bf16 %v6703_v15, %v6703_v15  ;;  %v7028_v35 = vpack.c.bf16 %v6704_v30, %v6704_v30 }
0x216a   : > { %v6739_v2 = vpop.f32.mrb[204].mxu0  ;;  %v6779_v23 = vpop.f32.mrb[220].mxu1 }
0x216b   : > { %v7029_v4 = vpack.c.bf16 %v6739_v2, %v6739_v2  ;;  %v7030_v5 = vpack.c.bf16 %v6779_v23, %v6779_v23  ;;  %v10861_v49 = vpop.f32.mrb[205].mxu0  ;;  %v10867_v7 = vpop.f32.mrb[221].mxu1 }
0x216c   : > { %v6742_v8 = vpop.f32.mrb[206].mxu0  ;;  %v6782_v9 = vpop.f32.mrb[222].mxu1 }
0x216d   : > { %v7037_v10 = vsel %vm1600_vm1, %v7029_v4, 0  ;;  %v7083_v12 = vsel %vm1600_vm1, %v7030_v5, 0  ;;  %v10862_v13 = vpop.f32.mrb[207].mxu0  ;;  %v10868_v14 = vpop.f32.mrb[223].mxu1 }
0x216e   : > { %10906 = vmatpush3.bf16.xpose.msra.mxu0 %v7037_v10  ;;  %10912 = vmatpush3.bf16.xpose.msra.mxu1 %v7083_v12 }
0x216f   : > { %10917 = vmatprep.subr.bf16.mxu0 %v12099_v0  ;;  %10923 = vmatprep.subr.bf16.mxu1 %v12099_v0 }
0x2172   : > { %v6819_v3 = vpop.f32.mrb[208].mxu0  ;;  %v6859_v45 = vpop.f32.mrb[224].mxu1 }
0x2173   : > { %v7031_v21 = vpack.c.bf16 %v6819_v3, %v6819_v3  ;;  %v7032_v22 = vpack.c.bf16 %v6859_v45, %v6859_v45  ;;  %v10873_v24 = vpop.f32.mrb[209].mxu0  ;;  %v10879_v25 = vpop.f32.mrb[225].mxu1 }
0x2174   : > { %v6822_v26 = vpop.f32.mrb[210].mxu0  ;;  %v6862_v27 = vpop.f32.mrb[226].mxu1 }
0x2175   : > { %v7129_v29 = vsel %vm1600_vm1, %v7031_v21, 0  ;;  %v7175_v31 = vsel %vm1600_vm1, %v7032_v22, 0  ;;  %v10874_v32 = vpop.f32.mrb[211].mxu0  ;;  %v10880_v33 = vpop.f32.mrb[227].mxu1  ;;  %10908 = vmatmul.mubr.msk.bf16.vlgmr.msra.gmra.mrb[220].mxu0 %vm1600_vm1, %v7025_v19  ;;  %10914 = vmatmul.mubr.msk.bf16.vlgmr.msra.gmra.mrb[236].mxu1 %vm1600_vm1, %v7026_v11 }
0x2176   : > { %10918 = vmatpush3.bf16.xpose.msra.mxu0 %v7129_v29  ;;  %10924 = vmatpush3.bf16.xpose.msra.mxu1 %v7175_v31 }
0x2177   : > { %10919 = vmatprep.mubr.msk.bf16.mxu0 %vm12100_vm0, %v12099_v0  ;;  %10925 = vmatprep.mubr.msk.bf16.mxu1 %vm12100_vm0, %v12099_v0 }
0x2178   : > { %10929 = vmatprep.subr.bf16.mxu0 %v12099_v0  ;;  %10935 = vmatprep.subr.bf16.mxu1 %v12099_v0 }
0x217a   : > { %v6899_v17 = vpop.f32.mrb[212].mxu0  ;;  %v6939_v28 = vpop.f32.mrb[228].mxu1 }
0x217b   : > { %v7265_v36 = vpack.c.bf16 %v6899_v17, %v6899_v17  ;;  %v7266_v37 = vpack.c.bf16 %v6939_v28, %v6939_v28  ;;  %v10885_v39 = vpop.f32.mrb[213].mxu0  ;;  %v10891_v40 = vpop.f32.mrb[229].mxu1 }
0x217c   : > { %v6902_v41 = vpop.f32.mrb[214].mxu0  ;;  %v6942_v42 = vpop.f32.mrb[230].mxu1 }
0x217d   : > { %v7273_v43 = vsel %vm4699_vm4, %v7265_v36, 0  ;;  %v7319_v44 = vsel %vm4699_vm4, %v7266_v37, 0  ;;  %v10886_v46 = vpop.f32.mrb[215].mxu0  ;;  %v10892_v47 = vpop.f32.mrb[231].mxu1  ;;  %10920 = vmatmul.mubr.msk.bf16.vlgmr.msra.gmra.mrb[224].mxu0 %vm1600_vm1, %v7027_v34  ;;  %10926 = vmatmul.mubr.msk.bf16.vlgmr.msra.gmra.mrb[240].mxu1 %vm1600_vm1, %v7028_v35 }
0x217e   : > { %10930 = vmatpush3.bf16.msra.mxu0 %v7273_v43  ;;  %10936 = vmatpush3.bf16.msra.mxu1 %v7319_v44 }
0x217f   : > { %10931 = vmatprep.mubr.msk.bf16.mxu0 %vm12100_vm0, %v12099_v0  ;;  %10937 = vmatprep.mubr.msk.bf16.mxu1 %vm12100_vm0, %v12099_v0 }
0x2180   : > { %10941 = vmatprep.subr.bf16.mxu0 %v12099_v0  ;;  %10947 = vmatprep.subr.bf16.mxu1 %v12099_v0 }
0x2182   : > { %v13584_v48 = vpop.f32.mrb[216].mxu0  ;;  %v13586_v51 = vpop.f32.mrb[232].mxu1 }
0x2183   : > { %v10897_v52 = vpop.f32.mrb[217].mxu0  ;;  %v10903_v53 = vpop.f32.mrb[233].mxu1  ;;  %v7267_v46 = vpack.c.bf16 %v13584_v48, %v13584_v48 }
0x2184   : > { %v6982_v55 = vpop.f32.mrb[218].mxu0  ;;  %v7022_v38 = vpop.f32.mrb[234].mxu1  ;;  %v7268_v52 = vpack.c.bf16 %v13586_v51, %v13586_v51  ;;  %v6536_v51 = vld [vmem:[#allocation13 + $0x10] sm:$0xf] }
0x2185   : > { %v10898_v56 = vpop.f32.mrb[219].mxu0  ;;  %v10904_v59 = vpop.f32.mrb[235].mxu1 }
0x2186   : > { %v7365_v56 = vsel %vm4699_vm4, %v7267_v46, 0  ;;  %v7411_v59 = vsel %vm4699_vm4, %v7268_v52, 0 }
0x2248   : > { %v7073_v60 = vpop.f32.mrb[220].mxu0  ;;  %v7119_v61 = vpop.f32.mrb[236].mxu1 }
0x2249   : > { %v7074_v62 = vadd.f32 %v7073_v60, %v13207_v6  ;;  %v7120_v57 = vadd.f32 %v7119_v61, %v13207_v6  ;;  %v10909_v63 = vpop.f32.mrb[221].mxu0  ;;  %v10915_v58 = vpop.f32.mrb[237].mxu1 }
0x224a   : > { %v7076_v1 = vpop.f32.mrb[222].mxu0  ;;  %v7122_v2 = vpop.f32.mrb[238].mxu1  ;;  %v7461_v58 = vsel %vm1840_vm2, %v6536_v51, 0 }
0x224b   : > { %v10910_v23 = vpop.f32.mrb[223].mxu0  ;;  %v10916_v4 = vpop.f32.mrb[239].mxu1  ;;  %v7217_v5 = vsel %vm4642_vm5, %v7074_v62, -inf  ;;  %v7220_v49 = vsel %vm4642_vm5, %v7120_v57, -inf }
0x224c   : > { %7218 = vmax.xlane.f32.xlu0 %v7217_v5  ;;  %7221 = vmax.xlane.f32.xlu1 %v7220_v49  ;;  %v6538_v23 = vld [vmem:[#allocation13 + $0x18] sm:$0xf]  ;;  %v6539_v4 = vld [vmem:[#allocation13 + $0x1c] sm:$0xf] }
0x2250   : > { %v7165_v7 = vpop.f32.mrb[224].mxu0  ;;  %v7211_v8 = vpop.f32.mrb[240].mxu1 }
0x2251   : > { %v7166_v9 = vadd.f32 %v7165_v7, %v13207_v6  ;;  %v7212_v10 = vadd.f32 %v7211_v8, %v13207_v6  ;;  %v10921_v12 = vpop.f32.mrb[225].mxu0  ;;  %v10927_v13 = vpop.f32.mrb[241].mxu1 }
0x2252   : > { %v7168_v14 = vpop.f32.mrb[226].mxu0  ;;  %v7214_v16 = vpop.f32.mrb[242].mxu1 }
0x2253   : > { %v10922_v18 = vpop.f32.mrb[227].mxu0  ;;  %v10928_v3 = vpop.f32.mrb[243].mxu1  ;;  %v7223_v45 = vsel %vm4642_vm5, %v7166_v9, -inf  ;;  %v7226_v19 = vsel %vm4642_vm5, %v7212_v10, -inf  ;;  %v7599_v14 = vsel %vm1840_vm2, %v6539_v4, 0 }
0x2254   : > { %7224 = vmax.xlane.f32.xlu0 %v7223_v45  ;;  %7227 = vmax.xlane.f32.xlu1 %v7226_v19 }
0x22d9   : > { %v7219_v11 = vpop.xlane.xlu0 %7218  ;;  %v7222_v21 = vpop.xlane.xlu1 %7221 }
0x22da   : > { %v7229_v22 = vsub.f32 %v7074_v62, %v7219_v11  ;;  %v7230_v24 = vsub.f32 %v7120_v57, %v7222_v21  ;;  %v6537_v62 = vld [vmem:[#allocation13 + $0x14] sm:$0xf] }
0x22db   : > { %v7507_v2 = vsel %vm1840_vm2, %v6537_v62, 0 }
0x22dc   : > { %v7233_v25 = vmul.f32 1.442695, %v7229_v22  ;;  %v7235_v26 = vmul.f32 1.442695, %v7230_v24 }
0x22de   : > { %11518 = vpow2.f32 %v7233_v25 }
0x22df   : > { %11520 = vpow2.f32 %v7235_v26 }
0x22e1   : > { %v7225_v6 = vpop.xlane.xlu0 %7224  ;;  %v7228_v27 = vpop.xlane.xlu1 %7227 }
0x22e2   : > { %v7231_v29 = vsub.f32 %v7166_v9, %v7225_v6  ;;  %v7232_v31 = vsub.f32 %v7212_v10, %v7228_v27  ;;  %v7553_v9 = vsel %vm1840_vm2, %v6538_v23, 0  ;;  %v9703_v23 = vld [vmem:[#allocation22 + $0x6] ss:$0 sm:$0xff] }
0x22e4   : > { %v7237_v32 = vmul.f32 1.442695, %v7231_v29  ;;  %v7239_v33 = vmul.f32 1.442695, %v7232_v31 }
0x22e6   : > { %11522 = vpow2.f32 %v7237_v32 }
0x22e7   : > { %11524 = vpow2.f32 %v7239_v33 }
0x22e8   : > { %v11519_v15 = vpop.eup %11518 }
0x22e9   : > { %v11521_v30 = vpop.eup %11520  ;;  %v7241_v17 = vsel %vm4642_vm5, %v11519_v15, 0.0 }
0x22ea   : > { %7242 = vadd.xlane.f32.xlu0 %v7241_v17  ;;  %v7244_v28 = vsel %vm4642_vm5, %v11521_v30, 0.0 }
0x22eb   : > { %7245 = vadd.xlane.f32.xlu1 %v7244_v28 }
0x22f0   : > { %v11523_v34 = vpop.eup %11522 }
0x22f1   : > { %v11525_v35 = vpop.eup %11524  ;;  %v7247_v36 = vsel %vm4642_vm5, %v11523_v34, 0.0 }
0x22f2   : > { %7248 = vadd.xlane.f32.xlu0 %v7247_v36  ;;  %v7250_v37 = vsel %vm4642_vm5, %v11525_v35, 0.0 }
0x22f3   : > { %7251 = vadd.xlane.f32.xlu1 %v7250_v37 }
0x2377   : > { %v7243_v39 = vpop.xlane.xlu0 %7242 }
0x2378   : > { %11526 = vrcp.f32 %v7243_v39  ;;  %v7246_v40 = vpop.xlane.xlu1 %7245 }
0x2379   : > { %11528 = vrcp.f32 %v7246_v40 }
0x237f   : > { %v7249_v41 = vpop.xlane.xlu0 %7248 }
0x2380   : > { %11530 = vrcp.f32 %v7249_v41  ;;  %v7252_v42 = vpop.xlane.xlu1 %7251 }
0x2381   : > { %11532 = vrcp.f32 %v7252_v42 }
0x2382   : > { %v11527_v43 = vpop.eup %11526 }
0x2383   : > { %v11529_v44 = vpop.eup %11528  ;;  %v7254_v47 = vmul.f32 %v11527_v43, %v11519_v15 }
0x2384   : > { %v7256_v53 = vmul.f32 %v11529_v44, %v11521_v30 }
0x2385   : > { %v7261_v55 = vpack.c.bf16 %v7254_v47, %v7254_v47 }
0x2386   : > { %v7262_v38 = vpack.c.bf16 %v7256_v53, %v7256_v53 }
0x2387   : > { %10932 = vmatmul.mubr.msk.bf16.vlgmr.msra.gmra.mrb[228].mxu0 %vm4695_vm6, %v7261_v55 }
0x2388   : > { %10938 = vmatmul.mubr.msk.bf16.vlgmr.msra.gmra.mrb[244].mxu1 %vm4695_vm6, %v7262_v38  ;;  %10942 = vmatpush3.bf16.msra.mxu0 %v7365_v56 }
0x2389   : > { %10948 = vmatpush3.bf16.msra.mxu1 %v7411_v59  ;;  %10943 = vmatprep.mubr.msk.bf16.mxu0 %vm12100_vm0, %v12099_v0 }
0x238a   : > { %v11531_v48 = vpop.eup %11530  ;;  %10949 = vmatprep.mubr.msk.bf16.mxu1 %vm12100_vm0, %v12099_v0  ;;  %10953 = vmatprep.subr.bf16.mxu0 %v12099_v0 }
0x238b   : > { %v11533_v60 = vpop.eup %11532  ;;  %v7258_v61 = vmul.f32 %v11531_v48, %v11523_v34  ;;  %10959 = vmatprep.subr.bf16.mxu1 %v12099_v0 }
0x238c   : > { %v7260_v57 = vmul.f32 %v11533_v60, %v11525_v35 }
0x238d   : > { %v7263_v63 = vpack.c.bf16 %v7258_v61, %v7258_v61 }
0x238e   : > { %v7264_v1 = vpack.c.bf16 %v7260_v57, %v7260_v57  ;;  %v7678_v57 = vld [vmem:[#allocation15 + $0x30] sm:$0xf] }
0x238f   : > { %10944 = vmatmul.mubr.msk.bf16.vlgmr.msra.gmra.mrb[232].mxu0 %vm4695_vm6, %v7263_v63  ;;  %v7679_v63 = vld [vmem:[#allocation15 + $0x34] sm:$0xf] }
0x2390   : > { %10950 = vmatmul.mubr.msk.bf16.vlgmr.msra.gmra.mrb[248].mxu1 %vm4695_vm6, %v7264_v1  ;;  %10954 = vmatpush3.bf16.msra.mxu0 %v7461_v58 }
0x2391   : > { %10960 = vmatpush3.bf16.msra.mxu1 %v7507_v2  ;;  %10955 = vmatprep.mubr.msk.bf16.mxu0 %vm12100_vm0, %v12099_v0 }
0x2392   : > { %10961 = vmatprep.mubr.msk.bf16.mxu1 %vm12100_vm0, %v12099_v0  ;;  %10965 = vmatprep.subr.bf16.mxu0 %v12099_v0 }
0x2393   : > { %10971 = vmatprep.subr.bf16.mxu1 %v12099_v0 }
0x245a   : > { %v7309_v5 = vpop.f32.mrb[228].mxu0 }
0x245b   : > { %v7453_v49 = vpack.c.bf16 %v7309_v5, %v7309_v5  ;;  %v7355_v7 = vpop.f32.mrb[244].mxu1  ;;  %v10933_v8 = vpop.f32.mrb[229].mxu0  ;;  %v9704_v5 = vld [vmem:[#allocation22 + $0x7] ss:$0 sm:$0xff] }
0x245c   : > { %v7454_v10 = vpack.c.bf16 %v7355_v7, %v7355_v7  ;;  %v10939_v12 = vpop.f32.mrb[245].mxu1  ;;  %v7312_v13 = vpop.f32.mrb[230].mxu0 }
0x245d   : > { %v7358_v16 = vpop.f32.mrb[246].mxu1  ;;  %v10934_v18 = vpop.f32.mrb[231].mxu0  ;;  %10956 = vmatmul.mubr.msk.bf16.vlgmr.msra.gmra.mrb[236].mxu0 %vm1600_vm1, %v7453_v49  ;;  %v7682_v12 = vld [vmem:[#allocation15 + $0x40] sm:$0xf]  ;;  %v7683_v13 = vld [vmem:[#allocation15 + $0x44] sm:$0xf] }
0x245e   : > { %v10940_v3 = vpop.f32.mrb[247].mxu1  ;;  %10962 = vmatmul.mubr.msk.bf16.vlgmr.msra.gmra.mrb[252].mxu1 %vm1600_vm1, %v7454_v10  ;;  %10966 = vmatpush3.bf16.msra.mxu0 %v7553_v9  ;;  %v7680_v9 = vld [vmem:[#allocation15 + $0x38] sm:$0xf]  ;;  %v7681_v10 = vld [vmem:[#allocation15 + $0x3c] sm:$0xf] }
0x245f   : > { %10972 = vmatpush3.bf16.msra.mxu1 %v7599_v14  ;;  %10967 = vmatprep.mubr.msk.bf16.mxu0 %vm12100_vm0, %v12099_v0  ;;  %v7684_v14 = vld [vmem:[#allocation15 + $0x48] sm:$0xf]  ;;  %v7685_v16 = vld [vmem:[#allocation15 + $0x4c] sm:$0xf]  ;;  %v7686_v18 = vld [vmem:[#allocation15 + $0x50] sm:$0xf] }
0x2460   : > { %10973 = vmatprep.mubr.msk.bf16.mxu1 %vm12100_vm0, %v12099_v0  ;;  %10977 = vmatprep.subr.bf16.mxu0 %v12099_v0  ;;  %v7687_v3 = vld [vmem:[#allocation15 + $0x54] sm:$0xf] }
0x2461   : > { %10983 = vmatprep.subr.bf16.mxu1 %v12099_v0 }
0x2462   : > { %v7401_v45 = vpop.f32.mrb[232].mxu0 }
0x2463   : > { %v7455_v19 = vpack.c.bf16 %v7401_v45, %v7401_v45  ;;  %v7447_v11 = vpop.f32.mrb[248].mxu1  ;;  %v10945_v21 = vpop.f32.mrb[233].mxu0  ;;  %v7688_v45 = vld [vmem:[#allocation15 + $0x58] sm:$0xf] }
0x2464   : > { %v7456_v22 = vpack.c.bf16 %v7447_v11, %v7447_v11  ;;  %v10951_v24 = vpop.f32.mrb[249].mxu1  ;;  %v7404_v25 = vpop.f32.mrb[234].mxu0 }
0x2465   : > { %v7450_v26 = vpop.f32.mrb[250].mxu1  ;;  %v10946_v6 = vpop.f32.mrb[235].mxu0  ;;  %10968 = vmatmul.mubr.msk.bf16.vlgmr.msra.gmra.mrb[240].mxu0 %vm1600_vm1, %v7455_v19  ;;  %v7689_v19 = vld [vmem:[#allocation15 + $0x5c] sm:$0xf] }
0x2466   : > { %v10952_v27 = vpop.f32.mrb[251].mxu1  ;;  %10974 = vmatmul.mubr.msk.bf16.vlgmr.msra.gmra.mrb[0].mxu1 %vm1600_vm1, %v7456_v22  ;;  %10979 = vmatprep.mubr.msk.bf16.mxu0 %vm12100_vm0, %v12099_v0 }
0x2467   : > { %10985 = vmatprep.mubr.msk.bf16.mxu1 %vm12100_vm0, %v12099_v0  ;;  %10978 = vmatpush3.bf16.xpose.msra.mxu0 %v7678_v57 }
0x2468   : > { %10984 = vmatpush3.bf16.xpose.msra.mxu1 %v7679_v63  ;;  %10989 = vmatprep.subr.bf16.mxu0 %v12099_v0 }
0x2469   : > { %10995 = vmatprep.subr.bf16.mxu1 %v12099_v0 }
0x2530   : > { %v7497_v29 = vpop.f32.mrb[236].mxu0 }
0x2531   : > { %v7641_v31 = vsel %vm5069_vm7, %v7497_v29, 0.0  ;;  %v7543_v32 = vpop.f32.mrb[252].mxu1  ;;  %v10957_v33 = vpop.f32.mrb[237].mxu0 }
0x2532   : > { %v7642_v15 = vsel %vm5069_vm7, %v7543_v32, 0.0  ;;  %v10963_v30 = vpop.f32.mrb[253].mxu1  ;;  %v7500_v17 = vpop.f32.mrb[238].mxu0 }
0x2533   : > { %v7643_v28 = vadd.f32 %v7642_v15, %v7641_v31  ;;  %v7546_v34 = vpop.f32.mrb[254].mxu1  ;;  %v10958_v35 = vpop.f32.mrb[239].mxu0 }
0x2534   : > { %v10964_v36 = vpop.f32.mrb[255].mxu1 }
0x2538   : > { %v7589_v37 = vpop.f32.mrb[240].mxu0 }
0x2539   : > { %v7644_v39 = vsel %vm5069_vm7, %v7589_v37, 0.0  ;;  %v7635_v40 = vpop.f32.mrb[0].mxu1  ;;  %v10969_v41 = vpop.f32.mrb[241].mxu0 }
0x253a   : > { %v7645_v42 = vadd.f32 %v7644_v39, %v7643_v28  ;;  %v10975_v43 = vpop.f32.mrb[1].mxu1  ;;  %v7592_v44 = vpop.f32.mrb[242].mxu0  ;;  %v7646_v46 = vsel %vm5069_vm7, %v7635_v40, 0.0 }
0x253b   : > { %v7638_v47 = vpop.f32.mrb[2].mxu1  ;;  %v10970_v52 = vpop.f32.mrb[243].mxu0 }
0x253c   : > { %v7647_v53 = vadd.f32 %v7646_v46, %v7645_v42  ;;  %v10976_v55 = vpop.f32.mrb[3].mxu1 }
0x253e   : > { %v7648_v38 = vadd.f32 %v7647_v53, %v13492_v54 }
0x2540   : > { %v7649_v56 = vsel %vm5069_vm7, %v7648_v38, 0.0 }
0x2541   : > { %7650 = vadd.xlane.f32.xlu0 %v7649_v56 }
0x25ce   : > { %v7651_v59 = vpop.xlane.xlu0 %7650 }
0x25cf   : > { %v7652_v48 = vmul.f32 0.03125, %v7651_v59 }
0x25d1   : > { %v7653_v51 = vsub.f32 %v7648_v38, %v7652_v48 }
0x25d3   : > { %v7654_v60 = vsel %vm1076_vm3, %v7653_v51, 0.0 }
0x25d4   : > { %v7655_v61 = vmul.f32 %v7654_v60, %v7654_v60 }
0x25d6   : > { %v7656_v62 = vsel %vm5069_vm7, %v7655_v61, 0.0 }
0x25d7   : > { %7657 = vadd.xlane.f32.xlu1 %v7656_v62 }
0x2664   : > { %v7658_v54 = vpop.xlane.xlu1 %7657 }
0x2665   : > { %v7659_v58 = vmul.f32 0.03125, %v7658_v54 }
0x2667   : > { %v7660_v1 = vadd.f32 1e-05, %v7659_v58 }
0x2669   : > { %11534 = vrsqrt.f32 %v7660_v1 }
0x2673   : > { %v11535_v2 = vpop.eup %11534 }
0x2674   : > { %v7662_v4 = vmul.f32 %v11535_v2, %v7654_v60 }
0x2676   : > { %v7669_v49 = vmul.f32 %v9703_v23, %v7662_v4 }
0x2678   : > { %v13651_v7 = vadd.f32 %v9704_v5, %v7669_v49 }
0x267a   : > { %v7695_v8 = vpack.c.bf16 %v13651_v7, %v13651_v7 }
0x267c   : > { %10980 = vmatmul.mubr.bf16.vlgmr.msra.gmra.mrb[244].mxu0 %v7695_v8  ;;  %10986 = vmatmul.mubr.bf16.vlgmr.msra.gmra.mrb[4].mxu1 %v7695_v8 }
0x267d   : > { %10990 = vmatpush3.bf16.xpose.msra.mxu0 %v7680_v9  ;;  %10996 = vmatpush3.bf16.xpose.msra.mxu1 %v7681_v10 }
0x267e   : > { %10991 = vmatprep.mubr.msk.bf16.mxu0 %vm12100_vm0, %v12099_v0  ;;  %10997 = vmatprep.mubr.msk.bf16.mxu1 %vm12100_vm0, %v12099_v0 }
0x267f   : > { %11001 = vmatprep.subr.bf16.mxu0 %v12099_v0  ;;  %11007 = vmatprep.subr.bf16.mxu1 %v12099_v0 }
0x2684   : > { %10992 = vmatmul.mubr.bf16.vlgmr.msra.gmra.mrb[248].mxu0 %v7695_v8  ;;  %10998 = vmatmul.mubr.bf16.vlgmr.msra.gmra.mrb[8].mxu1 %v7695_v8 }
0x2685   : > { %11002 = vmatpush3.bf16.xpose.msra.mxu0 %v7682_v12  ;;  %11008 = vmatpush3.bf16.xpose.msra.mxu1 %v7683_v13 }
0x2686   : > { %11003 = vmatprep.mubr.msk.bf16.mxu0 %vm12100_vm0, %v12099_v0  ;;  %11009 = vmatprep.mubr.msk.bf16.mxu1 %vm12100_vm0, %v12099_v0 }
0x2687   : > { %11013 = vmatprep.subr.bf16.mxu0 %v12099_v0  ;;  %11019 = vmatprep.subr.bf16.mxu1 %v12099_v0 }
0x268c   : > { %11004 = vmatmul.mubr.bf16.vlgmr.msra.gmra.mrb[252].mxu0 %v13319_v20  ;;  %11010 = vmatmul.mubr.bf16.vlgmr.msra.gmra.mrb[12].mxu1 %v13319_v20 }
0x268d   : > { %11014 = vmatpush3.bf16.xpose.msra.mxu0 %v7684_v14  ;;  %11020 = vmatpush3.bf16.xpose.msra.mxu1 %v7685_v16 }
0x268e   : > { %11015 = vmatprep.mubr.msk.bf16.mxu0 %vm12100_vm0, %v12099_v0  ;;  %11021 = vmatprep.mubr.msk.bf16.mxu1 %vm12100_vm0, %v12099_v0 }
0x268f   : > { %11025 = vmatprep.subr.bf16.mxu0 %v12099_v0  ;;  %11031 = vmatprep.subr.bf16.mxu1 %v12099_v0 }
0x2694   : > { %11016 = vmatmul.mubr.bf16.vlgmr.msra.gmra.mrb[0].mxu0 %v13319_v20  ;;  %11022 = vmatmul.mubr.bf16.vlgmr.msra.gmra.mrb[16].mxu1 %v13319_v20 }
0x2695   : > { %11026 = vmatpush3.bf16.xpose.msra.mxu0 %v7686_v18  ;;  %11032 = vmatpush3.bf16.xpose.msra.mxu1 %v7687_v3 }
0x2696   : > { %11027 = vmatprep.mubr.msk.bf16.mxu0 %vm12100_vm0, %v12099_v0  ;;  %11033 = vmatprep.mubr.msk.bf16.mxu1 %vm12100_vm0, %v12099_v0 }
0x2697   : > { %11037 = vmatprep.subr.bf16.mxu0 %v12099_v0  ;;  %11043 = vmatprep.subr.bf16.mxu1 %v12099_v0 }
0x269c   : > { %11028 = vmatmul.mubr.bf16.vlgmr.msra.gmra.mrb[4].mxu0 %v13319_v20  ;;  %11034 = vmatmul.mubr.bf16.vlgmr.msra.gmra.mrb[20].mxu1 %v13319_v20 }
0x269d   : > { %11038 = vmatpush3.bf16.xpose.msra.mxu0 %v7688_v45  ;;  %11044 = vmatpush3.bf16.xpose.msra.mxu1 %v7689_v19 }
0x269e   : > { %11039 = vmatprep.mubr.msk.bf16.mxu0 %vm12100_vm0, %v12099_v0  ;;  %11045 = vmatprep.mubr.msk.bf16.mxu1 %vm12100_vm0, %v12099_v0 }
0x269f   : > { %11049 = vmatprep.subr.bf16.mxu0 %v12099_v0  ;;  %11055 = vmatprep.subr.bf16.mxu1 %v12099_v0 }
0x26a4   : > { %11040 = vmatmul.mubr.bf16.vlgmr.msra.gmra.mrb[8].mxu0 %v13319_v20  ;;  %11046 = vmatmul.mubr.bf16.vlgmr.msra.gmra.mrb[24].mxu1 %v13319_v20 }
0x26a5   : > { %11051 = vmatprep.mubr.msk.bf16.mxu0 %vm12100_vm0, %v12099_v0  ;;  %11057 = vmatprep.mubr.msk.bf16.mxu1 %vm12100_vm0, %v12099_v0 }
0x274f   : > { %v7730_v11 = vpop.f32.mrb[244].mxu0  ;;  %v7770_v21 = vpop.f32.mrb[4].mxu1 }
0x2750   : > { %v10981_v22 = vpop.f32.mrb[245].mxu0  ;;  %v10987_v24 = vpop.f32.mrb[5].mxu1  ;;  %v7856_v47 = vmul.f32 0.35355338, %v7730_v11  ;;  %v7857_v52 = vmul.f32 0.35355338, %v7770_v21 }
0x2751   : > { %v7733_v25 = vpop.f32.mrb[246].mxu0  ;;  %v7773_v26 = vpop.f32.mrb[6].mxu1 }
0x2752   : > { %v10982_v6 = vpop.f32.mrb[247].mxu0  ;;  %v10988_v27 = vpop.f32.mrb[7].mxu1  ;;  %v8180_v38 = vpack.c.bf16 %v7856_v47, %v7856_v47  ;;  %v8181_v56 = vpack.c.bf16 %v7857_v52, %v7857_v52 }
0x2757   : > { %v7810_v29 = vpop.f32.mrb[248].mxu0  ;;  %v7850_v31 = vpop.f32.mrb[8].mxu1 }
0x2758   : > { %v10993_v32 = vpop.f32.mrb[249].mxu0  ;;  %v10999_v33 = vpop.f32.mrb[9].mxu1  ;;  %v7858_v1 = vmul.f32 0.35355338, %v7810_v29  ;;  %v7859_v2 = vmul.f32 0.35355338, %v7850_v31 }
0x2759   : > { %v7813_v15 = vpop.f32.mrb[250].mxu0  ;;  %v7853_v20 = vpop.f32.mrb[10].mxu1 }
0x275a   : > { %v10994_v30 = vpop.f32.mrb[251].mxu0  ;;  %v11000_v17 = vpop.f32.mrb[11].mxu1  ;;  %v8182_v5 = vpack.c.bf16 %v7858_v1, %v7858_v1  ;;  %v8183_v49 = vpack.c.bf16 %v7859_v2, %v7859_v2 }
0x275f   : > { %v7894_v28 = vpop.f32.mrb[252].mxu0  ;;  %v7934_v34 = vpop.f32.mrb[12].mxu1 }
0x2760   : > { %v8184_v35 = vpack.c.bf16 %v7894_v28, %v7894_v28  ;;  %v8185_v36 = vpack.c.bf16 %v7934_v34, %v7934_v34  ;;  %v11005_v37 = vpop.f32.mrb[253].mxu0  ;;  %v11011_v39 = vpop.f32.mrb[13].mxu1 }
0x2761   : > { %v7897_v40 = vpop.f32.mrb[254].mxu0  ;;  %v7937_v41 = vpop.f32.mrb[14].mxu1 }
0x2762   : > { %v8192_v42 = vsel %vm1600_vm1, %v8184_v35, 0  ;;  %v8238_v43 = vsel %vm1600_vm1, %v8185_v36, 0  ;;  %v11006_v44 = vpop.f32.mrb[255].mxu0  ;;  %v11012_v46 = vpop.f32.mrb[15].mxu1 }
0x2763   : > { %11050 = vmatpush3.bf16.xpose.msra.mxu0 %v8192_v42  ;;  %11056 = vmatpush3.bf16.xpose.msra.mxu1 %v8238_v43 }
0x2764   : > { %11061 = vmatprep.subr.bf16.mxu0 %v12099_v0  ;;  %11067 = vmatprep.subr.bf16.mxu1 %v12099_v0 }
0x2767   : > { %v7974_v53 = vpop.f32.mrb[0].mxu0  ;;  %v8014_v55 = vpop.f32.mrb[16].mxu1 }
0x2768   : > { %v8186_v59 = vpack.c.bf16 %v7974_v53, %v7974_v53  ;;  %v8187_v48 = vpack.c.bf16 %v8014_v55, %v8014_v55  ;;  %v11017_v51 = vpop.f32.mrb[1].mxu0  ;;  %v11023_v60 = vpop.f32.mrb[17].mxu1 }
0x2769   : > { %v7977_v61 = vpop.f32.mrb[2].mxu0  ;;  %v8017_v62 = vpop.f32.mrb[18].mxu1 }
0x276a   : > { %v8284_v57 = vsel %vm1600_vm1, %v8186_v59, 0  ;;  %v8330_v63 = vsel %vm1600_vm1, %v8187_v48, 0  ;;  %v11018_v54 = vpop.f32.mrb[3].mxu0  ;;  %v11024_v58 = vpop.f32.mrb[19].mxu1  ;;  %11052 = vmatmul.mubr.msk.bf16.vlgmr.msra.gmra.mrb[12].mxu0 %vm1600_vm1, %v8180_v38  ;;  %11058 = vmatmul.mubr.msk.bf16.vlgmr.msra.gmra.mrb[28].mxu1 %vm1600_vm1, %v8181_v56 }
0x276b   : > { %11062 = vmatpush3.bf16.xpose.msra.mxu0 %v8284_v57  ;;  %11068 = vmatpush3.bf16.xpose.msra.mxu1 %v8330_v63 }
0x276c   : > { %11063 = vmatprep.mubr.msk.bf16.mxu0 %vm12100_vm0, %v12099_v0  ;;  %11069 = vmatprep.mubr.msk.bf16.mxu1 %vm12100_vm0, %v12099_v0 }
0x276d   : > { %11073 = vmatprep.subr.bf16.mxu0 %v12099_v0  ;;  %11079 = vmatprep.subr.bf16.mxu1 %v12099_v0 }
0x276f   : > { %v8054_v23 = vpop.f32.mrb[4].mxu0  ;;  %v8094_v4 = vpop.f32.mrb[20].mxu1 }
0x2770   : > { %v8420_v8 = vpack.c.bf16 %v8054_v23, %v8054_v23  ;;  %v8421_v9 = vpack.c.bf16 %v8094_v4, %v8094_v4  ;;  %v11029_v10 = vpop.f32.mrb[5].mxu0  ;;  %v11035_v12 = vpop.f32.mrb[21].mxu1 }
0x2771   : > { %v8057_v13 = vpop.f32.mrb[6].mxu0  ;;  %v8097_v14 = vpop.f32.mrb[22].mxu1 }
0x2772   : > { %v8428_v16 = vsel %vm1840_vm2, %v8420_v8, 0  ;;  %v8474_v18 = vsel %vm1840_vm2, %v8421_v9, 0  ;;  %v11030_v3 = vpop.f32.mrb[7].mxu0  ;;  %v11036_v45 = vpop.f32.mrb[23].mxu1  ;;  %11064 = vmatmul.mubr.msk.bf16.vlgmr.msra.gmra.mrb[16].mxu0 %vm1600_vm1, %v8182_v5  ;;  %11070 = vmatmul.mubr.msk.bf16.vlgmr.msra.gmra.mrb[32].mxu1 %vm1600_vm1, %v8183_v49 }
0x2773   : > { %11074 = vmatpush3.bf16.msra.mxu0 %v8428_v16  ;;  %11080 = vmatpush3.bf16.msra.mxu1 %v8474_v18 }
0x2774   : > { %11075 = vmatprep.mubr.msk.bf16.mxu0 %vm12100_vm0, %v12099_v0  ;;  %11081 = vmatprep.mubr.msk.bf16.mxu1 %vm12100_vm0, %v12099_v0 }
0x2775   : > { %11085 = vmatprep.subr.bf16.mxu0 %v12099_v0  ;;  %11091 = vmatprep.subr.bf16.mxu1 %v12099_v0 }
0x2777   : > { %v13721_v19 = vpop.f32.mrb[8].mxu0  ;;  %v13723_v11 = vpop.f32.mrb[24].mxu1 }
0x2778   : > { %v11041_v21 = vpop.f32.mrb[9].mxu0  ;;  %v11047_v22 = vpop.f32.mrb[25].mxu1  ;;  %v8422_v12 = vpack.c.bf16 %v13721_v19, %v13721_v19  ;;  %v8423_v14 = vpack.c.bf16 %v13723_v11, %v13723_v11  ;;  %v7691_v11 = vld [vmem:[#allocation16 + $0x10] sm:$0xf] }
0x2779   : > { %v8137_v24 = vpop.f32.mrb[10].mxu0  ;;  %v8177_v25 = vpop.f32.mrb[26].mxu1 }
0x277a   : > { %v11042_v26 = vpop.f32.mrb[11].mxu0  ;;  %v11048_v6 = vpop.f32.mrb[27].mxu1  ;;  %v8520_v45 = vsel %vm1840_vm2, %v8422_v12, 0  ;;  %v8566_v21 = vsel %vm1840_vm2, %v8423_v14, 0  ;;  %v7692_v25 = vld [vmem:[#allocation16 + $0x14] sm:$0xf] }
0x283d   : > { %v8228_v27 = vpop.f32.mrb[12].mxu0  ;;  %v8274_v29 = vpop.f32.mrb[28].mxu1 }
0x283e   : > { %v11053_v31 = vpop.f32.mrb[13].mxu0  ;;  %v11059_v32 = vpop.f32.mrb[29].mxu1  ;;  %v8372_v33 = vsel %vm5800_vm8, %v8228_v27, -inf  ;;  %v8375_v15 = vsel %vm5800_vm8, %v8274_v29, -inf }
0x283f   : > { %8373 = vmax.xlane.f32.xlu0 %v8372_v33  ;;  %v8231_v20 = vpop.f32.mrb[14].mxu0  ;;  %8376 = vmax.xlane.f32.xlu1 %v8375_v15  ;;  %v8277_v30 = vpop.f32.mrb[30].mxu1  ;;  %v8662_v31 = vsel %vm1840_vm2, %v7692_v25, 0  ;;  %v7693_v32 = vld [vmem:[#allocation16 + $0x18] sm:$0xf] }
0x2840   : > { %v11054_v17 = vpop.f32.mrb[15].mxu0  ;;  %v11060_v28 = vpop.f32.mrb[31].mxu1  ;;  %v7694_v33 = vld [vmem:[#allocation16 + $0x1c] sm:$0xf] }
0x2841   : > { %v8708_v28 = vsel %vm1840_vm2, %v7693_v32, 0  ;;  %v11421_v32 = vld [vmem:[%s13955_s4 + $0x78] sm:$0xff]  }
0x2845   : > { %v8320_v34 = vpop.f32.mrb[16].mxu0  ;;  %v8366_v35 = vpop.f32.mrb[32].mxu1 }
0x2846   : > { %v11065_v36 = vpop.f32.mrb[17].mxu0  ;;  %v11071_v37 = vpop.f32.mrb[33].mxu1  ;;  %v8378_v39 = vsel %vm5800_vm8, %v8320_v34, -inf  ;;  %v8381_v40 = vsel %vm5800_vm8, %v8366_v35, -inf }
0x2847   : > { %8379 = vmax.xlane.f32.xlu0 %v8378_v39  ;;  %v8323_v41 = vpop.f32.mrb[18].mxu0  ;;  %8382 = vmax.xlane.f32.xlu1 %v8381_v40  ;;  %v8369_v42 = vpop.f32.mrb[34].mxu1  ;;  %v8754_v37 = vsel %vm1840_vm2, %v7694_v33, 0  ;;  %v11422_v33 = vld [vmem:[#allocation19 + $0x40] sm:$0xff]  }
0x2848   : > { %v11066_v43 = vpop.f32.mrb[19].mxu0  ;;  %v11072_v44 = vpop.f32.mrb[35].mxu1 }
0x28cc   : > { %v8374_v46 = vpop.xlane.xlu0 %8373  ;;  %v8377_v47 = vpop.xlane.xlu1 %8376 }
0x28cd   : > { %v8384_v52 = vsub.f32 %v8228_v27, %v8374_v46  ;;  %v8385_v53 = vsub.f32 %v8274_v29, %v8377_v47  ;;  %v8616_v27 = vsel %vm1840_vm2, %v7691_v11, 0 }
0x28cf   : > { %v8388_v55 = vmul.f32 1.442695, %v8384_v52  ;;  %v8390_v38 = vmul.f32 1.442695, %v8385_v53 }
0x28d1   : > { %11536 = vpow2.f32 %v8388_v55 }
0x28d2   : > { %11538 = vpow2.f32 %v8390_v38 }
0x28d4   : > { %v8380_v56 = vpop.xlane.xlu0 %8379  ;;  %v8383_v59 = vpop.xlane.xlu1 %8382 }
0x28d5   : > { %v8386_v48 = vsub.f32 %v8320_v34, %v8380_v56  ;;  %v8387_v51 = vsub.f32 %v8366_v35, %v8383_v59 }
0x28d7   : > { %v8392_v60 = vmul.f32 1.442695, %v8386_v48  ;;  %v8394_v61 = vmul.f32 1.442695, %v8387_v51 }
0x28d9   : > { %11540 = vpow2.f32 %v8392_v60 }
0x28da   : > { %11542 = vpow2.f32 %v8394_v61 }
0x28db   : > { %v11537_v62 = vpop.eup %11536 }
0x28dc   : > { %v11539_v57 = vpop.eup %11538  ;;  %v8396_v63 = vsel %vm5800_vm8, %v11537_v62, 0.0 }
0x28dd   : > { %8397 = vadd.xlane.f32.xlu0 %v8396_v63  ;;  %v8399_v54 = vsel %vm5800_vm8, %v11539_v57, 0.0 }
0x28de   : > { %8400 = vadd.xlane.f32.xlu1 %v8399_v54 }
0x28e3   : > { %v11541_v58 = vpop.eup %11540 }
0x28e4   : > { %v11543_v1 = vpop.eup %11542  ;;  %v8402_v2 = vsel %vm5800_vm8, %v11541_v58, 0.0 }
0x28e5   : > { %8403 = vadd.xlane.f32.xlu0 %v8402_v2  ;;  %v8405_v23 = vsel %vm5800_vm8, %v11543_v1, 0.0 }
0x28e6   : > { %8406 = vadd.xlane.f32.xlu1 %v8405_v23 }
0x296a   : > { %v8398_v4 = vpop.xlane.xlu0 %8397 }
0x296b   : > { %11544 = vrcp.f32 %v8398_v4  ;;  %v8401_v5 = vpop.xlane.xlu1 %8400 }
0x296c   : > { %11546 = vrcp.f32 %v8401_v5 }
0x2972   : > { %v8404_v49 = vpop.xlane.xlu0 %8403 }
0x2973   : > { %11548 = vrcp.f32 %v8404_v49  ;;  %v8407_v8 = vpop.xlane.xlu1 %8406 }
0x2974   : > { %11550 = vrcp.f32 %v8407_v8 }
0x2975   : > { %v11545_v9 = vpop.eup %11544 }
0x2976   : > { %v11547_v10 = vpop.eup %11546  ;;  %v8409_v13 = vmul.f32 %v11545_v9, %v11537_v62 }
0x2977   : > { %v8411_v16 = vmul.f32 %v11547_v10, %v11539_v57 }
0x2978   : > { %v8416_v18 = vpack.c.bf16 %v8409_v13, %v8409_v13 }
0x2979   : > { %v8417_v3 = vpack.c.bf16 %v8411_v16, %v8411_v16 }
0x297a   : > { %11076 = vmatmul.mubr.msk.bf16.vlgmr.msra.gmra.mrb[20].mxu0 %vm1600_vm1, %v8416_v18 }
0x297b   : > { %11082 = vmatmul.mubr.msk.bf16.vlgmr.msra.gmra.mrb[36].mxu1 %vm1600_vm1, %v8417_v3  ;;  %11086 = vmatpush3.bf16.msra.mxu0 %v8520_v45  ;;  %v11414_v45 = vld [vmem:[%s13955_s4 + $0x40] sm:$0xff]  }
0x297c   : > { %11092 = vmatpush3.bf16.msra.mxu1 %v8566_v21  ;;  %11087 = vmatprep.mubr.msk.bf16.mxu0 %vm12100_vm0, %v12099_v0  ;;  %v11415_v21 = vld [vmem:[%s13955_s4 + $0x48] sm:$0xff]  }
0x297d   : > { %v11549_v19 = vpop.eup %11548  ;;  %11093 = vmatprep.mubr.msk.bf16.mxu1 %vm12100_vm0, %v12099_v0  ;;  %11097 = vmatprep.subr.bf16.mxu0 %v12099_v0 }
0x297e   : > { %v11551_v22 = vpop.eup %11550  ;;  %v8413_v24 = vmul.f32 %v11549_v19, %v11541_v58  ;;  %11103 = vmatprep.subr.bf16.mxu1 %v12099_v0 }
0x297f   : > { %v8415_v26 = vmul.f32 %v11551_v22, %v11543_v1 }
0x2980   : > { %v8418_v6 = vpack.c.bf16 %v8413_v24, %v8413_v24 }
0x2981   : > { %v8419_v29 = vpack.c.bf16 %v8415_v26, %v8415_v26  ;;  %v11416_v26 = vld [vmem:[%s13955_s4 + $0x50] sm:$0xff]  }
0x2982   : > { %11088 = vmatmul.mubr.msk.bf16.vlgmr.msra.gmra.mrb[24].mxu0 %vm1600_vm1, %v8418_v6  ;;  %v11417_v6 = vld [vmem:[%s13955_s4 + $0x58] sm:$0xff]  }
0x2983   : > { %11094 = vmatmul.mubr.msk.bf16.vlgmr.msra.gmra.mrb[40].mxu1 %vm1600_vm1, %v8419_v29  ;;  %11098 = vmatpush3.bf16.msra.mxu0 %v8616_v27  ;;  %v11418_v27 = vld [vmem:[%s13955_s4 + $0x60] sm:$0xff]   ;;  %v11419_v29 = vld [vmem:[%s13955_s4 + $0x68] sm:$0xff]  }
0x2984   : > { %11104 = vmatpush3.bf16.msra.mxu1 %v8662_v31  ;;  %11099 = vmatprep.mubr.msk.bf16.mxu0 %vm12100_vm0, %v12099_v0  ;;  %v11420_v31 = vld [vmem:[%s13955_s4 + $0x70] sm:$0xff]  }
0x2985   : > { %11105 = vmatprep.mubr.msk.bf16.mxu1 %vm12100_vm0, %v12099_v0  ;;  %11109 = vmatprep.subr.bf16.mxu0 %v12099_v0 }
0x2986   : > { %11115 = vmatprep.subr.bf16.mxu1 %v12099_v0 }
0x2a4d   : > { %v8464_v15 = vpop.f32.mrb[20].mxu0 }
0x2a4e   : > { %v8608_v20 = vpack.c.bf16 %v8464_v15, %v8464_v15  ;;  %v8510_v30 = vpop.f32.mrb[36].mxu1  ;;  %v11077_v17 = vpop.f32.mrb[21].mxu0  ;;  %v11423_v15 = vld [vmem:[#allocation19 + $0x48] sm:$0xff]  }
0x2a4f   : > { %v8609_v34 = vpack.c.bf16 %v8510_v30, %v8510_v30  ;;  %v11083_v35 = vpop.f32.mrb[37].mxu1  ;;  %v8467_v36 = vpop.f32.mrb[22].mxu0  ;;  %v11425_v30 = vld [vmem:[#allocation19 + $0x58] sm:$0xff]   ;;  %v11426_v17 = vld [vmem:[#allocation19 + $0x60] sm:$0xff]  }
0x2a50   : > { %v8513_v39 = vpop.f32.mrb[38].mxu1  ;;  %v11078_v40 = vpop.f32.mrb[23].mxu0  ;;  %11100 = vmatmul.mubr.msk.bf16.vlgmr.msra.gmra.mrb[28].mxu0 %vm1600_vm1, %v8608_v20  ;;  %v11424_v20 = vld [vmem:[#allocation19 + $0x50] sm:$0xff]  }
0x2a51   : > { %v11084_v41 = vpop.f32.mrb[39].mxu1  ;;  %11106 = vmatmul.mubr.msk.bf16.vlgmr.msra.gmra.mrb[44].mxu1 %vm1600_vm1, %v8609_v34  ;;  %11110 = vmatpush3.bf16.msra.mxu0 %v8708_v28  ;;  %v11427_v28 = vld [vmem:[#allocation19 + $0x68] sm:$0xff]  }
0x2a52   : > { %11116 = vmatpush3.bf16.msra.mxu1 %v8754_v37  ;;  %11111 = vmatprep.mubr.msk.bf16.mxu0 %vm12100_vm0, %v12099_v0  ;;  %v9717_v39 = vld [vmem:[#allocation22 + $0x8] ss:$0 sm:$0xff]  ;;  %v9718_v41 = vld [vmem:[#allocation22 + $0x9] ss:$0 sm:$0xff] }
0x2a53   : > { %11117 = vmatprep.mubr.msk.bf16.mxu1 %vm12100_vm0, %v12099_v0  ;;  %11121 = vmatprep.subr.bf16.mxu0 %v12099_v0 }
0x2a54   : > { %11141 = vmatprep.subr.bf16.mxu1 %v12099_v0 }
0x2a55   : > { %v8556_v42 = vpop.f32.mrb[24].mxu0 }
0x2a56   : > { %v8610_v43 = vpack.c.bf16 %v8556_v42, %v8556_v42  ;;  %v8602_v44 = vpop.f32.mrb[40].mxu1  ;;  %v11089_v46 = vpop.f32.mrb[25].mxu0 }
0x2a57   : > { %v8611_v47 = vpack.c.bf16 %v8602_v44, %v8602_v44  ;;  %v11095_v52 = vpop.f32.mrb[41].mxu1  ;;  %v8559_v53 = vpop.f32.mrb[26].mxu0  ;;  %v11428_v46 = vld [vmem:[#allocation19 + $0x70] sm:$0xff]  }
0x2a58   : > { %v8605_v55 = vpop.f32.mrb[42].mxu1  ;;  %v11090_v38 = vpop.f32.mrb[27].mxu0  ;;  %11112 = vmatmul.mubr.msk.bf16.vlgmr.msra.gmra.mrb[32].mxu0 %vm1600_vm1, %v8610_v43  ;;  %v9735_v52 = vld [vmem:[#allocation18 + $0x1] ss:$0 sm:$0xff] }
0x2a59   : > { %v11096_v56 = vpop.f32.mrb[43].mxu1  ;;  %11118 = vmatmul.mubr.msk.bf16.vlgmr.msra.gmra.mrb[48].mxu1 %vm1600_vm1, %v8611_v47  ;;  %11137 = vmatprep.mubr.msk.bf16.mxu0 %vm12100_vm0, %v12099_v0  ;;  %v11429_v47 = vld [vmem:[#allocation19 + $0x78] sm:$0xff]  }
0x2a5a   : > { %11157 = vmatprep.mubr.msk.bf16.mxu1 %vm12100_vm0, %v12099_v0  ;;  %11122 = vmatpush3.bf16.msra.mxu0 %v11414_v45 }
0x2a5b   : > { %11123 = vmatprep.subr.bf16.mxu0 %v12099_v0  ;;  %11142 = vmatpush3.bf16.msra.mxu1 %v11422_v33  ;;  %v11437_v33 = vld [vmem:[#allocation25 + $0x38] sm:$0xff]  }
0x2a5c   : > { %11143 = vmatprep.subr.bf16.mxu1 %v12099_v0 }
0x2a5e   : > { %11124 = vmatpush3.bf16.msra.mxu0 %v11415_v21 }
0x2a5f   : > { %11125 = vmatprep.subr.bf16.mxu0 %v12099_v0  ;;  %11144 = vmatpush3.bf16.msra.mxu1 %v11423_v15 }
0x2a60   : > { %11145 = vmatprep.subr.bf16.mxu1 %v12099_v0 }
0x2a62   : > { %11126 = vmatpush3.bf16.msra.mxu0 %v11416_v26 }
0x2a63   : > { %11127 = vmatprep.subr.bf16.mxu0 %v12099_v0  ;;  %11146 = vmatpush3.bf16.msra.mxu1 %v11424_v20 }
0x2a64   : > { %11147 = vmatprep.subr.bf16.mxu1 %v12099_v0 }
0x2a66   : > { %11128 = vmatpush3.bf16.msra.mxu0 %v11417_v6 }
0x2a67   : > { %11129 = vmatprep.subr.bf16.mxu0 %v12099_v0  ;;  %11148 = vmatpush3.bf16.msra.mxu1 %v11425_v30 }
0x2a68   : > { %11149 = vmatprep.subr.bf16.mxu1 %v12099_v0 }
0x2a6a   : > { %11130 = vmatpush3.bf16.msra.mxu0 %v11418_v27  ;;  %v11432_v27 = vld [vmem:[#allocation25 + $0x10] sm:$0xff]  }
0x2a6b   : > { %11131 = vmatprep.subr.bf16.mxu0 %v12099_v0  ;;  %11150 = vmatpush3.bf16.msra.mxu1 %v11426_v17 }
0x2a6c   : > { %11151 = vmatprep.subr.bf16.mxu1 %v12099_v0 }
0x2a6e   : > { %11132 = vmatpush3.bf16.msra.mxu0 %v11419_v29  ;;  %v11433_v29 = vld [vmem:[#allocation25 + $0x18] sm:$0xff]  }
0x2a6f   : > { %11133 = vmatprep.subr.bf16.mxu0 %v12099_v0  ;;  %11152 = vmatpush3.bf16.msra.mxu1 %v11427_v28  ;;  %v9755_v28 = vld [vmem:[#allocation24] ss:$0 sm:$0xff] }
0x2a70   : > { %11153 = vmatprep.subr.bf16.mxu1 %v12099_v0 }
0x2a72   : > { %11134 = vmatpush3.bf16.msra.mxu0 %v11420_v31  ;;  %v11434_v31 = vld [vmem:[#allocation25 + $0x20] sm:$0xff]  }
0x2a73   : > { %11135 = vmatprep.subr.bf16.mxu0 %v12099_v0  ;;  %11154 = vmatpush3.bf16.msra.mxu1 %v11428_v46 }
0x2a74   : > { %11155 = vmatprep.subr.bf16.mxu1 %v12099_v0 }
0x2a76   : > { %11136 = vmatpush3.bf16.msra.mxu0 %v11421_v32  ;;  %v11435_v32 = vld [vmem:[#allocation25 + $0x28] sm:$0xff]  }
0x2a77   : > { %11161 = vmatprep.subr.bf16.mxu0 %v12099_v0  ;;  %11156 = vmatpush3.bf16.msra.mxu1 %v11429_v47 }
0x2b23   : > { %v8652_v59 = vpop.f32.mrb[28].mxu0 }
0x2b24   : > { %v8796_v48 = vsel %vm5069_vm7, %v8652_v59, 0.0  ;;  %v8698_v51 = vpop.f32.mrb[44].mxu1  ;;  %v11101_v60 = vpop.f32.mrb[29].mxu0 }
0x2b25   : > { %v8797_v61 = vsel %vm5069_vm7, %v8698_v51, 0.0  ;;  %v11107_v62 = vpop.f32.mrb[45].mxu1  ;;  %v8655_v57 = vpop.f32.mrb[30].mxu0  ;;  %v9744_v60 = vld [vmem:[#allocation21 + $0x1] ss:$0 sm:$0xff] }
0x2b26   : > { %v8798_v63 = vadd.f32 %v8797_v61, %v8796_v48  ;;  %v8701_v54 = vpop.f32.mrb[46].mxu1  ;;  %v11102_v58 = vpop.f32.mrb[31].mxu0 }
0x2b27   : > { %v11108_v1 = vpop.f32.mrb[47].mxu1 }
0x2b2b   : > { %v8744_v2 = vpop.f32.mrb[32].mxu0 }
0x2b2c   : > { %v8799_v23 = vsel %vm5069_vm7, %v8744_v2, 0.0  ;;  %v8790_v4 = vpop.f32.mrb[48].mxu1  ;;  %v11113_v5 = vpop.f32.mrb[33].mxu0 }
0x2b2d   : > { %v8800_v49 = vadd.f32 %v8799_v23, %v8798_v63  ;;  %v11119_v8 = vpop.f32.mrb[49].mxu1  ;;  %v8747_v9 = vpop.f32.mrb[34].mxu0  ;;  %v8801_v10 = vsel %vm5069_vm7, %v8790_v4, 0.0 }
0x2b2e   : > { %v8793_v12 = vpop.f32.mrb[50].mxu1  ;;  %v11114_v13 = vpop.f32.mrb[35].mxu0 }
0x2b2f   : > { %v8802_v14 = vadd.f32 %v8801_v10, %v8800_v49  ;;  %v11120_v16 = vpop.f32.mrb[51].mxu1 }
0x2b31   : > { %v8803_v18 = vadd.f32 %v8802_v14, %v13651_v7  ;;  %v9753_v14 = vld [vmem:[#allocation22 + $0xa] ss:$0 sm:$0xff] }
0x2b33   : > { %v8804_v3 = vsel %vm5069_vm7, %v8803_v18, 0.0 }
0x2b34   : > { %8805 = vadd.xlane.f32.xlu0 %v8804_v3 }
0x2bc1   : > { %v8806_v19 = vpop.xlane.xlu0 %8805 }
0x2bc2   : > { %v8807_v11 = vmul.f32 0.03125, %v8806_v19  ;;  %v11430_v19 = vld [vmem:[#allocation25] sm:$0xff]  }
0x2bc4   : > { %v8808_v7 = vsub.f32 %v8803_v18, %v8807_v11  ;;  %v9754_v18 = vld [vmem:[#allocation22 + $0xb] ss:$0 sm:$0xff]  ;;  %v11431_v11 = vld [vmem:[#allocation25 + $0x8] sm:$0xff]  }
0x2bc6   : > { %v8809_v22 = vsel %vm1076_vm3, %v8808_v7, 0.0 }
0x2bc7   : > { %v8810_v24 = vmul.f32 %v8809_v22, %v8809_v22 }
0x2bc9   : > { %v8811_v25 = vsel %vm5069_vm7, %v8810_v24, 0.0 }
0x2bca   : > { %8812 = vadd.xlane.f32.xlu1 %v8811_v25 }
0x2c57   : > { %v8813_v34 = vpop.xlane.xlu1 %8812 }
0x2c58   : > { %v8814_v35 = vmul.f32 0.03125, %v8813_v34 }
0x2c5a   : > { %v8815_v36 = vadd.f32 1e-05, %v8814_v35  ;;  %v9756_v35 = vld [vmem:[#allocation24 + $0x1] ss:$0 sm:$0xff] }
0x2c5c   : > { %11552 = vrsqrt.f32 %v8815_v36 }
0x2c66   : > { %v11553_v37 = vpop.eup %11552 }
0x2c67   : > { %v8817_v40 = vmul.f32 %v11553_v37, %v8809_v22 }
0x2c69   : > { %v8824_v42 = vmul.f32 %v9717_v39, %v8817_v40  ;;  %v9757_v40 = vld [vmem:[#allocation27] ss:$0 sm:$0xff] }
0x2c6b   : > { %v8831_v43 = vadd.f32 %v9718_v41, %v8824_v42 }
0x2c6d   : > { %v8870_v44 = vpack.c.bf16 %v8831_v43, %v8831_v43 }
0x2c6f   : > { %11138 = vmatmul.mubr.bf16.vlgmr.msra.gmra.mrb[36].mxu0 %v8870_v44 }
0x2c70   : > { %11177 = vmatprep.mubr.msk.bf16.mxu0 %vm12100_vm0, %v12099_v0  ;;  %11162 = vmatpush3.bf16.msra.mxu0 %v11430_v19 }
0x2c71   : > { %11163 = vmatprep.subr.bf16.mxu0 %v12099_v0 }
0x2c74   : > { %11164 = vmatpush3.bf16.msra.mxu0 %v11431_v11 }
0x2c75   : > { %11165 = vmatprep.subr.bf16.mxu0 %v12099_v0 }
0x2c78   : > { %11166 = vmatpush3.bf16.msra.mxu0 %v11432_v27 }
0x2c79   : > { %11167 = vmatprep.subr.bf16.mxu0 %v12099_v0 }
0x2c7c   : > { %11168 = vmatpush3.bf16.msra.mxu0 %v11433_v29 }
0x2c7d   : > { %11169 = vmatprep.subr.bf16.mxu0 %v12099_v0 }
0x2c80   : > { %11170 = vmatpush3.bf16.msra.mxu0 %v11434_v31 }
0x2c81   : > { %11171 = vmatprep.subr.bf16.mxu0 %v12099_v0 }
0x2c84   : > { %11172 = vmatpush3.bf16.msra.mxu0 %v11435_v32 }
0x2c85   : > { %11173 = vmatprep.subr.bf16.mxu0 %v12099_v0 }
0x2c88   : > { %11174 = vmatpush3.bf16.msra.mxu0 %v11436_v50 }
0x2c89   : > { %11175 = vmatprep.subr.bf16.mxu0 %v12099_v0 }
0x2c8c   : > { %11176 = vmatpush3.bf16.msra.mxu0 %v11437_v33 }
0x2d42   : > { %v8959_v53 = vpop.f32.mrb[36].mxu0 }
0x2d43   : > { %v8960_v55 = vadd.f32 %v9735_v52, %v8959_v53  ;;  %v11139_v38 = vpop.f32.mrb[37].mxu0 }
0x2d44   : > { %v8962_v56 = vpop.f32.mrb[38].mxu0 }
0x2d45   : > { %v8965_v59 = vmax.f32 %v8960_v55, 0.0  ;;  %v11140_v48 = vpop.f32.mrb[39].mxu0 }
0x2d47   : > { %v8966_v51 = vpack.c.bf16 %v8965_v59, %v8965_v59 }
0x2d49   : > { %11158 = vmatmul.mubr.bf16.vlgmr.msra.gmra.mrb[52].mxu1 %v8966_v51 }
0x2e1c   : > { %v9055_v61 = vpop.f32.mrb[52].mxu1 }
0x2e1d   : > { %v9056_v62 = vadd.f32 %v9744_v60, %v9055_v61  ;;  %v11159_v57 = vpop.f32.mrb[53].mxu1 }
0x2e1e   : > { %v9058_v63 = vpop.f32.mrb[54].mxu1 }
0x2e1f   : > { %v11160_v54 = vpop.f32.mrb[55].mxu1  ;;  %v9061_v58 = vadd.f32 %v9056_v62, %v8831_v43 }
0x2e21   : > { %v9062_v1 = vsel %vm5069_vm7, %v9061_v58, 0.0 }
0x2e22   : > { %9063 = vadd.xlane.f32.xlu0 %v9062_v1 }
0x2eaf   : > { %v9064_v2 = vpop.xlane.xlu0 %9063 }
0x2eb0   : > { %v9065_v23 = vmul.f32 0.03125, %v9064_v2 }
0x2eb2   : > { %v9066_v4 = vsub.f32 %v9061_v58, %v9065_v23 }
0x2eb4   : > { %v9067_v5 = vsel %vm1076_vm3, %v9066_v4, 0.0 }
0x2eb5   : > { %v9068_v49 = vmul.f32 %v9067_v5, %v9067_v5 }
0x2eb7   : > { %v9069_v8 = vsel %vm5069_vm7, %v9068_v49, 0.0 }
0x2eb8   : > { %9070 = vadd.xlane.f32.xlu1 %v9069_v8 }
0x2f45   : > { %v9071_v9 = vpop.xlane.xlu1 %9070 }
0x2f46   : > { %v9072_v10 = vmul.f32 0.03125, %v9071_v9 }
0x2f48   : > { %v9073_v12 = vadd.f32 1e-05, %v9072_v10 }
0x2f4a   : > { %11554 = vrsqrt.f32 %v9073_v12 }
0x2f54   : > { %v11555_v13 = vpop.eup %11554 }
0x2f55   : > { %v9075_v16 = vmul.f32 %v11555_v13, %v9067_v5 }
0x2f57   : > { %v9082_v3 = vmul.f32 %v9753_v14, %v9075_v16 }
0x2f59   : > { %v9089_v45 = vadd.f32 %v9754_v18, %v9082_v3 }
0x2f5b   : > { %v9093_v21 = vsel %vm5069_vm7, %v9089_v45, 0.0 }
0x2f5c   : > { %9094 = vadd.xlane.f32.xlu0 %v9093_v21 }
0x2fe9   : > { %v9095_v7 = vpop.xlane.xlu0 %9094 }
0x2fea   : > { %v9096_v22 = vmul.f32 0.03125, %v9095_v7 }
0x2fec   : > { %v9097_v24 = vsub.f32 %v9089_v45, %v9096_v22 }
0x2fee   : > { %v9098_v25 = vsel %vm1076_vm3, %v9097_v24, 0.0 }
0x2fef   : > { %v9099_v26 = vmul.f32 %v9098_v25, %v9098_v25 }
0x2ff1   : > { %v9100_v6 = vsel %vm5069_vm7, %v9099_v26, 0.0 }
0x2ff2   : > { %9101 = vadd.xlane.f32.xlu1 %v9100_v6 }
0x307f   : > { %v9102_v15 = vpop.xlane.xlu1 %9101 }
0x3080   : > { %v9103_v20 = vmul.f32 0.03125, %v9102_v15 }
0x3082   : > { %v9104_v30 = vadd.f32 1e-05, %v9103_v20 }
0x3084   : > { %11556 = vrsqrt.f32 %v9104_v30 }
0x308e   : > { %v11557_v17 = vpop.eup %11556 }
0x308f   : > { %v9106_v34 = vmul.f32 %v11557_v17, %v9098_v25 }
0x3091   : > { %v9113_v36 = vmul.f32 %v9755_v28, %v9106_v34 }
0x3093   : > { %v9120_v37 = vadd.f32 %v9756_v35, %v9113_v36 }
0x3095   : > { %v9121_v39 = vpack.c.bf16 %v9120_v37, %v9120_v37 }
0x3097   : > { %11178 = vmatmul.mubr.bf16.vlgmr.msra.gmra.mrb[40].mxu0 %v9121_v39 }
0x316a   : > { %v9227_v0 = vpop.f32.mrb[40].mxu0 }
0x316b   : > { %v9228_v41 = vadd.f32 %v9757_v40, %v9227_v0  ;;  %v11179_v42 = vpop.f32.mrb[41].mxu0 }
0x316c   : > { %v9230_v43 = vpop.f32.mrb[42].mxu0 }
0x316d   : > { %9233 = vst [vmem:[%s1072_s29] sm:$0x3f] %v9228_v41  ;;  %v11180_v44 = vpop.f32.mrb[43].mxu0 }
0x316e PF: > { %s13957_s5 = sld [smem:[#allocation37_spill]] }
0x3174   : > { %s45_s27 = sadd.s32 1, %s13957_s5  }
0x3175   : > { %p42_p5 = scmp.ge.s32.totalorder %s45_s27, 4  }
0x3177   :  { %44 = sbr.rel (!%p42_p5) target bundleno = 28 (0x1c), region = 250 }
0x317e   :  { %9253 = vsyncpa [#allocation3], 1 }
0x317f   :  { %9255 = vsyncpa [#allocation3 + $0x1], 1 }
0x3180   :  { %9256 = vsyncpa [#allocation5], 1 }
0x3181   :  { %9257 = vsyncpa [#allocation8], 1 }
0x3182   :  { %9258 = vsyncpa [#allocation11], 1 }
0x3183   :  { %9259 = vsyncpa [#allocation14], 1 }
0x3184   :  { %9260 = vsyncpa [#allocation17], 1 }
0x3185   :  { %9261 = vsyncpa [#allocation20], 1 }
0x3186   :  { %9262 = vsyncpa [#allocation23], 1 }
0x3187   :  { %9263 = vsyncpa [#allocation26], 1 }

</bundles_post_ra>
